<compile_context>
chip_gen: v5e
topology: v5e:2x2
jax: 0.10.0
libtpu: 0.0.40
codegen_flags: <defaults>
</compile_context>

<pallas_src>
import functools

import numpy as np
import jax
import jax.numpy as jnp
from jax import lax
from jax.experimental import pallas as pl
from jax.experimental.pallas import tpu as pltpu

LANE = 128
BN_EPS = 1e-5


def _round_up_lane(c: int) -> int:
    return ((c + LANE - 1) // LANE) * LANE


# ----------------------------------------------------------------------------
# Bilinear 2x upsample helpers (PyTorch align_corners=False semantics)
# ----------------------------------------------------------------------------
def _interp_matrix(out_size: int, in_size: int) -> np.ndarray:
    """Interpolation matrix matching PyTorch bilinear, align_corners=False."""
    scale = in_size / out_size
    U = np.zeros((out_size, in_size), dtype=np.float32)
    for o in range(out_size):
        src = max((o + 0.5) * scale - 0.5, 0.0)      # PyTorch clamps src >= 0
        i0 = min(int(np.floor(src)), in_size - 1)
        i1 = min(i0 + 1, in_size - 1)
        frac = src - i0
        U[o, i0] += 1.0 - frac
        U[o, i1] += frac
    return U


def _upsample_kernel(x_ref, uwt_ref, o_ref, *, C, H, W):
    """x_ref: (1, C, H, W).  o_ref: (1, 2, C, H, 2W)  (even rows, odd rows)."""
    A = x_ref[0].reshape(C * H, W)                                   # planes stacked
    # W direction: one batched matmul over all (c, h) rows.
    B = jnp.dot(A, uwt_ref[...], preferred_element_type=jnp.float32)  # (C*H, 2W)
    # H direction: VPU blend 0.75/0.25 with borders clamped per channel plane.
    rid = lax.broadcasted_iota(jnp.int32, (C * H, 1), 0)
    hh = rid % H
    Bm = jnp.concatenate([B[:1], B[:-1]], axis=0)                    # row h-1
    Bp = jnp.concatenate([B[1:], B[-1:]], axis=0)                    # row h+1
    Bm = jnp.where(hh == 0, B, Bm)                                   # clamp top
    Bp = jnp.where(hh == H - 1, B, Bp)                               # clamp bottom
    even = 0.75 * B + 0.25 * Bm                                      # output rows 2h
    odd = 0.75 * B + 0.25 * Bp                                       # output rows 2h+1
    o_ref[0, 0] = even.reshape(C, H, 2 * W).astype(o_ref.dtype)
    o_ref[0, 1] = odd.reshape(C, H, 2 * W).astype(o_ref.dtype)


def bilinear_upsample_2x_nhwc(x):
    """x: (N, C, H, W) NCHW -> (N, 2H, 2W, C) NHWC."""
    N, C, H, W = x.shape
    uwt = jnp.asarray(_interp_matrix(2 * W, W).T)                    # (W, 2W)
    split = pl.pallas_call(
        functools.partial(_upsample_kernel, C=C, H=H, W=W),
        out_shape=jax.ShapeDtypeStruct((N, 2, C, H, 2 * W), jnp.float32),
        grid=(N,),
        in_specs=[pl.BlockSpec((1, C, H, W), lambda n: (n, 0, 0, 0)),
                  pl.BlockSpec((W, 2 * W), lambda n: (0, 0))],
        out_specs=pl.BlockSpec((1, 2, C, H, 2 * W), lambda n: (n, 0, 0, 0, 0)),
        compiler_params=pltpu.CompilerParams(dimension_semantics=("parallel",)),
    )(x, uwt)
    # Interleave even/odd rows + move channels last: XLA layout glue on a tiny array.
    xu = jnp.transpose(split, (0, 3, 1, 4, 2)).reshape(N, 2 * H, 2 * W, C)
    return xu


# ----------------------------------------------------------------------------
# Shared conv helper: im2col from a padded VMEM scratch + single MXU matmul
# ----------------------------------------------------------------------------
def _conv_from_padded(pbuf_ref, w_ref):
    Hp, Wp, Cin = pbuf_ref.shape
    H2, W2 = Hp - 2, Wp - 2
    P = H2 * W2
    patches = jnp.concatenate(
        [pbuf_ref[dy:dy + H2, dx:dx + W2, :].reshape(P, Cin)
         for dy in range(3) for dx in range(3)], axis=1)             # (P, 9*Cin)
    return jnp.dot(patches, w_ref[...], preferred_element_type=jnp.float32)


def _channel_stats(acc):
    """Per-channel (sum, sum of squares) over pixels, from the f32 accumulator."""
    return jnp.concatenate(
        [jnp.sum(acc, axis=0, keepdims=True),
         jnp.sum(acc * acc, axis=0, keepdims=True)], axis=0)          # (2, C)


# ----------------------------------------------------------------------------
# Kernel 1: implicit concat([x_up, y]) + conv3x3 + per-image BN stats
# ----------------------------------------------------------------------------
def _conv1_kernel(xu_ref, y_ref, w_ref, z_ref, st_ref, pbuf_ref):
    _, H2, W2, Cx = xu_ref.shape
    Cy = y_ref.shape[-1]
    # zero border + write both inputs into the same padded scratch (= concat dim=1)
    pbuf_ref[...] = jnp.zeros(pbuf_ref.shape, pbuf_ref.dtype)
    pbuf_ref[1:1 + H2, 1:1 + W2, 0:Cx] = xu_ref[0].astype(pbuf_ref.dtype)
    pbuf_ref[1:1 + H2, 1:1 + W2, Cx:Cx + Cy] = y_ref[0].astype(pbuf_ref.dtype)
    acc = _conv_from_padded(pbuf_ref, w_ref)                         # (P, CP) f32
    CP = acc.shape[-1]
    z_ref[0] = acc.reshape(H2, W2, CP).astype(z_ref.dtype)
    st_ref[0] = _channel_stats(acc)


def conv1_with_stats(xu, y, w1f, cp):
    N, H2, W2, Cx = xu.shape
    Cy = y.shape[-1]
    Cin = Cx + Cy
    return pl.pallas_call(
        _conv1_kernel,
        out_shape=(jax.ShapeDtypeStruct((N, H2, W2, cp), jnp.bfloat16),
                   jax.ShapeDtypeStruct((N, 2, cp), jnp.float32)),
        grid=(N,),
        in_specs=[pl.BlockSpec((1, H2, W2, Cx), lambda n: (n, 0, 0, 0)),
                  pl.BlockSpec((1, H2, W2, Cy), lambda n: (n, 0, 0, 0)),
                  pl.BlockSpec((9 * Cin, cp), lambda n: (0, 0))],
        out_specs=(pl.BlockSpec((1, H2, W2, cp), lambda n: (n, 0, 0, 0)),
                   pl.BlockSpec((1, 2, cp), lambda n: (n, 0, 0))),
        scratch_shapes=[pltpu.VMEM((H2 + 2, W2 + 2, Cin), jnp.bfloat16)],
        compiler_params=pltpu.CompilerParams(dimension_semantics=("parallel",)),
    )(xu, y, w1f)


# ----------------------------------------------------------------------------
# Kernel 2: BN(prev stats) + ReLU fused into conv3x3 prologue, + BN stats
# ----------------------------------------------------------------------------
def _bn_relu_conv_kernel(z_ref, sc_ref, sh_ref, w_ref, o_ref, st_ref, pbuf_ref):
    _, H2, W2, CP = z_ref.shape
    a = (z_ref[0].astype(jnp.float32) * sc_ref[...].reshape(1, 1, CP)
         + sh_ref[...].reshape(1, 1, CP))
    a = jnp.maximum(a, 0.0)
    pbuf_ref[...] = jnp.zeros(pbuf_ref.shape, pbuf_ref.dtype)
    pbuf_ref[1:1 + H2, 1:1 + W2, :] = a.astype(pbuf_ref.dtype)
    acc = _conv_from_padded(pbuf_ref, w_ref)                          # (P, CP) f32
    o_ref[0] = acc.reshape(H2, W2, CP).astype(o_ref.dtype)
    st_ref[0] = _channel_stats(acc)


def bn_relu_conv_with_stats(z, scale, shift, wf):
    N, H2, W2, cp = z.shape
    return pl.pallas_call(
        _bn_relu_conv_kernel,
        out_shape=(jax.ShapeDtypeStruct((N, H2, W2, cp), jnp.bfloat16),
                   jax.ShapeDtypeStruct((N, 2, cp), jnp.float32)),
        grid=(N,),
        in_specs=[pl.BlockSpec((1, H2, W2, cp), lambda n: (n, 0, 0, 0)),
                  pl.BlockSpec((1, cp), lambda n: (0, 0)),
                  pl.BlockSpec((1, cp), lambda n: (0, 0)),
                  pl.BlockSpec((9 * cp, cp), lambda n: (0, 0))],
        out_specs=(pl.BlockSpec((1, H2, W2, cp), lambda n: (n, 0, 0, 0)),
                   pl.BlockSpec((1, 2, cp), lambda n: (n, 0, 0))),
        scratch_shapes=[pltpu.VMEM((H2 + 2, W2 + 2, cp), jnp.bfloat16)],
        compiler_params=pltpu.CompilerParams(dimension_semantics=("parallel",)),
    )(z, scale, shift, wf)


# ----------------------------------------------------------------------------
# Kernel 3: final BN + ReLU, dropping the zero padded channels
# ----------------------------------------------------------------------------
def _bn_relu_out_kernel(z_ref, sc_ref, sh_ref, o_ref):
    _, H2, W2, CP = z_ref.shape
    Cout = o_ref.shape[-1]
    a = (z_ref[0].astype(jnp.float32) * sc_ref[...].reshape(1, 1, CP)
         + sh_ref[...].reshape(1, 1, CP))
    a = jnp.maximum(a, 0.0)
    o_ref[0] = a[:, :, :Cout].astype(o_ref.dtype)


def bn_relu_final(z, scale, shift, cout):
    N, H2, W2, cp = z.shape
    return pl.pallas_call(
        _bn_relu_out_kernel,
        out_shape=jax.ShapeDtypeStruct((N, H2, W2, cout), jnp.float32),
        grid=(N,),
        in_specs=[pl.BlockSpec((1, H2, W2, cp), lambda n: (n, 0, 0, 0)),
                  pl.BlockSpec((1, cp), lambda n: (0, 0)),
                  pl.BlockSpec((1, cp), lambda n: (0, 0))],
        out_specs=pl.BlockSpec((1, H2, W2, cout), lambda n: (n, 0, 0, 0)),
        compiler_params=pltpu.CompilerParams(dimension_semantics=("parallel",)),
    )(z, scale, shift)


# ----------------------------------------------------------------------------
# Tiny XLA glue: batch-stat scale/shift, weight padding/flattening
# ----------------------------------------------------------------------------
def _bn_scale_shift(part, gamma_p, beta_p, count, eps=BN_EPS):
    """part: (N, 2, CP) per-image (sum, sumsq) -> per-channel scale/shift (1, CP)."""
    s = jnp.sum(part, axis=0)
    mean = s[0] / count
    var = s[1] / count - mean * mean                 # biased, training-mode BN
    inv = gamma_p * lax.rsqrt(var + eps)             # padded channels: gamma=0 -> 0
    scale = inv
    shift = beta_p - mean * inv
    return (scale.reshape(1, -1).astype(jnp.float32),
            shift.reshape(1, -1).astype(jnp.float32))


def _prep_params(params, cx, cy, cp):
    cin = cx + cy
    w1 = params["w1"]                                # (3, 3, cin, cout) HWIO
    cout = w1.shape[-1]
    w1p = jnp.zeros((3, 3, cin, cp), jnp.float32).at[:, :, :, :cout].set(w1)
    w1f = w1p.reshape(9 * cin, cp).astype(jnp.bfloat16)
    w2 = params["w2"]                                # (3, 3, cout, cout)
    w2p = jnp.zeros((3, 3, cp, cp), jnp.float32).at[:, :, :cout, :cout].set(w2)
    w2f = w2p.reshape(9 * cp, cp).astype(jnp.bfloat16)
    pad_vec = lambda v: jnp.zeros((cp,), jnp.float32).at[:cout].set(v)
    return (w1f, w2f, pad_vec(params["g1"]), pad_vec(params["b1"]),
            pad_vec(params["g2"]), pad_vec(params["b2"]), cout)


# ----------------------------------------------------------------------------
# UpsampleBlock forward
# ----------------------------------------------------------------------------
def init_params(key, in_ch, out_ch):
    k1, k2, k3, k4, k5, k6 = jax.random.split(key, 6)
    s1 = 1.0 / np.sqrt(9.0 * in_ch)
    s2 = 1.0 / np.sqrt(9.0 * out_ch)
    return {
        # HWIO weights (w[ky, kx, cin, cout] == W_pytorch[cout, cin, ky, kx])
        "w1": jax.random.normal(k1, (3, 3, in_ch, out_ch), jnp.float32) * s1,
        "g1": 1.0 + 0.1 * jax.random.normal(k2, (out_ch,), jnp.float32),
        "b1": 0.1 * jax.random.normal(k3, (out_ch,), jnp.float32),
        "w2": jax.random.normal(k4, (3, 3, out_ch, out_ch), jnp.float32) * s2,
        "g2": 1.0 + 0.1 * jax.random.normal(k5, (out_ch,), jnp.float32),
        "b2": 0.1 * jax.random.normal(k6, (out_ch,), jnp.float32),
    }


def upsample_block_forward(x, y, params):
    """x: (N, Cx, H, W), y: (N, Cy, 2H, 2W) -> (N, out_ch, 2H, 2W), all NCHW."""
    N, Cx, H, W = x.shape
    Cy = y.shape[1]
    H2, W2 = 2 * H, 2 * W
    cp = _round_up_lane(params["w1"].shape[-1])      # lane-padded channel count
    w1f, w2f, g1, b1, g2, b2, cout = _prep_params(params, Cx, Cy, cp)

    xu = bilinear_upsample_2x_nhwc(x).astype(jnp.bfloat16)            # (N,H2,W2,Cx)
    y_nhwc = jnp.transpose(y, (0, 2, 3, 1)).astype(jnp.bfloat16)      # (N,H2,W2,Cy)

    count = N * H2 * W2
    z1, p1 = conv1_with_stats(xu, y_nhwc, w1f, cp)
    s1, t1 = _bn_scale_shift(p1, g1, b1, count)
    z2, p2 = bn_relu_conv_with_stats(z1, s1, t1, w2f)
    s2, t2 = _bn_scale_shift(p2, g2, b2, count)
    out_nhwc = bn_relu_final(z2, s2, t2, cout)                        # (N,H2,W2,cout)
    return jnp.transpose(out_nhwc, (0, 3, 1, 2))                      # NHWC -> NCHW


# ----------------------------------------------------------------------------
# Pure-JAX f32 reference (correctness check)
# ----------------------------------------------------------------------------
def reference_forward(x, y, params):
    N, Cx, H, W = x.shape
    Uh = jnp.asarray(_interp_matrix(2 * H, H))
    Uw = jnp.asarray(_interp_matrix(2 * W, W))
    xu = jnp.einsum("oh,nchw->ncow", Uh, x)
    xu = jnp.einsum("pw,ncow->ncop", Uw, xu)
    z = jnp.concatenate([xu, y], axis=1)
    z = jnp.transpose(z, (0, 2, 3, 1))

    def conv(a, w):
        return lax.conv_general_dilated(
            a, w, (1, 1), "SAME", dimension_numbers=("NHWC", "HWIO", "NHWC"))

    def bn_relu(a, g, b, eps=BN_EPS):
        m = jnp.mean(a, axis=(0, 1, 2), keepdims=True)
        v = jnp.mean((a - m) ** 2, axis=(0, 1, 2), keepdims=True)
        return jnp.maximum((a - m) * lax.rsqrt(v + eps) * g + b, 0.0)

    z = bn_relu(conv(z, params["w1"]), params["g1"], params["b1"])
    z = bn_relu(conv(z, params["w2"]), params["g2"], params["b2"])
    return jnp.transpose(z, (0, 3, 1, 2))


if __name__ == "__main__":
    key = jax.random.PRNGKey(0)
    kx, ky, kp = jax.random.split(key, 3)

    N, Cx, H, W = 2, 8, 8, 8          # x comes from the deeper (coarser) level
    Cy = 8                            # skip connection
    in_ch, out_ch = Cx + Cy, 8        # UpsampleBlock(in_ch=16, out_ch=8)

    x = jax.random.normal(kx, (N, Cx, H, W), jnp.float32)
    y = jax.random.normal(ky, (N, Cy, 2 * H, 2 * W), jnp.float32)
    params = init_params(kp, in_ch, out_ch)

    fwd = jax.jit(upsample_block_forward)
    out = jax.block_until_ready(fwd(x, y, params))
    ref = jax.block_until_ready(reference_forward(x, y, params))

    assert out.shape == (N, out_ch, 2 * H, 2 * W)
    # bf16 conv operands + f32 accumulation/BN-stats: stays well within 5e-2.
    np.testing.assert_allclose(np.asarray(out), np.asarray(ref),
                               rtol=5e-2, atol=5e-2)
    print("KERNEL_OK")
</pallas_src>

<mosaic_0001>
module attributes {stable_mosaic.version = 11 : i64} {
  func.func @_upsample_kernel(%arg0: i32, %arg1: memref<1x8x8x8xf32, #tpu.memory_space<vmem>>, %arg2: memref<8x16xf32, #tpu.memory_space<vmem>>, %arg3: memref<1x2x8x8x16xf32, #tpu.memory_space<vmem>>) attributes {dimension_semantics = [#tpu.dimension_semantics<parallel>], iteration_bounds = array<i64: 2>, scalar_prefetch = 0 : i64, scratch_operands = 0 : i64, tpu.core_type = #tpu.core_type<tc>, window_params = [{transform_indices = @transform_0, window_bounds = array<i64: 1, 8, 8, 8>}, {pipeline_mode = #tpu.pipeline_mode<synchronous>, transform_indices = @transform_1, window_bounds = array<i64: 8, 16>}, {transform_indices = @transform_2, window_bounds = array<i64: 1, 2, 8, 8, 16>}]} {
    %c0 = arith.constant 0 : index
    %c0_0 = arith.constant 0 : index
    %c0_1 = arith.constant 0 : index
    %c0_2 = arith.constant 0 : index
    %0 = vector.load %arg1[%c0, %c0_0, %c0_1, %c0_2] : memref<1x8x8x8xf32, #tpu.memory_space<vmem>>, vector<1x8x8x8xf32>
    %1 = vector.shape_cast %0 : vector<1x8x8x8xf32> to vector<8x8x8xf32>
    %2 = vector.shape_cast %1 : vector<8x8x8xf32> to vector<64x8xf32>
    %c0_3 = arith.constant 0 : index
    %c0_4 = arith.constant 0 : index
    %3 = vector.load %arg2[%c0_3, %c0_4] : memref<8x16xf32, #tpu.memory_space<vmem>>, vector<8x16xf32>
    %cst = arith.constant dense<0.000000e+00> : vector<64x16xf32>
    %4 = tpu.matmul %2, %3, %cst {dimension_numbers = #tpu.dot_dimension_numbers<[1], [0], [0], [1], [0, 0, 1, 1], [], []>} : vector<64x8xf32>, vector<8x16xf32>, vector<64x16xf32> -> vector<64x16xf32>
    %5 = tpu.iota {dimensions = array<i32: 0>} : vector<64x1xi32>
    %c8_i32 = arith.constant 8 : i32
    %c0_i32 = arith.constant 0 : i32
    %6 = arith.cmpi eq, %c8_i32, %c0_i32 : i32
    %c1_i32 = arith.constant 1 : i32
    %7 = arith.select %6, %c1_i32, %c8_i32 : i32
    %8 = vector.broadcast %7 : i32 to vector<64x1xi32>
    %9 = arith.remsi %5, %8 : vector<64x1xi32>
    %c0_i32_5 = arith.constant 0 : i32
    %10 = vector.broadcast %c0_i32_5 : i32 to vector<64x1xi32>
    %11 = arith.cmpi ne, %9, %10 : vector<64x1xi32>
    %c0_i32_6 = arith.constant 0 : i32
    %12 = vector.broadcast %c0_i32_6 : i32 to vector<64x1xi32>
    %13 = arith.cmpi slt, %9, %12 : vector<64x1xi32>
    %c0_i32_7 = arith.constant 0 : i32
    %14 = arith.cmpi slt, %7, %c0_i32_7 : i32
    %15 = vector.broadcast %14 : i1 to vector<64x1xi1>
    %16 = vector.broadcast %15 : vector<64x1xi1> to vector<64x1xi1>
    %17 = arith.xori %13, %16 : vector<64x1xi1>
    %18 = arith.andi %17, %11 : vector<64x1xi1>
    %19 = vector.broadcast %7 : i32 to vector<64x1xi32>
    %20 = arith.addi %9, %19 : vector<64x1xi32>
    %21 = arith.select %18, %20, %9 : vector<64x1xi1>, vector<64x1xi32>
    %22 = vector.extract_strided_slice %4 {offsets = [0, 0], sizes = [1, 16], strides = [1, 1]} : vector<64x16xf32> to vector<1x16xf32>
    %23 = vector.extract_strided_slice %4 {offsets = [0, 0], sizes = [63, 16], strides = [1, 1]} : vector<64x16xf32> to vector<63x16xf32>
    %24 = tpu.concatenate %22, %23 in 0 : vector<1x16xf32>, vector<63x16xf32> -> vector<64x16xf32>
    %25 = vector.extract_strided_slice %4 {offsets = [1, 0], sizes = [63, 16], strides = [1, 1]} : vector<64x16xf32> to vector<63x16xf32>
    %26 = vector.extract_strided_slice %4 {offsets = [63, 0], sizes = [1, 16], strides = [1, 1]} : vector<64x16xf32> to vector<1x16xf32>
    %27 = tpu.concatenate %25, %26 in 0 : vector<63x16xf32>, vector<1x16xf32> -> vector<64x16xf32>
    %c0_i32_8 = arith.constant 0 : i32
    %28 = vector.broadcast %c0_i32_8 : i32 to vector<64x1xi32>
    %29 = arith.cmpi eq, %21, %28 : vector<64x1xi32>
    %30 = vector.shape_cast %29 : vector<64x1xi1> to vector<64x1xi1>
    %31 = vector.broadcast %30 : vector<64x1xi1> to vector<64x16xi1>
    %32 = arith.select %31, %4, %24 : vector<64x16xi1>, vector<64x16xf32>
    %c7_i32 = arith.constant 7 : i32
    %33 = vector.broadcast %c7_i32 : i32 to vector<64x1xi32>
    %34 = arith.cmpi eq, %21, %33 : vector<64x1xi32>
    %35 = vector.shape_cast %34 : vector<64x1xi1> to vector<64x1xi1>
    %36 = vector.broadcast %35 : vector<64x1xi1> to vector<64x16xi1>
    %37 = arith.select %36, %4, %27 : vector<64x16xi1>, vector<64x16xf32>
    %cst_9 = arith.constant 7.500000e-01 : f32
    %38 = vector.broadcast %cst_9 : f32 to vector<64x16xf32>
    %39 = arith.mulf %38, %4 : vector<64x16xf32>
    %cst_10 = arith.constant 2.500000e-01 : f32
    %40 = vector.broadcast %cst_10 : f32 to vector<64x16xf32>
    %41 = arith.mulf %40, %32 : vector<64x16xf32>
    %42 = arith.addf %39, %41 : vector<64x16xf32>
    %cst_11 = arith.constant 7.500000e-01 : f32
    %43 = vector.broadcast %cst_11 : f32 to vector<64x16xf32>
    %44 = arith.mulf %43, %4 : vector<64x16xf32>
    %cst_12 = arith.constant 2.500000e-01 : f32
    %45 = vector.broadcast %cst_12 : f32 to vector<64x16xf32>
    %46 = arith.mulf %45, %37 : vector<64x16xf32>
    %47 = arith.addf %44, %46 : vector<64x16xf32>
    %48 = vector.shape_cast %42 : vector<64x16xf32> to vector<8x8x16xf32>
    %c0_13 = arith.constant 0 : index
    %c0_14 = arith.constant 0 : index
    %c0_15 = arith.constant 0 : index
    %c0_16 = arith.constant 0 : index
    %c0_17 = arith.constant 0 : index
    %49 = vector.load %arg3[%c0_13, %c0_14, %c0_15, %c0_16, %c0_17] : memref<1x2x8x8x16xf32, #tpu.memory_space<vmem>>, vector<1x1x8x8x16xf32>
    %50 = vector.shape_cast %49 : vector<1x1x8x8x16xf32> to vector<8x8x16xf32>
    %51 = vector.shape_cast %48 : vector<8x8x16xf32> to vector<1x1x8x8x16xf32>
    tpu.vector_store %arg3[%c0_13, %c0_14, %c0_15, %c0_16, %c0_17], %51 {strides = array<i32>} : memref<1x2x8x8x16xf32, #tpu.memory_space<vmem>>, vector<1x1x8x8x16xf32>,
    %52 = vector.shape_cast %47 : vector<64x16xf32> to vector<8x8x16xf32>
    %c0_18 = arith.constant 0 : index
    %c1 = arith.constant 1 : index
    %c0_19 = arith.constant 0 : index
    %c0_20 = arith.constant 0 : index
    %c0_21 = arith.constant 0 : index
    %53 = vector.load %arg3[%c0_18, %c1, %c0_19, %c0_20, %c0_21] : memref<1x2x8x8x16xf32, #tpu.memory_space<vmem>>, vector<1x1x8x8x16xf32>
    %54 = vector.shape_cast %53 : vector<1x1x8x8x16xf32> to vector<8x8x16xf32>
    %55 = vector.shape_cast %52 : vector<8x8x16xf32> to vector<1x1x8x8x16xf32>
    tpu.vector_store %arg3[%c0_18, %c1, %c0_19, %c0_20, %c0_21], %55 {strides = array<i32>} : memref<1x2x8x8x16xf32, #tpu.memory_space<vmem>>, vector<1x1x8x8x16xf32>,
    return
  }
  func.func @transform_0(%arg0: i32) -> (i32, i32, i32, i32) {
    %c0_i32 = arith.constant 0 : i32
    %c0_i32_0 = arith.constant 0 : i32
    %c0_i32_1 = arith.constant 0 : i32
    %c0_i32_2 = arith.constant 0 : i32
    return %arg0, %c0_i32, %c0_i32_0, %c0_i32_1 : i32, i32, i32, i32
  }
  func.func @transform_1(%arg0: i32) -> (i32, i32) {
    %c0_i32 = arith.constant 0 : i32
    %c0_i32_0 = arith.constant 0 : i32
    %c0_i32_1 = arith.constant 0 : i32
    return %c0_i32, %c0_i32_0 : i32, i32
  }
  func.func @transform_2(%arg0: i32) -> (i32, i32, i32, i32, i32) {
    %c0_i32 = arith.constant 0 : i32
    %c0_i32_0 = arith.constant 0 : i32
    %c0_i32_1 = arith.constant 0 : i32
    %c0_i32_2 = arith.constant 0 : i32
    %c0_i32_3 = arith.constant 0 : i32
    return %arg0, %c0_i32, %c0_i32_0, %c0_i32_1, %c0_i32_2 : i32, i32, i32, i32, i32
  }
}

module attributes {stable_mosaic.version = 11 : i64} {
  func.func @_conv1_kernel(%arg0: i32, %arg1: memref<1x16x16x8xbf16, #tpu.memory_space<vmem>>, %arg2: memref<1x16x16x8xbf16, #tpu.memory_space<vmem>>, %arg3: memref<144x128xbf16, #tpu.memory_space<vmem>>, %arg4: memref<1x16x16x128xbf16, #tpu.memory_space<vmem>>, %arg5: memref<1x2x128xf32, #tpu.memory_space<vmem>>, %arg6: memref<18x18x16xbf16, #tpu.memory_space<vmem>>) attributes {dimension_semantics = [#tpu.dimension_semantics<parallel>], iteration_bounds = array<i64: 2>, scalar_prefetch = 0 : i64, scratch_operands = 1 : i64, tpu.core_type = #tpu.core_type<tc>, window_params = [{transform_indices = @transform_0, window_bounds = array<i64: 1, 16, 16, 8>}, {transform_indices = @transform_1, window_bounds = array<i64: 1, 16, 16, 8>}, {pipeline_mode = #tpu.pipeline_mode<synchronous>, transform_indices = @transform_2, window_bounds = array<i64: 144, 128>}, {transform_indices = @transform_3, window_bounds = array<i64: 1, 16, 16, 128>}, {transform_indices = @transform_4, window_bounds = array<i64: 1, 2, 128>}]} {
    %cst = arith.constant 0.000000e+00 : bf16
    %0 = vector.broadcast %cst : bf16 to vector<18x18x16xbf16>
    %c0 = arith.constant 0 : index
    %c0_0 = arith.constant 0 : index
    %c0_1 = arith.constant 0 : index
    %1 = vector.load %arg6[%c0, %c0_0, %c0_1] : memref<18x18x16xbf16, #tpu.memory_space<vmem>>, vector<18x18x16xbf16>
    tpu.vector_store %arg6[%c0, %c0_0, %c0_1], %0 {strides = array<i32>} : memref<18x18x16xbf16, #tpu.memory_space<vmem>>, vector<18x18x16xbf16>,
    %c0_2 = arith.constant 0 : index
    %c0_3 = arith.constant 0 : index
    %c0_4 = arith.constant 0 : index
    %c0_5 = arith.constant 0 : index
    %2 = vector.load %arg1[%c0_2, %c0_3, %c0_4, %c0_5] : memref<1x16x16x8xbf16, #tpu.memory_space<vmem>>, vector<1x16x16x8xbf16>
    %3 = vector.shape_cast %2 : vector<1x16x16x8xbf16> to vector<16x16x8xbf16>
    %c1 = arith.constant 1 : index
    %c1_6 = arith.constant 1 : index
    %c0_7 = arith.constant 0 : index
    %4 = vector.load %arg6[%c1, %c1_6, %c0_7] : memref<18x18x16xbf16, #tpu.memory_space<vmem>>, vector<16x16x8xbf16>
    tpu.vector_store %arg6[%c1, %c1_6, %c0_7], %3 {strides = array<i32>} : memref<18x18x16xbf16, #tpu.memory_space<vmem>>, vector<16x16x8xbf16>,
    %c0_8 = arith.constant 0 : index
    %c0_9 = arith.constant 0 : index
    %c0_10 = arith.constant 0 : index
    %c0_11 = arith.constant 0 : index
    %5 = vector.load %arg2[%c0_8, %c0_9, %c0_10, %c0_11] : memref<1x16x16x8xbf16, #tpu.memory_space<vmem>>, vector<1x16x16x8xbf16>
    %6 = vector.shape_cast %5 : vector<1x16x16x8xbf16> to vector<16x16x8xbf16>
    %c1_12 = arith.constant 1 : index
    %c1_13 = arith.constant 1 : index
    %c8 = arith.constant 8 : index
    %7 = vector.load %arg6[%c1_12, %c1_13, %c8] : memref<18x18x16xbf16, #tpu.memory_space<vmem>>, vector<16x16x8xbf16>
    tpu.vector_store %arg6[%c1_12, %c1_13, %c8], %6 {strides = array<i32>} : memref<18x18x16xbf16, #tpu.memory_space<vmem>>, vector<16x16x8xbf16>,
    %c0_14 = arith.constant 0 : index
    %c0_15 = arith.constant 0 : index
    %c0_16 = arith.constant 0 : index
    %8 = vector.load %arg6[%c0_14, %c0_15, %c0_16] : memref<18x18x16xbf16, #tpu.memory_space<vmem>>, vector<16x16x16xbf16>
    %9 = vector.shape_cast %8 : vector<16x16x16xbf16> to vector<256x16xbf16>
    %c0_17 = arith.constant 0 : index
    %c1_18 = arith.constant 1 : index
    %c0_19 = arith.constant 0 : index
    %10 = vector.load %arg6[%c0_17, %c1_18, %c0_19] : memref<18x18x16xbf16, #tpu.memory_space<vmem>>, vector<16x16x16xbf16>
    %11 = vector.shape_cast %10 : vector<16x16x16xbf16> to vector<256x16xbf16>
    %c0_20 = arith.constant 0 : index
    %c2 = arith.constant 2 : index
    %c0_21 = arith.constant 0 : index
    %12 = vector.load %arg6[%c0_20, %c2, %c0_21] : memref<18x18x16xbf16, #tpu.memory_space<vmem>>, vector<16x16x16xbf16>
    %13 = vector.shape_cast %12 : vector<16x16x16xbf16> to vector<256x16xbf16>
    %c1_22 = arith.constant 1 : index
    %c0_23 = arith.constant 0 : index
    %c0_24 = arith.constant 0 : index
    %14 = vector.load %arg6[%c1_22, %c0_23, %c0_24] : memref<18x18x16xbf16, #tpu.memory_space<vmem>>, vector<16x16x16xbf16>
    %15 = vector.shape_cast %14 : vector<16x16x16xbf16> to vector<256x16xbf16>
    %c1_25 = arith.constant 1 : index
    %c1_26 = arith.constant 1 : index
    %c0_27 = arith.constant 0 : index
    %16 = vector.load %arg6[%c1_25, %c1_26, %c0_27] : memref<18x18x16xbf16, #tpu.memory_space<vmem>>, vector<16x16x16xbf16>
    %17 = vector.shape_cast %16 : vector<16x16x16xbf16> to vector<256x16xbf16>
    %c1_28 = arith.constant 1 : index
    %c2_29 = arith.constant 2 : index
    %c0_30 = arith.constant 0 : index
    %18 = vector.load %arg6[%c1_28, %c2_29, %c0_30] : memref<18x18x16xbf16, #tpu.memory_space<vmem>>, vector<16x16x16xbf16>
    %19 = vector.shape_cast %18 : vector<16x16x16xbf16> to vector<256x16xbf16>
    %c2_31 = arith.constant 2 : index
    %c0_32 = arith.constant 0 : index
    %c0_33 = arith.constant 0 : index
    %20 = vector.load %arg6[%c2_31, %c0_32, %c0_33] : memref<18x18x16xbf16, #tpu.memory_space<vmem>>, vector<16x16x16xbf16>
    %21 = vector.shape_cast %20 : vector<16x16x16xbf16> to vector<256x16xbf16>
    %c2_34 = arith.constant 2 : index
    %c1_35 = arith.constant 1 : index
    %c0_36 = arith.constant 0 : index
    %22 = vector.load %arg6[%c2_34, %c1_35, %c0_36] : memref<18x18x16xbf16, #tpu.memory_space<vmem>>, vector<16x16x16xbf16>
    %23 = vector.shape_cast %22 : vector<16x16x16xbf16> to vector<256x16xbf16>
    %c2_37 = arith.constant 2 : index
    %c2_38 = arith.constant 2 : index
    %c0_39 = arith.constant 0 : index
    %24 = vector.load %arg6[%c2_37, %c2_38, %c0_39] : memref<18x18x16xbf16, #tpu.memory_space<vmem>>, vector<16x16x16xbf16>
    %25 = vector.shape_cast %24 : vector<16x16x16xbf16> to vector<256x16xbf16>
    %26 = tpu.concatenate %9, %11, %13, %15, %17, %19, %21, %23, %25 in 1 : vector<256x16xbf16>, vector<256x16xbf16>, vector<256x16xbf16>, vector<256x16xbf16>, vector<256x16xbf16>, vector<256x16xbf16>, vector<256x16xbf16>, vector<256x16xbf16>, vector<256x16xbf16> -> vector<256x144xbf16>
    %c0_40 = arith.constant 0 : index
    %c0_41 = arith.constant 0 : index
    %27 = vector.load %arg3[%c0_40, %c0_41] : memref<144x128xbf16, #tpu.memory_space<vmem>>, vector<144x128xbf16>
    %cst_42 = arith.constant dense<0.000000e+00> : vector<256x128xf32>
    %28 = tpu.matmul %26, %27, %cst_42 {dimension_numbers = #tpu.dot_dimension_numbers<[1], [0], [0], [1], [0, 0, 1, 1], [], []>} : vector<256x144xbf16>, vector<144x128xbf16>, vector<256x128xf32> -> vector<256x128xf32>
    %29 = vector.shape_cast %28 : vector<256x128xf32> to vector<16x16x128xf32>
    %30 = arith.truncf %29 : vector<16x16x128xf32> to vector<16x16x128xbf16>
    %c0_43 = arith.constant 0 : index
    %c0_44 = arith.constant 0 : index
    %c0_45 = arith.constant 0 : index
    %c0_46 = arith.constant 0 : index
    %31 = vector.load %arg4[%c0_43, %c0_44, %c0_45, %c0_46] : memref<1x16x16x128xbf16, #tpu.memory_space<vmem>>, vector<1x16x16x128xbf16>
    %32 = vector.shape_cast %31 : vector<1x16x16x128xbf16> to vector<16x16x128xbf16>
    %33 = vector.shape_cast %30 : vector<16x16x128xbf16> to vector<1x16x16x128xbf16>
    tpu.vector_store %arg4[%c0_43, %c0_44, %c0_45, %c0_46], %33 {strides = array<i32>} : memref<1x16x16x128xbf16, #tpu.memory_space<vmem>>, vector<1x16x16x128xbf16>,
    %cst_47 = arith.constant dense<0.000000e+00> : vector<128xf32>
    %34 = vector.multi_reduction <add>, %28, %cst_47 [0] : vector<256x128xf32> to vector<128xf32>
    %35 = vector.shape_cast %34 : vector<128xf32> to vector<1x128xf32>
    %36 = arith.mulf %28, %28 : vector<256x128xf32>
    %cst_48 = arith.constant dense<0.000000e+00> : vector<128xf32>
    %37 = vector.multi_reduction <add>, %36, %cst_48 [0] : vector<256x128xf32> to vector<128xf32>
    %38 = vector.shape_cast %37 : vector<128xf32> to vector<1x128xf32>
    %39 = tpu.concatenate %35, %38 in 0 : vector<1x128xf32>, vector<1x128xf32> -> vector<2x128xf32>
    %c0_49 = arith.constant 0 : index
    %c0_50 = arith.constant 0 : index
    %c0_51 = arith.constant 0 : index
    %40 = vector.load %arg5[%c0_49, %c0_50, %c0_51] : memref<1x2x128xf32, #tpu.memory_space<vmem>>, vector<1x2x128xf32>
    %41 = vector.shape_cast %40 : vector<1x2x128xf32> to vector<2x128xf32>
    %42 = vector.shape_cast %39 : vector<2x128xf32> to vector<1x2x128xf32>
    tpu.vector_store %arg5[%c0_49, %c0_50, %c0_51], %42 {strides = array<i32>} : memref<1x2x128xf32, #tpu.memory_space<vmem>>, vector<1x2x128xf32>,
    return
  }
  func.func @transform_0(%arg0: i32) -> (i32, i32, i32, i32) {
    %c0_i32 = arith.constant 0 : i32
    %c0_i32_0 = arith.constant 0 : i32
    %c0_i32_1 = arith.constant 0 : i32
    %c0_i32_2 = arith.constant 0 : i32
    return %arg0, %c0_i32, %c0_i32_0, %c0_i32_1 : i32, i32, i32, i32
  }
  func.func @transform_1(%arg0: i32) -> (i32, i32, i32, i32) {
    %c0_i32 = arith.constant 0 : i32
    %c0_i32_0 = arith.constant 0 : i32
    %c0_i32_1 = arith.constant 0 : i32
    %c0_i32_2 = arith.constant 0 : i32
    return %arg0, %c0_i32, %c0_i32_0, %c0_i32_1 : i32, i32, i32, i32
  }
  func.func @transform_2(%arg0: i32) -> (i32, i32) {
    %c0_i32 = arith.constant 0 : i32
    %c0_i32_0 = arith.constant 0 : i32
    %c0_i32_1 = arith.constant 0 : i32
    return %c0_i32, %c0_i32_0 : i32, i32
  }
  func.func @transform_3(%arg0: i32) -> (i32, i32, i32, i32) {
    %c0_i32 = arith.constant 0 : i32
    %c0_i32_0 = arith.constant 0 : i32
    %c0_i32_1 = arith.constant 0 : i32
    %c0_i32_2 = arith.constant 0 : i32
    return %arg0, %c0_i32, %c0_i32_0, %c0_i32_1 : i32, i32, i32, i32
  }
  func.func @transform_4(%arg0: i32) -> (i32, i32, i32) {
    %c0_i32 = arith.constant 0 : i32
    %c0_i32_0 = arith.constant 0 : i32
    %c0_i32_1 = arith.constant 0 : i32
    return %arg0, %c0_i32, %c0_i32_0 : i32, i32, i32
  }
}

module attributes {stable_mosaic.version = 11 : i64} {
  func.func @_bn_relu_out_kernel(%arg0: i32, %arg1: memref<1x16x16x128xbf16, #tpu.memory_space<vmem>>, %arg2: memref<1x128xf32, #tpu.memory_space<vmem>>, %arg3: memref<1x128xf32, #tpu.memory_space<vmem>>, %arg4: memref<1x16x16x8xf32, #tpu.memory_space<vmem>>) attributes {dimension_semantics = [#tpu.dimension_semantics<parallel>], iteration_bounds = array<i64: 2>, scalar_prefetch = 0 : i64, scratch_operands = 0 : i64, tpu.core_type = #tpu.core_type<tc>, window_params = [{transform_indices = @transform_0, window_bounds = array<i64: 1, 16, 16, 128>}, {pipeline_mode = #tpu.pipeline_mode<synchronous>, transform_indices = @transform_1, window_bounds = array<i64: 1, 128>}, {pipeline_mode = #tpu.pipeline_mode<synchronous>, transform_indices = @transform_2, window_bounds = array<i64: 1, 128>}, {transform_indices = @transform_3, window_bounds = array<i64: 1, 16, 16, 8>}]} {
    %c0 = arith.constant 0 : index
    %c0_0 = arith.constant 0 : index
    %c0_1 = arith.constant 0 : index
    %c0_2 = arith.constant 0 : index
    %0 = vector.load %arg1[%c0, %c0_0, %c0_1, %c0_2] : memref<1x16x16x128xbf16, #tpu.memory_space<vmem>>, vector<1x16x16x128xbf16>
    %1 = vector.shape_cast %0 : vector<1x16x16x128xbf16> to vector<16x16x128xbf16>
    %2 = arith.extf %1 : vector<16x16x128xbf16> to vector<16x16x128xf32>
    %c0_3 = arith.constant 0 : index
    %c0_4 = arith.constant 0 : index
    %3 = vector.load %arg2[%c0_3, %c0_4] : memref<1x128xf32, #tpu.memory_space<vmem>>, vector<1x128xf32>
    %4 = vector.shape_cast %3 : vector<1x128xf32> to vector<1x1x128xf32>
    %5 = vector.broadcast %4 : vector<1x1x128xf32> to vector<16x16x128xf32>
    %6 = arith.mulf %2, %5 : vector<16x16x128xf32>
    %c0_5 = arith.constant 0 : index
    %c0_6 = arith.constant 0 : index
    %7 = vector.load %arg3[%c0_5, %c0_6] : memref<1x128xf32, #tpu.memory_space<vmem>>, vector<1x128xf32>
    %8 = vector.shape_cast %7 : vector<1x128xf32> to vector<1x1x128xf32>
    %9 = vector.broadcast %8 : vector<1x1x128xf32> to vector<16x16x128xf32>
    %10 = arith.addf %6, %9 : vector<16x16x128xf32>
    %cst = arith.constant 0.000000e+00 : f32
    %11 = vector.broadcast %cst : f32 to vector<16x16x128xf32>
    %12 = arith.maximumf %10, %11 : vector<16x16x128xf32>
    %13 = vector.extract_strided_slice %12 {offsets = [0, 0, 0], sizes = [16, 16, 8], strides = [1, 1, 1]} : vector<16x16x128xf32> to vector<16x16x8xf32>
    %c0_7 = arith.constant 0 : index
    %c0_8 = arith.constant 0 : index
    %c0_9 = arith.constant 0 : index
    %c0_10 = arith.constant 0 : index
    %14 = vector.load %arg4[%c0_7, %c0_8, %c0_9, %c0_10] : memref<1x16x16x8xf32, #tpu.memory_space<vmem>>, vector<1x16x16x8xf32>
    %15 = vector.shape_cast %14 : vector<1x16x16x8xf32> to vector<16x16x8xf32>
    %16 = vector.shape_cast %13 : vector<16x16x8xf32> to vector<1x16x16x8xf32>
    tpu.vector_store %arg4[%c0_7, %c0_8, %c0_9, %c0_10], %16 {strides = array<i32>} : memref<1x16x16x8xf32, #tpu.memory_space<vmem>>, vector<1x16x16x8xf32>,
    return
  }
  func.func @transform_0(%arg0: i32) -> (i32, i32, i32, i32) {
    %c0_i32 = arith.constant 0 : i32
    %c0_i32_0 = arith.constant 0 : i32
    %c0_i32_1 = arith.constant 0 : i32
    %c0_i32_2 = arith.constant 0 : i32
    return %arg0, %c0_i32, %c0_i32_0, %c0_i32_1 : i32, i32, i32, i32
  }
  func.func @transform_1(%arg0: i32) -> (i32, i32) {
    %c0_i32 = arith.constant 0 : i32
    %c0_i32_0 = arith.constant 0 : i32
    %c0_i32_1 = arith.constant 0 : i32
    return %c0_i32, %c0_i32_0 : i32, i32
  }
  func.func @transform_2(%arg0: i32) -> (i32, i32) {
    %c0_i32 = arith.constant 0 : i32
    %c0_i32_0 = arith.constant 0 : i32
    %c0_i32_1 = arith.constant 0 : i32
    return %c0_i32, %c0_i32_0 : i32, i32
  }
  func.func @transform_3(%arg0: i32) -> (i32, i32, i32, i32) {
    %c0_i32 = arith.constant 0 : i32
    %c0_i32_0 = arith.constant 0 : i32
    %c0_i32_1 = arith.constant 0 : i32
    %c0_i32_2 = arith.constant 0 : i32
    return %arg0, %c0_i32, %c0_i32_0, %c0_i32_1 : i32, i32, i32, i32
  }
}

module attributes {stable_mosaic.version = 11 : i64} {
  func.func @_bn_relu_conv_kernel(%arg0: i32, %arg1: memref<1x16x16x128xbf16, #tpu.memory_space<vmem>>, %arg2: memref<1x128xf32, #tpu.memory_space<vmem>>, %arg3: memref<1x128xf32, #tpu.memory_space<vmem>>, %arg4: memref<1152x128xbf16, #tpu.memory_space<vmem>>, %arg5: memref<1x16x16x128xbf16, #tpu.memory_space<vmem>>, %arg6: memref<1x2x128xf32, #tpu.memory_space<vmem>>, %arg7: memref<18x18x128xbf16, #tpu.memory_space<vmem>>) attributes {dimension_semantics = [#tpu.dimension_semantics<parallel>], iteration_bounds = array<i64: 2>, scalar_prefetch = 0 : i64, scratch_operands = 1 : i64, tpu.core_type = #tpu.core_type<tc>, window_params = [{transform_indices = @transform_0, window_bounds = array<i64: 1, 16, 16, 128>}, {pipeline_mode = #tpu.pipeline_mode<synchronous>, transform_indices = @transform_1, window_bounds = array<i64: 1, 128>}, {pipeline_mode = #tpu.pipeline_mode<synchronous>, transform_indices = @transform_2, window_bounds = array<i64: 1, 128>}, {pipeline_mode = #tpu.pipeline_mode<synchronous>, transform_indices = @transform_3, window_bounds = array<i64: 1152, 128>}, {transform_indices = @transform_4, window_bounds = array<i64: 1, 16, 16, 128>}, {transform_indices = @transform_5, window_bounds = array<i64: 1, 2, 128>}]} {
    %c0 = arith.constant 0 : index
    %c0_0 = arith.constant 0 : index
    %c0_1 = arith.constant 0 : index
    %c0_2 = arith.constant 0 : index
    %0 = vector.load %arg1[%c0, %c0_0, %c0_1, %c0_2] : memref<1x16x16x128xbf16, #tpu.memory_space<vmem>>, vector<1x16x16x128xbf16>
    %1 = vector.shape_cast %0 : vector<1x16x16x128xbf16> to vector<16x16x128xbf16>
    %2 = arith.extf %1 : vector<16x16x128xbf16> to vector<16x16x128xf32>
    %c0_3 = arith.constant 0 : index
    %c0_4 = arith.constant 0 : index
    %3 = vector.load %arg2[%c0_3, %c0_4] : memref<1x128xf32, #tpu.memory_space<vmem>>, vector<1x128xf32>
    %4 = vector.shape_cast %3 : vector<1x128xf32> to vector<1x1x128xf32>
    %5 = vector.broadcast %4 : vector<1x1x128xf32> to vector<16x16x128xf32>
    %6 = arith.mulf %2, %5 : vector<16x16x128xf32>
    %c0_5 = arith.constant 0 : index
    %c0_6 = arith.constant 0 : index
    %7 = vector.load %arg3[%c0_5, %c0_6] : memref<1x128xf32, #tpu.memory_space<vmem>>, vector<1x128xf32>
    %8 = vector.shape_cast %7 : vector<1x128xf32> to vector<1x1x128xf32>
    %9 = vector.broadcast %8 : vector<1x1x128xf32> to vector<16x16x128xf32>
    %10 = arith.addf %6, %9 : vector<16x16x128xf32>
    %cst = arith.constant 0.000000e+00 : f32
    %11 = vector.broadcast %cst : f32 to vector<16x16x128xf32>
    %12 = arith.maximumf %10, %11 : vector<16x16x128xf32>
    %cst_7 = arith.constant 0.000000e+00 : bf16
    %13 = vector.broadcast %cst_7 : bf16 to vector<18x18x128xbf16>
    %c0_8 = arith.constant 0 : index
    %c0_9 = arith.constant 0 : index
    %c0_10 = arith.constant 0 : index
    %14 = vector.load %arg7[%c0_8, %c0_9, %c0_10] : memref<18x18x128xbf16, #tpu.memory_space<vmem>>, vector<18x18x128xbf16>
    tpu.vector_store %arg7[%c0_8, %c0_9, %c0_10], %13 {strides = array<i32>} : memref<18x18x128xbf16, #tpu.memory_space<vmem>>, vector<18x18x128xbf16>,
    %15 = arith.truncf %12 : vector<16x16x128xf32> to vector<16x16x128xbf16>
    %c1 = arith.constant 1 : index
    %c1_11 = arith.constant 1 : index
    %c0_12 = arith.constant 0 : index
    %16 = vector.load %arg7[%c1, %c1_11, %c0_12] : memref<18x18x128xbf16, #tpu.memory_space<vmem>>, vector<16x16x128xbf16>
    tpu.vector_store %arg7[%c1, %c1_11, %c0_12], %15 {strides = array<i32>} : memref<18x18x128xbf16, #tpu.memory_space<vmem>>, vector<16x16x128xbf16>,
    %c0_13 = arith.constant 0 : index
    %c0_14 = arith.constant 0 : index
    %c0_15 = arith.constant 0 : index
    %17 = vector.load %arg7[%c0_13, %c0_14, %c0_15] : memref<18x18x128xbf16, #tpu.memory_space<vmem>>, vector<16x16x128xbf16>
    %18 = vector.shape_cast %17 : vector<16x16x128xbf16> to vector<256x128xbf16>
    %c0_16 = arith.constant 0 : index
    %c1_17 = arith.constant 1 : index
    %c0_18 = arith.constant 0 : index
    %19 = vector.load %arg7[%c0_16, %c1_17, %c0_18] : memref<18x18x128xbf16, #tpu.memory_space<vmem>>, vector<16x16x128xbf16>
    %20 = vector.shape_cast %19 : vector<16x16x128xbf16> to vector<256x128xbf16>
    %c0_19 = arith.constant 0 : index
    %c2 = arith.constant 2 : index
    %c0_20 = arith.constant 0 : index
    %21 = vector.load %arg7[%c0_19, %c2, %c0_20] : memref<18x18x128xbf16, #tpu.memory_space<vmem>>, vector<16x16x128xbf16>
    %22 = vector.shape_cast %21 : vector<16x16x128xbf16> to vector<256x128xbf16>
    %c1_21 = arith.constant 1 : index
    %c0_22 = arith.constant 0 : index
    %c0_23 = arith.constant 0 : index
    %23 = vector.load %arg7[%c1_21, %c0_22, %c0_23] : memref<18x18x128xbf16, #tpu.memory_space<vmem>>, vector<16x16x128xbf16>
    %24 = vector.shape_cast %23 : vector<16x16x128xbf16> to vector<256x128xbf16>
    %c1_24 = arith.constant 1 : index
    %c1_25 = arith.constant 1 : index
    %c0_26 = arith.constant 0 : index
    %25 = vector.load %arg7[%c1_24, %c1_25, %c0_26] : memref<18x18x128xbf16, #tpu.memory_space<vmem>>, vector<16x16x128xbf16>
    %26 = vector.shape_cast %25 : vector<16x16x128xbf16> to vector<256x128xbf16>
    %c1_27 = arith.constant 1 : index
    %c2_28 = arith.constant 2 : index
    %c0_29 = arith.constant 0 : index
    %27 = vector.load %arg7[%c1_27, %c2_28, %c0_29] : memref<18x18x128xbf16, #tpu.memory_space<vmem>>, vector<16x16x128xbf16>
    %28 = vector.shape_cast %27 : vector<16x16x128xbf16> to vector<256x128xbf16>
    %c2_30 = arith.constant 2 : index
    %c0_31 = arith.constant 0 : index
    %c0_32 = arith.constant 0 : index
    %29 = vector.load %arg7[%c2_30, %c0_31, %c0_32] : memref<18x18x128xbf16, #tpu.memory_space<vmem>>, vector<16x16x128xbf16>
    %30 = vector.shape_cast %29 : vector<16x16x128xbf16> to vector<256x128xbf16>
    %c2_33 = arith.constant 2 : index
    %c1_34 = arith.constant 1 : index
    %c0_35 = arith.constant 0 : index
    %31 = vector.load %arg7[%c2_33, %c1_34, %c0_35] : memref<18x18x128xbf16, #tpu.memory_space<vmem>>, vector<16x16x128xbf16>
    %32 = vector.shape_cast %31 : vector<16x16x128xbf16> to vector<256x128xbf16>
    %c2_36 = arith.constant 2 : index
    %c2_37 = arith.constant 2 : index
    %c0_38 = arith.constant 0 : index
    %33 = vector.load %arg7[%c2_36, %c2_37, %c0_38] : memref<18x18x128xbf16, #tpu.memory_space<vmem>>, vector<16x16x128xbf16>
    %34 = vector.shape_cast %33 : vector<16x16x128xbf16> to vector<256x128xbf16>
    %35 = tpu.concatenate %18, %20, %22, %24, %26, %28, %30, %32, %34 in 1 : vector<256x128xbf16>, vector<256x128xbf16>, vector<256x128xbf16>, vector<256x128xbf16>, vector<256x128xbf16>, vector<256x128xbf16>, vector<256x128xbf16>, vector<256x128xbf16>, vector<256x128xbf16> -> vector<256x1152xbf16>
    %c0_39 = arith.constant 0 : index
    %c0_40 = arith.constant 0 : index
    %36 = vector.load %arg4[%c0_39, %c0_40] : memref<1152x128xbf16, #tpu.memory_space<vmem>>, vector<1152x128xbf16>
    %cst_41 = arith.constant dense<0.000000e+00> : vector<256x128xf32>
    %37 = tpu.matmul %35, %36, %cst_41 {dimension_numbers = #tpu.dot_dimension_numbers<[1], [0], [0], [1], [0, 0, 1, 1], [], []>} : vector<256x1152xbf16>, vector<1152x128xbf16>, vector<256x128xf32> -> vector<256x128xf32>
    %38 = vector.shape_cast %37 : vector<256x128xf32> to vector<16x16x128xf32>
    %39 = arith.truncf %38 : vector<16x16x128xf32> to vector<16x16x128xbf16>
    %c0_42 = arith.constant 0 : index
    %c0_43 = arith.constant 0 : index
    %c0_44 = arith.constant 0 : index
    %c0_45 = arith.constant 0 : index
    %40 = vector.load %arg5[%c0_42, %c0_43, %c0_44, %c0_45] : memref<1x16x16x128xbf16, #tpu.memory_space<vmem>>, vector<1x16x16x128xbf16>
    %41 = vector.shape_cast %40 : vector<1x16x16x128xbf16> to vector<16x16x128xbf16>
    %42 = vector.shape_cast %39 : vector<16x16x128xbf16> to vector<1x16x16x128xbf16>
    tpu.vector_store %arg5[%c0_42, %c0_43, %c0_44, %c0_45], %42 {strides = array<i32>} : memref<1x16x16x128xbf16, #tpu.memory_space<vmem>>, vector<1x16x16x128xbf16>,
    %cst_46 = arith.constant dense<0.000000e+00> : vector<128xf32>
    %43 = vector.multi_reduction <add>, %37, %cst_46 [0] : vector<256x128xf32> to vector<128xf32>
    %44 = vector.shape_cast %43 : vector<128xf32> to vector<1x128xf32>
    %45 = arith.mulf %37, %37 : vector<256x128xf32>
    %cst_47 = arith.constant dense<0.000000e+00> : vector<128xf32>
    %46 = vector.multi_reduction <add>, %45, %cst_47 [0] : vector<256x128xf32> to vector<128xf32>
    %47 = vector.shape_cast %46 : vector<128xf32> to vector<1x128xf32>
    %48 = tpu.concatenate %44, %47 in 0 : vector<1x128xf32>, vector<1x128xf32> -> vector<2x128xf32>
    %c0_48 = arith.constant 0 : index
    %c0_49 = arith.constant 0 : index
    %c0_50 = arith.constant 0 : index
    %49 = vector.load %arg6[%c0_48, %c0_49, %c0_50] : memref<1x2x128xf32, #tpu.memory_space<vmem>>, vector<1x2x128xf32>
    %50 = vector.shape_cast %49 : vector<1x2x128xf32> to vector<2x128xf32>
    %51 = vector.shape_cast %48 : vector<2x128xf32> to vector<1x2x128xf32>
    tpu.vector_store %arg6[%c0_48, %c0_49, %c0_50], %51 {strides = array<i32>} : memref<1x2x128xf32, #tpu.memory_space<vmem>>, vector<1x2x128xf32>,
    return
  }
  func.func @transform_0(%arg0: i32) -> (i32, i32, i32, i32) {
    %c0_i32 = arith.constant 0 : i32
    %c0_i32_0 = arith.constant 0 : i32
    %c0_i32_1 = arith.constant 0 : i32
    %c0_i32_2 = arith.constant 0 : i32
    return %arg0, %c0_i32, %c0_i32_0, %c0_i32_1 : i32, i32, i32, i32
  }
  func.func @transform_1(%arg0: i32) -> (i32, i32) {
    %c0_i32 = arith.constant 0 : i32
    %c0_i32_0 = arith.constant 0 : i32
    %c0_i32_1 = arith.constant 0 : i32
    return %c0_i32, %c0_i32_0 : i32, i32
  }
  func.func @transform_2(%arg0: i32) -> (i32, i32) {
    %c0_i32 = arith.constant 0 : i32
    %c0_i32_0 = arith.constant 0 : i32
    %c0_i32_1 = arith.constant 0 : i32
    return %c0_i32, %c0_i32_0 : i32, i32
  }
  func.func @transform_3(%arg0: i32) -> (i32, i32) {
    %c0_i32 = arith.constant 0 : i32
    %c0_i32_0 = arith.constant 0 : i32
    %c0_i32_1 = arith.constant 0 : i32
    return %c0_i32, %c0_i32_0 : i32, i32
  }
  func.func @transform_4(%arg0: i32) -> (i32, i32, i32, i32) {
    %c0_i32 = arith.constant 0 : i32
    %c0_i32_0 = arith.constant 0 : i32
    %c0_i32_1 = arith.constant 0 : i32
    %c0_i32_2 = arith.constant 0 : i32
    return %arg0, %c0_i32, %c0_i32_0, %c0_i32_1 : i32, i32, i32, i32
  }
  func.func @transform_5(%arg0: i32) -> (i32, i32, i32) {
    %c0_i32 = arith.constant 0 : i32
    %c0_i32_0 = arith.constant 0 : i32
    %c0_i32_1 = arith.constant 0 : i32
    return %arg0, %c0_i32, %c0_i32_0 : i32, i32, i32
  }
}

</mosaic_0001>

<bundles_post_ra>
// kernel: upsample_block_forward.4
= control target key start
LH: loop header
LB: loop body
LE: loop exit
PB: predicated region body
PF: predicated region fallthrough
CT: control target
= control target key end

     0   :  { %s622_s9 = smov 0   ;;  %s867_s0 = inlined_call_operand.vmem [shape: f32[2,8,8,8], index: 0, kind: input, shape index: {}]   ;;  %s868_s1 = inlined_call_operand.vmem [shape: f32[8,16], index: 1, kind: input, shape index: {}]   ;;  %s869_s2 = inlined_call_operand.vmem [shape: f32[2,2,8,8,16], index: 2, kind: output, shape index: {}]  }
   0x1 LB: > { %s559_s10 = sadd.s32 4294967295, %s605_s9   ;;  %p563_p0 = scmp.ge.s32.totalorder %s605_s9, 1  ;;  %s605_s9 = sphi %s622_s9, %s12_s9  }
   0x2   : > { %p112_p1 = scmp.lt.s32.totalorder %s605_s9, 3 }
   0x4   : > { %p113_p2 = pnand %p563_p0, %p112_p1 }
   0x5   : > { %p134_p3 = scmp.lt.s32.totalorder (!%p113_p2), %s559_s10, 1 }
   0x6   : > { %116 = sbr.rel (%p113_p2) target bundleno = 173 (0xad), region = 28 }
   0xb   : > { %v152_v0 = vld [vmem:[%s868_s1] sm:$0xff]  ;;  %s903_s10 = smov (!%p134_p3, %s559_s10), 1  ;;  %vm153_vm0 = vcmask 64512   ;;  %v219_v9 = vlaneseq  ;;  %vm332_vm1 = vcmask 1040384   ;;  %vm486_vm3 = vcmask 130048  }
   0xc   : > { %193 = vmatpush.msra.mxu0 %v152_v0  ;;  %588 = vmatpush.msra.mxu1 %v152_v0  ;;  %s586_s13 = sshll.u32 %s903_s10, 6  ;;  %s587_s17 = sshll.u32 %s903_s10, 7  ;;  %vm357_vm4 = vcmask 1046528  }
   0xd   : > { %589 = vmatpush.msra.mxu2 %v152_v0  ;;  %590 = vmatpush.msra.mxu3 %v152_v0  ;;  %s138_s16 = scalar_lea.vmem %s867_s0, %s586_s13  ;;  %v220_v10 = vshrl.u32 %v219_v9, 7  ;;  %s702_s20 = scalar_lea.vmem %s869_s2, %s587_s17 }
   0xe   : > { %v144_v1 = vld [vmem:[%s138_s16] sm:$0xff]  ;;  %v146_v2 = vld [vmem:[%s138_s16 + $0x10] sm:$0xff]  ;;  %v145_v5 = vld [vmem:[%s138_s16 + $0x8] sm:$0xff] }
   0xf   : > { %v148_v3 = vld [vmem:[%s138_s16 + $0x20] sm:$0xff]  ;;  %568 = vmatmul.msk.f32.vlgmr.msra.gmra.mxu0 %vm153_vm0, %v144_v1  ;;  %570 = vmatmul.msk.f32.vlgmr.msra.gmra.mxu1 %vm153_vm0, %v146_v2  ;;  %v150_v4 = vld [vmem:[%s138_s16 + $0x30] sm:$0xff]  ;;  %v147_v6 = vld [vmem:[%s138_s16 + $0x18] sm:$0xff]  ;;  %v221_v11 = vadd.s32 8, %v220_v10  ;;  %v222_v12 = vadd.s32 16, %v220_v10  ;;  %v232_v13 = vand.u32 7, %v220_v10 }
  0x10   : > { %572 = vmatmul.msk.f32.vlgmr.msra.gmra.mxu2 %vm153_vm0, %v148_v3  ;;  %574 = vmatmul.msk.f32.vlgmr.msra.gmra.mxu3 %vm153_vm0, %v150_v4  ;;  %v149_v7 = vld [vmem:[%s138_s16 + $0x28] sm:$0xff]  ;;  %v151_v8 = vld [vmem:[%s138_s16 + $0x38] sm:$0xff]  ;;  %v223_v14 = vadd.s32 24, %v220_v10  ;;  %v224_v15 = vadd.s32 32, %v220_v10  ;;  %v225_v24 = vadd.s32 40, %v220_v10  ;;  %v656_v25 = vadd.s32 48, %v220_v10 }
  0x11   : > { %v239_v18 = vand.u32 7, %v221_v11  ;;  %v246_v19 = vand.u32 7, %v222_v12  ;;  %vm652_vm2 = vcmp.eq.s32.totalorder %v232_v13, 0  ;;  %v658_v26 = vadd.s32 56, %v220_v10 }
  0x12   : > { %v253_v22 = vand.u32 7, %v223_v14  ;;  %v260_v23 = vand.u32 7, %v224_v15  ;;  %vm664_vm5 = vcmp.eq.s32.totalorder %v232_v13, 7  ;;  %v267_v40 = vand.u32 7, %v225_v24 }
  0x13   : > { %vm671_vm6 = vcmp.eq.s32.totalorder %v239_v18, 0  ;;  %vm675_vm7 = vcmp.eq.s32.totalorder %v246_v19, 0  ;;  %vm679_vm8 = vcmp.eq.s32.totalorder %v239_v18, 7  ;;  %vm691_vm11 = vcmp.eq.s32.totalorder %v246_v19, 7 }
  0x14   : > { %vm683_vm9 = vcmp.eq.s32.totalorder %v253_v22, 0  ;;  %vm687_vm10 = vcmp.eq.s32.totalorder %v260_v23, 0  ;;  %vm695_vm12 = vcmp.eq.s32.totalorder %v253_v22, 7  ;;  %v274_v41 = vand.u32 7, %v656_v25 }
  0x15   : > { %v281_v42 = vand.u32 7, %v658_v26  ;;  %vm726_vm13 = vcmp.eq.s32.totalorder %v267_v40, 0  ;;  %vm736_vm15 = vcmp.eq.s32.totalorder %v260_v23, 7 }
  0x16   : > { %vm732_vm14 = vcmp.eq.s32.totalorder %v274_v41, 0 }
  0x17   : > { %569 = vmatmul.msk.f32.gmra.mxu0 %vm153_vm0, %v145_v5  ;;  %571 = vmatmul.msk.f32.gmra.mxu1 %vm153_vm0, %v147_v6 }
  0x18   : > { %573 = vmatmul.msk.f32.gmra.mxu2 %vm153_vm0, %v149_v7  ;;  %575 = vmatmul.msk.f32.gmra.mxu3 %vm153_vm0, %v151_v8  ;;  %vm740_vm0 = vcmp.eq.s32.totalorder %v267_v40, 7 }
  0x8c   : > { %v647_v16 = vpop.f32.mrf.mxu0  ;;  %v649_v17 = vpop.f32.mrf.mxu1 }
  0x8d   : > { %v333_v20 = vrot.slane %v647_v16, 7  ;;  %v446_v28 = vmul.f32 0.75, %v647_v16  ;;  %v358_v39 = vrot.slane %v647_v16, 1  ;;  %v336_v44 = vrot.slane %v649_v17, 7 }
  0x8e   : > { %v361_v45 = vrot.slane %v649_v17, 1  ;;  %v448_v46 = vmul.f32 0.75, %v649_v17 }
  0x8f   : > { %v356_v27 = vsel %vm332_vm1, %v647_v16, %v333_v20 }
  0x90   : > { %v406_v30 = vsel %vm652_vm2, %v647_v16, %v356_v27  ;;  %vm768_vm2 = vcmp.eq.s32.totalorder %v281_v42, 0 }
  0x91   : > { %v454_v34 = vmul.f32 0.25, %v406_v30 }
  0x93   : > { %v462_v43 = vadd.f32 %v454_v34, %v446_v28  ;;  %v710_v47 = vpop.f32.mrf.mxu2  ;;  %v712_v48 = vpop.f32.mrf.mxu3 }
  0x94   : > { %v340_v49 = vrot.slane %v710_v47, 7  ;;  %v365_v50 = vrot.slane %v710_v47, 1  ;;  %v717_v51 = vmul.f32 0.75, %v710_v47  ;;  %v344_v52 = vrot.slane %v712_v48, 7  ;;  %v198_v53 = vpop.f32.mrf.mxu0  ;;  %v204_v54 = vpop.f32.mrf.mxu1 }
  0x95   : > { %487 = vst.msk [vmem:[%s702_s20] sm:$0xff] %vm486_vm3, %v462_v43  ;;  %v369_v55 = vrot.slane %v712_v48, 1  ;;  %v724_v56 = vmul.f32 0.75, %v712_v48  ;;  %v334_v57 = vrot.slane %v198_v53, 7  ;;  %v359_v58 = vrot.slane %v198_v53, 1 }
  0x96   : > { %v447_v59 = vmul.f32 0.75, %v198_v53  ;;  %v338_v60 = vrot.slane %v204_v54, 7  ;;  %v363_v61 = vrot.slane %v204_v54, 1  ;;  %v449_v62 = vmul.f32 0.75, %v204_v54 }
  0x97   : > { %v335_v3 = vsel %vm332_vm1, %v333_v20, %v334_v57  ;;  %v337_v4 = vsel %vm332_vm1, %v334_v57, %v336_v44  ;;  %v360_v5 = vsel %vm357_vm4, %v358_v39, %v359_v58  ;;  %v362_v6 = vsel %vm357_vm4, %v359_v58, %v361_v45 }
  0x98   : > { %v407_v7 = vsel %vm671_vm6, %v198_v53, %v335_v3  ;;  %v408_v8 = vsel %vm675_vm7, %v649_v17, %v337_v4  ;;  %v438_v9 = vsel %vm664_vm5, %v647_v16, %v360_v5  ;;  %v439_v10 = vsel %vm679_vm8, %v198_v53, %v362_v6 }
  0x99   : > { %v455_v11 = vmul.f32 0.25, %v407_v7  ;;  %v456_v12 = vmul.f32 0.25, %v408_v8  ;;  %v470_v13 = vmul.f32 0.25, %v438_v9  ;;  %v471_v14 = vmul.f32 0.25, %v439_v10 }
  0x9a   : > { %v339_v15 = vsel %vm332_vm1, %v336_v44, %v338_v60  ;;  %v341_v18 = vsel %vm332_vm1, %v338_v60, %v340_v49  ;;  %v364_v19 = vsel %vm357_vm4, %v361_v45, %v363_v61  ;;  %v366_v16 = vsel %vm357_vm4, %v363_v61, %v365_v50 }
  0x9b   : > { %v463_v21 = vadd.f32 %v455_v11, %v447_v59  ;;  %v464_v22 = vadd.f32 %v456_v12, %v448_v46  ;;  %v478_v23 = vadd.f32 %v470_v13, %v446_v28  ;;  %v479_v24 = vadd.f32 %v471_v14, %v447_v59  ;;  %v210_v27 = vpop.f32.mrf.mxu2  ;;  %v216_v29 = vpop.f32.mrf.mxu3 }
  0x9c   : > { %v409_v30 = vsel %vm683_vm9, %v204_v54, %v339_v15  ;;  %v410_v31 = vsel %vm687_vm10, %v710_v47, %v341_v18  ;;  %v440_v32 = vsel %vm691_vm11, %v649_v17, %v364_v19  ;;  %v441_v33 = vsel %vm695_vm12, %v204_v54, %v366_v16 }
  0x9d   : > { %488 = vst.msk [vmem:[%s702_s20 + $0x8] sm:$0xff] %vm486_vm3, %v463_v21  ;;  %v457_v28 = vmul.f32 0.25, %v409_v30  ;;  %v458_v34 = vmul.f32 0.25, %v410_v31  ;;  %v472_v39 = vmul.f32 0.25, %v440_v32  ;;  %v473_v40 = vmul.f32 0.25, %v441_v33 }
  0x9e   : > { %489 = vst.msk [vmem:[%s702_s20 + $0x10] sm:$0xff] %vm486_vm3, %v464_v22  ;;  %v342_v35 = vrot.slane %v210_v27, 7  ;;  %v367_v36 = vrot.slane %v210_v27, 1  ;;  %v451_v43 = vmul.f32 0.75, %v210_v27  ;;  %v346_v44 = vrot.slane %v216_v29, 7 }
  0x9f   : > { %576 = vst.msk [vmem:[%s702_s20 + $0x40] sm:$0xff] %vm486_vm3, %v478_v23  ;;  %v465_v17 = vadd.f32 %v457_v28, %v449_v62  ;;  %v466_v37 = vadd.f32 %v458_v34, %v717_v51  ;;  %v480_v38 = vadd.f32 %v472_v39, %v448_v46  ;;  %v481_v45 = vadd.f32 %v473_v40, %v449_v62 }
  0xa0   : > { %577 = vst.msk [vmem:[%s702_s20 + $0x48] sm:$0xff] %vm486_vm3, %v479_v24  ;;  %v343_v53 = vsel %vm332_vm1, %v340_v49, %v342_v35  ;;  %v345_v54 = vsel %vm332_vm1, %v342_v35, %v344_v52  ;;  %v368_v57 = vsel %vm357_vm4, %v365_v50, %v367_v36  ;;  %v370_v46 = vsel %vm357_vm4, %v367_v36, %v369_v55 }
  0xa1   : > { %490 = vst.msk [vmem:[%s702_s20 + $0x18] sm:$0xff] %vm486_vm3, %v465_v17  ;;  %v411_v58 = vsel %vm726_vm13, %v210_v27, %v343_v53  ;;  %v412_v49 = vsel %vm732_vm14, %v712_v48, %v345_v54  ;;  %v442_v59 = vsel %vm736_vm15, %v710_v47, %v368_v57  ;;  %v443_v50 = vsel %vm740_vm0, %v210_v27, %v370_v46 }
  0xa2   : > { %491 = vst.msk [vmem:[%s702_s20 + $0x20] sm:$0xff] %vm486_vm3, %v466_v37  ;;  %v459_v60 = vmul.f32 0.25, %v411_v58  ;;  %v460_v61 = vmul.f32 0.25, %v412_v49  ;;  %v474_v62 = vmul.f32 0.25, %v442_v59  ;;  %v475_v3 = vmul.f32 0.25, %v443_v50 }
  0xa3   : > { %578 = vst.msk [vmem:[%s702_s20 + $0x50] sm:$0xff] %vm486_vm3, %v480_v38  ;;  %v347_v63 = vsel %vm332_vm1, %v344_v52, %v346_v44  ;;  %v371_v0 = vrot.slane %v216_v29, 1  ;;  %vm824_vm5 = vcmp.eq.s32.totalorder %v274_v41, 7  ;;  %vm830_vm6 = vcmp.eq.s32.totalorder %v281_v42, 7 }
  0xa4   : > { %579 = vst.msk [vmem:[%s702_s20 + $0x58] sm:$0xff] %vm486_vm3, %v481_v45  ;;  %v467_v2 = vadd.f32 %v459_v60, %v451_v43  ;;  %v468_v52 = vadd.f32 %v460_v61, %v724_v56  ;;  %v482_v25 = vadd.f32 %v474_v62, %v717_v51  ;;  %v483_v4 = vadd.f32 %v475_v3, %v451_v43 }
  0xa5   : > { %v372_v41 = vsel %vm357_vm4, %v369_v55, %v371_v0  ;;  %v381_v26 = vsel %vm357_vm4, %v371_v0, %v216_v29  ;;  %v413_v42 = vsel %vm768_vm2, %v216_v29, %v347_v63  ;;  %v453_v6 = vmul.f32 0.75, %v216_v29 }
  0xa6   : > { %492 = vst.msk [vmem:[%s702_s20 + $0x28] sm:$0xff] %vm486_vm3, %v467_v2  ;;  %v444_v5 = vsel %vm824_vm5, %v712_v48, %v372_v41  ;;  %v445_v51 = vsel %vm830_vm6, %v216_v29, %v381_v26  ;;  %v461_v7 = vmul.f32 0.25, %v413_v42 }
  0xa7   : > { %493 = vst.msk [vmem:[%s702_s20 + $0x30] sm:$0xff] %vm486_vm3, %v468_v52  ;;  %v476_v55 = vmul.f32 0.25, %v444_v5  ;;  %v477_v8 = vmul.f32 0.25, %v445_v51 }
  0xa8   : > { %580 = vst.msk [vmem:[%s702_s20 + $0x60] sm:$0xff] %vm486_vm3, %v482_v25  ;;  %v469_v9 = vadd.f32 %v461_v7, %v453_v6 }
  0xa9   : > { %581 = vst.msk [vmem:[%s702_s20 + $0x68] sm:$0xff] %vm486_vm3, %v483_v4  ;;  %v484_v10 = vadd.f32 %v476_v55, %v724_v56  ;;  %v485_v11 = vadd.f32 %v477_v8, %v453_v6 }
  0xaa   : > { %494 = vst.msk [vmem:[%s702_s20 + $0x38] sm:$0xff] %vm486_vm3, %v469_v9 }
  0xab   : > { %582 = vst.msk [vmem:[%s702_s20 + $0x70] sm:$0xff] %vm486_vm3, %v484_v10 }
  0xac   : > { %583 = vst.msk [vmem:[%s702_s20 + $0x78] sm:$0xff] %vm486_vm3, %v485_v11 }
  0xad PF: > { %s12_s9 = sadd.s32 1, %s605_s9  }
  0xae   : > { %p9_p4 = scmp.ge.s32.totalorder %s12_s9, 4  }
  0xb0   :  { %11 = sbr.rel (!%p9_p4) target bundleno = 1 (0x1), region = 59 }

// kernel: upsample_block_forward.7
= control target key start
LH: loop header
LB: loop body
LE: loop exit
PB: predicated region body
PF: predicated region fallthrough
CT: control target
= control target key end

     0   :  { %s557_s12 = smov 0   ;;  %s736_s0 = inlined_call_operand.vmem [shape: bf16[2,16,16,128], index: 0, kind: input, shape index: {}]   ;;  %s737_s1 = inlined_call_operand.vmem [shape: f32[1,128], index: 1, kind: input, shape index: {}]   ;;  %s738_s2 = inlined_call_operand.vmem [shape: f32[1,128], index: 2, kind: input, shape index: {}]   ;;  %s739_s3 = inlined_call_operand.vmem [shape: f32[2,16,16,8], index: 3, kind: output, shape index: {}]  }
   0x1 LB: > { %s427_s13 = sadd.s32 4294967295, %s535_s12   ;;  %p431_p0 = scmp.ge.s32.totalorder %s535_s12, 1  ;;  %s535_s12 = sphi %s557_s12, %s13_s12  }
   0x2   : > { %p137_p1 = scmp.lt.s32.totalorder %s535_s12, 3 }
   0x4   : > { %p138_p2 = pnand %p431_p0, %p137_p1 }
   0x5   : > { %p161_p3 = scmp.lt.s32.totalorder (!%p138_p2), %s427_s13, 1 }
   0x6   : > { %141 = sbr.rel (%p138_p2) target bundleno = 55 (0x37), region = 32 }
   0xb   : > { %s741_s13 = smov (!%p161_p3, %s427_s13), 1  ;;  %v576_v0 = vld [vmem:[%s737_s1] ss:$0 sm:$0xff]  ;;  %vm339_vm0 = vcmask 64512  }
   0xc   : > { %s438_s14 = sshll.u32 %s741_s13, 7  ;;  %v584_v5 = vld [vmem:[%s738_s2] ss:$0 sm:$0xff]  ;;  %s439_s22 = sshll.u32 %s741_s13, 8 }
   0xd   : > { %s571_s17 = scalar_lea.vmem %s736_s0, %s438_s14  ;;  %s603_s25 = scalar_lea.vmem %s739_s3, %s439_s22 }
   0xe   : > { %v441_v1 = vld [vmem:[%s571_s17] sm:$0xff]   ;;  %v504_v2 = vld [vmem:[%s571_s17 + $0x8] sm:$0xff]   ;;  %v505_v3 = vld [vmem:[%s571_s17 + $0x10] sm:$0xff]  }
   0xf   : > { %v442_v4 = vunpack.c.l.bf16 %v441_v1  ;;  %v443_v6 = vunpack.c.h.bf16 %v441_v1  ;;  %v446_v7 = vunpack.c.l.bf16 %v504_v2  ;;  %v447_v8 = vunpack.c.h.bf16 %v504_v2  ;;  %v506_v9 = vld [vmem:[%s571_s17 + $0x18] sm:$0xff]   ;;  %v507_v30 = vld [vmem:[%s571_s17 + $0x20] sm:$0xff]   ;;  %v508_v31 = vld [vmem:[%s571_s17 + $0x28] sm:$0xff]  }
  0x10   : > { %v450_v10 = vunpack.c.l.bf16 %v505_v3  ;;  %v451_v11 = vunpack.c.h.bf16 %v505_v3  ;;  %v454_v12 = vunpack.c.l.bf16 %v506_v9  ;;  %v455_v13 = vunpack.c.h.bf16 %v506_v9  ;;  %v509_v36 = vld [vmem:[%s571_s17 + $0x30] sm:$0xff]   ;;  %v510_v37 = vld [vmem:[%s571_s17 + $0x38] sm:$0xff]   ;;  %v511_v3 = vld [vmem:[%s571_s17 + $0x40] sm:$0xff]  }
  0x11   : > { %v239_v14 = vmul.f32 %v576_v0, %v442_v4  ;;  %v240_v15 = vmul.f32 %v576_v0, %v443_v6  ;;  %v241_v16 = vmul.f32 %v576_v0, %v446_v7  ;;  %v242_v17 = vmul.f32 %v576_v0, %v447_v8  ;;  %v512_v4 = vld [vmem:[%s571_s17 + $0x48] sm:$0xff]   ;;  %v513_v6 = vld [vmem:[%s571_s17 + $0x50] sm:$0xff]  }
  0x12   : > { %v243_v18 = vmul.f32 %v576_v0, %v450_v10  ;;  %v244_v19 = vmul.f32 %v576_v0, %v451_v11  ;;  %v245_v20 = vmul.f32 %v576_v0, %v454_v12  ;;  %v246_v21 = vmul.f32 %v576_v0, %v455_v13  ;;  %v514_v11 = vld [vmem:[%s571_s17 + $0x58] sm:$0xff]  }
  0x13   : > { %v275_v22 = vadd.f32 %v584_v5, %v239_v14  ;;  %v276_v23 = vadd.f32 %v584_v5, %v240_v15  ;;  %v277_v24 = vadd.f32 %v584_v5, %v241_v16  ;;  %v278_v25 = vadd.f32 %v584_v5, %v242_v17 }
  0x14   : > { %v279_v26 = vadd.f32 %v584_v5, %v243_v18  ;;  %v280_v27 = vadd.f32 %v584_v5, %v244_v19  ;;  %v281_v28 = vadd.f32 %v584_v5, %v245_v20  ;;  %v282_v29 = vadd.f32 %v584_v5, %v246_v21 }
  0x15   : > { %v307_v32 = vmax.f32 %v275_v22, 0.0  ;;  %v308_v33 = vmax.f32 %v276_v23, 0.0  ;;  %v309_v34 = vmax.f32 %v277_v24, 0.0  ;;  %v310_v35 = vmax.f32 %v278_v25, 0.0 }
  0x16   : > { %v311_v38 = vmax.f32 %v279_v26, 0.0  ;;  %v312_v39 = vmax.f32 %v280_v27, 0.0  ;;  %v313_v40 = vmax.f32 %v281_v28, 0.0  ;;  %v314_v41 = vmax.f32 %v282_v29, 0.0 }
  0x17   : > { %340 = vst.msk [vmem:[%s603_s25] sm:$0xff] %vm339_vm0, %v307_v32  ;;  %v458_v42 = vunpack.c.l.bf16 %v507_v30  ;;  %v459_v43 = vunpack.c.h.bf16 %v507_v30  ;;  %v462_v44 = vunpack.c.l.bf16 %v508_v31  ;;  %v463_v45 = vunpack.c.h.bf16 %v508_v31 }
  0x18   : > { %341 = vst.msk [vmem:[%s603_s25 + $0x8] sm:$0xff] %vm339_vm0, %v308_v33  ;;  %v466_v46 = vunpack.c.l.bf16 %v509_v36  ;;  %v467_v47 = vunpack.c.h.bf16 %v509_v36  ;;  %v470_v48 = vunpack.c.l.bf16 %v510_v37  ;;  %v471_v49 = vunpack.c.h.bf16 %v510_v37 }
  0x19   : > { %342 = vst.msk [vmem:[%s603_s25 + $0x10] sm:$0xff] %vm339_vm0, %v309_v34  ;;  %v247_v50 = vmul.f32 %v576_v0, %v458_v42  ;;  %v248_v51 = vmul.f32 %v576_v0, %v459_v43  ;;  %v249_v52 = vmul.f32 %v576_v0, %v462_v44  ;;  %v250_v53 = vmul.f32 %v576_v0, %v463_v45  ;;  %v517_v42 = vld [vmem:[%s571_s17 + $0x70] sm:$0xff]  }
  0x1a   : > { %343 = vst.msk [vmem:[%s603_s25 + $0x18] sm:$0xff] %vm339_vm0, %v310_v35  ;;  %v251_v54 = vmul.f32 %v576_v0, %v466_v46  ;;  %v252_v55 = vmul.f32 %v576_v0, %v467_v47  ;;  %v253_v56 = vmul.f32 %v576_v0, %v470_v48  ;;  %v254_v57 = vmul.f32 %v576_v0, %v471_v49  ;;  %v518_v47 = vld [vmem:[%s571_s17 + $0x78] sm:$0xff]  }
  0x1b   : > { %344 = vst.msk [vmem:[%s603_s25 + $0x20] sm:$0xff] %vm339_vm0, %v311_v38  ;;  %v283_v58 = vadd.f32 %v584_v5, %v247_v50  ;;  %v284_v59 = vadd.f32 %v584_v5, %v248_v51  ;;  %v285_v60 = vadd.f32 %v584_v5, %v249_v52  ;;  %v286_v61 = vadd.f32 %v584_v5, %v250_v53 }
  0x1c   : > { %345 = vst.msk [vmem:[%s603_s25 + $0x28] sm:$0xff] %vm339_vm0, %v312_v39  ;;  %v287_v62 = vadd.f32 %v584_v5, %v251_v54  ;;  %v288_v63 = vadd.f32 %v584_v5, %v252_v55  ;;  %v289_v1 = vadd.f32 %v584_v5, %v253_v56  ;;  %v290_v2 = vadd.f32 %v584_v5, %v254_v57 }
  0x1d   : > { %346 = vst.msk [vmem:[%s603_s25 + $0x30] sm:$0xff] %vm339_vm0, %v313_v40  ;;  %v315_v7 = vmax.f32 %v283_v58, 0.0  ;;  %v316_v8 = vmax.f32 %v284_v59, 0.0  ;;  %v317_v9 = vmax.f32 %v285_v60, 0.0  ;;  %v318_v10 = vmax.f32 %v286_v61, 0.0  ;;  %v515_v40 = vld [vmem:[%s571_s17 + $0x60] sm:$0xff]  }
  0x1e   : > { %347 = vst.msk [vmem:[%s603_s25 + $0x38] sm:$0xff] %vm339_vm0, %v314_v41  ;;  %v319_v12 = vmax.f32 %v287_v62, 0.0  ;;  %v320_v13 = vmax.f32 %v288_v63, 0.0  ;;  %v321_v14 = vmax.f32 %v289_v1, 0.0  ;;  %v322_v15 = vmax.f32 %v290_v2, 0.0  ;;  %v516_v41 = vld [vmem:[%s571_s17 + $0x68] sm:$0xff]  }
  0x1f   : > { %348 = vst.msk [vmem:[%s603_s25 + $0x40] sm:$0xff] %vm339_vm0, %v315_v7  ;;  %v474_v16 = vunpack.c.l.bf16 %v511_v3  ;;  %v475_v17 = vunpack.c.h.bf16 %v511_v3  ;;  %v478_v18 = vunpack.c.l.bf16 %v512_v4  ;;  %v479_v19 = vunpack.c.h.bf16 %v512_v4 }
  0x20   : > { %349 = vst.msk [vmem:[%s603_s25 + $0x48] sm:$0xff] %vm339_vm0, %v316_v8  ;;  %v482_v20 = vunpack.c.l.bf16 %v513_v6  ;;  %v483_v21 = vunpack.c.h.bf16 %v513_v6  ;;  %v486_v22 = vunpack.c.l.bf16 %v514_v11  ;;  %v487_v23 = vunpack.c.h.bf16 %v514_v11 }
  0x21   : > { %350 = vst.msk [vmem:[%s603_s25 + $0x50] sm:$0xff] %vm339_vm0, %v317_v9  ;;  %v255_v24 = vmul.f32 %v576_v0, %v474_v16  ;;  %v256_v25 = vmul.f32 %v576_v0, %v475_v17  ;;  %v257_v26 = vmul.f32 %v576_v0, %v478_v18  ;;  %v258_v27 = vmul.f32 %v576_v0, %v479_v19 }
  0x22   : > { %351 = vst.msk [vmem:[%s603_s25 + $0x58] sm:$0xff] %vm339_vm0, %v318_v10  ;;  %v259_v28 = vmul.f32 %v576_v0, %v482_v20  ;;  %v260_v29 = vmul.f32 %v576_v0, %v483_v21  ;;  %v261_v30 = vmul.f32 %v576_v0, %v486_v22  ;;  %v262_v31 = vmul.f32 %v576_v0, %v487_v23 }
  0x23   : > { %352 = vst.msk [vmem:[%s603_s25 + $0x60] sm:$0xff] %vm339_vm0, %v319_v12  ;;  %v291_v32 = vadd.f32 %v584_v5, %v255_v24  ;;  %v292_v33 = vadd.f32 %v584_v5, %v256_v25  ;;  %v293_v34 = vadd.f32 %v584_v5, %v257_v26  ;;  %v294_v35 = vadd.f32 %v584_v5, %v258_v27 }
  0x24   : > { %353 = vst.msk [vmem:[%s603_s25 + $0x68] sm:$0xff] %vm339_vm0, %v320_v13  ;;  %v295_v36 = vadd.f32 %v584_v5, %v259_v28  ;;  %v296_v37 = vadd.f32 %v584_v5, %v260_v29  ;;  %v297_v38 = vadd.f32 %v584_v5, %v261_v30  ;;  %v298_v39 = vadd.f32 %v584_v5, %v262_v31 }
  0x25   : > { %354 = vst.msk [vmem:[%s603_s25 + $0x70] sm:$0xff] %vm339_vm0, %v321_v14  ;;  %v323_v43 = vmax.f32 %v291_v32, 0.0  ;;  %v324_v44 = vmax.f32 %v292_v33, 0.0  ;;  %v325_v45 = vmax.f32 %v293_v34, 0.0  ;;  %v326_v46 = vmax.f32 %v294_v35, 0.0 }
  0x26   : > { %355 = vst.msk [vmem:[%s603_s25 + $0x78] sm:$0xff] %vm339_vm0, %v322_v15  ;;  %v327_v48 = vmax.f32 %v295_v36, 0.0  ;;  %v328_v49 = vmax.f32 %v296_v37, 0.0  ;;  %v329_v50 = vmax.f32 %v297_v38, 0.0  ;;  %v330_v51 = vmax.f32 %v298_v39, 0.0 }
  0x27   : > { %356 = vst.msk [vmem:[%s603_s25 + $0x80] sm:$0xff] %vm339_vm0, %v323_v43  ;;  %v490_v52 = vunpack.c.l.bf16 %v515_v40  ;;  %v491_v53 = vunpack.c.h.bf16 %v515_v40  ;;  %v494_v54 = vunpack.c.l.bf16 %v516_v41  ;;  %v495_v55 = vunpack.c.h.bf16 %v516_v41 }
  0x28   : > { %357 = vst.msk [vmem:[%s603_s25 + $0x88] sm:$0xff] %vm339_vm0, %v324_v44  ;;  %v498_v56 = vunpack.c.l.bf16 %v517_v42  ;;  %v499_v57 = vunpack.c.h.bf16 %v517_v42  ;;  %v502_v58 = vunpack.c.l.bf16 %v518_v47  ;;  %v503_v59 = vunpack.c.h.bf16 %v518_v47 }
  0x29   : > { %358 = vst.msk [vmem:[%s603_s25 + $0x90] sm:$0xff] %vm339_vm0, %v325_v45  ;;  %v263_v60 = vmul.f32 %v576_v0, %v490_v52  ;;  %v264_v61 = vmul.f32 %v576_v0, %v491_v53  ;;  %v265_v62 = vmul.f32 %v576_v0, %v494_v54  ;;  %v266_v63 = vmul.f32 %v576_v0, %v495_v55 }
  0x2a   : > { %359 = vst.msk [vmem:[%s603_s25 + $0x98] sm:$0xff] %vm339_vm0, %v326_v46  ;;  %v267_v1 = vmul.f32 %v576_v0, %v498_v56  ;;  %v268_v2 = vmul.f32 %v576_v0, %v499_v57  ;;  %v269_v3 = vmul.f32 %v576_v0, %v502_v58  ;;  %v270_v4 = vmul.f32 %v576_v0, %v503_v59 }
  0x2b   : > { %360 = vst.msk [vmem:[%s603_s25 + $0xa0] sm:$0xff] %vm339_vm0, %v327_v48  ;;  %v299_v6 = vadd.f32 %v584_v5, %v263_v60  ;;  %v300_v7 = vadd.f32 %v584_v5, %v264_v61  ;;  %v301_v8 = vadd.f32 %v584_v5, %v265_v62  ;;  %v302_v9 = vadd.f32 %v584_v5, %v266_v63 }
  0x2c   : > { %361 = vst.msk [vmem:[%s603_s25 + $0xa8] sm:$0xff] %vm339_vm0, %v328_v49  ;;  %v303_v10 = vadd.f32 %v584_v5, %v267_v1  ;;  %v304_v0 = vadd.f32 %v584_v5, %v268_v2  ;;  %v305_v14 = vadd.f32 %v584_v5, %v269_v3  ;;  %v306_v16 = vadd.f32 %v584_v5, %v270_v4 }
  0x2d   : > { %362 = vst.msk [vmem:[%s603_s25 + $0xb0] sm:$0xff] %vm339_vm0, %v329_v50  ;;  %v331_v11 = vmax.f32 %v299_v6, 0.0  ;;  %v332_v12 = vmax.f32 %v300_v7, 0.0  ;;  %v333_v13 = vmax.f32 %v301_v8, 0.0  ;;  %v334_v15 = vmax.f32 %v302_v9, 0.0 }
  0x2e   : > { %363 = vst.msk [vmem:[%s603_s25 + $0xb8] sm:$0xff] %vm339_vm0, %v330_v51  ;;  %v335_v17 = vmax.f32 %v303_v10, 0.0  ;;  %v336_v18 = vmax.f32 %v304_v0, 0.0  ;;  %v337_v19 = vmax.f32 %v305_v14, 0.0  ;;  %v338_v20 = vmax.f32 %v306_v16, 0.0 }
  0x2f   : > { %364 = vst.msk [vmem:[%s603_s25 + $0xc0] sm:$0xff] %vm339_vm0, %v331_v11 }
  0x30   : > { %365 = vst.msk [vmem:[%s603_s25 + $0xc8] sm:$0xff] %vm339_vm0, %v332_v12 }
  0x31   : > { %366 = vst.msk [vmem:[%s603_s25 + $0xd0] sm:$0xff] %vm339_vm0, %v333_v13 }
  0x32   : > { %367 = vst.msk [vmem:[%s603_s25 + $0xd8] sm:$0xff] %vm339_vm0, %v334_v15 }
  0x33   : > { %368 = vst.msk [vmem:[%s603_s25 + $0xe0] sm:$0xff] %vm339_vm0, %v335_v17 }
  0x34   : > { %369 = vst.msk [vmem:[%s603_s25 + $0xe8] sm:$0xff] %vm339_vm0, %v336_v18 }
  0x35   : > { %370 = vst.msk [vmem:[%s603_s25 + $0xf0] sm:$0xff] %vm339_vm0, %v337_v19 }
  0x36   : > { %371 = vst.msk [vmem:[%s603_s25 + $0xf8] sm:$0xff] %vm339_vm0, %v338_v20 }
  0x37 PF: > { %s13_s12 = sadd.s32 1, %s535_s12  }
  0x38   : > { %p10_p4 = scmp.ge.s32.totalorder %s13_s12, 4  }
  0x3a   :  { %12 = sbr.rel (!%p10_p4) target bundleno = 1 (0x1), region = 62 }

// kernel: upsample_block_forward.5
= control target key start
LH: loop header
LB: loop body
LE: loop exit
PB: predicated region body
PF: predicated region fallthrough
CT: control target
= control target key end

     0   :  { %s5239_s15 = smov 0   ;;  %s7191_s0 = inlined_call_operand.vmem [shape: bf16[2,16,16,8], index: 0, kind: input, shape index: {}]   ;;  %s7192_s1 = inlined_call_operand.vmem [shape: bf16[2,16,16,8], index: 1, kind: input, shape index: {}]   ;;  %s7193_s2 = inlined_call_operand.vmem [shape: bf16[144,128], index: 2, kind: input, shape index: {}]   ;;  %s7194_s3 = inlined_call_operand.vmem [shape: bf16[2,16,16,128], index: 3, kind: output, shape index: {0}]   ;;  %s7195_s4 = inlined_call_operand.vmem [shape: f32[2,2,128], index: 4, kind: output, shape index: {1}]  }
   0x1 LB: > { %s4692_s16 = sadd.s32 4294967295, %s5203_s15   ;;  %p4696_p0 = scmp.ge.s32.totalorder %s5203_s15, 1  ;;  %s5203_s15 = sphi %s5239_s15, %s15_s15  }
   0x2   : > { %p175_p1 = scmp.lt.s32.totalorder %s5203_s15, 3 }
   0x4   : > { %p176_p2 = pnand %p4696_p0, %p175_p1 }
   0x5   : > { %p210_p3 = scmp.lt.s32.totalorder (!%p176_p2), %s4692_s16, 1  ;;  %s5205_s21 = smov (!%p176_p2), 8  }
   0x6   : > { %179 = sbr.rel (%p176_p2) target bundleno = 825 (0x339), region = 32  ;;  %s5207_s27 = smov (!%p176_p2), 16  }
   0x7   : > { %s5208_s28 = smov (!%p176_p2), 32   ;;  %s5209_s29 = smov (!%p176_p2), 48  }
   0x8   : > { %s5210_s30 = smov (!%p176_p2), 80   ;;  %s5211_s5 = smov (!%p176_p2), 96  }
   0x9   : > { %s5212_s6 = smov (!%p176_p2), 64   ;;  %s5213_s7 = smov (!%p176_p2), 112  }
   0xb   : > { %s7211_s16 = smov (!%p210_p3, %s4692_s16), 1  ;;  %vm318_vm0 = vsmask.f32 256  ;;  %vm319_vm1 = vsmask.f32 4368  ;;  %vm233_vm3 = vcmask 122880  }
   0xc   : > { %s5250_s17 = sshll.u32 %s7211_s16, 7  ;;  %vm5268_vm2 = vmor %vm318_vm0, %vm319_vm1  ;;  %vm650_vm4 = vcmask 57344   ;;  %vm230_vm6 = vcmask 125952   ;;  %vm642_vm7 = vcmask 60416   ;;  %vm1215_vm8 = vcmask 122944  }
   0xd   : > { %s5256_s20 = scalar_lea.vmem %s7192_s1, %s5250_s17  ;;  %s5331_s24 = scalar_lea.vmem %s7191_s0, %s5250_s17  ;;  %vm5358_vm5 = vmand %vm650_vm4, %vm318_vm0  ;;  %vm1208_vm10 = vcmask 126016   ;;  %vm643_vm11 = vsmask.f32 7938  ;;  %vm1373_vm12 = vsmask.f32 3328  ;;  %vm1824_vm14 = vcmask 1042432  }
   0xe   : > { %v761_v0 = vld [vmem:[%s5256_s20 + $0x4] sm:$0xf]  ;;  %v760_v1 = vld [vmem:[%s5256_s20] sm:$0xf]  ;;  %v762_v2 = vld [vmem:[%s5256_s20 + $0x8] sm:$0xf]  ;;  %s6841_s11 = scalar_lea.vmem %s7194_s3, %s5250_s17 }
   0xf   : > { %v801_v3 = vshrl.u32 %v761_v0, 16  ;;  %v793_v4 = vshrl.u32 %v760_v1, 16  ;;  %v796_v5 = vshll.u32 %v760_v1, 16  ;;  %v763_v6 = vld [vmem:[%s5256_s20 + $0xc] sm:$0xf]  ;;  %v810_v10 = vshrl.u32 %v762_v2, 16  ;;  %vm5424_vm9 = vmand %vm1215_vm8, %vm318_vm0 }
  0x10   : > { %v818_v7 = vshrl.u32 %v763_v6, 16  ;;  %v804_v11 = vshll.u32 %v761_v0, 16  ;;  %v821_v15 = vshll.u32 %v763_v6, 16  ;;  %v764_v16 = vld [vmem:[%s5256_s20 + $0x10] sm:$0xf]  ;;  %v813_v20 = vshll.u32 %v762_v2, 16  ;;  %vm5682_vm4 = vmand %vm1208_vm10, %vm643_vm11 }
  0x11   : > { %v803_v8 = vrot.slane %v801_v3, 7  ;;  %v795_v9 = vrot.slane %v793_v4, 7  ;;  %v765_v17 = vld [vmem:[%s5256_s20 + $0x14] sm:$0xf]  ;;  %v812_v19 = vrot.slane %v810_v10, 7  ;;  %v827_v23 = vshrl.u32 %v764_v16, 16 }
  0x12   : > { %v820_v12 = vrot.slane %v818_v7, 7  ;;  %v835_v24 = vshrl.u32 %v765_v17, 16  ;;  %v838_v32 = vshll.u32 %v765_v17, 16  ;;  %v766_v34 = vld [vmem:[%s5256_s20 + $0x18] sm:$0xf]  ;;  %v830_v36 = vshll.u32 %v764_v16, 16 }
  0x13   : > { %v808_v13 = vrot.slane %v803_v8, 4  ;;  %v798_v14 = vor.u32 %v796_v5, %v795_v9  ;;  %v806_v21 = vor.u32 %v804_v11, %v803_v8  ;;  %v799_v22 = vrot.slane %v795_v9, 4  ;;  %v767_v35 = vld [vmem:[%s5256_s20 + $0x1c] sm:$0xf]  ;;  %v768_v47 = vld [vmem:[%s5256_s20 + $0x20] sm:$0xf] }
  0x14   : > { %v825_v18 = vrot.slane %v820_v12, 4  ;;  %v823_v26 = vor.u32 %v821_v15, %v820_v12  ;;  %v816_v27 = vrot.slane %v812_v19, 4  ;;  %v815_v28 = vor.u32 %v813_v20, %v812_v19  ;;  %v769_v48 = vld [vmem:[%s5256_s20 + $0x24] sm:$0xf]  ;;  %v770_v60 = vld [vmem:[%s5256_s20 + $0x28] sm:$0xf] }
  0x15   : > { %1068 = vrot.lane.b32.xlu1 %v808_v13, %s5205_s21  ;;  %1064 = vrot.lane.b32.xlu0 %v798_v14, %s5205_s21  ;;  %v807_v29 = vsel %vm5268_vm2, %v799_v22, %v806_v21  ;;  %v829_v30 = vrot.slane %v827_v23, 7  ;;  %v837_v31 = vrot.slane %v835_v24, 7  ;;  %v844_v39 = vshrl.u32 %v766_v34, 16  ;;  %v771_v61 = vld [vmem:[%s5256_s20 + $0x2c] sm:$0xf]  ;;  %s4703_s17 = sshll.u32 %s7211_s16, 1 }
  0x16   : > { %1074 = vrot.lane.b32.xlu2 %v825_v18, %s5205_s21  ;;  %v824_v33 = vsel %vm5268_vm2, %v816_v27, %v823_v26  ;;  %v852_v40 = vshrl.u32 %v767_v35, 16  ;;  %v855_v42 = vshll.u32 %v767_v35, 16  ;;  %v847_v49 = vshll.u32 %v766_v34, 16  ;;  %v772_v9 = vld [vmem:[%s5256_s20 + $0x30] sm:$0xf] }
  0x17   : > { %v833_v37 = vrot.slane %v829_v30, 4  ;;  %v840_v38 = vor.u32 %v838_v32, %v837_v31  ;;  %v832_v41 = vor.u32 %v830_v36, %v829_v30  ;;  %v846_v44 = vrot.slane %v844_v39, 7  ;;  %v773_v10 = vld [vmem:[%s5256_s20 + $0x34] sm:$0xf]  ;;  %v774_v22 = vld [vmem:[%s5256_s20 + $0x38] sm:$0xf] }
  0x18   : > { %v854_v45 = vrot.slane %v852_v40, 7  ;;  %v842_v46 = vrot.slane %v837_v31, 4  ;;  %v861_v52 = vshrl.u32 %v768_v47, 16  ;;  %v869_v53 = vshrl.u32 %v769_v48, 16  ;;  %v775_v23 = vld [vmem:[%s5256_s20 + $0x3c] sm:$0xf] }
  0x19   : > { %v841_v43 = vsel %vm5268_vm2, %v833_v37, %v840_v38  ;;  %v850_v50 = vrot.slane %v846_v44, 4  ;;  %v849_v54 = vor.u32 %v847_v49, %v846_v44  ;;  %v872_v55 = vshll.u32 %v769_v48, 16  ;;  %v776_v36 = vld [vmem:[%s5256_s20 + $0x40] sm:$0xf]  ;;  %v777_v37 = vld [vmem:[%s5256_s20 + $0x44] sm:$0xf] }
  0x1a   : > { %v857_v51 = vor.u32 %v855_v42, %v854_v45  ;;  %v863_v57 = vrot.slane %v861_v52, 7  ;;  %v871_v58 = vrot.slane %v869_v53, 7  ;;  %v859_v59 = vrot.slane %v854_v45, 4  ;;  %v778_v49 = vld [vmem:[%s5256_s20 + $0x48] sm:$0xf] }
  0x1b   : > { %v864_v62 = vshll.u32 %v768_v47, 16  ;;  %v878_v1 = vshrl.u32 %v770_v60, 16  ;;  %v886_v2 = vshrl.u32 %v771_v61, 16  ;;  %v889_v4 = vshll.u32 %v771_v61, 16 }
  0x1c   : > { %v858_v56 = vsel %vm5268_vm2, %v850_v50, %v857_v51  ;;  %v867_v63 = vrot.slane %v863_v57, 4  ;;  %v874_v0 = vor.u32 %v872_v55, %v871_v58  ;;  %v876_v8 = vrot.slane %v871_v58, 4  ;;  %v779_v50 = vld [vmem:[%s5256_s20 + $0x4c] sm:$0xf] }
  0x1d   : > { %1070 = vrot.lane.b32.xlu1 %v815_v28, %s5205_s21  ;;  %1066 = vrot.lane.b32.xlu0 %v807_v29, %s5205_s21  ;;  %v866_v3 = vor.u32 %v864_v62, %v863_v57  ;;  %v880_v6 = vrot.slane %v878_v1, 7  ;;  %v888_v7 = vrot.slane %v886_v2, 7  ;;  %v881_v11 = vshll.u32 %v770_v60, 16  ;;  %v780_v62 = vld [vmem:[%s5256_s20 + $0x50] sm:$0xf] }
  0x1e   : > { %1072 = vrot.lane.b32.xlu2 %v824_v33, %s5205_s21  ;;  %v875_v5 = vsel %vm5268_vm2, %v867_v63, %v874_v0  ;;  %v895_v12 = vshrl.u32 %v772_v9, 16  ;;  %v903_v15 = vshrl.u32 %v773_v10, 16  ;;  %v906_v18 = vshll.u32 %v773_v10, 16  ;;  %v781_v63 = vld [vmem:[%s5256_s20 + $0x54] sm:$0xf] }
  0x1f   : > { %v884_v13 = vrot.slane %v880_v6, 4  ;;  %v891_v14 = vor.u32 %v889_v4, %v888_v7  ;;  %v883_v16 = vor.u32 %v881_v11, %v880_v6  ;;  %v893_v21 = vrot.slane %v888_v7, 4 }
  0x20   : > { %v897_v17 = vrot.slane %v895_v12, 7  ;;  %v905_v20 = vrot.slane %v903_v15, 7  ;;  %v898_v24 = vshll.u32 %v772_v9, 16  ;;  %v912_v26 = vshrl.u32 %v774_v22, 16  ;;  %v782_v15 = vld [vmem:[%s5256_s20 + $0x58] sm:$0xf] }
  0x21   : > { %v892_v19 = vsel %vm5268_vm2, %v884_v13, %v891_v14  ;;  %v920_v27 = vshrl.u32 %v775_v23, 16  ;;  %v923_v33 = vshll.u32 %v775_v23, 16  ;;  %v915_v40 = vshll.u32 %v774_v22, 16 }
  0x22   : > { %v901_v28 = vrot.slane %v897_v17, 4  ;;  %v908_v29 = vor.u32 %v906_v18, %v905_v20  ;;  %v900_v30 = vor.u32 %v898_v24, %v897_v17  ;;  %v914_v31 = vrot.slane %v912_v26, 7  ;;  %v783_v17 = vld [vmem:[%s5256_s20 + $0x5c] sm:$0xf] }
  0x23   : > { %v922_v32 = vrot.slane %v920_v27, 7  ;;  %v910_v35 = vrot.slane %v905_v20, 4  ;;  %v937_v42 = vshrl.u32 %v777_v37, 16  ;;  %v940_v47 = vshll.u32 %v777_v37, 16  ;;  %v5370_v27 = vld [vmem:[%s5331_s24 + $0x8] sm:$0xf] }
  0x24   : > { %v909_v34 = vsel %vm5268_vm2, %v901_v28, %v908_v29  ;;  %v918_v38 = vrot.slane %v914_v31, 4  ;;  %v917_v44 = vor.u32 %v915_v40, %v914_v31  ;;  %v932_v51 = vshll.u32 %v776_v36, 16  ;;  %v784_v37 = vld [vmem:[%s5256_s20 + $0x60] sm:$0xf] }
  0x25   : > { %1078 = vrot.lane.b32.xlu1 %v841_v43, %s5205_s21  ;;  %1076 = vrot.lane.b32.xlu0 %v832_v41, %s5205_s21  ;;  %v925_v39 = vor.u32 %v923_v33, %v922_v32  ;;  %v929_v41 = vshrl.u32 %v776_v36, 16  ;;  %v927_v48 = vrot.slane %v922_v32, 4  ;;  %v946_v52 = vshrl.u32 %v778_v49, 16 }
  0x26   : > { %1080 = vrot.lane.b32.xlu2 %v842_v46, %s5205_s21  ;;  %v939_v46 = vrot.slane %v937_v42, 7  ;;  %v954_v55 = vshrl.u32 %v779_v50, 16  ;;  %v957_v58 = vshll.u32 %v779_v50, 16  ;;  %v949_v0 = vshll.u32 %v778_v49, 16 }
  0x27   : > { %v926_v43 = vsel %vm5268_vm2, %v918_v38, %v925_v39  ;;  %v931_v45 = vrot.slane %v929_v41, 7  ;;  %v948_v57 = vrot.slane %v946_v52, 7  ;;  %v963_v1 = vshrl.u32 %v780_v62, 16  ;;  %v785_v38 = vld [vmem:[%s5256_s20 + $0x64] sm:$0xf] }
  0x28   : > { %v956_v60 = vrot.slane %v954_v55, 7  ;;  %v944_v61 = vrot.slane %v939_v46, 4  ;;  %v971_v2 = vshrl.u32 %v781_v63, 16  ;;  %v5206_v6 = vmov 0  }
  0x29   : > { %v935_v53 = vrot.slane %v931_v45, 4  ;;  %v952_v4 = vrot.slane %v948_v57, 4  ;;  %240 = vst.msk [vmem:[#allocation2 + $0x20] sm:$0x1] %vm233_vm3, %v5206_v6  ;;  %v965_v10 = vrot.slane %v963_v1, 7  ;;  %v974_v12 = vshll.u32 %v781_v63, 16 }
  0x2a   : > { %234 = vst.msk [vmem:[#allocation2 + $0x8] sm:$0x1] %vm233_vm3, %v5206_v6  ;;  %v973_v11 = vrot.slane %v971_v2, 7  ;;  %v961_v13 = vrot.slane %v956_v60, 4  ;;  %v966_v18 = vshll.u32 %v780_v62, 16  ;;  %v988_v24 = vshrl.u32 %v783_v17, 16 }
  0x2b   : > { %237 = vst.msk [vmem:[#allocation2 + $0x14] sm:$0x1] %vm233_vm3, %v5206_v6  ;;  %v969_v22 = vrot.slane %v965_v10, 4  ;;  %v339_v28 = vshrl.u32 %v5370_v27, 16  ;;  %v991_v36 = vshll.u32 %v783_v17, 16  ;;  %v983_v41 = vshll.u32 %v782_v15, 16 }
  0x2c   : > { %243 = vst.msk [vmem:[#allocation2 + $0x2c] sm:$0x1] %vm233_vm3, %v5206_v6  ;;  %v976_v23 = vor.u32 %v974_v12, %v973_v11  ;;  %v978_v31 = vrot.slane %v973_v11, 4  ;;  %v997_v42 = vshrl.u32 %v784_v37, 16  ;;  %v1008_v52 = vshll.u32 %v785_v38, 16 }
  0x2d   : > { %1084 = vrot.lane.b32.xlu1 %v858_v56, %s5205_s21  ;;  %1082 = vrot.lane.b32.xlu0 %v849_v54, %s5205_s21  ;;  %v942_v54 = vor.u32 %v940_v47, %v939_v46  ;;  %v934_v56 = vor.u32 %v932_v51, %v931_v45  ;;  %246 = vst.msk [vmem:[#allocation2 + $0x38] sm:$0x1] %vm233_vm3, %v5206_v6  ;;  %v5377_v33 = vrot.slane %v339_v28, 7  ;;  %v1005_v45 = vshrl.u32 %v785_v38, 16  ;;  %v5435_v2 = vld [vmem:[%s5331_s24 + $0x4] sm:$0xf] }
  0x2e   : > { %1086 = vrot.lane.b32.xlu2 %v859_v59, %s5205_s21  ;;  %249 = vst.msk [vmem:[#allocation2 + $0x44] sm:$0x1] %vm233_vm3, %v5206_v6  ;;  %v1000_v55 = vshll.u32 %v784_v37, 16  ;;  %v789_v12 = vld [vmem:[%s5256_s20 + $0x74] sm:$0xf]  ;;  %vm1825_vm0 = vcmask 1046532  }
  0x2f   : > { %v943_v59 = vsel %vm5268_vm2, %v935_v53, %v942_v54  ;;  %252 = vst.msk [vmem:[#allocation2 + $0x50] sm:$0x1] %vm233_vm3, %v5206_v6  ;;  %v345_v39 = vrot.slane %v5377_v33, 4  ;;  %v1007_v51 = vrot.slane %v1005_v45, 7  ;;  %v786_v53 = vld [vmem:[%s5256_s20 + $0x68] sm:$0xf]  ;;  %vm5560_vm1 = vmor %vm1824_vm14, %vm1825_vm0 }
  0x30   : > { %255 = vst.msk [vmem:[#allocation2 + $0x5c] sm:$0x1] %vm233_vm3, %v5206_v6  ;;  %v787_v54 = vld [vmem:[%s5256_s20 + $0x6c] sm:$0xf]  ;;  %vm1374_vm13 = vsmask.f32 7440 }
  0x31   : > { %258 = vst.msk [vmem:[#allocation2 + $0x68] sm:$0x1] %vm233_vm3, %v5206_v6  ;;  %v1012_v1 = vrot.slane %v1007_v51, 4  ;;  %vm5543_vm15 = vmor %vm1373_vm12, %vm1374_vm13  ;;  %vm3909_vm8 = vcmask 261120   ;;  %vm3975_vm12 = vcmask 523264   ;;  %vm4008_vm13 = vcmask 654336  }
  0x32   : > { %261 = vst.msk [vmem:[#allocation2 + $0x74] sm:$0x1] %vm233_vm3, %v5206_v6  ;;  %vm4041_vm14 = vcmask 785408   ;;  %vm4074_vm0 = vcmask 916480  }
  0x33   : > { %264 = vst.msk [vmem:[#allocation2 + $0x80] sm:$0x1] %vm233_vm3, %v5206_v6 }
  0x34   : > { %267 = vst.msk [vmem:[#allocation2 + $0x8c] sm:$0x1] %vm233_vm3, %v5206_v6 }
  0x35   : > { %1090 = vrot.lane.b32.xlu1 %v875_v5, %s5205_s21  ;;  %1088 = vrot.lane.b32.xlu0 %v866_v3, %s5205_s21  ;;  %v289_v3 = vld [vmem:[%s5331_s24 + $0xc] sm:$0xf]  ;;  %v959_v5 = vor.u32 %v957_v58, %v956_v60  ;;  %270 = vst.msk [vmem:[#allocation2 + $0x98] sm:$0x1] %vm233_vm3, %v5206_v6  ;;  %v1010_v58 = vor.u32 %v1008_v52, %v1007_v51  ;;  %v1022_v60 = vshrl.u32 %v787_v54, 16 }
  0x36   : > { %1092 = vrot.lane.b32.xlu2 %v876_v8, %s5205_s21  ;;  %v347_v7 = vshrl.u32 %v289_v3, 16  ;;  %v951_v8 = vor.u32 %v949_v0, %v948_v57  ;;  %v350_v29 = vshll.u32 %v289_v3, 16  ;;  %273 = vst.msk [vmem:[#allocation2 + $0xa4] sm:$0x1] %vm233_vm3, %v5206_v6 }
  0x37   : > { %v960_v14 = vsel %vm5268_vm2, %v952_v4, %v959_v5  ;;  %276 = vst.msk [vmem:[#allocation2 + $0xb0] sm:$0x1] %vm233_vm3, %v5206_v6  ;;  %v1024_v5 = vrot.slane %v1022_v60, 7 }
  0x38   : > { %v349_v9 = vrot.slane %v347_v7, 7  ;;  %279 = vst.msk [vmem:[#allocation2 + $0xbc] sm:$0x1] %vm233_vm3, %v5206_v6  ;;  %v1025_v7 = vshll.u32 %v787_v54, 16 }
  0x39   : > { %282 = vst.msk [vmem:[#allocation2 + $0xc8] sm:$0x1] %vm233_vm3, %v5206_v6 }
  0x3a   : > { %v352_v40 = vor.u32 %v350_v29, %v349_v9  ;;  %285 = vst.msk [vmem:[#allocation2 + $0xd4] sm:$0x1] %vm233_vm3, %v5206_v6  ;;  %vm5596_vm3 = vmand %vm642_vm7, %vm643_vm11  ;;  %vm3942_vm11 = vcmask 392192  }
  0x3b   : > { %239 = vst.msk [vmem:[#allocation2 + $0x1c] sm:$0xf] %vm230_vm6, %v5206_v6 }
  0x3c   : > { %v353_v46 = vsel %vm5268_vm2, %v345_v39, %v352_v40  ;;  %231 = vst.msk [vmem:[#allocation2] sm:$0xf] %vm230_vm6, %v5206_v6 }
  0x3d   : > { %1096 = vrot.lane.b32.xlu1 %v892_v19, %s5205_s21  ;;  %1094 = vrot.lane.b32.xlu0 %v883_v16, %s5205_s21  ;;  %v354_v16 = vrot.slane %v349_v9, 4  ;;  %v980_v19 = vshrl.u32 %v782_v15, 16  ;;  %658 = vst.msk [vmem:[#allocation2 + $0x1c] sm:$0xf] %vm642_vm7, %v353_v46  ;;  %v330_v9 = vshrl.u32 %v5435_v2, 16 }
  0x3e   : > { %1098 = vrot.lane.b32.xlu2 %v893_v21, %s5205_s21  ;;  %v659_v21 = vld [vmem:[#allocation2 + $0x20] sm:$0x1]  ;;  %232 = vst.msk [vmem:[#allocation2 + $0x4] sm:$0xf] %vm230_vm6, %v5206_v6 }
  0x3f   : > { %v660_v26 = vsel %vm5358_vm5, %v354_v16, %v659_v21  ;;  %v982_v32 = vrot.slane %v980_v19, 7  ;;  %235 = vst.msk [vmem:[#allocation2 + $0xc] sm:$0xf] %vm230_vm6, %v5206_v6  ;;  %v5454_v15 = vld [vmem:[%s5331_s24] sm:$0xf]  ;;  %v1039_v16 = vshrl.u32 %v789_v12, 16 }
  0x40   : > { %661 = vst [vmem:[#allocation2 + $0x20] sm:$0x1] %v660_v26  ;;  %v322_v21 = vshrl.u32 %v5454_v15, 16  ;;  %v1029_v26 = vrot.slane %v1024_v5, 4  ;;  %v325_v37 = vshll.u32 %v5454_v15, 16 }
  0x41   : > { %v985_v47 = vor.u32 %v983_v41, %v982_v32  ;;  %236 = vst.msk [vmem:[#allocation2 + $0x10] sm:$0xf] %vm230_vm6, %v5206_v6  ;;  %v1041_v28 = vrot.slane %v1039_v16, 7 }
  0x42   : > { %238 = vst.msk [vmem:[#allocation2 + $0x18] sm:$0xf] %vm230_vm6, %v5206_v6 }
  0x43   : > { %241 = vst.msk [vmem:[#allocation2 + $0x24] sm:$0xf] %vm230_vm6, %v5206_v6  ;;  %v1325_v29 = vld [vmem:[#allocation2] sm:$0xf] }
  0x44   : > { %242 = vst.msk [vmem:[#allocation2 + $0x28] sm:$0xf] %vm230_vm6, %v5206_v6  ;;  %v1380_v51 = vshll.u32 %v1325_v29, 16 }
  0x45   : > { %1102 = vrot.lane.b32.xlu1 %v909_v34, %s5205_s21  ;;  %1100 = vrot.lane.b32.xlu0 %v900_v30, %s5205_s21  ;;  %v968_v30 = vor.u32 %v966_v18, %v965_v10  ;;  %v977_v34 = vsel %vm5268_vm2, %v969_v22, %v976_v23  ;;  %244 = vst.msk [vmem:[#allocation2 + $0x30] sm:$0xf] %vm230_vm6, %v5206_v6  ;;  %v1017_v10 = vshll.u32 %v786_v53, 16  ;;  %v5460_v18 = vrot.slane %v330_v9, 7  ;;  %v5490_v40 = vld [vmem:[#allocation2 + $0x4] sm:$0xf] }
  0x46   : > { %1104 = vrot.lane.b32.xlu2 %v910_v35, %s5205_s21  ;;  %v990_v35 = vrot.slane %v988_v24, 7  ;;  %245 = vst.msk [vmem:[#allocation2 + $0x34] sm:$0xf] %vm230_vm6, %v5206_v6  ;;  %v1042_v23 = vshll.u32 %v789_v12, 16  ;;  %v1386_v52 = vshll.u32 %v5490_v40, 16  ;;  %v1390_v54 = vshrl.u32 %v5490_v40, 16 }
  0x47   : > { %v1224_v57 = vld [vmem:[#allocation2 + $0x20] sm:$0x1]  ;;  %247 = vst.msk [vmem:[#allocation2 + $0x3c] sm:$0xf] %vm230_vm6, %v5206_v6  ;;  %v1760_v9 = vld [vmem:[#allocation2] sm:$0xe] }
  0x48   : > { %v995_v50 = vrot.slane %v990_v35, 4  ;;  %248 = vst.msk [vmem:[#allocation2 + $0x40] sm:$0xf] %vm230_vm6, %v5206_v6  ;;  %v1044_v39 = vor.u32 %v1042_v23, %v1041_v28  ;;  %v4704_v16 = vrot.slane %v1760_v9, 9 }
  0x49   : > { %250 = vst.msk [vmem:[#allocation2 + $0x48] sm:$0xf] %vm230_vm6, %v5206_v6 }
  0x4a   : > { %251 = vst.msk [vmem:[#allocation2 + $0x4c] sm:$0xf] %vm230_vm6, %v5206_v6 }
  0x4b   : > { %253 = vst.msk [vmem:[#allocation2 + $0x54] sm:$0xf] %vm230_vm6, %v5206_v6 }
  0x4c   : > { %254 = vst.msk [vmem:[#allocation2 + $0x58] sm:$0xf] %vm230_vm6, %v5206_v6 }
  0x4d   : > { %1108 = vrot.lane.b32.xlu1 %v926_v43, %s5205_s21  ;;  %1106 = vrot.lane.b32.xlu0 %v917_v44, %s5205_s21  ;;  %v986_v43 = vrot.slane %v982_v32, 4  ;;  %v993_v44 = vor.u32 %v991_v36, %v990_v35  ;;  %256 = vst.msk [vmem:[#allocation2 + $0x60] sm:$0xf] %vm230_vm6, %v5206_v6  ;;  %v5481_v35 = vrot.slane %v322_v21, 7  ;;  %v1377_v36 = vshrl.u32 %v1325_v29, 16 }
  0x4e   : > { %1110 = vrot.lane.b32.xlu2 %v927_v48, %s5205_s21  ;;  %v999_v48 = vrot.slane %v997_v42, 7  ;;  %257 = vst.msk [vmem:[#allocation2 + $0x64] sm:$0xf] %vm230_vm6, %v5206_v6  ;;  %v333_v42 = vshll.u32 %v5435_v2, 16  ;;  %v673_v2 = vld [vmem:[#allocation2 + $0x38] sm:$0x1] }
  0x4f   : > { %v994_v49 = vsel %vm5268_vm2, %v986_v43, %v993_v44  ;;  %259 = vst.msk [vmem:[#allocation2 + $0x6c] sm:$0xf] %vm230_vm6, %v5206_v6  ;;  %v5496_v43 = vld [vmem:[#allocation2 + $0x8] sm:$0x1]  ;;  %v652_v44 = vld [vmem:[#allocation2 + $0x14] sm:$0x1]  ;;  %v5555_v12 = vor.u32 %v325_v37, %v5481_v35 }
  0x50   : > { %v1002_v63 = vor.u32 %v1000_v55, %v999_v48  ;;  %260 = vst.msk [vmem:[#allocation2 + $0x70] sm:$0xf] %vm230_vm6, %v5206_v6  ;;  %v328_v46 = vrot.slane %v5481_v35, 4  ;;  %v1396_v55 = vshll.u32 %v5496_v43, 16  ;;  %v1832_v23 = vrot.slane %v5496_v43, 5 }
  0x51   : > { %262 = vst.msk [vmem:[#allocation2 + $0x78] sm:$0xf] %vm230_vm6, %v5206_v6  ;;  %v655_v43 = vld [vmem:[#allocation2 + $0x18] sm:$0xf] }
  0x52   : > { %263 = vst.msk [vmem:[#allocation2 + $0x7c] sm:$0xf] %vm230_vm6, %v5206_v6 }
  0x53   : > { %265 = vst.msk [vmem:[#allocation2 + $0x84] sm:$0xf] %vm230_vm6, %v5206_v6 }
  0x54   : > { %266 = vst.msk [vmem:[#allocation2 + $0x88] sm:$0xf] %vm230_vm6, %v5206_v6 }
  0x55   : > { %1114 = vrot.lane.b32.xlu1 %v943_v59, %s5205_s21  ;;  %1112 = vrot.lane.b32.xlu0 %v934_v56, %s5205_s21  ;;  %v1003_v56 = vrot.slane %v999_v48, 4  ;;  %v1014_v59 = vshrl.u32 %v786_v53, 16  ;;  %v5503_v48 = vld [vmem:[%s5331_s24 + $0x1c] sm:$0xf]  ;;  %268 = vst.msk [vmem:[#allocation2 + $0x90] sm:$0xf] %vm230_vm6, %v5206_v6 }
  0x56   : > { %1116 = vrot.lane.b32.xlu2 %v944_v61, %s5205_s21  ;;  %v381_v60 = vshrl.u32 %v5503_v48, 16  ;;  %269 = vst.msk [vmem:[#allocation2 + $0x94] sm:$0xf] %vm230_vm6, %v5206_v6 }
  0x57   : > { %v1011_v3 = vsel %vm5268_vm2, %v1003_v56, %v1010_v58  ;;  %v1016_v4 = vrot.slane %v1014_v59, 7  ;;  %v1382_v56 = vrot.slane %v1380_v51, 5  ;;  %271 = vst.msk [vmem:[#allocation2 + $0x9c] sm:$0xf] %vm230_vm6, %v5206_v6 }
  0x58   : > { %272 = vst.msk [vmem:[#allocation2 + $0xa0] sm:$0xf] %vm230_vm6, %v5206_v6 }
  0x59   : > { %v1019_v19 = vor.u32 %v1017_v10, %v1016_v4  ;;  %v1829_v10 = vrot.slane %v5490_v40, 5  ;;  %274 = vst.msk [vmem:[#allocation2 + $0xa8] sm:$0xf] %vm230_vm6, %v5206_v6  ;;  %v666_v40 = vld [vmem:[#allocation2 + $0x2c] sm:$0x1] }
  0x5a   : > { %275 = vst.msk [vmem:[#allocation2 + $0xac] sm:$0xf] %vm230_vm6, %v5206_v6 }
  0x5b   : > { %v1830_v29 = vsel %vm5560_vm1, %v4704_v16, %v1829_v10  ;;  %277 = vst.msk [vmem:[#allocation2 + $0xb4] sm:$0xf] %vm230_vm6, %v5206_v6 }
  0x5c   : > { %v3300_v37 = vunpack.c.l.b16 %v1830_v29  ;;  %278 = vst.msk [vmem:[#allocation2 + $0xb8] sm:$0xf] %vm230_vm6, %v5206_v6 }
  0x5d   : > { %1120 = vrot.lane.b32.xlu1 %v960_v14, %s5205_s21  ;;  %1118 = vrot.lane.b32.xlu0 %v951_v8, %s5205_s21  ;;  %v788_v8 = vld [vmem:[%s5256_s20 + $0x70] sm:$0xf]  ;;  %v1027_v14 = vor.u32 %v1025_v7, %v1024_v5  ;;  %280 = vst.msk [vmem:[#allocation2 + $0xc0] sm:$0xf] %vm230_vm6, %v5206_v6 }
  0x5e   : > { %1122 = vrot.lane.b32.xlu2 %v961_v13, %s5205_s21  ;;  %v1031_v11 = vshrl.u32 %v788_v8, 16  ;;  %v1020_v13 = vrot.slane %v1016_v4, 4  ;;  %v1034_v32 = vshll.u32 %v788_v8, 16  ;;  %281 = vst.msk [vmem:[#allocation2 + $0xc4] sm:$0xf] %vm230_vm6, %v5206_v6 }
  0x5f   : > { %283 = vst.msk [vmem:[#allocation2 + $0xcc] sm:$0xf] %vm230_vm6, %v5206_v6 }
  0x60   : > { %v1033_v22 = vrot.slane %v1031_v11, 7  ;;  %v1028_v24 = vsel %vm5268_vm2, %v1020_v13, %v1027_v14  ;;  %284 = vst.msk [vmem:[#allocation2 + $0xd0] sm:$0xf] %vm230_vm6, %v5206_v6  ;;  %vm3860_vm6 = vcmask 130048  }
  0x62   : > { %v1037_v38 = vrot.slane %v1033_v22, 4  ;;  %v1036_v45 = vor.u32 %v1034_v32, %v1033_v22  ;;  %v1831_v22 = vrot.slane %v1829_v10, 4  ;;  %v5645_v10 = vld [vmem:[%s5331_s24 + $0x20] sm:$0xf] }
  0x63   : > { %v390_v35 = vshrl.u32 %v5645_v10, 16 }
  0x64   : > { %v1045_v53 = vsel %vm5268_vm2, %v1037_v38, %v1044_v39  ;;  %v5590_v38 = vld [vmem:[%s5331_s24 + $0x18] sm:$0xf] }
  0x65   : > { %1126 = vrot.lane.b32.xlu1 %v977_v34, %s5205_s21  ;;  %1124 = vrot.lane.b32.xlu0 %v968_v30, %s5205_s21  ;;  %v342_v30 = vshll.u32 %v5370_v27, 16  ;;  %v5475_v34 = vld [vmem:[%s5331_s24 + $0x14] sm:$0xf]  ;;  %v5484_v27 = vld [vmem:[%s5256_s20 + $0x78] sm:$0xf] }
  0x66   : > { %1128 = vrot.lane.b32.xlu2 %v978_v31, %s5205_s21  ;;  %v337_v31 = vrot.slane %v5460_v18, 4  ;;  %v364_v41 = vshrl.u32 %v5475_v34, 16  ;;  %v1051_v59 = vshll.u32 %v5484_v27, 16  ;;  %v367_v51 = vshll.u32 %v5475_v34, 16 }
  0x67   : > { %v5534_v4 = vor.u32 %v342_v30, %v5377_v33  ;;  %v5581_v30 = vld [vmem:[%s5331_s24 + $0x24] sm:$0xf] }
  0x68   : > { %v5557_v13 = vrot.slane %v364_v41, 7 }
  0x69   : > { %v656_v6 = vsel %vm5596_vm3, %v5534_v4, %v655_v43 }
  0x6a   : > { %v371_v41 = vrot.slane %v5557_v13, 4  ;;  %657 = vst [vmem:[#allocation2 + $0x18] sm:$0xf] %v656_v6 }
  0x6d   : > { %1130 = vrot.lane.b32.xlu0 %v985_v47, %s5205_s21  ;;  %1132 = vrot.lane.b32.xlu1 %v994_v49, %s5205_s21  ;;  %v1048_v47 = vshrl.u32 %v5484_v27, 16  ;;  %v1046_v49 = vrot.slane %v1041_v28, 4 }
  0x6e   : > { %1134 = vrot.lane.b32.xlu2 %v995_v50, %s5205_s21  ;;  %v1379_v50 = vrot.slane %v1377_v36, 4  ;;  %v1833_v36 = vsel %vm5560_vm1, %v1831_v22, %v1832_v23 }
  0x6f   : > { %v5518_v58 = vrot.slane %v1048_v47, 7  ;;  %v3301_v47 = vunpack.c.l.b16 %v1833_v36 }
  0x70   : > { %v1075_v62 = vpop.permute.xlu2 %1074 }
  0x71   : > { %v1225_v0 = vsel %vm5424_vm9, %v1075_v62, %v1224_v57  ;;  %v1388_v57 = vrot.slane %v1386_v52, 5  ;;  %v1392_v62 = vrot.slane %v1390_v54, 4  ;;  %v398_v52 = vshrl.u32 %v5581_v30, 16 }
  0x72   : > { %1226 = vst [vmem:[#allocation2 + $0x20] sm:$0x1] %v1225_v0  ;;  %v1383_v0 = vor.u32 %v1382_v56, %v1379_v50  ;;  %v373_v54 = vshrl.u32 %v5590_v38, 16 }
  0x73   : > { %v1393_v8 = vor.u32 %v1392_v62, %v1388_v57  ;;  %v5642_v9 = vrot.slane %v398_v52, 7  ;;  %v5701_v52 = vld [vmem:[#allocation2 + $0x30] sm:$0xf] }
  0x74   : > { %v1384_v14 = vrot.slane %v1383_v0, 4  ;;  %v5633_v0 = vld [vmem:[%s5331_s24 + $0x2c] sm:$0xf] }
  0x75   : > { %1136 = vrot.lane.b32.xlu0 %v1002_v63, %s5205_s21  ;;  %1138 = vrot.lane.b32.xlu1 %v1011_v3, %s5205_s21  ;;  %v5526_v63 = vsel %vm5358_vm5, %v337_v31, %v652_v44  ;;  %v5531_v3 = vld [vmem:[%s5331_s24 + $0x10] sm:$0xf]  ;;  %v1394_v21 = vrot.slane %v1393_v8, 4  ;;  %v645_v31 = vld [vmem:[#allocation2 + $0xc] sm:$0xf]  ;;  %v335_v44 = vor.u32 %v333_v42, %v5460_v18  ;;  %v369_v8 = vor.u32 %v367_v51, %v5557_v13 }
  0x76   : > { %1140 = vrot.lane.b32.xlu2 %v1012_v1, %s5205_s21  ;;  %v1398_v1 = vrot.slane %v1396_v55, 5  ;;  %v356_v28 = vshrl.u32 %v5531_v3, 16  ;;  %v359_v50 = vshll.u32 %v5531_v3, 16  ;;  %v646_v34 = vsel %vm5596_vm3, %v5555_v12, %v645_v31  ;;  %654 = vst [vmem:[#allocation2 + $0x14] sm:$0x1] %v5526_v63 }
  0x77   : > { %647 = vst [vmem:[#allocation2 + $0xc] sm:$0xf] %v646_v34  ;;  %v336_v12 = vsel %vm5268_vm2, %v328_v46, %v335_v44  ;;  %v415_v4 = vshrl.u32 %v5633_v0, 16  ;;  %v5657_v13 = vld [vmem:[#allocation2 + $0x24] sm:$0xf]  ;;  %v376_v46 = vshll.u32 %v5590_v38, 16 }
  0x78   : > { %v1073_v17 = vpop.permute.xlu2 %1072  ;;  %v1399_v32 = vsel %vm5543_vm15, %v1394_v21, %v1398_v1  ;;  %v358_v42 = vrot.slane %v356_v28, 7  ;;  %v384_v21 = vshll.u32 %v5503_v48, 16  ;;  %649 = vst.msk [vmem:[#allocation2 + $0x10] sm:$0xf] %vm642_vm7, %v336_v12  ;;  %v680_v28 = vld [vmem:[#allocation2 + $0x44] sm:$0x1] }
  0x79   : > { %1223 = vst.msk [vmem:[#allocation2 + $0x1c] sm:$0xf] %vm1208_vm10, %v1073_v17  ;;  %v5057_v17 = vld [vmem:[%s7193_s2 + $0x40] sm:$0xff]  ;;  %v405_v48 = vrot.slane %v5642_v9, 4  ;;  %v5686_v38 = vrot.slane %v390_v35, 7  ;;  %v401_v34 = vshll.u32 %v5581_v30, 16 }
  0x7a   : > { %4339 = vmatpush.bf16.msra.mxu1 %v5057_v17  ;;  %5161 = vmatpush.bf16.msra.mxu3 %v5057_v17  ;;  %v5621_v56 = vld [vmem:[#allocation2 + $0x20] sm:$0x1]  ;;  %v362_v3 = vrot.slane %v358_v42, 4  ;;  %v5655_v16 = vor.u32 %v359_v50, %v358_v42  ;;  %v375_v17 = vrot.slane %v373_v54, 7  ;;  %v676_v35 = vld [vmem:[#allocation2 + $0x3c] sm:$0xf] }
  0x7b   : > { %v3049_v23 = vrot.slane %v5621_v56, 5  ;;  %v2616_v43 = vshll.u32 %v5621_v56, 16  ;;  %v5691_v44 = vld [vmem:[#allocation2 + $0x20] sm:$0x1] }
  0x7c   : > { %v379_v29 = vrot.slane %v375_v17, 4  ;;  %v663_v50 = vsel %vm5596_vm3, %v5655_v16, %v5657_v13  ;;  %v378_v54 = vor.u32 %v376_v46, %v375_v17 }
  0x7d   : > { %1142 = vrot.lane.b32.xlu0 %v1019_v19, %s5205_s21  ;;  %1144 = vrot.lane.b32.xlu1 %v1028_v24, %s5205_s21  ;;  %v5569_v19 = vrot.slane %v381_v60, 7  ;;  %v1053_v24 = vor.u32 %v1051_v59, %v5518_v58  ;;  %v5724_v12 = vrot.slane %v2616_v43, 5  ;;  %664 = vst [vmem:[#allocation2 + $0x24] sm:$0xf] %v663_v50 }
  0x7e   : > { %1146 = vrot.lane.b32.xlu2 %v1029_v26, %s5205_s21  ;;  %v1389_v26 = vsel %vm5543_vm15, %v1384_v14, %v1388_v57  ;;  %v667_v57 = vsel %vm5358_vm5, %v371_v41, %v666_v40  ;;  %v393_v40 = vshll.u32 %v5645_v10, 16  ;;  %v670_v17 = vsel %vm5596_vm3, %v378_v54, %v5701_v52 }
  0x7f   : > { %v3220_v27 = vunpack.c.l.b16 %v1389_v26  ;;  %668 = vst [vmem:[#allocation2 + $0x2c] sm:$0x1] %v667_v57  ;;  %v370_v26 = vsel %vm5268_vm2, %v362_v3, %v369_v8  ;;  %v386_v51 = vor.u32 %v384_v21, %v5569_v19  ;;  %v1220_v3 = vld [vmem:[#allocation2 + $0x18] sm:$0xf] }
  0x80   : > { %v5538_v5 = vpop.permute.xlu2 %1080  ;;  %v5619_v55 = vld [vmem:[#allocation2 + $0x1c] sm:$0xf]  ;;  %665 = vst.msk [vmem:[#allocation2 + $0x28] sm:$0xf] %vm642_vm7, %v370_v26 }
  0x81   : > { %v3046_v62 = vrot.slane %v5619_v55, 5  ;;  %v2606_v14 = vshll.u32 %v5619_v55, 16  ;;  %v5670_v31 = vld [vmem:[#allocation2 + $0x1c] sm:$0xf]  ;;  %v387_v13 = vsel %vm5268_vm2, %v379_v29, %v386_v51  ;;  %v403_v29 = vor.u32 %v401_v34, %v5642_v9  ;;  %671 = vst [vmem:[#allocation2 + $0x30] sm:$0xf] %v670_v17 }
  0x82   : > { %672 = vst.msk [vmem:[#allocation2 + $0x34] sm:$0xf] %vm642_vm7, %v387_v13 }
  0x83   : > { %v3048_v22 = vrot.slane %v3046_v62, 4  ;;  %v5678_v36 = vrot.slane %v2606_v14, 5 }
  0x85   : > { %1148 = vrot.lane.b32.xlu0 %v1036_v45, %s5205_s21  ;;  %1150 = vrot.lane.b32.xlu1 %v1045_v53, %s5205_s21  ;;  %v3221_v45 = vunpack.c.l.b16 %v1399_v32  ;;  %v3332_v53 = vpack.c.b16 %v3301_v47, %v3300_v37  ;;  %v5673_v32 = vrot.slane %v415_v4, 7  ;;  %v687_v4 = vld [vmem:[#allocation2 + $0x50] sm:$0x1]  ;;  %v5741_v21 = vsel %vm5560_vm1, %v3048_v22, %v3049_v23 }
  0x86   : > { %1152 = vrot.lane.b32.xlu2 %v1046_v49, %s5205_s21  ;;  %v388_v49 = vrot.slane %v5569_v19, 4  ;;  %v1231_v57 = vld [vmem:[#allocation2 + $0x2c] sm:$0x1] }
  0x87   : > { %v5550_v33 = vpop.permute.xlu1 %1068  ;;  %v5552_v11 = vpop.permute.xlu0 %1064  ;;  %v3252_v18 = vpack.c.b16 %v3221_v45, %v3220_v27  ;;  %v5676_v27 = vld [vmem:[%s5331_s24 + $0x34] sm:$0xf]  ;;  %v422_v6 = vrot.slane %v5673_v32, 4  ;;  %v1232_v30 = vsel %vm5424_vm9, %v5538_v5, %v1231_v57  ;;  %v2031_v5 = vshll.u32 %v5691_v44, 16 }
  0x88   : > { %v5639_v1 = vpop.permute.xlu2 %1086  ;;  %v674_v63 = vsel %vm5358_vm5, %v388_v49, %v673_v2  ;;  %v432_v41 = vshrl.u32 %v5676_v27, 16  ;;  %v1217_v45 = vld [vmem:[#allocation2 + $0x14] sm:$0x1]  ;;  %1233 = vst [vmem:[#allocation2 + $0x2c] sm:$0x1] %v1232_v30 }
  0x89   : > { %675 = vst [vmem:[#allocation2 + $0x38] sm:$0x1] %v674_v63  ;;  %v1218_v42 = vsel %vm5424_vm9, %v5550_v33, %v1217_v45  ;;  %v396_v33 = vrot.slane %v5686_v38, 4  ;;  %v688_v52 = vsel %vm5358_vm5, %v422_v6, %v687_v4 }
  0x8a   : > { %v5709_v56 = vrot.slane %v432_v41, 7  ;;  %1219 = vst [vmem:[#allocation2 + $0x14] sm:$0x1] %v1218_v42  ;;  %v694_v41 = vld [vmem:[#allocation2 + $0x5c] sm:$0x1] }
  0x8b   : > { %689 = vst [vmem:[#allocation2 + $0x50] sm:$0x1] %v688_v52 }
  0x8c   : > { %v439_v14 = vrot.slane %v5709_v56, 4 }
  0x8d   : > { %1154 = vrot.lane.b32.xlu0 %v1053_v24, %s5205_s21  ;;  %3268 = vrot.lane.b32.xlu1 %v3252_v18, %s5207_s27  ;;  %v2610_v24 = vshrl.u32 %v5619_v55, 16  ;;  %v2021_v18 = vshll.u32 %v5670_v31, 16 }
  0x8e   : > { %3348 = vrot.lane.b32.xlu2 %v3332_v53, %s5208_s28  ;;  %v1210_v53 = vld [vmem:[#allocation2 + $0xc] sm:$0xf] }
  0x8f   : > { %v5627_v59 = vpop.permute.xlu1 %1070  ;;  %v1067_v60 = vpop.permute.xlu0 %1066  ;;  %v2612_v2 = vrot.slane %v2610_v24, 4  ;;  %v1211_v19 = vsel %vm5682_vm4, %v5552_v11, %v1210_v53  ;;  %v2025_v11 = vshrl.u32 %v5670_v31, 16  ;;  %v5731_v16 = vrot.slane %v2021_v18, 5 }
  0x90   : > { %1214 = vst.msk [vmem:[#allocation2 + $0x10] sm:$0xf] %vm1208_vm10, %v1067_v60  ;;  %v681_v60 = vsel %vm5358_vm5, %v405_v48, %v680_v28  ;;  %v5721_v8 = vpop.permute.xlu2 %1092  ;;  %v1221_v63 = vsel %vm5682_vm4, %v5627_v59, %v1220_v3  ;;  %v1238_v24 = vld [vmem:[#allocation2 + $0x38] sm:$0x1]  ;;  %v395_v48 = vor.u32 %v393_v40, %v5686_v38  ;;  %v3813_v53 = vunpack.c.l.b16 %v5741_v21 }
  0x91   : > { %1212 = vst [vmem:[#allocation2 + $0xc] sm:$0xf] %v1211_v19  ;;  %v2613_v10 = vor.u32 %v2612_v2, %v5678_v36  ;;  %v1239_v43 = vsel %vm5424_vm9, %v5639_v1, %v1238_v24  ;;  %v5752_v45 = vrot.slane %v2025_v11, 4  ;;  %v1971_v1 = vld [vmem:[#allocation2 + $0x14] sm:$0x1]  ;;  %v404_v19 = vsel %vm5268_vm2, %v396_v33, %v403_v29 }
  0x92   : > { %1222 = vst [vmem:[#allocation2 + $0x18] sm:$0xf] %v1221_v63  ;;  %v2440_v34 = vrot.slane %v1971_v1, 5  ;;  %v677_v57 = vsel %vm5596_vm3, %v395_v48, %v676_v35  ;;  %v2007_v3 = vshll.u32 %v1971_v1, 16 }
  0x93   : > { %682 = vst [vmem:[#allocation2 + $0x44] sm:$0x1] %v681_v60  ;;  %v5750_v23 = vrot.slane %v2613_v10, 4  ;;  %v695_v10 = vsel %vm5358_vm5, %v439_v14, %v694_v41  ;;  %v2028_v17 = vor.u32 %v5752_v45, %v5731_v16  ;;  %v1227_v14 = vld [vmem:[#allocation2 + $0x24] sm:$0xf] }
  0x94   : > { %1240 = vst [vmem:[#allocation2 + $0x38] sm:$0x1] %v1239_v43 }
  0x95   : > { %v2619_v13 = vsel %vm5543_vm15, %v5750_v23, %v5724_v12  ;;  %679 = vst.msk [vmem:[#allocation2 + $0x40] sm:$0xf] %vm642_vm7, %v404_v19  ;;  %v5802_v19 = vld [vmem:[%s5331_s24 + $0x28] sm:$0xf] }
  0x96   : > { %678 = vst [vmem:[#allocation2 + $0x3c] sm:$0xf] %v677_v57  ;;  %v5799_v55 = vunpack.c.l.b16 %v2619_v13 }
  0x97   : > { %v1079_v47 = vpop.permute.xlu1 %1078  ;;  %v5694_v49 = vpop.permute.xlu0 %1076  ;;  %v1940_v59 = vld [vmem:[#allocation2 + $0x10] sm:$0xf]  ;;  %696 = vst [vmem:[#allocation2 + $0x5c] sm:$0x1] %v695_v10 }
  0x98   : > { %1230 = vst.msk [vmem:[#allocation2 + $0x28] sm:$0xf] %vm1208_vm10, %v1079_v47  ;;  %v5743_v46 = vld [vmem:[#allocation2 + $0x10] sm:$0xf]  ;;  %v2437_v26 = vrot.slane %v1940_v59, 5  ;;  %v1997_v28 = vshll.u32 %v1940_v59, 16  ;;  %v1099_v24 = vpop.permute.xlu2 %1098  ;;  %v1228_v48 = vsel %vm5682_vm4, %v5694_v49, %v1227_v14 }
  0x99   : > { %v2001_v22 = vshrl.u32 %v1940_v59, 16  ;;  %v1410_v38 = vshll.u32 %v5743_v46, 16  ;;  %v1414_v9 = vshrl.u32 %v5743_v46, 16  ;;  %v1836_v18 = vrot.slane %v5743_v46, 5  ;;  %v5017_v42 = vld [vmem:[#allocation2 + $0xc] sm:$0xff]  ;;  %v5018_v11 = vld [vmem:[#allocation2 + $0x18] sm:$0xff] }
  0x9a   : > { %v2439_v50 = vrot.slane %v2437_v26, 4  ;;  %v5754_v51 = vrot.slane %v1997_v28, 5  ;;  %v2371_v54 = vld [vmem:[#allocation2 + $0xc] sm:$0xe]  ;;  %3444 = vrot.lane.b32.xlu0 %v5017_v42, %s5209_s29  ;;  %v2980_v63 = vld [vmem:[#allocation2 + $0x18] sm:$0xe]  ;;  %3446 = vrot.lane.b32.xlu1 %v5018_v11, %s5209_s29 }
  0x9b   : > { %v2003_v2 = vrot.slane %v2001_v22, 4  ;;  %v4720_v60 = vrot.slane %v2371_v54, 9  ;;  %v1939_v30 = vld [vmem:[#allocation2 + $0xc] sm:$0xf]  ;;  %v5776_v4 = vrot.slane %v1410_v38, 5  ;;  %v4736_v21 = vrot.slane %v2980_v63, 9 }
  0x9c   : > { %v2441_v33 = vsel %vm5560_vm1, %v2439_v50, %v2440_v34  ;;  %v1988_v28 = vshrl.u32 %v1939_v30, 16  ;;  %v1245_v29 = vld [vmem:[#allocation2 + $0x44] sm:$0x1]  ;;  %v1991_v41 = vshll.u32 %v1939_v30, 16  ;;  %1229 = vst [vmem:[#allocation2 + $0x24] sm:$0xf] %v1228_v48 }
  0x9d   : > { %v2004_v6 = vor.u32 %v2003_v2, %v5754_v51  ;;  %v2438_v59 = vsel %vm5560_vm1, %v4720_v60, %v2437_v26  ;;  %v3557_v35 = vunpack.c.l.b16 %v2441_v33  ;;  %v1246_v26 = vsel %vm5424_vm9, %v5721_v8, %v1245_v29  ;;  %v1358_v2 = vld [vmem:[#allocation2 + $0x14] sm:$0x1]  ;;  %v5033_v60 = vld [vmem:[#allocation2 + $0x18] sm:$0xff]  ;;  %v1761_v11 = vld [vmem:[#allocation2 + $0xc] sm:$0xe] }
  0x9e   : > { %v3556_v12 = vunpack.c.l.b16 %v2438_v59  ;;  %v3047_v22 = vsel %vm5560_vm1, %v4736_v21, %v3046_v62  ;;  %v1990_v23 = vrot.slane %v1988_v28, 4  ;;  %v2009_v49 = vrot.slane %v2007_v3, 5  ;;  %1247 = vst [vmem:[#allocation2 + $0x44] sm:$0x1] %v1246_v26  ;;  %v1234_v62 = vld [vmem:[#allocation2 + $0x30] sm:$0xf] }
  0x9f   : > { %v1085_v47 = vpop.permute.xlu1 %1084  ;;  %v5759_v40 = vpop.permute.xlu0 %1082  ;;  %v2005_v43 = vrot.slane %v2004_v6, 4  ;;  %v3812_v50 = vunpack.c.l.b16 %v3047_v22  ;;  %v1993_v1 = vrot.slane %v1991_v41, 5  ;;  %v1416_v8 = vrot.slane %v1414_v9, 4  ;;  %v1252_v63 = vld [vmem:[#allocation2 + $0x50] sm:$0x1] }
  0xa0   : > { %1237 = vst.msk [vmem:[#allocation2 + $0x34] sm:$0xf] %vm1208_vm10, %v1085_v47  ;;  %v1327_v47 = vld [vmem:[#allocation2 + $0xc] sm:$0xf]  ;;  %v3588_v38 = vpack.c.b16 %v3557_v35, %v3556_v12  ;;  %v1420_v34 = vshll.u32 %v1358_v2, 16  ;;  %v1235_v9 = vsel %vm5682_vm4, %v5759_v40, %v1234_v62  ;;  %v1253_v21 = vsel %vm5424_vm9, %v1099_v24, %v1252_v63 }
  0xa1   : > { %v1401_v42 = vshrl.u32 %v1327_v47, 16  ;;  %v1404_v54 = vshll.u32 %v1327_v47, 16  ;;  %v3844_v57 = vpack.c.b16 %v3813_v53, %v3812_v50  ;;  %v1994_v30 = vor.u32 %v1993_v1, %v1990_v23  ;;  %1236 = vst [vmem:[#allocation2 + $0x30] sm:$0xf] %v1235_v9  ;;  %v1241_v48 = vld [vmem:[#allocation2 + $0x3c] sm:$0xf]  ;;  %v1105_v50 = vpop.permute.xlu2 %1104 }
  0xa2   : > { %3604 = vrot.lane.b32.xlu2 %v3588_v38, %s5210_s30  ;;  %v2010_v6 = vsel %vm5543_vm15, %v2005_v43, %v2009_v49  ;;  %v1417_v14 = vor.u32 %v1416_v8, %v5776_v4  ;;  %v1422_v53 = vrot.slane %v1420_v34, 5  ;;  %3700 = vrot.lane.b32.xlu0 %v5033_v60, %s5211_s5  ;;  %v4705_v35 = vrot.slane %v1761_v11, 9  ;;  %1254 = vst [vmem:[#allocation2 + $0x50] sm:$0x1] %v1253_v21  ;;  %v2548_v26 = vld [vmem:[#allocation2 + $0x18] sm:$0xf] }
  0xa3   : > { %v1403_v3 = vrot.slane %v1401_v42, 4  ;;  %v1406_v13 = vrot.slane %v1404_v54, 5  ;;  %4980 = vmatmul.msk.bf16.vlgmr.msra.gmra.mxu1 %vm3860_vm6, %v3844_v57  ;;  %v1995_v59 = vrot.slane %v1994_v30, 4  ;;  %v1838_v40 = vrot.slane %v1836_v18, 4  ;;  %v5831_v42 = vld [vmem:[#allocation2 + $0x28] sm:$0xf] }
  0xa4   : > { %v3477_v28 = vunpack.c.l.b16 %v2010_v6  ;;  %v1418_v12 = vrot.slane %v1417_v14, 4  ;;  %v1839_v10 = vrot.slane %v1358_v2, 5  ;;  %v1837_v24 = vsel %vm5560_vm1, %v4705_v35, %v1836_v18  ;;  %v5836_v62 = vld [vmem:[#allocation2 + $0x2c] sm:$0x1]  ;;  %v2981_v57 = vld [vmem:[#allocation2 + $0x24] sm:$0xe] }
  0xa5   : > { %v1407_v29 = vor.u32 %v1406_v13, %v1403_v3  ;;  %v2000_v41 = vsel %vm5543_vm15, %v1995_v59, %v5754_v51  ;;  %v407_v22 = vshrl.u32 %v5802_v19, 16  ;;  %v3302_v1 = vunpack.c.l.b16 %v1837_v24  ;;  %v1259_v6 = vld [vmem:[#allocation2 + $0x5c] sm:$0x1]  ;;  %v1941_v9 = vld [vmem:[#allocation2 + $0x18] sm:$0xf] }
  0xa6   : > { %v3476_v23 = vunpack.c.l.b16 %v2000_v41  ;;  %v1423_v47 = vsel %vm5543_vm15, %v1418_v12, %v1422_v53  ;;  %v1840_v51 = vsel %vm5560_vm1, %v1838_v40, %v1839_v10  ;;  %v2597_v46 = vshrl.u32 %v2548_v26, 16  ;;  %v683_v14 = vld [vmem:[#allocation2 + $0x48] sm:$0xf] }
  0xa7   : > { %v1091_v52 = vpop.permute.xlu1 %1090  ;;  %v1089_v33 = vpop.permute.xlu0 %1088  ;;  %v1408_v49 = vrot.slane %v1407_v29, 4  ;;  %v3223_v38 = vunpack.c.l.b16 %v1423_v47  ;;  %v2600_v8 = vshll.u32 %v2548_v26, 16  ;;  %v409_v34 = vrot.slane %v407_v22, 7 }
  0xa8   : > { %1244 = vst.msk [vmem:[#allocation2 + $0x40] sm:$0xf] %vm1208_vm10, %v1091_v52  ;;  %v1242_v43 = vsel %vm5682_vm4, %v1089_v33, %v1241_v48  ;;  %v3303_v52 = vunpack.c.l.b16 %v1840_v51  ;;  %v3508_v18 = vpack.c.b16 %v3477_v28, %v3476_v23  ;;  %v2599_v3 = vrot.slane %v2597_v46, 4 }
  0xa9   : > { %1243 = vst [vmem:[#allocation2 + $0x3c] sm:$0xf] %v1242_v43  ;;  %v1413_v54 = vsel %vm5543_vm15, %v1408_v49, %v5776_v4  ;;  %v410_v11 = vshll.u32 %v5802_v19, 16  ;;  %v1260_v63 = vsel %vm5424_vm9, %v1105_v50, %v1259_v6  ;;  %v2602_v33 = vrot.slane %v2600_v8, 5  ;;  %v2372_v43 = vld [vmem:[#allocation2 + $0x18] sm:$0xe] }
  0xaa   : > { %v3222_v60 = vunpack.c.l.b16 %v1413_v54  ;;  %v3333_v30 = vpack.c.b16 %v3303_v52, %v3302_v1  ;;  %3524 = vrot.lane.b32.xlu1 %v3508_v18, %s5212_s6  ;;  %v413_v4 = vrot.slane %v409_v34, 4  ;;  %v418_v13 = vshll.u32 %v5633_v0, 16  ;;  %1261 = vst [vmem:[#allocation2 + $0x5c] sm:$0x1] %v1260_v63  ;;  %v5869_v18 = vpop.permute.xlu2 %1110  ;;  %v5872_v54 = vld [vmem:[%s5331_s24 + $0x3c] sm:$0xf] }
  0xab   : > { %v412_v21 = vor.u32 %v410_v11, %v409_v34  ;;  %v4737_v59 = vrot.slane %v2981_v57, 9  ;;  %v3053_v19 = vrot.slane %v5831_v42, 5  ;;  %v2603_v35 = vor.u32 %v2602_v33, %v2599_v3  ;;  %v298_v34 = vld [vmem:[%s5331_s24 + $0x30] sm:$0xf] }
  0xac   : > { %v3253_v53 = vpack.c.b16 %v3223_v38, %v3222_v60  ;;  %3350 = vrot.lane.b32.xlu0 %v3333_v30, %s5208_s28  ;;  %v420_v40 = vor.u32 %v418_v13, %v5673_v32  ;;  %v3056_v28 = vrot.slane %v5836_v62, 5  ;;  %v2012_v48 = vshrl.u32 %v1941_v9, 16  ;;  %v2550_v30 = vld [vmem:[#allocation2 + $0x24] sm:$0xf] }
  0xad   : > { %v684_v0 = vsel %vm5596_vm3, %v412_v21, %v683_v14  ;;  %v3054_v12 = vsel %vm5560_vm1, %v4737_v59, %v3053_v19  ;;  %v3055_v10 = vrot.slane %v3053_v19, 4  ;;  %v2015_v41 = vshll.u32 %v1941_v9, 16  ;;  %v701_v14 = vld [vmem:[#allocation2 + $0x68] sm:$0x1] }
  0xae   : > { %3270 = vrot.lane.b32.xlu2 %v3253_v53, %s5207_s27  ;;  %v2604_v24 = vrot.slane %v2603_v35, 4  ;;  %v421_v26 = vsel %vm5268_vm2, %v413_v4, %v420_v40  ;;  %685 = vst [vmem:[#allocation2 + $0x48] sm:$0xf] %v684_v0  ;;  %v3814_v32 = vunpack.c.l.b16 %v3054_v12  ;;  %v2014_v22 = vrot.slane %v2012_v48, 4  ;;  %v690_v40 = vld [vmem:[#allocation2 + $0x54] sm:$0xf] }
  0xaf   : > { %v1097_v2 = vpop.permute.xlu1 %1096  ;;  %v1095_v29 = vpop.permute.xlu0 %1094  ;;  %686 = vst.msk [vmem:[#allocation2 + $0x4c] sm:$0xf] %vm642_vm7, %v421_v26  ;;  %v3057_v23 = vsel %vm5560_vm1, %v3055_v10, %v3056_v28  ;;  %v2017_v49 = vrot.slane %v2015_v41, 5  ;;  %v2029_v47 = vrot.slane %v2028_v17, 4  ;;  %v2033_v51 = vrot.slane %v2031_v5, 5 }
  0xb0   : > { %v2609_v38 = vsel %vm5543_vm15, %v2604_v24, %v5678_v36  ;;  %1251 = vst.msk [vmem:[#allocation2 + $0x4c] sm:$0xf] %vm1208_vm10, %v1097_v2  ;;  %v3815_v1 = vunpack.c.l.b16 %v3057_v23  ;;  %v4721_v52 = vrot.slane %v2372_v43, 9  ;;  %v2444_v46 = vrot.slane %v5670_v31, 5  ;;  %v5894_v28 = vld [vmem:[%s5331_s24 + $0x44] sm:$0xf] }
  0xb1   : > { %v3732_v45 = vunpack.c.l.b16 %v2609_v38  ;;  %v2018_v17 = vor.u32 %v2017_v49, %v2014_v22  ;;  %v2034_v5 = vsel %vm5543_vm15, %v2029_v47, %v2033_v51  ;;  %v2447_v8 = vrot.slane %v5691_v44, 5  ;;  %v5909_v51 = vld [vmem:[#allocation2 + $0x38] sm:$0x1]  ;;  %v2982_v38 = vld [vmem:[#allocation2 + $0x30] sm:$0xe] }
  0xb2   : > { %v3845_v57 = vpack.c.b16 %v3815_v1, %v3814_v32  ;;  %v3479_v36 = vunpack.c.l.b16 %v2034_v5  ;;  %v2445_v2 = vsel %vm5560_vm1, %v4721_v52, %v2444_v46  ;;  %v2446_v60 = vrot.slane %v2444_v46, 4  ;;  %v300_v32 = vld [vmem:[%s5331_s24 + $0x38] sm:$0xf] }
  0xb3   : > { %v3764_v31 = vpack.c.b16 %v5799_v55, %v3732_v45  ;;  %v2019_v6 = vrot.slane %v2018_v17, 4  ;;  %v3558_v3 = vunpack.c.l.b16 %v2445_v2  ;;  %v449_v11 = vshrl.u32 %v5872_v54, 16  ;;  %v5916_v45 = vpop.permute.xlu2 %1116 }
  0xb4   : > { %4981 = vmatmul.msk.bf16.gmra.mxu1 %vm3860_vm6, %v3845_v57  ;;  %v2448_v9 = vsel %vm5560_vm1, %v2446_v60, %v2447_v8  ;;  %v424_v44 = vshrl.u32 %v298_v34, 16  ;;  %v427_v63 = vshll.u32 %v298_v34, 16  ;;  %v435_v33 = vshll.u32 %v5676_v27, 16  ;;  %v708_v57 = vld [vmem:[#allocation2 + $0x74] sm:$0x1] }
  0xb5   : > { %3780 = vrot.lane.b32.xlu1 %v3764_v31, %s5213_s7  ;;  %v1248_v4 = vld [vmem:[#allocation2 + $0x48] sm:$0xf]  ;;  %v2024_v55 = vsel %vm5543_vm15, %v2019_v6, %v5731_v16  ;;  %v3559_v13 = vunpack.c.l.b16 %v2448_v9  ;;  %v451_v53 = vrot.slane %v449_v11, 7  ;;  %v2621_v21 = vshrl.u32 %v2550_v30, 16 }
  0xb6   : > { %v1249_v59 = vsel %vm5682_vm4, %v1095_v29, %v1248_v4  ;;  %v3478_v19 = vunpack.c.l.b16 %v2024_v55  ;;  %v426_v35 = vrot.slane %v424_v44, 7  ;;  %v437_v27 = vor.u32 %v435_v33, %v5709_v56  ;;  %v5902_v56 = vld [vmem:[#allocation2 + $0x34] sm:$0xf]  ;;  %v697_v33 = vld [vmem:[#allocation2 + $0x60] sm:$0xf] }
  0xb7   : > { %v5862_v50 = vpop.permute.xlu1 %1102  ;;  %1250 = vst [vmem:[#allocation2 + $0x48] sm:$0xf] %v1249_v59  ;;  %v3589_v48 = vpack.c.b16 %v3559_v13, %v3558_v3  ;;  %v456_v0 = vrot.slane %v451_v53, 4  ;;  %v5896_v12 = vpop.permute.xlu0 %1100  ;;  %v2623_v16 = vrot.slane %v2621_v21, 4  ;;  %v2624_v10 = vshll.u32 %v2550_v30, 16 }
  0xb8   : > { %v3509_v41 = vpack.c.b16 %v3479_v36, %v3478_v19  ;;  %v429_v43 = vor.u32 %v427_v63, %v426_v35  ;;  %v430_v24 = vrot.slane %v426_v35, 4  ;;  %v2630_v29 = vshll.u32 %v5831_v42, 16  ;;  %v302_v35 = vld [vmem:[%s5331_s24 + $0x40] sm:$0xf] }
  0xb9   : > { %3606 = vrot.lane.b32.xlu0 %v3589_v48, %s5210_s30  ;;  %v702_v22 = vsel %vm5358_vm5, %v456_v0, %v701_v14  ;;  %v2626_v23 = vrot.slane %v2624_v10, 5  ;;  %v2634_v49 = vshrl.u32 %v5831_v42, 16  ;;  %v2640_v47 = vshll.u32 %v5836_v62, 16  ;;  %v5920_v42 = vld [vmem:[%s5331_s24 + $0x4c] sm:$0xf]  ;;  %v5034_v62 = vld [vmem:[#allocation2 + $0x24] sm:$0xff] }
  0xba   : > { %3526 = vrot.lane.b32.xlu2 %v3509_v41, %s5212_s6  ;;  %703 = vst [vmem:[#allocation2 + $0x68] sm:$0x1] %v702_v22  ;;  %v438_v1 = vsel %vm5268_vm2, %v430_v24, %v437_v27  ;;  %v691_v52 = vsel %vm5596_vm3, %v429_v43, %v690_v40  ;;  %v2632_v46 = vrot.slane %v2630_v29, 5  ;;  %v466_v17 = vshrl.u32 %v5894_v28, 16  ;;  %v715_v41 = vld [vmem:[#allocation2 + $0x80] sm:$0x1] }
  0xbb   : > { %693 = vst.msk [vmem:[#allocation2 + $0x58] sm:$0xf] %vm642_vm7, %v438_v1  ;;  %v2627_v5 = vor.u32 %v2626_v23, %v2623_v16  ;;  %v2636_v8 = vrot.slane %v2634_v49, 4  ;;  %v2642_v34 = vrot.slane %v2640_v47, 5  ;;  %v441_v36 = vshrl.u32 %v300_v32, 16 }
  0xbc   : > { %1258 = vst.msk [vmem:[#allocation2 + $0x58] sm:$0xf] %vm1208_vm10, %v5862_v50  ;;  %v468_v2 = vrot.slane %v466_v17, 7  ;;  %v444_v60 = vshll.u32 %v300_v32, 16  ;;  %v452_v30 = vshll.u32 %v5872_v54, 16  ;;  %v4738_v31 = vrot.slane %v2982_v38, 9 }
  0xbd   : > { %3702 = vrot.lane.b32.xlu1 %v5034_v62, %s5211_s5  ;;  %692 = vst [vmem:[#allocation2 + $0x54] sm:$0xf] %v691_v52  ;;  %v2628_v6 = vrot.slane %v2627_v5, 4  ;;  %v2637_v3 = vor.u32 %v2636_v8, %v2632_v46  ;;  %v443_v11 = vrot.slane %v441_v36, 7  ;;  %v3060_v9 = vrot.slane %v5902_v56, 5 }
  0xbe   : > { %v473_v44 = vrot.slane %v468_v2, 4  ;;  %v454_v63 = vor.u32 %v452_v30, %v451_v53  ;;  %v3063_v4 = vrot.slane %v5909_v51, 5  ;;  %v483_v50 = vshrl.u32 %v5920_v42, 16  ;;  %v5946_v43 = vld [vmem:[%s5331_s24 + $0x54] sm:$0xf] }
  0xbf   : > { %v5899_v26 = vpop.permute.xlu1 %1108  ;;  %v2633_v54 = vsel %vm5543_vm15, %v2628_v6, %v2632_v46  ;;  %v2638_v55 = vrot.slane %v2637_v3, 4  ;;  %v446_v13 = vor.u32 %v444_v60, %v443_v11  ;;  %v447_v14 = vrot.slane %v443_v11, 4  ;;  %v5941_v0 = vpop.permute.xlu0 %1106  ;;  %v304_v49 = vld [vmem:[%s5331_s24 + $0x48] sm:$0xf]  ;;  %v2555_v46 = vld [vmem:[#allocation2 + $0x40] sm:$0xf] }
  0xc0   : > { %v3734_v21 = vunpack.c.l.b16 %v2633_v54  ;;  %v709_v59 = vsel %vm5358_vm5, %v473_v44, %v708_v57  ;;  %v3061_v19 = vsel %vm5560_vm1, %v4738_v31, %v3060_v9  ;;  %v3062_v53 = vrot.slane %v3060_v9, 4  ;;  %v2983_v30 = vld [vmem:[#allocation2 + $0x3c] sm:$0xe]  ;;  %v722_v31 = vld [vmem:[#allocation2 + $0x8c] sm:$0x1] }
  0xc1   : > { %v1266_v27 = vld [vmem:[#allocation2 + $0x68] sm:$0x1]  ;;  %v2643_v40 = vsel %vm5543_vm15, %v2638_v55, %v2642_v34  ;;  %710 = vst [vmem:[#allocation2 + $0x74] sm:$0x1] %v709_v59  ;;  %v455_v48 = vsel %vm5268_vm2, %v447_v14, %v454_v63  ;;  %v698_v16 = vsel %vm5596_vm3, %v446_v13, %v697_v33  ;;  %v3816_v10 = vunpack.c.l.b16 %v3061_v19  ;;  %v2583_v11 = vld [vmem:[#allocation2 + $0x44] sm:$0x1] }
  0xc2   : > { %v1267_v24 = vsel %vm5424_vm9, %v5869_v18, %v1266_v27  ;;  %v3735_v29 = vunpack.c.l.b16 %v2643_v40  ;;  %700 = vst.msk [vmem:[#allocation2 + $0x64] sm:$0xf] %vm642_vm7, %v455_v48  ;;  %v3064_v32 = vsel %vm5560_vm1, %v3062_v53, %v3063_v4  ;;  %v485_v22 = vrot.slane %v483_v50, 7  ;;  %v5958_v18 = vpop.permute.xlu2 %1122  ;;  %v5978_v14 = vld [vmem:[%s5331_s24 + $0x5c] sm:$0xf] }
  0xc3   : > { %1268 = vst [vmem:[#allocation2 + $0x68] sm:$0x1] %v1267_v24  ;;  %v3817_v47 = vunpack.c.l.b16 %v3064_v32  ;;  %v458_v38 = vshrl.u32 %v302_v35, 16  ;;  %v461_v1 = vshll.u32 %v302_v35, 16  ;;  %v469_v52 = vshll.u32 %v5894_v28, 16 }
  0xc4   : > { %v1255_v17 = vld [vmem:[#allocation2 + $0x54] sm:$0xf]  ;;  %v3765_v62 = vpack.c.b16 %v3735_v29, %v3734_v21  ;;  %1265 = vst.msk [vmem:[#allocation2 + $0x64] sm:$0xf] %vm1208_vm10, %v5899_v26  ;;  %v490_v5 = vrot.slane %v485_v22, 4  ;;  %v500_v8 = vshrl.u32 %v5946_v43, 16 }
  0xc5   : > { %v1256_v34 = vsel %vm5682_vm4, %v5896_v12, %v1255_v17  ;;  %699 = vst [vmem:[#allocation2 + $0x60] sm:$0xf] %v698_v16  ;;  %v3846_v57 = vpack.c.b16 %v3817_v47, %v3816_v10  ;;  %v460_v36 = vrot.slane %v458_v38, 7  ;;  %v471_v60 = vor.u32 %v469_v52, %v468_v2  ;;  %v704_v28 = vld [vmem:[#allocation2 + $0x6c] sm:$0xf] }
  0xc6   : > { %1257 = vst [vmem:[#allocation2 + $0x54] sm:$0xf] %v1256_v34  ;;  %3782 = vrot.lane.b32.xlu2 %v3765_v62, %s5213_s7  ;;  %v716_v26 = vsel %vm5358_vm5, %v490_v5, %v715_v41  ;;  %v5967_v6 = vrot.slane %v500_v8, 7  ;;  %v475_v3 = vshrl.u32 %v304_v49, 16  ;;  %v478_v2 = vshll.u32 %v304_v49, 16 }
  0xc7   : > { %v1115_v23 = vpop.permute.xlu1 %1114  ;;  %4982 = vmatmul.msk.bf16.gmra.mxu1 %vm3860_vm6, %v3846_v57  ;;  %717 = vst [vmem:[#allocation2 + $0x80] sm:$0x1] %v716_v26  ;;  %v463_v12 = vor.u32 %v461_v1, %v460_v36  ;;  %v464_v9 = vrot.slane %v460_v36, 4  ;;  %v486_v44 = vshll.u32 %v5920_v42, 16  ;;  %v4739_v50 = vrot.slane %v2983_v30, 9  ;;  %v5983_v35 = vpop.permute.xlu0 %1112 }
  0xc8   : > { %v1273_v63 = vld [vmem:[#allocation2 + $0x74] sm:$0x1]  ;;  %v507_v33 = vrot.slane %v5967_v6, 4  ;;  %v477_v4 = vrot.slane %v475_v3, 7  ;;  %v3067_v54 = vrot.slane %v2555_v46, 5  ;;  %v3070_v19 = vrot.slane %v2583_v11, 5 }
  0xc9   : > { %v1274_v55 = vsel %vm5424_vm9, %v5916_v45, %v1273_v63  ;;  %v472_v13 = vsel %vm5268_vm2, %v464_v9, %v471_v60  ;;  %v705_v42 = vsel %vm5596_vm3, %v463_v12, %v704_v28  ;;  %v488_v59 = vor.u32 %v486_v44, %v485_v22  ;;  %v711_v27 = vld [vmem:[#allocation2 + $0x78] sm:$0xf]  ;;  %v306_v16 = vld [vmem:[%s5331_s24 + $0x50] sm:$0xf] }
  0xca   : > { %1275 = vst [vmem:[#allocation2 + $0x74] sm:$0x1] %v1274_v55  ;;  %v481_v21 = vrot.slane %v477_v4, 4  ;;  %v1365_v53 = vld [vmem:[#allocation2 + $0x68] sm:$0x1]  ;;  %v723_v45 = vsel %vm5358_vm5, %v507_v33, %v722_v31  ;;  %v3069_v40 = vrot.slane %v3067_v54, 4  ;;  %v480_v24 = vor.u32 %v478_v2, %v477_v4  ;;  %v1129_v46 = vpop.permute.xlu2 %1128 }
  0xcb   : > { %707 = vst.msk [vmem:[#allocation2 + $0x70] sm:$0xf] %vm642_vm7, %v472_v13  ;;  %v5987_v48 = vld [vmem:[#allocation2 + $0x64] sm:$0xf]  ;;  %v3068_v29 = vsel %vm5560_vm1, %v4739_v50, %v3067_v54  ;;  %v517_v22 = vshrl.u32 %v5978_v14, 16  ;;  %v1888_v47 = vrot.slane %v1365_v53, 5 }
  0xcc   : > { %v1262_v10 = vld [vmem:[#allocation2 + $0x60] sm:$0xf]  ;;  %1272 = vst.msk [vmem:[#allocation2 + $0x70] sm:$0xf] %vm1208_vm10, %v1115_v23  ;;  %v1885_v32 = vrot.slane %v5987_v48, 5  ;;  %v1578_v1 = vshll.u32 %v5987_v48, 16  ;;  %v489_v17 = vsel %vm5268_vm2, %v481_v21, %v488_v59  ;;  %v3071_v62 = vsel %vm5560_vm1, %v3069_v40, %v3070_v19 }
  0xcd   : > { %v1263_v49 = vsel %vm5682_vm4, %v5941_v0, %v1262_v10  ;;  %706 = vst [vmem:[#allocation2 + $0x6c] sm:$0xf] %v705_v42  ;;  %v729_v38 = vld [vmem:[#allocation2 + $0x98] sm:$0x1]  ;;  %v1582_v23 = vshrl.u32 %v5987_v48, 16  ;;  %v6006_v5 = vrot.slane %v517_v22, 7  ;;  %v712_v60 = vsel %vm5596_vm3, %v480_v24, %v711_v27 }
  0xce   : > { %1264 = vst [vmem:[#allocation2 + $0x60] sm:$0xf] %v1263_v49  ;;  %v1280_v52 = vld [vmem:[#allocation2 + $0x80] sm:$0x1]  ;;  %v1887_v0 = vrot.slane %v1885_v32, 4  ;;  %v6011_v34 = vrot.slane %v1578_v1, 5  ;;  %v3818_v28 = vunpack.c.l.b16 %v3068_v29  ;;  %v3819_v3 = vunpack.c.l.b16 %v3071_v62 }
  0xcf   : > { %v1121_v41 = vpop.permute.xlu1 %1120  ;;  %v1281_v8 = vsel %vm5424_vm9, %v5958_v18, %v1280_v52  ;;  %724 = vst [vmem:[#allocation2 + $0x8c] sm:$0x1] %v723_v45  ;;  %v1584_v57 = vrot.slane %v1582_v23, 4  ;;  %v1588_v36 = vshll.u32 %v1365_v53, 16  ;;  %v524_v30 = vrot.slane %v6006_v5, 4  ;;  %v1119_v45 = vpop.permute.xlu0 %1118 }
  0xd0   : > { %1282 = vst [vmem:[#allocation2 + $0x80] sm:$0x1] %v1281_v8  ;;  %v492_v26 = vshrl.u32 %v306_v16, 16  ;;  %v6017_v31 = vld [vmem:[%s5331_s24 + $0x64] sm:$0xf]  ;;  %v495_v12 = vshll.u32 %v306_v16, 16  ;;  %v1889_v50 = vsel %vm5560_vm1, %v1887_v0, %v1888_v47  ;;  %v3847_v27 = vpack.c.b16 %v3819_v3, %v3818_v28 }
  0xd1   : > { %714 = vst.msk [vmem:[#allocation2 + $0x7c] sm:$0xf] %vm642_vm7, %v489_v17  ;;  %v1585_v18 = vor.u32 %v1584_v57, %v6011_v34  ;;  %v6021_v11 = vrot.slane %v1588_v36, 5  ;;  %v6023_v9 = vld [vmem:[#allocation2 + $0x74] sm:$0x1]  ;;  %v730_v2 = vsel %vm5358_vm5, %v524_v30, %v729_v38  ;;  %v503_v63 = vshll.u32 %v5946_v43, 16 }
  0xd2   : > { %1279 = vst.msk [vmem:[#allocation2 + $0x7c] sm:$0xf] %vm1208_vm10, %v1121_v41  ;;  %v494_v44 = vrot.slane %v492_v26, 7  ;;  %v718_v33 = vld [vmem:[#allocation2 + $0x84] sm:$0xf]  ;;  %v2496_v4 = vrot.slane %v6023_v9, 5  ;;  %v3317_v49 = vunpack.c.l.b16 %v1889_v50  ;;  %v1135_v0 = vpop.permute.xlu2 %1134 }
  0xd3   : > { %713 = vst [vmem:[#allocation2 + $0x78] sm:$0xf] %v712_v60  ;;  %v6032_v54 = vrot.slane %v1585_v18, 4  ;;  %v6034_v55 = vld [vmem:[#allocation2 + $0x70] sm:$0xf]  ;;  %v534_v13 = vshrl.u32 %v6017_v31, 16  ;;  %v505_v19 = vor.u32 %v503_v63, %v5967_v6 }
  0xd4   : > { %v1269_v42 = vld [vmem:[#allocation2 + $0x6c] sm:$0xf]  ;;  %731 = vst [vmem:[#allocation2 + $0x98] sm:$0x1] %v730_v2  ;;  %v497_v21 = vor.u32 %v495_v12, %v494_v44  ;;  %v498_v59 = vrot.slane %v494_v44, 4  ;;  %v2493_v43 = vrot.slane %v6034_v55, 5 }
  0xd5   : > { %v1270_v53 = vsel %vm5682_vm4, %v5983_v35, %v1269_v42  ;;  %v1768_v40 = vld [vmem:[#allocation2 + $0x60] sm:$0xe]  ;;  %v6042_v10 = vrot.slane %v534_v13, 7  ;;  %v2189_v41 = vshll.u32 %v6034_v55, 16  ;;  %v2984_v24 = vld [vmem:[#allocation2 + $0x48] sm:$0xe]  ;;  %v1591_v57 = vsel %vm5543_vm15, %v6032_v54, %v6021_v11 }
  0xd6   : > { %v1341_v16 = vld [vmem:[#allocation2 + $0x60] sm:$0xf]  ;;  %1271 = vst [vmem:[#allocation2 + $0x6c] sm:$0xf] %v1270_v53  ;;  %v1287_v29 = vld [vmem:[#allocation2 + $0x8c] sm:$0x1]  ;;  %v506_v38 = vsel %vm5268_vm2, %v498_v59, %v505_v19  ;;  %v719_v23 = vsel %vm5596_vm3, %v497_v21, %v718_v33  ;;  %v3237_v19 = vunpack.c.l.b16 %v1591_v57 }
  0xd7   : > { %v4712_v22 = vrot.slane %v1768_v40, 9  ;;  %v1569_v6 = vshrl.u32 %v1341_v16, 16  ;;  %v1127_v47 = vpop.permute.xlu1 %1126  ;;  %v1288_v35 = vsel %vm5424_vm9, %v1129_v46, %v1287_v29  ;;  %4983 = vmatmul.msk.bf16.gmra.mxu1 %vm3860_vm6, %v3847_v27  ;;  %v1572_v1 = vshll.u32 %v1341_v16, 16  ;;  %721 = vst.msk [vmem:[#allocation2 + $0x88] sm:$0xf] %vm642_vm7, %v506_v38 }
  0xd8   : > { %v2495_v52 = vrot.slane %v2493_v43, 4  ;;  %v736_v17 = vld [vmem:[#allocation2 + $0xa4] sm:$0x1]  ;;  %v2557_v62 = vld [vmem:[#allocation2 + $0x4c] sm:$0xf]  ;;  %v541_v36 = vrot.slane %v6042_v10, 4 }
  0xd9   : > { %1289 = vst [vmem:[#allocation2 + $0x8c] sm:$0x1] %v1288_v35  ;;  %v1886_v46 = vsel %vm5560_vm1, %v4712_v22, %v1885_v32  ;;  %v1571_v8 = vrot.slane %v1569_v6, 4  ;;  %v2584_v60 = vld [vmem:[#allocation2 + $0x50] sm:$0x1]  ;;  %v1574_v30 = vrot.slane %v1572_v1, 5 }
  0xda   : > { %v3316_v28 = vunpack.c.l.b16 %v1886_v46  ;;  %1286 = vst.msk [vmem:[#allocation2 + $0x88] sm:$0xf] %vm1208_vm10, %v1127_v47  ;;  %v6065_v26 = vrot.slane %v2189_v41, 5  ;;  %v2193_v48 = vshrl.u32 %v6034_v55, 16  ;;  %v6069_v3 = vld [vmem:[%s5331_s24 + $0x6c] sm:$0xf]  ;;  %v2497_v18 = vsel %vm5560_vm1, %v2495_v52, %v2496_v4 }
  0xdb   : > { %v1276_v32 = vld [vmem:[#allocation2 + $0x78] sm:$0xf]  ;;  %720 = vst [vmem:[#allocation2 + $0x84] sm:$0xf] %v719_v23  ;;  %v737_v11 = vsel %vm5358_vm5, %v541_v36, %v736_v17  ;;  %v2199_v12 = vshll.u32 %v6023_v9, 16  ;;  %v4740_v2 = vrot.slane %v2984_v24, 9  ;;  %v1575_v50 = vor.u32 %v1574_v30, %v1571_v8 }
  0xdc   : > { %v1277_v44 = vsel %vm5682_vm4, %v1119_v45, %v1276_v32  ;;  %v3340_v63 = vpack.c.b16 %v3317_v49, %v3316_v28  ;;  %v1294_v33 = vld [vmem:[#allocation2 + $0x98] sm:$0x1]  ;;  %738 = vst [vmem:[#allocation2 + $0xa4] sm:$0x1] %v737_v11  ;;  %v2195_v54 = vrot.slane %v2193_v48, 4  ;;  %v3074_v4 = vrot.slane %v2557_v62, 5  ;;  %v1125_v49 = vpop.permute.xlu0 %1124 }
  0xdd   : > { %1278 = vst [vmem:[#allocation2 + $0x78] sm:$0xf] %v1277_v44  ;;  %v1295_v13 = vsel %vm5424_vm9, %v1135_v0, %v1294_v33  ;;  %v2201_v42 = vrot.slane %v2199_v12, 5  ;;  %v3077_v21 = vrot.slane %v2584_v60, 5  ;;  %v5025_v9 = vld [vmem:[#allocation2 + $0x6c] sm:$0xff]  ;;  %v1576_v59 = vrot.slane %v1575_v50, 4  ;;  %v1141_v60 = vpop.permute.xlu2 %1140 }
  0xde   : > { %3364 = vrot.lane.b32.xlu1 %v3340_v63, %s5208_s28  ;;  %1296 = vst [vmem:[#allocation2 + $0x98] sm:$0x1] %v1295_v13  ;;  %v2379_v53 = vld [vmem:[#allocation2 + $0x6c] sm:$0xe]  ;;  %v3573_v45 = vunpack.c.l.b16 %v2497_v18  ;;  %v2196_v27 = vor.u32 %v2195_v54, %v6065_v26  ;;  %v3075_v41 = vsel %vm5560_vm1, %v4740_v2, %v3074_v4  ;;  %v3076_v24 = vrot.slane %v3074_v4, 4  ;;  %3460 = vrot.lane.b32.xlu2 %v5025_v9, %s5209_s29 }
  0xdf   : > { %v4728_v40 = vrot.slane %v2379_v53, 9  ;;  %v1955_v16 = vld [vmem:[#allocation2 + $0x6c] sm:$0xf]  ;;  %v551_v29 = vshrl.u32 %v6069_v3, 16  ;;  %v1581_v22 = vsel %vm5543_vm15, %v1576_v59, %v6011_v34  ;;  %v3820_v52 = vunpack.c.l.b16 %v3075_v41  ;;  %v6095_v17 = vld [vmem:[#allocation2 + $0x20] sm:$0x1] }
  0xe0   : > { %v2180_v6 = vshrl.u32 %v1955_v16, 16  ;;  %v2183_v47 = vshll.u32 %v1955_v16, 16  ;;  %v2197_v38 = vrot.slane %v2196_v27, 4  ;;  %v3236_v35 = vunpack.c.l.b16 %v1581_v22  ;;  %v6099_v57 = vld [vmem:[#allocation2 + $0x1c] sm:$0xf] }
  0xe1   : > { %v2494_v1 = vsel %vm5560_vm1, %v4728_v40, %v2493_v43  ;;  %v3078_v23 = vsel %vm5560_vm1, %v3076_v24, %v3077_v21  ;;  %v1762_v55 = vld [vmem:[#allocation2 + $0x18] sm:$0xe]  ;;  %v743_v32 = vld [vmem:[#allocation2 + $0xb0] sm:$0x1]  ;;  %v6106_v63 = vrot.slane %v551_v29, 7  ;;  %v1843_v13 = vrot.slane %v6099_v57, 5 }
  0xe2   : > { %v1283_v62 = vld [vmem:[#allocation2 + $0x84] sm:$0xf]  ;;  %v3572_v46 = vunpack.c.l.b16 %v2494_v1  ;;  %v2182_v34 = vrot.slane %v2180_v6, 4  ;;  %v2185_v0 = vrot.slane %v2183_v47, 5  ;;  %v2202_v8 = vsel %vm5543_vm15, %v2197_v38, %v2201_v42  ;;  %v308_v18 = vld [vmem:[%s5331_s24 + $0x58] sm:$0xf] }
  0xe3   : > { %v3260_v36 = vpack.c.b16 %v3237_v19, %v3236_v35  ;;  %v1284_v43 = vsel %vm5682_vm4, %v1125_v49, %v1283_v62  ;;  %v1301_v28 = vld [vmem:[#allocation2 + $0xa4] sm:$0x1]  ;;  %v3493_v30 = vunpack.c.l.b16 %v2202_v8  ;;  %v3821_v48 = vunpack.c.l.b16 %v3078_v23  ;;  %v2565_v29 = vld [vmem:[#allocation2 + $0x7c] sm:$0xf]  ;;  %v2588_v22 = vld [vmem:[#allocation2 + $0x80] sm:$0x1] }
  0xe4   : > { %1285 = vst [vmem:[#allocation2 + $0x84] sm:$0xf] %v1284_v43  ;;  %v3596_v11 = vpack.c.b16 %v3573_v45, %v3572_v46  ;;  %v1302_v12 = vsel %vm5424_vm9, %v1141_v60, %v1301_v28  ;;  %v5041_v2 = vld [vmem:[#allocation2 + $0x78] sm:$0xff]  ;;  %v2186_v44 = vor.u32 %v2185_v0, %v2182_v34  ;;  %v4706_v54 = vrot.slane %v1762_v55, 9  ;;  %v725_v6 = vld [vmem:[#allocation2 + $0x90] sm:$0xf] }
  0xe5   : > { %v2564_v33 = vld [vmem:[#allocation2 + $0x78] sm:$0xf]  ;;  %3284 = vrot.lane.b32.xlu0 %v3260_v36, %s5207_s27  ;;  %1303 = vst [vmem:[#allocation2 + $0xa4] sm:$0x1] %v1302_v12  ;;  %v3848_v50 = vpack.c.b16 %v3821_v48, %v3820_v52  ;;  %v1846_v42 = vrot.slane %v6095_v17, 5  ;;  %v558_v21 = vrot.slane %v6106_v63, 4 }
  0xe6   : > { %3620 = vrot.lane.b32.xlu1 %v3596_v11, %s5210_s30  ;;  %v2187_v4 = vrot.slane %v2186_v44, 4  ;;  %v509_v9 = vshrl.u32 %v308_v18, 16  ;;  %v512_v59 = vshll.u32 %v308_v18, 16  ;;  %v1844_v19 = vsel %vm5560_vm1, %v4706_v54, %v1843_v13  ;;  %3716 = vrot.lane.b32.xlu2 %v5041_v2, %s5211_s5  ;;  %v1329_v52 = vld [vmem:[#allocation2 + $0x18] sm:$0xf]  ;;  %v1133_v11 = vpop.permute.xlu1 %1132 }
  0xe7   : > { %v1845_v53 = vrot.slane %v1843_v13, 4  ;;  %v520_v45 = vshll.u32 %v5978_v14, 16  ;;  %v2789_v27 = vshrl.u32 %v2564_v33, 16  ;;  %4984 = vmatmul.msk.bf16.gmra.mxu1 %vm3860_vm6, %v3848_v50  ;;  %v744_v16 = vsel %vm5358_vm5, %v558_v21, %v743_v32  ;;  %v6130_v60 = vld [vmem:[#allocation2 + $0x88] sm:$0xf] }
  0xe8   : > { %v2192_v40 = vsel %vm5543_vm15, %v2187_v4, %v6065_v26  ;;  %v3304_v41 = vunpack.c.l.b16 %v1844_v19  ;;  %v511_v24 = vrot.slane %v509_v9, 7  ;;  %745 = vst [vmem:[#allocation2 + $0xb0] sm:$0x1] %v744_v16  ;;  %v2792_v23 = vshll.u32 %v2564_v33, 16  ;;  %v6133_v18 = vld [vmem:[#allocation2 + $0x8c] sm:$0x1]  ;;  %v1147_v4 = vpop.permute.xlu2 %1146 }
  0xe9   : > { %v3492_v49 = vunpack.c.l.b16 %v2192_v40  ;;  %v1847_v14 = vsel %vm5560_vm1, %v1845_v53, %v1846_v42  ;;  %v522_v47 = vor.u32 %v520_v45, %v6006_v5  ;;  %v2791_v38 = vrot.slane %v2789_v27, 4  ;;  %v6145_v16 = vld [vmem:[%s5331_s24 + $0x74] sm:$0xf] }
  0xea   : > { %v3305_v35 = vunpack.c.l.b16 %v1847_v14  ;;  %v514_v26 = vor.u32 %v512_v59, %v511_v24  ;;  %v515_v1 = vrot.slane %v511_v24, 4  ;;  %v2798_v46 = vshll.u32 %v2565_v29, 16 }
  0xeb   : > { %v3516_v62 = vpack.c.b16 %v3493_v30, %v3492_v49  ;;  %v2802_v34 = vshrl.u32 %v2565_v29, 16  ;;  %v2808_v0 = vshll.u32 %v2588_v22, 16  ;;  %v2794_v43 = vrot.slane %v2792_v23, 5  ;;  %v2989_v5 = vld [vmem:[#allocation2 + $0x84] sm:$0xe]  ;;  %v1131_v49 = vpop.permute.xlu0 %1130 }
  0xec   : > { %v3334_v8 = vpack.c.b16 %v3305_v35, %v3304_v41  ;;  %v726_v55 = vsel %vm5596_vm3, %v514_v26, %v725_v6  ;;  %v523_v36 = vsel %vm5268_vm2, %v515_v1, %v522_v47  ;;  %v2800_v28 = vrot.slane %v2798_v46, 5  ;;  %v2373_v22 = vld [vmem:[#allocation2 + $0x24] sm:$0xe] }
  0xed   : > { %3540 = vrot.lane.b32.xlu0 %v3516_v62, %s5212_s6  ;;  %727 = vst [vmem:[#allocation2 + $0x90] sm:$0xf] %v726_v55  ;;  %v2804_v48 = vrot.slane %v2802_v34, 4  ;;  %v2810_v30 = vrot.slane %v2808_v0, 5  ;;  %v1425_v32 = vshrl.u32 %v1329_v52, 16  ;;  %v2795_v12 = vor.u32 %v2794_v43, %v2791_v38 }
  0xee   : > { %728 = vst.msk [vmem:[#allocation2 + $0x94] sm:$0xf] %vm642_vm7, %v523_v36  ;;  %v1428_v2 = vshll.u32 %v1329_v52, 16  ;;  %v1434_v44 = vshll.u32 %v6099_v57, 16  ;;  %v1438_v33 = vshrl.u32 %v6099_v57, 16  ;;  %v1444_v13 = vshll.u32 %v6095_v17, 16  ;;  %3352 = vrot.lane.b32.xlu2 %v3334_v8, %s5208_s28 }
  0xef   : > { %1293 = vst.msk [vmem:[#allocation2 + $0x94] sm:$0xf] %vm1208_vm10, %v1133_v11  ;;  %v2805_v50 = vor.u32 %v2804_v48, %v2800_v28  ;;  %v1427_v54 = vrot.slane %v1425_v32, 4  ;;  %v4745_v42 = vrot.slane %v2989_v5, 9  ;;  %v1308_v21 = vld [vmem:[#allocation2 + $0xb0] sm:$0x1] }
  0xf0   : > { %v2796_v9 = vrot.slane %v2795_v12, 4  ;;  %v1430_v59 = vrot.slane %v1428_v2, 5  ;;  %v1436_v19 = vrot.slane %v1434_v44, 5  ;;  %v1440_v53 = vrot.slane %v1438_v33, 4  ;;  %v1944_v62 = vld [vmem:[#allocation2 + $0x28] sm:$0xf] }
  0xf1   : > { %v1309_v45 = vsel %vm5424_vm9, %v1147_v4, %v1308_v21  ;;  %v2806_v57 = vrot.slane %v2805_v50, 4  ;;  %v1446_v27 = vrot.slane %v1444_v13, 5  ;;  %v3109_v40 = vrot.slane %v6130_v60, 5  ;;  %v1973_v8 = vld [vmem:[#allocation2 + $0x2c] sm:$0x1] }
  0xf2   : > { %1310 = vst [vmem:[#allocation2 + $0xb0] sm:$0x1] %v1309_v45  ;;  %v2801_v17 = vsel %vm5543_vm15, %v2796_v9, %v2800_v28  ;;  %v1431_v41 = vor.u32 %v1430_v59, %v1427_v54  ;;  %v1441_v24 = vor.u32 %v1440_v53, %v1436_v19  ;;  %v3112_v29 = vrot.slane %v6133_v18, 5  ;;  %v310_v36 = vld [vmem:[%s5331_s24 + $0x60] sm:$0xf] }
  0xf3   : > { %v2811_v14 = vsel %vm5543_vm15, %v2806_v57, %v2810_v30  ;;  %v3748_v6 = vunpack.c.l.b16 %v2801_v17  ;;  %v3110_v47 = vsel %vm5560_vm1, %v4745_v42, %v3109_v40  ;;  %v3111_v38 = vrot.slane %v3109_v40, 4  ;;  %v1943_v2 = vld [vmem:[#allocation2 + $0x24] sm:$0xf]  ;;  %v750_v33 = vld [vmem:[#allocation2 + $0xbc] sm:$0x1] }
  0xf4   : > { %v1290_v35 = vld [vmem:[#allocation2 + $0x90] sm:$0xf]  ;;  %v3749_v26 = vunpack.c.l.b16 %v2811_v14  ;;  %v1432_v1 = vrot.slane %v1431_v41, 4  ;;  %v1442_v23 = vrot.slane %v1441_v24, 4  ;;  %v3830_v52 = vunpack.c.l.b16 %v3110_v47  ;;  %v2559_v24 = vld [vmem:[#allocation2 + $0x58] sm:$0xf]  ;;  %v6178_v47 = vpop.permute.xlu0 %1136 }
  0xf5   : > { %v1291_v46 = vsel %vm5682_vm4, %v1131_v49, %v1290_v35  ;;  %v3113_v34 = vsel %vm5560_vm1, %v3111_v38, %v3112_v29  ;;  %v568_v0 = vshrl.u32 %v6145_v16, 16  ;;  %v4722_v55 = vrot.slane %v2373_v22, 9  ;;  %v2585_v29 = vld [vmem:[#allocation2 + $0x5c] sm:$0x1] }
  0xf6   : > { %1292 = vst [vmem:[#allocation2 + $0x90] sm:$0xf] %v1291_v46  ;;  %v3772_v43 = vpack.c.b16 %v3749_v26, %v3748_v6  ;;  %v1437_v5 = vsel %vm5543_vm15, %v1432_v1, %v1436_v19  ;;  %v1447_v28 = vsel %vm5543_vm15, %v1442_v23, %v1446_v27  ;;  %v3831_v48 = vunpack.c.l.b16 %v3113_v34  ;;  %v732_v19 = vld [vmem:[#allocation2 + $0x9c] sm:$0xf]  ;;  %v1343_v23 = vld [vmem:[#allocation2 + $0x6c] sm:$0xf] }
  0xf7   : > { %v3224_v30 = vunpack.c.l.b16 %v1437_v5  ;;  %v3225_v32 = vunpack.c.l.b16 %v1447_v28  ;;  %v6164_v11 = vrot.slane %v568_v0, 7  ;;  %v2451_v12 = vrot.slane %v1944_v62, 5 }
  0xf8   : > { %3796 = vrot.lane.b32.xlu1 %v3772_v43, %s5213_s7  ;;  %v3853_v44 = vpack.c.b16 %v3831_v48, %v3830_v52  ;;  %v2454_v50 = vrot.slane %v1973_v8, 5  ;;  %v526_v54 = vshrl.u32 %v310_v36, 16  ;;  %v529_v13 = vshll.u32 %v310_v36, 16  ;;  %v1153_v36 = vpop.permute.xlu2 %1152 }
  0xf9   : > { %v3254_v42 = vpack.c.b16 %v3225_v32, %v3224_v30  ;;  %v575_v4 = vrot.slane %v6164_v11, 4  ;;  %v2452_v21 = vsel %vm5560_vm1, %v4722_v55, %v2451_v12  ;;  %v2453_v9 = vrot.slane %v2451_v12, 4  ;;  %v6184_v55 = vld [vmem:[#allocation2 + $0x70] sm:$0xf] }
  0xfa   : > { %4989 = vmatmul.msk.bf16.vlgmr.msra.gmra.mxu3 %vm3860_vm6, %v3853_v44  ;;  %v3560_v59 = vunpack.c.l.b16 %v2452_v21  ;;  %v528_v53 = vrot.slane %v526_v54, 7  ;;  %v537_v45 = vshll.u32 %v6017_v31, 16  ;;  %v2036_v57 = vshrl.u32 %v1943_v2, 16  ;;  %v2985_v31 = vld [vmem:[#allocation2 + $0x54] sm:$0xe]  ;;  %v5019_v44 = vld [vmem:[#allocation2 + $0x24] sm:$0xff] }
  0xfb   : > { %3272 = vrot.lane.b32.xlu0 %v3254_v42, %s5207_s27  ;;  %v751_v27 = vsel %vm5358_vm5, %v575_v4, %v750_v33  ;;  %v2455_v40 = vsel %vm5560_vm1, %v2453_v9, %v2454_v50  ;;  %v2039_v17 = vshll.u32 %v1943_v2, 16  ;;  %v2045_v41 = vshll.u32 %v1944_v62, 16 }
  0xfc   : > { %752 = vst [vmem:[#allocation2 + $0xbc] sm:$0x1] %v751_v27  ;;  %v3561_v22 = vunpack.c.l.b16 %v2455_v40  ;;  %v531_v49 = vor.u32 %v529_v13, %v528_v53  ;;  %v532_v14 = vrot.slane %v528_v53, 4  ;;  %v539_v6 = vor.u32 %v537_v45, %v6042_v10  ;;  %v312_v45 = vld [vmem:[%s5331_s24 + $0x68] sm:$0xf] }
  0xfd   : > { %v2038_v38 = vrot.slane %v2036_v57, 4  ;;  %v2041_v35 = vrot.slane %v2039_v17, 5  ;;  %v2047_v26 = vrot.slane %v2045_v41, 5  ;;  %v2049_v1 = vshrl.u32 %v1944_v62, 16  ;;  %v1139_v62 = vpop.permute.xlu1 %1138  ;;  %v6201_v17 = vld [vmem:[#allocation2 + $0x74] sm:$0x1] }
  0xfe   : > { %v3590_v52 = vpack.c.b16 %v3561_v22, %v3560_v59  ;;  %v733_v46 = vsel %vm5596_vm3, %v531_v49, %v732_v19  ;;  %v540_v34 = vsel %vm5268_vm2, %v532_v14, %v539_v6  ;;  %v2055_v0 = vshll.u32 %v1973_v8, 16  ;;  %v5056_v14 = vld [vmem:[%s7193_s2 + $0x38] sm:$0xff] }
  0xff   : > { %734 = vst [vmem:[#allocation2 + $0x9c] sm:$0xf] %v733_v46  ;;  %v2042_v10 = vor.u32 %v2041_v35, %v2038_v38  ;;  %v2051_v43 = vrot.slane %v2049_v1, 4  ;;  %v4741_v5 = vrot.slane %v2985_v31, 9  ;;  %v3081_v28 = vrot.slane %v2559_v24, 5  ;;  %4243 = vmatpush.bf16.msra.mxu0 %v5056_v14  ;;  %5153 = vmatpush.bf16.msra.mxu2 %v5056_v14 }
 0x100   : > { %3608 = vrot.lane.b32.xlu2 %v3590_v52, %s5210_s30  ;;  %735 = vst.msk [vmem:[#allocation2 + $0xa0] sm:$0xf] %vm642_vm7, %v540_v34  ;;  %v2057_v48 = vrot.slane %v2055_v0, 5  ;;  %v3084_v30 = vrot.slane %v2585_v29, 5  ;;  %v1593_v32 = vshrl.u32 %v1343_v23, 16  ;;  %v1596_v12 = vshll.u32 %v1343_v23, 16  ;;  %v6212_v34 = vpop.permute.xlu0 %1142 }
 0x101   : > { %1300 = vst.msk [vmem:[#allocation2 + $0xa0] sm:$0xf] %vm1208_vm10, %v1139_v62  ;;  %v2043_v8 = vrot.slane %v2042_v10, 4  ;;  %v2052_v2 = vor.u32 %v2051_v43, %v2047_v26  ;;  %v3082_v33 = vsel %vm5560_vm1, %v4741_v5, %v3081_v28  ;;  %v3083_v50 = vrot.slane %v3081_v28, 4  ;;  %v2552_v1 = vld [vmem:[#allocation2 + $0x30] sm:$0xf]  ;;  %v6218_v62 = vpop.permute.xlu2 %3348 }
 0x102   : > { %v3822_v54 = vunpack.c.l.b16 %v3082_v33  ;;  %v1595_v13 = vrot.slane %v1593_v32, 4  ;;  %v1598_v42 = vrot.slane %v1596_v12, 5  ;;  %v1602_v4 = vshll.u32 %v6184_v55, 16  ;;  %v739_v43 = vld [vmem:[#allocation2 + $0xa8] sm:$0xf]  ;;  %v5035_v12 = vld [vmem:[#allocation2 + $0x30] sm:$0xff] }
 0x103   : > { %v1315_v21 = vld [vmem:[#allocation2 + $0xbc] sm:$0x1]  ;;  %v2048_v9 = vsel %vm5543_vm15, %v2043_v8, %v2047_v26  ;;  %v2053_v59 = vrot.slane %v2052_v2, 4  ;;  %3448 = vrot.lane.b32.xlu0 %v5019_v44, %s5209_s29  ;;  %v3085_v19 = vsel %vm5560_vm1, %v3083_v50, %v3084_v30  ;;  %v1606_v53 = vshrl.u32 %v6184_v55, 16  ;;  %v6220_v8 = vld [vmem:[#allocation2 + $0x94] sm:$0xf] }
 0x104   : > { %v1316_v57 = vsel %vm5424_vm9, %v1153_v36, %v1315_v21  ;;  %v3480_v27 = vunpack.c.l.b16 %v2048_v9  ;;  %v3823_v40 = vunpack.c.l.b16 %v3085_v19  ;;  %v1599_v41 = vor.u32 %v1598_v42, %v1595_v13  ;;  %v1957_v9 = vld [vmem:[#allocation2 + $0x78] sm:$0xf] }
 0x105   : > { %1317 = vst [vmem:[#allocation2 + $0xbc] sm:$0x1] %v1316_v57  ;;  %v2058_v24 = vsel %vm5543_vm15, %v2053_v59, %v2057_v48  ;;  %v1604_v29 = vrot.slane %v1602_v4, 5  ;;  %v1608_v22 = vrot.slane %v1606_v53, 4  ;;  %v1612_v49 = vshll.u32 %v6201_v17, 16 }
 0x106   : > { %v1297_v6 = vld [vmem:[#allocation2 + $0x9c] sm:$0xf]  ;;  %v3481_v31 = vunpack.c.l.b16 %v2058_v24  ;;  %v3849_v38 = vpack.c.b16 %v3823_v40, %v3822_v54  ;;  %v1600_v35 = vrot.slane %v1599_v41, 4  ;;  %v543_v26 = vshrl.u32 %v312_v45, 16  ;;  %v6225_v54 = vld [vmem:[#allocation2 + $0x98] sm:$0x1] }
 0x107   : > { %v1298_v23 = vsel %vm5682_vm4, %v6178_v47, %v1297_v6  ;;  %v1609_v52 = vor.u32 %v1608_v22, %v1604_v29  ;;  %v1614_v46 = vrot.slane %v1612_v49, 5  ;;  %v546_v0 = vshll.u32 %v312_v45, 16  ;;  %v6235_v57 = vld [vmem:[#allocation2 + $0x7c] sm:$0xf] }
 0x108   : > { %1299 = vst [vmem:[#allocation2 + $0x9c] sm:$0xf] %v1298_v23  ;;  %v3510_v36 = vpack.c.b16 %v3481_v31, %v3480_v27  ;;  %4985 = vmatmul.msk.bf16.gmra.mxu1 %vm3860_vm6, %v3849_v38  ;;  %v1605_v10 = vsel %vm5543_vm15, %v1600_v35, %v1604_v29  ;;  %v545_v5 = vrot.slane %v543_v26, 7  ;;  %v554_v28 = vshll.u32 %v6069_v3, 16  ;;  %v2990_v3 = vld [vmem:[#allocation2 + $0x90] sm:$0xe] }
 0x109   : > { %v1610_v47 = vrot.slane %v1609_v52, 4  ;;  %v3238_v48 = vunpack.c.l.b16 %v1605_v10  ;;  %v2645_v30 = vshrl.u32 %v2552_v1, 16  ;;  %v2648_v32 = vshll.u32 %v2552_v1, 16  ;;  %v6245_v26 = vld [vmem:[#allocation2 + $0x80] sm:$0x1]  ;;  %v5055_v52 = vld [vmem:[%s7193_s2 + $0x30] sm:$0xff] }
 0x10a   : > { %3528 = vrot.lane.b32.xlu1 %v3510_v36, %s5212_s6  ;;  %v548_v2 = vor.u32 %v546_v0, %v545_v5  ;;  %v549_v44 = vrot.slane %v545_v5, 4  ;;  %v556_v33 = vor.u32 %v554_v28, %v6106_v63  ;;  %v2654_v50 = vshll.u32 %v5902_v56, 16  ;;  %v1145_v63 = vpop.permute.xlu1 %1144  ;;  %v314_v5 = vld [vmem:[%s5331_s24 + $0x70] sm:$0xf]  ;;  %4244 = vmatpush.bf16.msra.mxu0 %v5055_v52 }
 0x10b   : > { %v1615_v13 = vsel %vm5543_vm15, %v1610_v47, %v1614_v46  ;;  %v2647_v42 = vrot.slane %v2645_v30, 4  ;;  %v2650_v4 = vrot.slane %v2648_v32, 5  ;;  %v2658_v21 = vshrl.u32 %v5902_v56, 16  ;;  %3704 = vrot.lane.b32.xlu0 %v5035_v12, %s5211_s5  ;;  %5154 = vmatpush.bf16.msra.mxu2 %v5055_v52 }
 0x10c   : > { %v3239_v59 = vunpack.c.l.b16 %v1615_v13  ;;  %v740_v19 = vsel %vm5596_vm3, %v548_v2, %v739_v43  ;;  %v557_v53 = vsel %vm5268_vm2, %v549_v44, %v556_v33  ;;  %v2656_v45 = vrot.slane %v2654_v50, 5  ;;  %v6253_v43 = vpop.permute.xlu0 %1148  ;;  %v6261_v2 = vpop.permute.xlu2 %3604  ;;  %v1769_v50 = vld [vmem:[#allocation2 + $0x6c] sm:$0xe] }
 0x10d   : > { %741 = vst [vmem:[#allocation2 + $0xa8] sm:$0xf] %v740_v19  ;;  %v2651_v27 = vor.u32 %v2650_v4, %v2647_v42  ;;  %v2660_v40 = vrot.slane %v2658_v21, 4  ;;  %v2664_v41 = vshll.u32 %v5909_v51, 16  ;;  %v4746_v56 = vrot.slane %v2990_v3, 9  ;;  %v5054_v3 = vld [vmem:[%s7193_s2 + $0x28] sm:$0xff] }
 0x10e   : > { %v3261_v24 = vpack.c.b16 %v3239_v59, %v3238_v48  ;;  %742 = vst.msk [vmem:[#allocation2 + $0xac] sm:$0xf] %vm642_vm7, %v557_v53  ;;  %v3116_v29 = vrot.slane %v6220_v8, 5  ;;  %v3119_v22 = vrot.slane %v6225_v54, 5  ;;  %v2204_v49 = vshrl.u32 %v1957_v9, 16  ;;  %4245 = vmatpush.bf16.msra.mxu0 %v5054_v3 }
 0x10f   : > { %1307 = vst.msk [vmem:[#allocation2 + $0xac] sm:$0xf] %vm1208_vm10, %v1145_v63  ;;  %v2652_v14 = vrot.slane %v2651_v27, 4  ;;  %v2661_v6 = vor.u32 %v2660_v40, %v2656_v45  ;;  %v2666_v31 = vrot.slane %v2664_v41, 5  ;;  %v2207_v38 = vshll.u32 %v1957_v9, 16  ;;  %5155 = vmatpush.bf16.msra.mxu2 %v5054_v3 }
 0x110   : > { %3286 = vrot.lane.b32.xlu2 %v3261_v24, %s5207_s27  ;;  %v3117_v51 = vsel %vm5560_vm1, %v4746_v56, %v3116_v29  ;;  %v3118_v35 = vrot.slane %v3116_v29, 4  ;;  %v2206_v1 = vrot.slane %v2204_v49, 4  ;;  %v2213_v23 = vshll.u32 %v6235_v57, 16  ;;  %v2986_v27 = vld [vmem:[#allocation2 + $0x60] sm:$0xe] }
 0x111   : > { %v2657_v46 = vsel %vm5543_vm15, %v2652_v14, %v2656_v45  ;;  %v2662_v0 = vrot.slane %v2661_v6, 4  ;;  %v3832_v36 = vunpack.c.l.b16 %v3117_v51  ;;  %v2209_v10 = vrot.slane %v2207_v38, 5  ;;  %v746_v45 = vld [vmem:[#allocation2 + $0xb4] sm:$0xf]  ;;  %v6301_v3 = vld [vmem:[#allocation2 + $0x2c] sm:$0x1] }
 0x112   : > { %v3736_v28 = vunpack.c.l.b16 %v2657_v46  ;;  %v3120_v47 = vsel %vm5560_vm1, %v3118_v35, %v3119_v22  ;;  %v2215_v48 = vrot.slane %v2213_v23, 5  ;;  %v2217_v30 = vshrl.u32 %v6235_v57, 16  ;;  %v1151_v24 = vpop.permute.xlu1 %1150  ;;  %v5053_v22 = vld [vmem:[%s7193_s2 + $0x20] sm:$0xff] }
 0x113   : > { %v2667_v32 = vsel %vm5543_vm15, %v2662_v0, %v2666_v31  ;;  %v3833_v12 = vunpack.c.l.b16 %v3120_v47  ;;  %v2210_v44 = vor.u32 %v2209_v10, %v2206_v1  ;;  %v2223_v33 = vshll.u32 %v6245_v26, 16  ;;  %v2561_v31 = vld [vmem:[#allocation2 + $0x64] sm:$0xf]  ;;  %v2586_v1 = vld [vmem:[#allocation2 + $0x68] sm:$0x1]  ;;  %4246 = vmatpush.bf16.msra.mxu0 %v5053_v22  ;;  %5156 = vmatpush.bf16.msra.mxu2 %v5053_v22 }
 0x114   : > { %v1304_v13 = vld [vmem:[#allocation2 + $0xa8] sm:$0xf]  ;;  %v3737_v42 = vunpack.c.l.b16 %v2667_v32  ;;  %v2219_v4 = vrot.slane %v2217_v30, 4  ;;  %v560_v21 = vshrl.u32 %v314_v5, 16  ;;  %v563_v9 = vshll.u32 %v314_v5, 16 }
 0x115   : > { %v1305_v59 = vsel %vm5682_vm4, %v6212_v34, %v1304_v13  ;;  %v3854_v19 = vpack.c.b16 %v3833_v12, %v3832_v36  ;;  %v2211_v63 = vrot.slane %v2210_v44, 4  ;;  %v2225_v53 = vrot.slane %v2223_v33, 5  ;;  %v1331_v36 = vld [vmem:[#allocation2 + $0x24] sm:$0xf]  ;;  %v6296_v12 = vpop.permute.xlu0 %1154 }
 0x116   : > { %1306 = vst [vmem:[#allocation2 + $0xa8] sm:$0xf] %v1305_v59  ;;  %v3766_v40 = vpack.c.b16 %v3737_v42, %v3736_v28  ;;  %v2220_v41 = vor.u32 %v2219_v4, %v2215_v48  ;;  %v562_v56 = vrot.slane %v560_v21, 7  ;;  %v571_v29 = vshll.u32 %v6145_v16, 16  ;;  %v6287_v28 = vld [vmem:[#allocation2 + $0x28] sm:$0xf] }
 0x117   : > { %4990 = vmatmul.msk.bf16.gmra.mxu3 %vm3860_vm6, %v3854_v19  ;;  %v2216_v34 = vsel %vm5543_vm15, %v2211_v63, %v2215_v48  ;;  %v4713_v49 = vrot.slane %v1769_v50, 9  ;;  %v1892_v14 = vrot.slane %v6184_v55, 5  ;;  %v1895_v6 = vrot.slane %v6201_v17, 5  ;;  %v316_v42 = vld [vmem:[%s5331_s24 + $0x78] sm:$0xf]  ;;  %v3271_v19 = vpop.permute.xlu2 %3270  ;;  %v5001_v63 = vld [vmem:[#allocation2] sm:$0xff] }
 0x118   : > { %3784 = vrot.lane.b32.xlu1 %v3766_v40, %s5213_s7  ;;  %v2221_v16 = vrot.slane %v2220_v41, 4  ;;  %v3494_v38 = vunpack.c.l.b16 %v2216_v34  ;;  %v565_v51 = vor.u32 %v563_v9, %v562_v56  ;;  %v566_v35 = vrot.slane %v562_v56, 4  ;;  %v5002_v56 = vld [vmem:[#allocation2 + $0xc] sm:$0xff] }
 0x119   : > { %v573_v23 = vor.u32 %v571_v29, %v6164_v11  ;;  %v1893_v52 = vsel %vm5560_vm1, %v4713_v49, %v1892_v14  ;;  %v1894_v46 = vrot.slane %v1892_v14, 4  ;;  %v4742_v0 = vrot.slane %v2986_v27, 9  ;;  %v5052_v11 = vld [vmem:[%s7193_s2 + $0x18] sm:$0xff] }
 0x11a   : > { %v2226_v55 = vsel %vm5543_vm15, %v2221_v16, %v2225_v53  ;;  %v747_v17 = vsel %vm5596_vm3, %v565_v51, %v746_v45  ;;  %v3318_v10 = vunpack.c.l.b16 %v1893_v52  ;;  %v3088_v5 = vrot.slane %v2561_v31, 5  ;;  %v5026_v53 = vld [vmem:[#allocation2 + $0x78] sm:$0xff]  ;;  %4247 = vmatpush.bf16.msra.mxu0 %v5052_v11  ;;  %5157 = vmatpush.bf16.msra.mxu2 %v5052_v11  ;;  %v3269_v51 = vpop.permute.xlu1 %3268 }
 0x11b   : > { %v3495_v47 = vunpack.c.l.b16 %v2226_v55  ;;  %748 = vst [vmem:[#allocation2 + $0xb4] sm:$0xf] %v747_v17  ;;  %v574_v48 = vsel %vm5268_vm2, %v566_v35, %v573_v23  ;;  %v1896_v30 = vsel %vm5560_vm1, %v1894_v46, %v1895_v6  ;;  %v3091_v32 = vrot.slane %v2586_v1, 5  ;;  %v2380_v14 = vld [vmem:[#allocation2 + $0x78] sm:$0xe] }
 0x11c   : > { %749 = vst.msk [vmem:[#allocation2 + $0xb8] sm:$0xf] %vm642_vm7, %v574_v48  ;;  %v3319_v44 = vunpack.c.l.b16 %v1896_v30  ;;  %v3089_v33 = vsel %vm5560_vm1, %v4742_v0, %v3088_v5  ;;  %v3090_v50 = vrot.slane %v3088_v5, 4  ;;  %v1449_v13 = vshrl.u32 %v1331_v36, 16  ;;  %v2991_v35 = vld [vmem:[#allocation2 + $0x9c] sm:$0xe] }
 0x11d   : > { %v3517_v4 = vpack.c.b16 %v3495_v47, %v3494_v38  ;;  %1314 = vst.msk [vmem:[#allocation2 + $0xb8] sm:$0xf] %vm1208_vm10, %v1151_v24  ;;  %v3824_v21 = vunpack.c.l.b16 %v3089_v33  ;;  %v1452_v9 = vshll.u32 %v1331_v36, 16  ;;  %v1458_v59 = vshll.u32 %v6287_v28, 16  ;;  %v5051_v24 = vld [vmem:[%s7193_s2 + $0x10] sm:$0xff]  ;;  %v5050_v33 = vld [vmem:[%s7193_s2 + $0x8] sm:$0xff] }
 0x11e   : > { %v3341_v45 = vpack.c.b16 %v3319_v44, %v3318_v10  ;;  %v3092_v27 = vsel %vm5560_vm1, %v3090_v50, %v3091_v32  ;;  %v1451_v40 = vrot.slane %v1449_v13, 4  ;;  %v1462_v41 = vshrl.u32 %v6287_v28, 16  ;;  %v2571_v0 = vld [vmem:[#allocation2 + $0xa0] sm:$0xf]  ;;  %v2591_v36 = vld [vmem:[#allocation2 + $0xa4] sm:$0x1]  ;;  %4248 = vmatpush.bf16.msra.mxu0 %v5051_v24  ;;  %5158 = vmatpush.bf16.msra.mxu2 %v5051_v24 }
 0x11f   : > { %3542 = vrot.lane.b32.xlu2 %v3517_v4, %s5212_s6  ;;  %v3825_v29 = vunpack.c.l.b16 %v3092_v27  ;;  %v1454_v22 = vrot.slane %v1452_v9, 5  ;;  %v1460_v34 = vrot.slane %v1458_v59, 5  ;;  %v1468_v49 = vshll.u32 %v6301_v3, 16  ;;  %v753_v30 = vld [vmem:[#allocation2 + $0xc0] sm:$0xf] }
 0x120   : > { %3462 = vrot.lane.b32.xlu1 %v5026_v53, %s5209_s29  ;;  %3366 = vrot.lane.b32.xlu0 %v3341_v45, %s5208_s28  ;;  %v1464_v6 = vrot.slane %v1462_v41, 4  ;;  %v6317_v31 = vsel %vm3860_vm6, %v5002_v56, %v3271_v19  ;;  %v577_v16 = vshrl.u32 %v316_v42, 16  ;;  %v580_v38 = vshll.u32 %v316_v42, 16  ;;  %v1763_v59 = vld [vmem:[#allocation2 + $0x24] sm:$0xe] }
 0x121   : > { %v3850_v1 = vpack.c.b16 %v3825_v29, %v3824_v21  ;;  %v1455_v23 = vor.u32 %v1454_v22, %v1451_v40  ;;  %v1470_v52 = vrot.slane %v1468_v49, 5  ;;  %v3863_v46 = vsel %vm3860_vm6, %v5001_v63, %v3269_v51  ;;  %v5042_v45 = vld [vmem:[#allocation2 + $0x84] sm:$0xff] }
 0x122   : > { %v1311_v55 = vld [vmem:[#allocation2 + $0xb4] sm:$0xf]  ;;  %v1465_v17 = vor.u32 %v1464_v6, %v1460_v34  ;;  %v6320_v10 = vrot.slane %v577_v16, 7  ;;  %v4729_v5 = vrot.slane %v2380_v14, 9  ;;  %v2500_v11 = vrot.slane %v6235_v57, 5  ;;  %4249 = vmatpush.bf16.msra.mxu0 %v5050_v33  ;;  %v5049_v40 = vld [vmem:[%s7193_s2] sm:$0xff]  ;;  %5159 = vmatpush.bf16.msra.mxu2 %v5050_v33 }
 0x123   : > { %v1312_v47 = vsel %vm5682_vm4, %v6253_v43, %v1311_v55  ;;  %4986 = vmatmul.msk.bf16.gmra.mxu1 %vm3860_vm6, %v3850_v1  ;;  %v1456_v48 = vrot.slane %v1455_v23, 4  ;;  %v2503_v32 = vrot.slane %v6245_v26, 5  ;;  %v4747_v44 = vrot.slane %v2991_v35, 9  ;;  %v3445_v26 = vpop.permute.xlu0 %3444 }
 0x124   : > { %1313 = vst [vmem:[#allocation2 + $0xb4] sm:$0xf] %v1312_v47  ;;  %v1466_v50 = vrot.slane %v1465_v17, 4  ;;  %v582_v57 = vor.u32 %v580_v38, %v6320_v10  ;;  %v2501_v13 = vsel %vm5560_vm1, %v4729_v5, %v2500_v11  ;;  %v2502_v42 = vrot.slane %v2500_v11, 4  ;;  %v2563_v5 = vld [vmem:[#allocation2 + $0x70] sm:$0xf] }
 0x125   : > { %v1461_v43 = vsel %vm5543_vm15, %v1456_v48, %v1460_v34  ;;  %v3574_v4 = vunpack.c.l.b16 %v2501_v13  ;;  %v3123_v21 = vrot.slane %v2571_v0, 5  ;;  %v3126_v9 = vrot.slane %v2591_v36, 5  ;;  %v2566_v34 = vld [vmem:[#allocation2 + $0x84] sm:$0xf]  ;;  %v6361_v36 = vld [vmem:[#allocation2 + $0x34] sm:$0xf] }
 0x126   : > { %v1471_v19 = vsel %vm5543_vm15, %v1466_v50, %v1470_v52  ;;  %v3226_v63 = vunpack.c.l.b16 %v1461_v43  ;;  %v754_v53 = vsel %vm5596_vm3, %v582_v57, %v753_v30  ;;  %v2504_v27 = vsel %vm5560_vm1, %v2502_v42, %v2503_v32  ;;  %4250 = vmatpush.bf16.msra.mxu0 %v5049_v40  ;;  %5160 = vmatpush.bf16.msra.mxu2 %v5049_v40  ;;  %v2374_v11 = vld [vmem:[#allocation2 + $0x30] sm:$0xe] }
 0x127   : > { %v3227_v41 = vunpack.c.l.b16 %v1471_v19  ;;  %755 = vst [vmem:[#allocation2 + $0xc0] sm:$0xf] %v754_v53  ;;  %v3575_v56 = vunpack.c.l.b16 %v2504_v27  ;;  %v3124_v24 = vsel %vm5560_vm1, %v4747_v44, %v3123_v21  ;;  %v3125_v29 = vrot.slane %v3123_v21, 4  ;;  %v2587_v44 = vld [vmem:[#allocation2 + $0x74] sm:$0x1] }
 0x128   : > { %3718 = vrot.lane.b32.xlu1 %v5042_v45, %s5211_s5  ;;  %v3834_v39 = vunpack.c.l.b16 %v3124_v24  ;;  %v4707_v22 = vrot.slane %v1763_v59, 9  ;;  %v3911_v16 = vsel %vm3909_vm8, %v3863_v46, %v6218_v62  ;;  %v1850_v35 = vrot.slane %v6287_v28, 5  ;;  %v2987_v46 = vld [vmem:[#allocation2 + $0x6c] sm:$0xe]  ;;  %v5020_v45 = vld [vmem:[#allocation2 + $0x30] sm:$0xff] }
 0x129   : > { %v3255_v49 = vpack.c.b16 %v3227_v41, %v3226_v63  ;;  %v3597_v14 = vpack.c.b16 %v3575_v56, %v3574_v4  ;;  %v3127_v6 = vsel %vm5560_vm1, %v3125_v29, %v3126_v9  ;;  %v6353_v51 = vsel %vm3942_vm11, %v3911_v16, %v3445_v26  ;;  %v1974_v26 = vld [vmem:[#allocation2 + $0x38] sm:$0x1] }
 0x12a   : > { %v3835_v38 = vunpack.c.l.b16 %v3127_v6  ;;  %v1853_v1 = vrot.slane %v6301_v3, 5  ;;  %v2813_v23 = vshrl.u32 %v2566_v34, 16  ;;  %v2816_v52 = vshll.u32 %v2566_v34, 16 }
 0x12b   : > { %3274 = vrot.lane.b32.xlu2 %v3255_v49, %s5207_s27  ;;  %3622 = vrot.lane.b32.xlu0 %v3597_v14, %s5210_s30  ;;  %v2822_v0 = vshll.u32 %v6130_v60, 16  ;;  %v2826_v62 = vshrl.u32 %v6130_v60, 16  ;;  %v1851_v28 = vsel %vm5560_vm1, %v4707_v22, %v1850_v35  ;;  %v1852_v3 = vrot.slane %v1850_v35, 4  ;;  %v6367_v60 = vpop.permute.xlu1 %3446  ;;  %v6374_v9 = vpop.permute.xlu0 %3700 }
 0x12c   : > { %v3855_v55 = vpack.c.b16 %v3835_v38, %v3834_v39  ;;  %v2832_v17 = vshll.u32 %v6133_v18, 16  ;;  %v3306_v47 = vunpack.c.l.b16 %v1851_v28  ;;  %v2815_v48 = vrot.slane %v2813_v23, 4 }
 0x12d   : > { %v2818_v30 = vrot.slane %v2816_v52, 5  ;;  %v2824_v32 = vrot.slane %v2822_v0, 5  ;;  %v1854_v50 = vsel %vm5560_vm1, %v1852_v3, %v1853_v1  ;;  %v2828_v57 = vrot.slane %v2826_v62, 4  ;;  %v2573_v62 = vld [vmem:[#allocation2 + $0xac] sm:$0xf] }
 0x12e   : > { %v1318_v33 = vld [vmem:[#allocation2 + $0xc0] sm:$0xf]  ;;  %4991 = vmatmul.msk.bf16.gmra.mxu3 %vm3860_vm6, %v3855_v55  ;;  %v2834_v13 = vrot.slane %v2832_v17, 5  ;;  %v4743_v42 = vrot.slane %v2987_v46, 9  ;;  %v3307_v43 = vunpack.c.l.b16 %v1854_v50  ;;  %v3095_v21 = vrot.slane %v2563_v5, 5 }
 0x12f   : > { %v1319_v18 = vsel %vm5682_vm4, %v6296_v12, %v1318_v33  ;;  %v2819_v4 = vor.u32 %v2818_v30, %v2815_v48  ;;  %v2829_v59 = vor.u32 %v2828_v57, %v2824_v32  ;;  %v3098_v19 = vrot.slane %v2587_v44, 5  ;;  %v1945_v12 = vld [vmem:[#allocation2 + $0x30] sm:$0xf]  ;;  %v1367_v33 = vld [vmem:[#allocation2 + $0x80] sm:$0x1] }
 0x130   : > { %1320 = vst [vmem:[#allocation2 + $0xc0] sm:$0xf] %v1319_v18  ;;  %v4723_v63 = vrot.slane %v2374_v11, 9  ;;  %v2458_v53 = vrot.slane %v6361_v36, 5  ;;  %v3335_v27 = vpack.c.b16 %v3307_v43, %v3306_v47  ;;  %v3096_v41 = vsel %vm5560_vm1, %v4743_v42, %v3095_v21  ;;  %v2592_v5 = vld [vmem:[#allocation2 + $0xb0] sm:$0x1]  ;;  %v6393_v47 = vpop.permute.xlu2 %3526 }
 0x131   : > { %v2820_v40 = vrot.slane %v2819_v4, 4  ;;  %v3097_v37 = vrot.slane %v3095_v21, 4  ;;  %v2830_v56 = vrot.slane %v2829_v59, 4  ;;  %v3826_v24 = vunpack.c.l.b16 %v3096_v41  ;;  %v2992_v11 = vld [vmem:[#allocation2 + $0xa8] sm:$0xe] }
 0x132   : > { %v2459_v29 = vsel %vm5560_vm1, %v4723_v63, %v2458_v53  ;;  %v2460_v39 = vrot.slane %v2458_v53, 4  ;;  %3354 = vrot.lane.b32.xlu1 %v3335_v27, %s5208_s28  ;;  %v2461_v49 = vrot.slane %v1974_v26, 5  ;;  %v2060_v35 = vshrl.u32 %v1945_v12, 16  ;;  %v1346_v53 = vld [vmem:[#allocation2 + $0x7c] sm:$0xf] }
 0x133   : > { %3450 = vrot.lane.b32.xlu2 %v5020_v45, %s5209_s29  ;;  %v2825_v22 = vsel %vm5543_vm15, %v2820_v40, %v2824_v32  ;;  %v3099_v34 = vsel %vm5560_vm1, %v3097_v37, %v3098_v19  ;;  %v3562_v14 = vunpack.c.l.b16 %v2459_v29  ;;  %v2835_v6 = vsel %vm5543_vm15, %v2830_v56, %v2834_v13  ;;  %v3525_v17 = vpop.permute.xlu1 %3524  ;;  %v1770_v13 = vld [vmem:[#allocation2 + $0x78] sm:$0xe]  ;;  %v3351_v21 = vpop.permute.xlu0 %3350 }
 0x134   : > { %v3750_v16 = vunpack.c.l.b16 %v2825_v22  ;;  %v3827_v38 = vunpack.c.l.b16 %v3099_v34  ;;  %v3751_v1 = vunpack.c.l.b16 %v2835_v6  ;;  %v2462_v23 = vsel %vm5560_vm1, %v2460_v39, %v2461_v49  ;;  %v1345_v22 = vld [vmem:[#allocation2 + $0x78] sm:$0xf] }
 0x135   : > { %v2063_v52 = vshll.u32 %v1945_v12, 16  ;;  %v2069_v0 = vshll.u32 %v6361_v36, 16  ;;  %v3563_v55 = vunpack.c.l.b16 %v2462_v23  ;;  %v2062_v28 = vrot.slane %v2060_v35, 4 }
 0x136   : > { %v3851_v46 = vpack.c.b16 %v3827_v38, %v3826_v24  ;;  %v2073_v3 = vshrl.u32 %v6361_v36, 16  ;;  %v3773_v48 = vpack.c.b16 %v3751_v1, %v3750_v16  ;;  %v2079_v44 = vshll.u32 %v1974_v26, 16  ;;  %v5036_v36 = vld [vmem:[#allocation2 + $0x3c] sm:$0xff] }
 0x137   : > { %v2065_v30 = vrot.slane %v2063_v52, 5  ;;  %v2071_v32 = vrot.slane %v2069_v0, 5  ;;  %v3591_v50 = vpack.c.b16 %v3563_v55, %v3562_v14  ;;  %v3977_v43 = vsel %vm3975_vm12, %v6353_v51, %v3525_v17 }
 0x138   : > { %4987 = vmatmul.msk.bf16.gmra.mxu1 %vm3860_vm6, %v3851_v46  ;;  %v2075_v57 = vrot.slane %v2073_v3, 4  ;;  %3798 = vrot.lane.b32.xlu0 %v3773_v48, %s5213_s7  ;;  %v2081_v18 = vrot.slane %v2079_v44, 5  ;;  %v4748_v4 = vrot.slane %v2992_v11, 9  ;;  %v6401_v26 = vsel %vm4008_vm13, %v3977_v43, %v6261_v2  ;;  %v6423_v46 = vpop.permute.xlu2 %3782 }
 0x139   : > { %v2066_v42 = vor.u32 %v2065_v30, %v2062_v28  ;;  %v3130_v19 = vrot.slane %v2573_v62, 5  ;;  %v3133_v63 = vrot.slane %v2592_v5, 5  ;;  %v4714_v27 = vrot.slane %v1770_v13, 9  ;;  %v2554_v62 = vld [vmem:[#allocation2 + $0x3c] sm:$0xf] }
 0x13a   : > { %v2076_v59 = vor.u32 %v2075_v57, %v2071_v32  ;;  %3610 = vrot.lane.b32.xlu1 %v3591_v50, %s5210_s30  ;;  %v1899_v40 = vrot.slane %v1346_v53, 5  ;;  %v1902_v41 = vrot.slane %v1367_v33, 5  ;;  %v3913_v2 = vsel %vm3909_vm8, %v6317_v31, %v3351_v21 }
 0x13b   : > { %3706 = vrot.lane.b32.xlu2 %v5036_v36, %s5211_s5  ;;  %v2067_v45 = vrot.slane %v2066_v42, 4  ;;  %v3131_v51 = vsel %vm5560_vm1, %v4748_v4, %v3130_v19  ;;  %v3132_v12 = vrot.slane %v3130_v19, 4  ;;  %v6421_v35 = vsel %vm3942_vm11, %v3913_v2, %v6367_v60  ;;  %v5179_v36 = vld [vmem:[#allocation2 + $0x40] sm:$0xf]  ;;  %v3781_v4 = vpop.permute.xlu1 %3780 }
 0x13c   : > { %v2077_v37 = vrot.slane %v2076_v59, 4  ;;  %v3836_v24 = vunpack.c.l.b16 %v3131_v51  ;;  %v1900_v29 = vsel %vm5560_vm1, %v4714_v27, %v1899_v40  ;;  %v1901_v39 = vrot.slane %v1899_v40, 4  ;;  %v5181_v51 = vld [vmem:[#allocation2 + $0x7c] sm:$0xf]  ;;  %v5182_v2 = vld [vmem:[#allocation2 + $0x80] sm:$0x1] }
 0x13d   : > { %v2072_v56 = vsel %vm5543_vm15, %v2067_v45, %v2071_v32  ;;  %v3134_v14 = vsel %vm5560_vm1, %v3132_v12, %v3133_v63  ;;  %v3320_v6 = vunpack.c.l.b16 %v1900_v29  ;;  %v1617_v23 = vshrl.u32 %v1345_v22, 16  ;;  %v2988_v32 = vld [vmem:[#allocation2 + $0x78] sm:$0xe] }
 0x13e   : > { %v2082_v34 = vsel %vm5543_vm15, %v2077_v37, %v2081_v18  ;;  %v3482_v49 = vunpack.c.l.b16 %v2072_v56  ;;  %v3837_v38 = vunpack.c.l.b16 %v3134_v14  ;;  %v1903_v31 = vsel %vm5560_vm1, %v1901_v39, %v1902_v41  ;;  %v2381_v39 = vld [vmem:[#allocation2 + $0x84] sm:$0xe] }
 0x13f   : > { %v3483_v16 = vunpack.c.l.b16 %v2082_v34  ;;  %v3321_v1 = vunpack.c.l.b16 %v1903_v31  ;;  %v1620_v52 = vshll.u32 %v1345_v22, 16  ;;  %v1626_v0 = vshll.u32 %v1346_v53, 16 }
 0x140   : > { %v3856_v28 = vpack.c.b16 %v3837_v38, %v3836_v24  ;;  %v1630_v3 = vshrl.u32 %v1346_v53, 16  ;;  %v1636_v17 = vshll.u32 %v1367_v33, 16  ;;  %v1619_v11 = vrot.slane %v1617_v23, 4  ;;  %v5180_v33 = vld [vmem:[#allocation2 + $0x44] sm:$0x1] }
 0x141   : > { %v3511_v55 = vpack.c.b16 %v3483_v16, %v3482_v49  ;;  %v3342_v5 = vpack.c.b16 %v3321_v1, %v3320_v6  ;;  %v1622_v48 = vrot.slane %v1620_v52, 5  ;;  %v1628_v30 = vrot.slane %v1626_v0, 5  ;;  %v6434_v6 = vpop.permute.xlu2 %3460  ;;  %v1960_v23 = vld [vmem:[#allocation2 + $0x88] sm:$0xf] }
 0x142   : > { %4992 = vmatmul.msk.bf16.gmra.mxu3 %vm3860_vm6, %v3856_v28  ;;  %v1632_v60 = vrot.slane %v1630_v3, 4  ;;  %v1638_v44 = vrot.slane %v1636_v17, 5  ;;  %v2669_v50 = vshrl.u32 %v2554_v62, 16  ;;  %v2672_v57 = vshll.u32 %v2554_v62, 16  ;;  %v1981_v62 = vld [vmem:[#allocation2 + $0x8c] sm:$0x1] }
 0x143   : > { %3530 = vrot.lane.b32.xlu0 %v3511_v55, %s5212_s6  ;;  %3368 = vrot.lane.b32.xlu2 %v3342_v5, %s5208_s28  ;;  %v1623_v13 = vor.u32 %v1622_v48, %v1619_v11  ;;  %v2678_v42 = vshll.u32 %v5179_v36, 16  ;;  %v2682_v18 = vshrl.u32 %v5179_v36, 16  ;;  %v2688_v43 = vshll.u32 %v5180_v33, 16  ;;  %v3607_v48 = vpop.permute.xlu0 %3606  ;;  %v3703_v36 = vpop.permute.xlu1 %3702 }
 0x144   : > { %v1633_v21 = vor.u32 %v1632_v60, %v1628_v30  ;;  %v2671_v59 = vrot.slane %v2669_v50, 4  ;;  %v2674_v19 = vrot.slane %v2672_v57, 5  ;;  %v4744_v63 = vrot.slane %v2988_v32, 9 }
 0x145   : > { %v1624_v53 = vrot.slane %v1623_v13, 4  ;;  %v2680_v45 = vrot.slane %v2678_v42, 5  ;;  %v2684_v27 = vrot.slane %v2682_v18, 4  ;;  %v2690_v40 = vrot.slane %v2688_v43, 5 }
 0x146   : > { %v1634_v41 = vrot.slane %v1633_v21, 4  ;;  %v2675_v37 = vor.u32 %v2674_v19, %v2671_v59  ;;  %v3102_v12 = vrot.slane %v5181_v51, 5  ;;  %v3105_v56 = vrot.slane %v5182_v2, 5  ;;  %v2993_v21 = vld [vmem:[#allocation2 + $0xb4] sm:$0xe] }
 0x147   : > { %v1629_v24 = vsel %vm5543_vm15, %v1624_v53, %v1628_v30  ;;  %v2685_v29 = vor.u32 %v2684_v27, %v2680_v45  ;;  %v4043_v0 = vsel %vm4041_vm14, %v6401_v26, %v6374_v9  ;;  %v4730_v55 = vrot.slane %v2381_v39, 9  ;;  %v1959_v30 = vld [vmem:[#allocation2 + $0x84] sm:$0xf] }
 0x148   : > { %v1639_v22 = vsel %vm5543_vm15, %v1634_v41, %v1638_v44  ;;  %v3240_v34 = vunpack.c.l.b16 %v1629_v24  ;;  %v2676_v49 = vrot.slane %v2675_v37, 4  ;;  %v3103_v14 = vsel %vm5560_vm1, %v4744_v63, %v3102_v12  ;;  %v2568_v41 = vld [vmem:[#allocation2 + $0x90] sm:$0xf] }
 0x149   : > { %v3241_v16 = vunpack.c.l.b16 %v1639_v22  ;;  %v2686_v38 = vrot.slane %v2685_v29, 4  ;;  %v3104_v31 = vrot.slane %v3102_v12, 4  ;;  %v3828_v1 = vunpack.c.l.b16 %v3103_v14  ;;  %v6458_v22 = vpop.permute.xlu2 %3716 }
 0x14a   : > { %v2681_v52 = vsel %vm5543_vm15, %v2676_v49, %v2680_v45  ;;  %v2507_v28 = vrot.slane %v1960_v23, 5  ;;  %v4076_v44 = vsel %vm4074_vm0, %v4043_v0, %v3781_v4  ;;  %v2510_v50 = vrot.slane %v1981_v62, 5  ;;  %v2575_v4 = vld [vmem:[#allocation2 + $0xb8] sm:$0xf]  ;;  %v2593_v45 = vld [vmem:[#allocation2 + $0xbc] sm:$0x1] }
 0x14b   : > { %v3262_v3 = vpack.c.b16 %v3241_v16, %v3240_v34  ;;  %v2691_v17 = vsel %vm5543_vm15, %v2686_v38, %v2690_v40  ;;  %v3738_v5 = vunpack.c.l.b16 %v2681_v52  ;;  %v3106_v11 = vsel %vm5560_vm1, %v3104_v31, %v3105_v56  ;;  %4251 = vmatmul.bf16.vlgmr.msra.gmra.mxu0 %v4076_v44  ;;  %v6472_v44 = vld [vmem:[#allocation2 + $0x34] sm:$0xf] }
 0x14c   : > { %v3739_v32 = vunpack.c.l.b16 %v2691_v17  ;;  %v3829_v60 = vunpack.c.l.b16 %v3106_v11  ;;  %v2508_v9 = vsel %vm5560_vm1, %v4730_v55, %v2507_v28  ;;  %v2509_v26 = vrot.slane %v2507_v28, 4  ;;  %v5027_v28 = vld [vmem:[#allocation2 + $0x84] sm:$0xff] }
 0x14d   : > { %3288 = vrot.lane.b32.xlu1 %v3262_v3, %s5207_s27  ;;  %v3576_v57 = vunpack.c.l.b16 %v2508_v9  ;;  %v3979_v13 = vsel %vm3975_vm12, %v6421_v35, %v6393_v47  ;;  %v2228_v43 = vshrl.u32 %v1959_v30, 16  ;;  %v2231_v19 = vshll.u32 %v1959_v30, 16 }
 0x14e   : > { %v3767_v42 = vpack.c.b16 %v3739_v32, %v3738_v5  ;;  %v3852_v18 = vpack.c.b16 %v3829_v60, %v3828_v1  ;;  %v4012_v33 = vsel %vm4008_vm13, %v3979_v13, %v3607_v48  ;;  %v2511_v59 = vsel %vm5560_vm1, %v2509_v26, %v2510_v50  ;;  %v1333_v48 = vld [vmem:[#allocation2 + $0x30] sm:$0xf] }
 0x14f   : > { %v2237_v63 = vshll.u32 %v1960_v23, 16  ;;  %v2241_v53 = vshrl.u32 %v1960_v23, 16  ;;  %v3577_v47 = vunpack.c.l.b16 %v2511_v59  ;;  %v2230_v35 = vrot.slane %v2228_v43, 4 }
 0x150   : > { %3786 = vrot.lane.b32.xlu0 %v3767_v42, %s5213_s7  ;;  %4988 = vmatmul.msk.bf16.gmra.mxu1 %vm3860_vm6, %v3852_v18  ;;  %v2247_v27 = vshll.u32 %v1981_v62, 16  ;;  %v4045_v40 = vsel %vm4041_vm14, %v4012_v33, %v3703_v36  ;;  %v2233_v37 = vrot.slane %v2231_v19, 5  ;;  %v4749_v2 = vrot.slane %v2993_v21, 9  ;;  %v6475_v42 = vld [vmem:[#allocation2 + $0x38] sm:$0x1] }
 0x151   : > { %v2239_v51 = vrot.slane %v2237_v63, 5  ;;  %v2243_v12 = vrot.slane %v2241_v53, 4  ;;  %v3598_v56 = vpack.c.b16 %v3577_v47, %v3576_v57  ;;  %v3137_v29 = vrot.slane %v2575_v4, 5  ;;  %v1947_v47 = vld [vmem:[#allocation2 + $0x3c] sm:$0xf] }
 0x152   : > { %v2249_v24 = vrot.slane %v2247_v27, 5  ;;  %v3140_v39 = vrot.slane %v2593_v45, 5  ;;  %v2234_v34 = vor.u32 %v2233_v37, %v2230_v35  ;;  %v2837_v14 = vshrl.u32 %v2568_v41, 16 }
 0x153   : > { %v2244_v49 = vor.u32 %v2243_v12, %v2239_v51  ;;  %v2840_v16 = vshll.u32 %v2568_v41, 16  ;;  %3624 = vrot.lane.b32.xlu2 %v3598_v56, %s5210_s30  ;;  %v3138_v38 = vsel %vm5560_vm1, %v4749_v2, %v3137_v29  ;;  %v3139_v31 = vrot.slane %v3137_v29, 4  ;;  %v1764_v29 = vld [vmem:[#allocation2 + $0x30] sm:$0xe] }
 0x154   : > { %v2846_v1 = vshll.u32 %v6220_v8, 16  ;;  %v2850_v23 = vshrl.u32 %v6220_v8, 16  ;;  %v2235_v52 = vrot.slane %v2234_v34, 4  ;;  %v3838_v62 = vunpack.c.l.b16 %v3138_v38  ;;  %v5043_v34 = vld [vmem:[#allocation2 + $0x90] sm:$0xff] }
 0x155   : > { %v2245_v0 = vrot.slane %v2244_v49, 4  ;;  %v2839_v55 = vrot.slane %v2837_v14, 4  ;;  %v3141_v3 = vsel %vm5560_vm1, %v3139_v31, %v3140_v39  ;;  %v2842_v17 = vrot.slane %v2840_v16, 5 }
 0x156   : > { %v2848_v5 = vrot.slane %v2846_v1, 5  ;;  %v2852_v11 = vrot.slane %v2850_v23, 4  ;;  %v2240_v30 = vsel %vm5543_vm15, %v2235_v52, %v2239_v51  ;;  %v3839_v60 = vunpack.c.l.b16 %v3141_v3  ;;  %v6490_v51 = vpop.permute.xlu2 %3352  ;;  %v1975_v23 = vld [vmem:[#allocation2 + $0x44] sm:$0x1] }
 0x157   : > { %v2250_v32 = vsel %vm5543_vm15, %v2245_v0, %v2249_v24  ;;  %v2856_v8 = vshll.u32 %v6225_v54, 16  ;;  %v3496_v9 = vunpack.c.l.b16 %v2240_v30  ;;  %v2843_v50 = vor.u32 %v2842_v17, %v2839_v55  ;;  %v6478_v54 = vld [vmem:[#allocation2 + $0x40] sm:$0xf]  ;;  %v2375_v55 = vld [vmem:[#allocation2 + $0x3c] sm:$0xe] }
 0x158   : > { %v3497_v26 = vunpack.c.l.b16 %v2250_v32  ;;  %3464 = vrot.lane.b32.xlu0 %v5027_v28, %s5209_s29  ;;  %v2853_v57 = vor.u32 %v2852_v11, %v2848_v5  ;;  %v3857_v13 = vpack.c.b16 %v3839_v60, %v3838_v62  ;;  %v1473_v18 = vshrl.u32 %v1333_v48, 16 }
 0x159   : > { %v2858_v36 = vrot.slane %v2856_v8, 5  ;;  %v1476_v33 = vshll.u32 %v1333_v48, 16  ;;  %v2844_v4 = vrot.slane %v2843_v50, 4  ;;  %v1482_v59 = vshll.u32 %v6472_v44, 16 }
 0x15a   : > { %v3518_v43 = vpack.c.b16 %v3497_v26, %v3496_v9  ;;  %v2854_v21 = vrot.slane %v2853_v57, 4  ;;  %4993 = vmatmul.msk.bf16.gmra.mxu3 %vm3860_vm6, %v3857_v13  ;;  %v1475_v19 = vrot.slane %v1473_v18, 4  ;;  %v1486_v53 = vshrl.u32 %v6472_v44, 16 }
 0x15b   : > { %v1478_v63 = vrot.slane %v1476_v33, 5  ;;  %v1492_v45 = vshll.u32 %v6475_v42, 16  ;;  %v2849_v35 = vsel %vm5543_vm15, %v2844_v4, %v2848_v5  ;;  %v1484_v41 = vrot.slane %v1482_v59, 5  ;;  %v3285_v59 = vpop.permute.xlu0 %3284 }
 0x15c   : > { %3544 = vrot.lane.b32.xlu1 %v3518_v43, %s5212_s6  ;;  %v2859_v27 = vsel %vm5543_vm15, %v2854_v21, %v2858_v36  ;;  %v4079_v37 = vsel %vm4074_vm0, %v4045_v40, %v6423_v46  ;;  %v3752_v12 = vunpack.c.l.b16 %v2849_v35  ;;  %v1488_v24 = vrot.slane %v1486_v53, 4  ;;  %v791_v21 = vld [vmem:[%s5256_s20 + $0x7c] sm:$0xf] }
 0x15d   : > { %v3753_v2 = vunpack.c.l.b16 %v2859_v27  ;;  %v1479_v56 = vor.u32 %v1478_v63, %v1475_v19  ;;  %4256 = vmatmul.bf16.gmra.mxu0 %v4079_v37  ;;  %v1494_v39 = vrot.slane %v1492_v45, 5  ;;  %v2084_v49 = vshrl.u32 %v1947_v47, 16  ;;  %v1347_v45 = vld [vmem:[#allocation2 + $0x84] sm:$0xf]  ;;  %v6519_v37 = vld [vmem:[#allocation2 + $0x88] sm:$0xf] }
 0x15e   : > { %v2087_v14 = vshll.u32 %v1947_v47, 16  ;;  %v2093_v16 = vshll.u32 %v6478_v54, 16  ;;  %v1489_v1 = vor.u32 %v1488_v24, %v1484_v41  ;;  %v2097_v46 = vshrl.u32 %v6478_v54, 16  ;;  %v6513_v47 = vpop.permute.xlu2 %3608 }
 0x15f   : > { %v3774_v38 = vpack.c.b16 %v3753_v2, %v3752_v12  ;;  %v1480_v31 = vrot.slane %v1479_v56, 4  ;;  %v2086_v40 = vrot.slane %v2084_v49, 4  ;;  %v2103_v62 = vshll.u32 %v1975_v23, 16 }
 0x160   : > { %3720 = vrot.lane.b32.xlu0 %v5043_v34, %s5211_s5  ;;  %v2089_v52 = vrot.slane %v2087_v14, 5  ;;  %v2095_v0 = vrot.slane %v2093_v16, 5  ;;  %v1490_v3 = vrot.slane %v1489_v1, 4  ;;  %v2099_v17 = vrot.slane %v2097_v46, 4  ;;  %v2556_v1 = vld [vmem:[#allocation2 + $0x48] sm:$0xf] }
 0x161   : > { %3800 = vrot.lane.b32.xlu2 %v3774_v38, %s5213_s7  ;;  %v1485_v28 = vsel %vm5543_vm15, %v1480_v31, %v1484_v41  ;;  %v4708_v5 = vrot.slane %v1764_v29, 9  ;;  %v2105_v30 = vrot.slane %v2103_v62, 5  ;;  %v1857_v32 = vrot.slane %v6472_v44, 5  ;;  %v6506_v44 = vpop.permute.xlu1 %3364 }
 0x162   : > { %v3228_v11 = vunpack.c.l.b16 %v1485_v28  ;;  %v2090_v48 = vor.u32 %v2089_v52, %v2086_v40  ;;  %v1495_v60 = vsel %vm5543_vm15, %v1490_v3, %v1494_v39  ;;  %v2100_v8 = vor.u32 %v2099_v17, %v2095_v0  ;;  %v6522_v39 = vld [vmem:[#allocation2 + $0x8c] sm:$0x1] }
 0x163   : > { %v1860_v9 = vrot.slane %v6475_v42, 5  ;;  %v4724_v26 = vrot.slane %v2375_v55, 9  ;;  %v3229_v50 = vunpack.c.l.b16 %v1495_v60  ;;  %v1858_v13 = vsel %vm5560_vm1, %v4708_v5, %v1857_v32 }
 0x164   : > { %v2091_v57 = vrot.slane %v2090_v48, 4  ;;  %v1859_v36 = vrot.slane %v1857_v32, 4  ;;  %v2101_v18 = vrot.slane %v2100_v8, 4  ;;  %v3308_v33 = vunpack.c.l.b16 %v1858_v13  ;;  %v6537_v48 = vpop.f32.mrf.mxu1 }
 0x165   : > { %v2465_v43 = vrot.slane %v6478_v54, 5  ;;  %v2468_v4 = vrot.slane %v1975_v23, 5  ;;  %v3256_v19 = vpack.c.b16 %v3229_v50, %v3228_v11  ;;  %v1054_v53 = vrot.slane %v5518_v58, 4  ;;  %v5009_v50 = vld [vmem:[#allocation2 + $0x60] sm:$0xff] }
 0x166   : > { %v2096_v42 = vsel %vm5543_vm15, %v2091_v57, %v2095_v0  ;;  %v1861_v63 = vsel %vm5560_vm1, %v1859_v36, %v1860_v9  ;;  %v2106_v54 = vsel %vm5543_vm15, %v2101_v18, %v2105_v30  ;;  %v1056_v24 = vshrl.u32 %v791_v21, 16  ;;  %v5021_v30 = vld [vmem:[#allocation2 + $0x3c] sm:$0xff]  ;;  %v5183_v9 = vld [vmem:[#allocation2 + $0x4c] sm:$0xf] }
 0x167   : > { %v3484_v35 = vunpack.c.l.b16 %v2096_v42  ;;  %v3309_v27 = vunpack.c.l.b16 %v1861_v63  ;;  %v2466_v41 = vsel %vm5560_vm1, %v4724_v26, %v2465_v43  ;;  %3276 = vrot.lane.b32.xlu1 %v3256_v19, %s5207_s27  ;;  %v3485_v12 = vunpack.c.l.b16 %v2106_v54  ;;  %v5184_v42 = vld [vmem:[#allocation2 + $0x50] sm:$0x1] }
 0x168   : > { %v2467_v2 = vrot.slane %v2465_v43, 4  ;;  %v3564_v56 = vunpack.c.l.b16 %v2466_v41  ;;  %v1059_v29 = vshll.u32 %v791_v21, 16  ;;  %v1641_v34 = vshrl.u32 %v1347_v45, 16  ;;  %v1961_v43 = vld [vmem:[#allocation2 + $0x90] sm:$0xf] }
 0x169   : > { %v3336_v58 = vpack.c.b16 %v3309_v27, %v3308_v33  ;;  %v1644_v49 = vshll.u32 %v1347_v45, 16  ;;  %v3512_v14 = vpack.c.b16 %v3485_v12, %v3484_v35  ;;  %v6526_v38 = vrot.slane %v1056_v24, 7  ;;  %v6541_v33 = vpop.permute.xlu1 %3620  ;;  %v5037_v12 = vld [vmem:[#allocation2 + $0x48] sm:$0xff] }
 0x16a   : > { %v2469_v16 = vsel %vm5560_vm1, %v2467_v2, %v2468_v4  ;;  %v1650_v31 = vshll.u32 %v6519_v37, 16  ;;  %v1643_v46 = vrot.slane %v1641_v34, 4  ;;  %v1654_v52 = vshrl.u32 %v6519_v37, 16  ;;  %v6543_v4 = vpop.permute.xlu0 %3540  ;;  %v3287_v45 = vpop.permute.xlu2 %3286 }
 0x16b   : > { %3356 = vrot.lane.b32.xlu0 %v3336_v58, %s5208_s28  ;;  %v3565_v23 = vunpack.c.l.b16 %v2469_v16  ;;  %v1646_v40 = vrot.slane %v1644_v49, 5  ;;  %3532 = vrot.lane.b32.xlu2 %v3512_v14, %s5212_s6  ;;  %v1061_v0 = vor.u32 %v1059_v29, %v6526_v38  ;;  %v1660_v55 = vshll.u32 %v6522_v39, 16  ;;  %v6551_v58 = vld [vmem:[#allocation2 + $0x94] sm:$0xf] }
 0x16c   : > { %v1652_v62 = vrot.slane %v1650_v31, 5  ;;  %v1063_v28 = vrot.slane %v6526_v38, 4  ;;  %v1656_v5 = vrot.slane %v1654_v52, 4  ;;  %v2693_v11 = vshrl.u32 %v2556_v1, 16  ;;  %v6558_v31 = vld [vmem:[#allocation2 + $0x98] sm:$0x1] }
 0x16d   : > { %v6535_v3 = vpack.c.b16 %v3565_v23, %v3564_v56  ;;  %v1647_v17 = vor.u32 %v1646_v40, %v1643_v46  ;;  %v1062_v32 = vsel %vm5268_vm2, %v1054_v53, %v1061_v0  ;;  %v1662_v60 = vrot.slane %v1660_v55, 5  ;;  %v5010_v46 = vld [vmem:[#allocation2 + $0x6c] sm:$0xff]  ;;  %v1771_v55 = vld [vmem:[#allocation2 + $0x84] sm:$0xe] }
 0x16e   : > { %v2696_v8 = vshll.u32 %v2556_v1, 16  ;;  %v2702_v26 = vshll.u32 %v5183_v9, 16  ;;  %v1657_v13 = vor.u32 %v1656_v5, %v1652_v62  ;;  %v2695_v36 = vrot.slane %v2693_v11, 4 }
 0x16f   : > { %v1648_v57 = vrot.slane %v1647_v17, 4  ;;  %v2706_v18 = vshrl.u32 %v5183_v9, 16  ;;  %3452 = vrot.lane.b32.xlu1 %v5021_v30, %s5209_s29  ;;  %v2712_v63 = vshll.u32 %v5184_v42, 16  ;;  %v3887_v53 = vsel %vm3860_vm6, %v5009_v50, %v3285_v59 }
 0x170   : > { %v2698_v21 = vrot.slane %v2696_v8, 5  ;;  %v2704_v19 = vrot.slane %v2702_v26, 5  ;;  %v1658_v35 = vrot.slane %v1657_v13, 4  ;;  %v3927_v41 = vsel %vm3909_vm8, %v3887_v53, %v6506_v44 }
 0x171   : > { %v1653_v54 = vsel %vm5543_vm15, %v1648_v57, %v1652_v62  ;;  %v2708_v27 = vrot.slane %v2706_v18, 4  ;;  %v2714_v24 = vrot.slane %v2712_v63, 5  ;;  %v2252_v29 = vshrl.u32 %v1961_v43, 16  ;;  %v6569_v50 = vpop.permute.xlu1 %3796  ;;  %v6571_v57 = vpop.f32.mrf.mxu1 }
 0x172   : > { %v3242_v2 = vunpack.c.l.b16 %v1653_v54  ;;  %v2699_v56 = vor.u32 %v2698_v21, %v2695_v36  ;;  %v1663_v59 = vsel %vm5543_vm15, %v1658_v35, %v1662_v60  ;;  %v2255_v49 = vshll.u32 %v1961_v43, 16  ;;  %v3273_v53 = vpop.permute.xlu0 %3272 }
 0x173   : > { %1156 = vrot.lane.b32.xlu0 %v1062_v32, %s5205_s21  ;;  %v2709_v34 = vor.u32 %v2708_v27, %v2704_v19  ;;  %v2261_v14 = vshll.u32 %v6551_v58, 16  ;;  %3708 = vrot.lane.b32.xlu2 %v5037_v12, %s5211_s5  ;;  %v3243_v16 = vunpack.c.l.b16 %v1663_v59  ;;  %v2254_v1 = vrot.slane %v2252_v29, 4  ;;  %v1335_v32 = vld [vmem:[#allocation2 + $0x3c] sm:$0xf] }
 0x174   : > { %v2700_v44 = vrot.slane %v2699_v56, 4  ;;  %v2265_v23 = vshrl.u32 %v6551_v58, 16  ;;  %v2257_v52 = vrot.slane %v2255_v49, 5  ;;  %v2271_v62 = vshll.u32 %v6558_v31, 16 }
 0x175   : > { %v2710_v40 = vrot.slane %v2709_v34, 4  ;;  %v2263_v0 = vrot.slane %v2261_v14, 5  ;;  %v3263_v17 = vpack.c.b16 %v3243_v16, %v3242_v2  ;;  %v6565_v30 = vsel %vm3860_vm6, %v5010_v46, %v3287_v45  ;;  %v1362_v14 = vld [vmem:[#allocation2 + $0x44] sm:$0x1] }
 0x176   : > { %v2705_v5 = vsel %vm5543_vm15, %v2700_v44, %v2704_v19  ;;  %v2267_v11 = vrot.slane %v2265_v23, 4  ;;  %v2258_v9 = vor.u32 %v2257_v52, %v2254_v1  ;;  %v2273_v26 = vrot.slane %v2271_v62, 5 }
 0x177   : > { %v2715_v60 = vsel %vm5543_vm15, %v2710_v40, %v2714_v24  ;;  %v3740_v8 = vunpack.c.l.b16 %v2705_v5  ;;  %3612 = vrot.lane.b32.xlu1 %v6535_v3, %s5210_s30  ;;  %v4715_v18 = vrot.slane %v1771_v55, 9  ;;  %v1906_v43 = vrot.slane %v6519_v37, 5  ;;  %v1336_v3 = vld [vmem:[#allocation2 + $0x40] sm:$0xf]  ;;  %v5003_v55 = vld [vmem:[#allocation2 + $0x18] sm:$0xff] }
 0x178   : > { %v3741_v13 = vunpack.c.l.b16 %v2715_v60  ;;  %v2268_v36 = vor.u32 %v2267_v11, %v2263_v0  ;;  %v2259_v21 = vrot.slane %v2258_v9, 4  ;;  %v1909_v19 = vrot.slane %v6522_v39, 5 }
 0x179   : > { %v3960_v42 = vsel %vm3942_vm11, %v3927_v41, %v6434_v6  ;;  %v1497_v63 = vshrl.u32 %v1335_v32, 16  ;;  %v1907_v35 = vsel %vm5560_vm1, %v4715_v18, %v1906_v43  ;;  %v1908_v27 = vrot.slane %v1906_v43, 4  ;;  %v6581_v12 = vpop.permute.xlu2 %3542  ;;  %v2382_v6 = vld [vmem:[#allocation2 + $0x90] sm:$0xe]  ;;  %v2570_v43 = vld [vmem:[#allocation2 + $0x9c] sm:$0xf] }
 0x17a   : > { %v3768_v45 = vpack.c.b16 %v3741_v13, %v3740_v8  ;;  %v2269_v54 = vrot.slane %v2268_v36, 4  ;;  %v2264_v37 = vsel %vm5543_vm15, %v2259_v21, %v2263_v0  ;;  %v3322_v2 = vunpack.c.l.b16 %v1907_v35  ;;  %v6603_v13 = vpop.f32.mrf.mxu1 }
 0x17b   : > { %v3993_v39 = vsel %vm3975_vm12, %v3960_v42, %v6543_v4  ;;  %v1499_v56 = vrot.slane %v1497_v63, 4  ;;  %3290 = vrot.lane.b32.xlu2 %v3263_v17, %s5207_s27  ;;  %v3498_v24 = vunpack.c.l.b16 %v2264_v37  ;;  %v1910_v29 = vsel %vm5560_vm1, %v1908_v27, %v1909_v19  ;;  %v1765_v17 = vld [vmem:[#allocation2 + $0x3c] sm:$0xe]  ;;  %v5004_v42 = vld [vmem:[#allocation2 + $0x24] sm:$0xff] }
 0x17c   : > { %3788 = vrot.lane.b32.xlu0 %v3768_v45, %s5213_s7  ;;  %v2274_v41 = vsel %vm5543_vm15, %v2269_v54, %v2273_v26  ;;  %v4026_v59 = vsel %vm4008_vm13, %v3993_v39, %v6541_v33  ;;  %v3323_v49 = vunpack.c.l.b16 %v1910_v29  ;;  %v1500_v4 = vshll.u32 %v1335_v32, 16  ;;  %v3529_v26 = vpop.permute.xlu1 %3528  ;;  %v5028_v39 = vld [vmem:[#allocation2 + $0x90] sm:$0xff] }
 0x17d   : > { %v3499_v34 = vunpack.c.l.b16 %v2274_v41  ;;  %v1506_v16 = vshll.u32 %v1336_v3, 16  ;;  %v1510_v44 = vshrl.u32 %v1336_v3, 16  ;;  %v1516_v1 = vshll.u32 %v1362_v14, 16 }
 0x17e   : > { %v4731_v23 = vrot.slane %v2382_v6, 9  ;;  %v2514_v46 = vrot.slane %v6551_v58, 5  ;;  %v3343_v52 = vpack.c.b16 %v3323_v49, %v3322_v2  ;;  %v1502_v0 = vrot.slane %v1500_v4, 5  ;;  %v2376_v4 = vld [vmem:[#allocation2 + $0x48] sm:$0xe] }
 0x17f   : > { %v3519_v40 = vpack.c.b16 %v3499_v34, %v3498_v24  ;;  %v1508_v62 = vrot.slane %v1506_v16, 5  ;;  %1158 = vrot.lane.b32.xlu1 %v1063_v28, %s5205_s21  ;;  %v1512_v33 = vrot.slane %v1510_v44, 4  ;;  %v1518_v5 = vrot.slane %v1516_v1, 5  ;;  %v5185_v16 = vld [vmem:[#allocation2 + $0xa0] sm:$0xf] }
 0x180   : > { %v2515_v11 = vsel %vm5560_vm1, %v4731_v23, %v2514_v46  ;;  %v2516_v32 = vrot.slane %v2514_v46, 4  ;;  %v1503_v60 = vor.u32 %v1502_v0, %v1499_v56  ;;  %v2517_v8 = vrot.slane %v6558_v31, 5  ;;  %v5186_v23 = vld [vmem:[#allocation2 + $0xa4] sm:$0x1] }
 0x181   : > { %v3578_v58 = vunpack.c.l.b16 %v2515_v11  ;;  %v3869_v9 = vsel %vm3860_vm6, %v5003_v55, %v3273_v53  ;;  %v1513_v36 = vor.u32 %v1512_v33, %v1508_v62  ;;  %v4059_v38 = vsel %vm4041_vm14, %v4026_v59, %v6458_v22  ;;  %v3449_v53 = vpop.permute.xlu0 %3448  ;;  %v1949_v33 = vld [vmem:[#allocation2 + $0x48] sm:$0xf] }
 0x182   : > { %v4709_v28 = vrot.slane %v1765_v17, 9  ;;  %v1864_v18 = vrot.slane %v1336_v3, 5  ;;  %v1504_v21 = vrot.slane %v1503_v60, 4  ;;  %v2518_v19 = vsel %vm5560_vm1, %v2516_v32, %v2517_v8 }
 0x183   : > { %v4100_v31 = vsel %vm4074_vm0, %v4059_v38, %v6569_v50  ;;  %v1867_v63 = vrot.slane %v1362_v14, 5  ;;  %3546 = vrot.lane.b32.xlu2 %v3519_v40, %s5212_s6  ;;  %v1514_v45 = vrot.slane %v1513_v36, 4  ;;  %v3579_v54 = vunpack.c.l.b16 %v2518_v19  ;;  %v1950_v14 = vld [vmem:[#allocation2 + $0x4c] sm:$0xf] }
 0x184   : > { %3370 = vrot.lane.b32.xlu0 %v3343_v52, %s5208_s28  ;;  %v1865_v35 = vsel %vm5560_vm1, %v4709_v28, %v1864_v18  ;;  %v1866_v27 = vrot.slane %v1864_v18, 4  ;;  %v1509_v3 = vsel %vm5543_vm15, %v1504_v21, %v1508_v62  ;;  %4291 = vmatmul.bf16.vlgmr.msra.gmra.mxu2 %v4100_v31  ;;  %v2861_v2 = vshrl.u32 %v2570_v43, 16  ;;  %v1976_v52 = vld [vmem:[#allocation2 + $0x50] sm:$0x1]  ;;  %v6631_v18 = vpop.f32.mrf.mxu1 }
 0x185   : > { %v3275_v22 = vpop.permute.xlu2 %3274  ;;  %v3310_v37 = vunpack.c.l.b16 %v1865_v35  ;;  %v1519_v56 = vsel %vm5543_vm15, %v1514_v45, %v1518_v5  ;;  %v3230_v6 = vunpack.c.l.b16 %v1509_v3  ;;  %v3599_v41 = vpack.c.b16 %v3579_v54, %v3578_v58 }
 0x186   : > { %v6618_v50 = vsel %vm3860_vm6, %v5004_v42, %v3275_v22  ;;  %v1868_v24 = vsel %vm5560_vm1, %v1866_v27, %v1867_v63  ;;  %v3231_v29 = vunpack.c.l.b16 %v1519_v56  ;;  %v2863_v34 = vrot.slane %v2861_v2, 4 }
 0x187   : > { %v3311_v59 = vunpack.c.l.b16 %v1868_v24  ;;  %v2864_v49 = vshll.u32 %v2570_v43, 16  ;;  %3466 = vrot.lane.b32.xlu1 %v5028_v39, %s5209_s29  ;;  %v2870_v44 = vshll.u32 %v5185_v16, 16  ;;  %v2874_v1 = vshrl.u32 %v5185_v16, 16  ;;  %v1772_v39 = vld [vmem:[#allocation2 + $0x90] sm:$0xe] }
 0x188   : > { %v2880_v46 = vshll.u32 %v5186_v23, 16  ;;  %v3915_v40 = vsel %vm3909_vm8, %v3869_v9, %v6490_v51  ;;  %v3257_v0 = vpack.c.b16 %v3231_v29, %v3230_v6  ;;  %v4725_v58 = vrot.slane %v2376_v4, 9  ;;  %v1350_v29 = vld [vmem:[#allocation2 + $0x94] sm:$0xf]  ;;  %v1369_v4 = vld [vmem:[#allocation2 + $0x98] sm:$0x1] }
 0x189   : > { %v6627_v62 = vpack.c.b16 %v3311_v59, %v3310_v37  ;;  %v2866_v55 = vrot.slane %v2864_v49, 5  ;;  %v3948_v17 = vsel %vm3942_vm11, %v3915_v40, %v3449_v53  ;;  %v2872_v5 = vrot.slane %v2870_v44, 5  ;;  %v3705_v63 = vpop.permute.xlu0 %3704  ;;  %v5044_v53 = vld [vmem:[#allocation2 + $0x9c] sm:$0xff]  ;;  %v1349_v16 = vld [vmem:[#allocation2 + $0x90] sm:$0xf]  ;;  %v5022_v44 = vld [vmem:[#allocation2 + $0x48] sm:$0xff] }
 0x18a   : > { %v2876_v11 = vrot.slane %v2874_v1, 4  ;;  %v2882_v32 = vrot.slane %v2880_v46, 5  ;;  %v3981_v60 = vsel %vm3975_vm12, %v3948_v17, %v3529_v26  ;;  %v2472_v36 = vrot.slane %v1950_v14, 5  ;;  %v3785_v28 = vpop.permute.xlu1 %3784 }
 0x18b   : > { %v2867_v8 = vor.u32 %v2866_v55, %v2863_v34  ;;  %v2475_v38 = vrot.slane %v1976_v52, 5  ;;  %3278 = vrot.lane.b32.xlu2 %v3257_v0, %s5207_s27  ;;  %v2108_v9 = vshrl.u32 %v1949_v33, 16  ;;  %v2111_v43 = vshll.u32 %v1949_v33, 16 }
 0x18c   : > { %3626 = vrot.lane.b32.xlu0 %v3599_v41, %s5210_s30  ;;  %v2877_v51 = vor.u32 %v2876_v11, %v2872_v5  ;;  %v2117_v21 = vshll.u32 %v1950_v14, 16  ;;  %v2473_v31 = vsel %vm5560_vm1, %v4725_v58, %v2472_v36  ;;  %v2474_v26 = vrot.slane %v2472_v36, 4 }
 0x18d   : > { %v2868_v19 = vrot.slane %v2867_v8, 4  ;;  %v2121_v42 = vshrl.u32 %v1950_v14, 16  ;;  %v3566_v54 = vunpack.c.l.b16 %v2473_v31  ;;  %v2110_v22 = vrot.slane %v2108_v9, 4  ;;  %v6660_v9 = vpop.f32.mrf.mxu1 }
 0x18e   : > { %v2878_v45 = vrot.slane %v2877_v51, 4  ;;  %v2113_v35 = vrot.slane %v2111_v43, 5  ;;  %v2476_v3 = vsel %vm5560_vm1, %v2474_v26, %v2475_v38  ;;  %v2119_v37 = vrot.slane %v2117_v21, 5  ;;  %v2558_v38 = vld [vmem:[#allocation2 + $0x54] sm:$0xf] }
 0x18f   : > { %v2873_v27 = vsel %vm5543_vm15, %v2868_v19, %v2872_v5  ;;  %v2123_v2 = vrot.slane %v2121_v42, 4  ;;  %3722 = vrot.lane.b32.xlu1 %v5044_v53, %s5211_s5  ;;  %v3567_v41 = vunpack.c.l.b16 %v2476_v3  ;;  %v2127_v49 = vshll.u32 %v1976_v52, 16  ;;  %v6650_v5 = vpop.permute.xlu2 %3450 }
 0x190   : > { %v2883_v56 = vsel %vm5543_vm15, %v2878_v45, %v2882_v32  ;;  %v3754_v6 = vunpack.c.l.b16 %v2873_v27  ;;  %v2114_v24 = vor.u32 %v2113_v35, %v2110_v22  ;;  %v4014_v14 = vsel %vm4008_vm13, %v3981_v60, %v6513_v47 }
 0x191   : > { %v3755_v59 = vunpack.c.l.b16 %v2883_v56  ;;  %v2124_v34 = vor.u32 %v2123_v2, %v2119_v37  ;;  %v6646_v1 = vpack.c.b16 %v3567_v41, %v3566_v54  ;;  %v4047_v46 = vsel %vm4041_vm14, %v4014_v14, %v3705_v63  ;;  %v5038_v56 = vld [vmem:[#allocation2 + $0x54] sm:$0xff] }
 0x192   : > { %v2115_v23 = vrot.slane %v2114_v24, 4  ;;  %v4716_v40 = vrot.slane %v1772_v39, 9  ;;  %v2129_v17 = vrot.slane %v2127_v49, 5  ;;  %v1913_v33 = vrot.slane %v1350_v29, 5  ;;  %v3463_v51 = vpop.permute.xlu1 %3462  ;;  %v3367_v53 = vpop.permute.xlu0 %3366  ;;  %v2383_v39 = vld [vmem:[#allocation2 + $0x9c] sm:$0xe] }
 0x193   : > { %v3775_v0 = vpack.c.b16 %v3755_v59, %v3754_v6  ;;  %v2125_v55 = vrot.slane %v2124_v34, 4  ;;  %3454 = vrot.lane.b32.xlu2 %v5022_v44, %s5209_s29  ;;  %v1916_v52 = vrot.slane %v1369_v4, 5  ;;  %v4082_v11 = vsel %vm4074_vm0, %v4047_v46, %v3785_v28  ;;  %v5187_v59 = vld [vmem:[#allocation2 + $0x58] sm:$0xf]  ;;  %v1964_v34 = vld [vmem:[#allocation2 + $0xa0] sm:$0xf] }
 0x194   : > { %v2120_v47 = vsel %vm5543_vm15, %v2115_v23, %v2119_v37  ;;  %v1665_v32 = vshrl.u32 %v1349_v16, 16  ;;  %v1914_v58 = vsel %vm5560_vm1, %v4716_v40, %v1913_v33  ;;  %v1915_v36 = vrot.slane %v1913_v33, 4  ;;  %4261 = vmatmul.bf16.gmra.mxu0 %v4082_v11  ;;  %v1983_v44 = vld [vmem:[#allocation2 + $0xa4] sm:$0x1] }
 0x195   : > { %3802 = vrot.lane.b32.xlu0 %v3775_v0, %s5213_s7  ;;  %v2130_v60 = vsel %vm5543_vm15, %v2125_v55, %v2129_v17  ;;  %v3486_v8 = vunpack.c.l.b16 %v2120_v47  ;;  %v3324_v21 = vunpack.c.l.b16 %v1914_v58  ;;  %v1668_v28 = vshll.u32 %v1349_v16, 16 }
 0x196   : > { %v3487_v43 = vunpack.c.l.b16 %v2130_v60  ;;  %v1667_v19 = vrot.slane %v1665_v32, 4  ;;  %v1917_v31 = vsel %vm5560_vm1, %v1915_v36, %v1916_v52  ;;  %v1674_v26 = vshll.u32 %v1350_v29, 16  ;;  %v1963_v52 = vld [vmem:[#allocation2 + $0x9c] sm:$0xf] }
 0x197   : > { %v1678_v42 = vshrl.u32 %v1350_v29, 16  ;;  %v1684_v63 = vshll.u32 %v1369_v4, 16  ;;  %3358 = vrot.lane.b32.xlu1 %v6627_v62, %s5208_s28  ;;  %v3325_v54 = vunpack.c.l.b16 %v1917_v31  ;;  %v1670_v22 = vrot.slane %v1668_v28, 5  ;;  %v5188_v62 = vld [vmem:[#allocation2 + $0x5c] sm:$0x1]  ;;  %v6670_v11 = vpop.permute.xlu2 %3706 }
 0x198   : > { %v3513_v45 = vpack.c.b16 %v3487_v43, %v3486_v8  ;;  %v2717_v35 = vshrl.u32 %v2558_v38, 16  ;;  %v1676_v27 = vrot.slane %v1674_v26, 5  ;;  %v2720_v2 = vshll.u32 %v2558_v38, 16 }
 0x199   : > { %v1680_v3 = vrot.slane %v1678_v42, 4  ;;  %v1686_v37 = vrot.slane %v1684_v63, 5  ;;  %v3344_v6 = vpack.c.b16 %v3325_v54, %v3324_v21  ;;  %v1671_v41 = vor.u32 %v1670_v22, %v1667_v19  ;;  %v6679_v19 = vpop.f32.mrf.mxu1 }
 0x19a   : > { %v2719_v24 = vrot.slane %v2717_v35, 4  ;;  %v2726_v29 = vshll.u32 %v5187_v59, 16  ;;  %v2722_v14 = vrot.slane %v2720_v2, 5  ;;  %v2730_v4 = vshrl.u32 %v5187_v59, 16  ;;  %v6677_v21 = vpop.permute.xlu1 %3718 }
 0x19b   : > { %v1681_v49 = vor.u32 %v1680_v3, %v1676_v27  ;;  %v2736_v16 = vshll.u32 %v5188_v62, 16  ;;  %3710 = vrot.lane.b32.xlu2 %v5038_v56, %s5211_s5  ;;  %v1672_v23 = vrot.slane %v1671_v41, 4  ;;  %v3929_v40 = vsel %vm3909_vm8, %v6565_v30, %v3367_v53  ;;  %v2572_v56 = vld [vmem:[#allocation2 + $0xa8] sm:$0xf] }
 0x19c   : > { %v2728_v46 = vrot.slane %v2726_v29, 5  ;;  %v4732_v0 = vrot.slane %v2383_v39, 9  ;;  %v2723_v17 = vor.u32 %v2722_v14, %v2719_v24  ;;  %v2732_v33 = vrot.slane %v2730_v4, 4 }
 0x19d   : > { %3534 = vrot.lane.b32.xlu0 %v3513_v45, %s5212_s6  ;;  %v1682_v55 = vrot.slane %v1681_v49, 4  ;;  %v2738_v47 = vrot.slane %v2736_v16, 5  ;;  %v1677_v32 = vsel %vm5543_vm15, %v1672_v23, %v1676_v27  ;;  %v3962_v60 = vsel %vm3942_vm11, %v3929_v40, %v3463_v51  ;;  %v3623_v54 = vpop.permute.xlu0 %3622  ;;  %v1337_v16 = vld [vmem:[#allocation2 + $0x48] sm:$0xf] }
 0x19e   : > { %v2521_v8 = vrot.slane %v1964_v34, 5  ;;  %v2524_v58 = vrot.slane %v1983_v44, 5  ;;  %v3244_v36 = vunpack.c.l.b16 %v1677_v32  ;;  %v2724_v38 = vrot.slane %v2723_v17, 4 }
 0x19f   : > { %v1687_v30 = vsel %vm5543_vm15, %v1682_v55, %v1686_v37  ;;  %v2733_v43 = vor.u32 %v2732_v33, %v2728_v46  ;;  %3614 = vrot.lane.b32.xlu1 %v6646_v1, %s5210_s30  ;;  %v2276_v26 = vshrl.u32 %v1963_v52, 16  ;;  %v2279_v45 = vshll.u32 %v1963_v52, 16  ;;  %v5189_v33 = vld [vmem:[#allocation2 + $0xac] sm:$0xf]  ;;  %v5190_v52 = vld [vmem:[#allocation2 + $0xb0] sm:$0x1] }
 0x1a0   : > { %v3245_v28 = vunpack.c.l.b16 %v1687_v30  ;;  %v2522_v31 = vsel %vm5560_vm1, %v4732_v0, %v2521_v8  ;;  %v2523_v51 = vrot.slane %v2521_v8, 4  ;;  %v2729_v42 = vsel %vm5543_vm15, %v2724_v38, %v2728_v46 }
 0x1a1   : > { %v2734_v63 = vrot.slane %v2733_v43, 4  ;;  %v3580_v53 = vunpack.c.l.b16 %v2522_v31  ;;  %v3742_v35 = vunpack.c.l.b16 %v2729_v42  ;;  %v2278_v3 = vrot.slane %v2276_v26, 4 }
 0x1a2   : > { %v3264_v22 = vpack.c.b16 %v3245_v28, %v3244_v36  ;;  %v2525_v27 = vsel %vm5560_vm1, %v2523_v51, %v2524_v58  ;;  %v2281_v2 = vrot.slane %v2279_v45, 5  ;;  %v2285_v39 = vshll.u32 %v1964_v34, 16  ;;  %v6703_v28 = vpop.f32.mrf.mxu1  ;;  %v6705_v45 = vld [vmem:[#allocation2 + $0x50] sm:$0x1] }
 0x1a3   : > { %v2739_v1 = vsel %vm5543_vm15, %v2734_v63, %v2738_v47  ;;  %v3581_v37 = vunpack.c.l.b16 %v2525_v27  ;;  %3372 = vrot.lane.b32.xlu2 %v3344_v6, %s5208_s28  ;;  %v2289_v24 = vshrl.u32 %v1964_v34, 16  ;;  %v2295_v59 = vshll.u32 %v1983_v44, 16 }
 0x1a4   : > { %v3743_v41 = vunpack.c.l.b16 %v2739_v1  ;;  %v3995_v29 = vsel %vm3975_vm12, %v3962_v60, %v6581_v12  ;;  %v2282_v14 = vor.u32 %v2281_v2, %v2278_v3  ;;  %v2287_v4 = vrot.slane %v2285_v39, 5  ;;  %v6697_v12 = vpop.permute.xlu2 %3368  ;;  %v6699_v60 = vld [vmem:[#allocation2 + $0x4c] sm:$0xf]  ;;  %v3355_v43 = vpop.permute.xlu1 %3354 }
 0x1a5   : > { %v3600_v49 = vpack.c.b16 %v3581_v37, %v3580_v53  ;;  %v4028_v62 = vsel %vm4008_vm13, %v3995_v29, %v3623_v54  ;;  %v2291_v46 = vrot.slane %v2289_v24, 4  ;;  %v2297_v40 = vrot.slane %v2295_v59, 5  ;;  %v6715_v24 = vld [vmem:[#allocation2 + $0x58] sm:$0xf]  ;;  %v5029_v59 = vld [vmem:[#allocation2 + $0x9c] sm:$0xff] }
 0x1a6   : > { %v3769_v23 = vpack.c.b16 %v3743_v41, %v3742_v35  ;;  %v2885_v0 = vshrl.u32 %v2572_v56, 16  ;;  %v2283_v55 = vrot.slane %v2282_v14, 4  ;;  %v2888_v17 = vshll.u32 %v2572_v56, 16 }
 0x1a7   : > { %v2894_v6 = vshll.u32 %v5189_v33, 16  ;;  %v2898_v47 = vshrl.u32 %v5189_v33, 16  ;;  %3292 = vrot.lane.b32.xlu1 %v3264_v22, %s5207_s27  ;;  %v2292_v34 = vor.u32 %v2291_v46, %v2287_v4  ;;  %v2904_v32 = vshll.u32 %v5190_v52, 16 }
 0x1a8   : > { %3790 = vrot.lane.b32.xlu0 %v3769_v23, %s5213_s7  ;;  %v2887_v44 = vrot.slane %v2885_v0, 4  ;;  %v1521_v8 = vshrl.u32 %v1337_v16, 16  ;;  %v2288_v58 = vsel %vm5543_vm15, %v2283_v55, %v2287_v4  ;;  %v2890_v30 = vrot.slane %v2888_v17, 5 }
 0x1a9   : > { %v2896_v36 = vrot.slane %v2894_v6, 5  ;;  %v2900_v38 = vrot.slane %v2898_v47, 4  ;;  %v2293_v31 = vrot.slane %v2292_v34, 4  ;;  %v3500_v51 = vunpack.c.l.b16 %v2288_v58 }
 0x1aa   : > { %v2906_v26 = vrot.slane %v2904_v32, 5  ;;  %v1523_v42 = vrot.slane %v1521_v8, 4  ;;  %v2891_v63 = vor.u32 %v2890_v30, %v2887_v44  ;;  %v1524_v54 = vshll.u32 %v1337_v16, 16  ;;  %v3799_v35 = vpop.permute.xlu0 %3798  ;;  %v1951_v16 = vld [vmem:[#allocation2 + $0x54] sm:$0xf] }
 0x1ab   : > { %v2901_v53 = vor.u32 %v2900_v38, %v2896_v36  ;;  %v1530_v22 = vshll.u32 %v6699_v60, 16  ;;  %3628 = vrot.lane.b32.xlu2 %v3600_v49, %s5210_s30  ;;  %v2298_v27 = vsel %vm5543_vm15, %v2293_v31, %v2297_v40  ;;  %v1534_v3 = vshrl.u32 %v6699_v60, 16  ;;  %v1766_v30 = vld [vmem:[#allocation2 + $0x48] sm:$0xe] }
 0x1ac   : > { %v1540_v1 = vshll.u32 %v6705_v45, 16  ;;  %v3917_v37 = vsel %vm3909_vm8, %v6618_v50, %v3355_v43  ;;  %v3501_v2 = vunpack.c.l.b16 %v2298_v27  ;;  %v2892_v39 = vrot.slane %v2891_v63, 4 }
 0x1ad   : > { %v2902_v56 = vrot.slane %v2901_v53, 4  ;;  %v1526_v41 = vrot.slane %v1524_v54, 5  ;;  %v1532_v29 = vrot.slane %v1530_v22, 5  ;;  %v1536_v14 = vrot.slane %v1534_v3, 4  ;;  %v6729_v52 = vpop.permute.xlu2 %3624 }
 0x1ae   : > { %v1542_v49 = vrot.slane %v1540_v1, 5  ;;  %v4061_v4 = vsel %vm4041_vm14, %v4028_v62, %v6677_v21  ;;  %v3520_v23 = vpack.c.b16 %v3501_v2, %v3500_v51  ;;  %v2897_v46 = vsel %vm5543_vm15, %v2892_v39, %v2896_v36  ;;  %v6726_v21 = vld [vmem:[#allocation2 + $0x5c] sm:$0x1]  ;;  %v2560_v51 = vld [vmem:[#allocation2 + $0x60] sm:$0xf]  ;;  %v3611_v1 = vpop.permute.xlu1 %3610  ;;  %v5045_v39 = vld [vmem:[#allocation2 + $0xa8] sm:$0xff] }
 0x1af   : > { %v2907_v50 = vsel %vm5543_vm15, %v2902_v56, %v2906_v26  ;;  %v1527_v40 = vor.u32 %v1526_v41, %v1523_v42  ;;  %v3756_v0 = vunpack.c.l.b16 %v2897_v46  ;;  %v1537_v17 = vor.u32 %v1536_v14, %v1532_v29  ;;  %v6735_v26 = vpop.f32.mrf.mxu1 }
 0x1b0   : > { %3468 = vrot.lane.b32.xlu0 %v5029_v59, %s5209_s29  ;;  %v3757_v55 = vunpack.c.l.b16 %v2907_v50  ;;  %v4103_v33 = vsel %vm4074_vm0, %v4061_v4, %v3799_v35  ;;  %3548 = vrot.lane.b32.xlu1 %v3520_v23, %s5212_s6  ;;  %v2132_v62 = vshrl.u32 %v1951_v16, 16  ;;  %v2135_v47 = vshll.u32 %v1951_v16, 16 }
 0x1b1   : > { %v1528_v6 = vrot.slane %v1527_v40, 4  ;;  %4296 = vmatmul.bf16.gmra.mxu2 %v4103_v33  ;;  %v2141_v34 = vshll.u32 %v6715_v24, 16  ;;  %v1538_v32 = vrot.slane %v1537_v17, 4  ;;  %v2145_v8 = vshrl.u32 %v6715_v24, 16 }
 0x1b2   : > { %v3776_v44 = vpack.c.b16 %v3757_v55, %v3756_v0  ;;  %v2151_v58 = vshll.u32 %v6726_v21, 16  ;;  %v2134_v38 = vrot.slane %v2132_v62, 4  ;;  %v2137_v43 = vrot.slane %v2135_v47, 5  ;;  %v2377_v0 = vld [vmem:[#allocation2 + $0x54] sm:$0xe] }
 0x1b3   : > { %v1533_v36 = vsel %vm5543_vm15, %v1528_v6, %v1532_v29  ;;  %v2143_v31 = vrot.slane %v2141_v34, 5  ;;  %v1543_v42 = vsel %vm5543_vm15, %v1538_v32, %v1542_v49  ;;  %v2147_v53 = vrot.slane %v2145_v8, 4  ;;  %v5191_v6 = vld [vmem:[#allocation2 + $0x64] sm:$0xf]  ;;  %v5192_v32 = vld [vmem:[#allocation2 + $0x68] sm:$0x1] }
 0x1b4   : > { %3804 = vrot.lane.b32.xlu2 %v3776_v44, %s5213_s7  ;;  %v3232_v63 = vunpack.c.l.b16 %v1533_v36  ;;  %v2153_v54 = vrot.slane %v2151_v58, 5  ;;  %v3233_v22 = vunpack.c.l.b16 %v1543_v42  ;;  %v2138_v35 = vor.u32 %v2137_v43, %v2134_v38 }
 0x1b5   : > { %v4710_v27 = vrot.slane %v1766_v30, 9  ;;  %v1871_v3 = vrot.slane %v6699_v60, 5  ;;  %v3531_v2 = vpop.permute.xlu0 %3530  ;;  %v2148_v56 = vor.u32 %v2147_v53, %v2143_v31  ;;  %v1874_v41 = vrot.slane %v6705_v45, 5 }
 0x1b6   : > { %v3950_v59 = vsel %vm3942_vm11, %v3917_v37, %v6650_v5  ;;  %v2741_v29 = vshrl.u32 %v2560_v51, 16  ;;  %v3258_v14 = vpack.c.b16 %v3233_v22, %v3232_v63  ;;  %v2139_v49 = vrot.slane %v2138_v35, 4  ;;  %v1370_v22 = vld [vmem:[#allocation2 + $0xa4] sm:$0x1] }
 0x1b7   : > { %v1872_v4 = vsel %vm5560_vm1, %v4710_v27, %v1871_v3  ;;  %v1873_v16 = vrot.slane %v1871_v3, 4  ;;  %v2149_v23 = vrot.slane %v2148_v56, 4  ;;  %v3983_v46 = vsel %vm3975_vm12, %v3950_v59, %v3531_v2  ;;  %v6764_v56 = vpop.f32.mrf.mxu1 }
 0x1b8   : > { %3724 = vrot.lane.b32.xlu0 %v5045_v39, %s5211_s5  ;;  %v3312_v60 = vunpack.c.l.b16 %v1872_v4  ;;  %v2743_v50 = vrot.slane %v2741_v29, 4  ;;  %3280 = vrot.lane.b32.xlu1 %v3258_v14, %s5207_s27  ;;  %v2144_v45 = vsel %vm5543_vm15, %v2139_v49, %v2143_v31  ;;  %v4016_v37 = vsel %vm4008_vm13, %v3983_v46, %v3611_v1  ;;  %v1773_v31 = vld [vmem:[#allocation2 + $0x9c] sm:$0xe] }
 0x1b9   : > { %v1875_v5 = vsel %vm5560_vm1, %v1873_v16, %v1874_v41  ;;  %v2744_v40 = vshll.u32 %v2560_v51, 16  ;;  %v2154_v55 = vsel %vm5543_vm15, %v2149_v23, %v2153_v54  ;;  %v3488_v17 = vunpack.c.l.b16 %v2144_v45  ;;  %v1352_v54 = vld [vmem:[#allocation2 + $0xa0] sm:$0xf]  ;;  %v5011_v1 = vld [vmem:[#allocation2 + $0x78] sm:$0xff] }
 0x1ba   : > { %v3313_v33 = vunpack.c.l.b16 %v1875_v5  ;;  %v2750_v62 = vshll.u32 %v5191_v6, 16  ;;  %v3489_v47 = vunpack.c.l.b16 %v2154_v55  ;;  %v2754_v44 = vshrl.u32 %v5191_v6, 16  ;;  %v1351_v39 = vld [vmem:[#allocation2 + $0x9c] sm:$0xf] }
 0x1bb   : > { %v2746_v34 = vrot.slane %v2744_v40, 5  ;;  %v2760_v8 = vshll.u32 %v5192_v32, 16  ;;  %v6756_v58 = vpop.permute.xlu2 %3800  ;;  %v4726_v38 = vrot.slane %v2377_v0, 9  ;;  %v2479_v43 = vrot.slane %v6715_v24, 5  ;;  %v5023_v24 = vld [vmem:[#allocation2 + $0x54] sm:$0xff] }
 0x1bc   : > { %v3338_v30 = vpack.c.b16 %v3313_v33, %v3312_v60  ;;  %v2752_v36 = vrot.slane %v2750_v62, 5  ;;  %v3514_v51 = vpack.c.b16 %v3489_v47, %v3488_v17  ;;  %v2756_v63 = vrot.slane %v2754_v44, 4  ;;  %v2384_v62 = vld [vmem:[#allocation2 + $0xa8] sm:$0xe] }
 0x1bd   : > { %v2747_v42 = vor.u32 %v2746_v34, %v2743_v50  ;;  %v2762_v53 = vrot.slane %v2760_v8, 5  ;;  %v2480_v35 = vsel %vm5560_vm1, %v4726_v38, %v2479_v43  ;;  %v2481_v27 = vrot.slane %v2479_v43, 4  ;;  %v1966_v8 = vld [vmem:[#allocation2 + $0xac] sm:$0xf] }
 0x1be   : > { %v2482_v3 = vrot.slane %v6726_v21, 5  ;;  %v4049_v2 = vsel %vm4041_vm14, %v4016_v37, %v6670_v11  ;;  %3536 = vrot.lane.b32.xlu2 %v3514_v51, %s5212_s6  ;;  %v2757_v59 = vor.u32 %v2756_v63, %v2752_v36  ;;  %v3568_v29 = vunpack.c.l.b16 %v2480_v35  ;;  %v1965_v51 = vld [vmem:[#allocation2 + $0xa8] sm:$0xf] }
 0x1bf   : > { %v2748_v41 = vrot.slane %v2747_v42, 4  ;;  %v3289_v14 = vpop.permute.xlu1 %3288  ;;  %v4717_v49 = vrot.slane %v1773_v31, 9  ;;  %v1920_v16 = vrot.slane %v1352_v54, 5  ;;  %v1923_v11 = vrot.slane %v1370_v22, 5 }
 0x1c0   : > { %3360 = vrot.lane.b32.xlu0 %v3338_v30, %s5208_s28  ;;  %v2483_v21 = vsel %vm5560_vm1, %v2481_v27, %v2482_v3  ;;  %v3893_v4 = vsel %vm3860_vm6, %v5011_v1, %v3289_v14  ;;  %3456 = vrot.lane.b32.xlu1 %v5023_v24, %s5209_s29  ;;  %v2758_v60 = vrot.slane %v2757_v59, 4  ;;  %v1689_v50 = vshrl.u32 %v1351_v39, 16  ;;  %v1984_v30 = vld [vmem:[#allocation2 + $0xb0] sm:$0x1]  ;;  %v5039_v3 = vld [vmem:[#allocation2 + $0x60] sm:$0xff] }
 0x1c1   : > { %v2753_v23 = vsel %vm5543_vm15, %v2748_v41, %v2752_v36  ;;  %v3569_v46 = vunpack.c.l.b16 %v2483_v21  ;;  %v1921_v37 = vsel %vm5560_vm1, %v4717_v49, %v1920_v16  ;;  %v1922_v40 = vrot.slane %v1920_v16, 4 }
 0x1c2   : > { %v3744_v45 = vunpack.c.l.b16 %v2753_v23  ;;  %v3787_v5 = vpop.permute.xlu0 %3786  ;;  %v1692_v0 = vshll.u32 %v1351_v39, 16  ;;  %v2763_v55 = vsel %vm5543_vm15, %v2758_v60, %v2762_v53  ;;  %v3326_v6 = vunpack.c.l.b16 %v1921_v37 }
 0x1c3   : > { %v3594_v17 = vpack.c.b16 %v3569_v46, %v3568_v29  ;;  %v4085_v33 = vsel %vm4074_vm0, %v4049_v2, %v3787_v5  ;;  %v3745_v47 = vunpack.c.l.b16 %v2763_v55  ;;  %v1924_v34 = vsel %vm5560_vm1, %v1922_v40, %v1923_v11  ;;  %v6787_v29 = vpop.f32.mrf.mxu1  ;;  %v1767_v40 = vld [vmem:[#allocation2 + $0x54] sm:$0xe] }
 0x1c4   : > { %4266 = vmatmul.bf16.gmra.mxu0 %v4085_v33  ;;  %v1691_v44 = vrot.slane %v1689_v50, 4  ;;  %v1694_v32 = vrot.slane %v1692_v0, 5  ;;  %v3327_v36 = vunpack.c.l.b16 %v1924_v34  ;;  %v1698_v38 = vshll.u32 %v1352_v54, 16 }
 0x1c5   : > { %v1702_v43 = vshrl.u32 %v1352_v54, 16  ;;  %v1708_v31 = vshll.u32 %v1370_v22, 16  ;;  %v3770_v42 = vpack.c.b16 %v3745_v47, %v3744_v45  ;;  %v6781_v63 = vpop.permute.xlu2 %3532  ;;  %v3931_v35 = vsel %vm3909_vm8, %v3893_v4, %v6697_v12 }
 0x1c6   : > { %v1695_v53 = vor.u32 %v1694_v32, %v1691_v44  ;;  %v4733_v27 = vrot.slane %v2384_v62, 9  ;;  %v3345_v1 = vpack.c.b16 %v3327_v36, %v3326_v6  ;;  %v1700_v2 = vrot.slane %v1698_v38, 5  ;;  %v6802_v44 = vld [vmem:[#allocation2 + $0x58] sm:$0xf]  ;;  %v5030_v32 = vld [vmem:[#allocation2 + $0xa8] sm:$0xff] }
 0x1c7   : > { %v1704_v39 = vrot.slane %v1702_v43, 4  ;;  %v1710_v24 = vrot.slane %v1708_v31, 5  ;;  %3792 = vrot.lane.b32.xlu2 %v3770_v42, %s5213_s7  ;;  %v2528_v22 = vrot.slane %v1966_v8, 5  ;;  %v2531_v41 = vrot.slane %v1984_v30, 5  ;;  %v6810_v31 = vld [vmem:[#allocation2 + $0x5c] sm:$0x1] }
 0x1c8   : > { %3616 = vrot.lane.b32.xlu0 %v3594_v17, %s5210_s30  ;;  %v1696_v54 = vrot.slane %v1695_v53, 4  ;;  %v2300_v59 = vshrl.u32 %v1965_v51, 16  ;;  %3712 = vrot.lane.b32.xlu1 %v5039_v3, %s5211_s5  ;;  %v2303_v12 = vshll.u32 %v1965_v51, 16  ;;  %v2309_v49 = vshll.u32 %v1966_v8, 16  ;;  %v4252_v60 = vpop.f32.mrf.mxu0  ;;  %v2574_v42 = vld [vmem:[#allocation2 + $0xb4] sm:$0xf] }
 0x1c9   : > { %v1705_v14 = vor.u32 %v1704_v39, %v1700_v2  ;;  %v2313_v21 = vshrl.u32 %v1966_v8, 16  ;;  %v2529_v11 = vsel %vm5560_vm1, %v4733_v27, %v2528_v22  ;;  %v2530_v23 = vrot.slane %v2528_v22, 4 }
 0x1ca   : > { %v1701_v4 = vsel %vm5543_vm15, %v1696_v54, %v1700_v2  ;;  %v3465_v16 = vpop.permute.xlu0 %3464  ;;  %v2302_v46 = vrot.slane %v2300_v59, 4  ;;  %v3582_v37 = vunpack.c.l.b16 %v2529_v11  ;;  %v6798_v55 = vadd.f32 %v6537_v48, %v4252_v60 }
 0x1cb   : > { %v1706_v50 = vrot.slane %v1705_v14, 4  ;;  %v3246_v45 = vunpack.c.l.b16 %v1701_v4  ;;  %v3964_v5 = vsel %vm3942_vm11, %v3931_v35, %v3465_v16  ;;  %v2532_v0 = vsel %vm5560_vm1, %v2530_v23, %v2531_v41  ;;  %v6824_v16 = vpop.f32.mrf.mxu1 }
 0x1cc   : > { %v2305_v17 = vrot.slane %v2303_v12, 5  ;;  %v2311_v33 = vrot.slane %v2309_v49, 5  ;;  %v3583_v62 = vunpack.c.l.b16 %v2532_v0  ;;  %v2315_v47 = vrot.slane %v2313_v21, 4  ;;  %v5012_v0 = vld [vmem:[#allocation2 + $0x84] sm:$0xff] }
 0x1cd   : > { %v1711_v6 = vsel %vm5543_vm15, %v1706_v50, %v1710_v24  ;;  %v2319_v34 = vshll.u32 %v1984_v30, 16  ;;  %v6804_v8 = vpop.permute.xlu2 %3708  ;;  %v6808_v43 = vmul.f32 %v6798_v55, %v6798_v55  ;;  %v4711_v51 = vrot.slane %v1767_v40, 9  ;;  %v1339_v50 = vld [vmem:[#allocation2 + $0x54] sm:$0xf] }
 0x1ce   : > { %v3247_v36 = vunpack.c.l.b16 %v1711_v6  ;;  %v3545_v38 = vpop.permute.xlu1 %3544  ;;  %v2306_v48 = vor.u32 %v2305_v17, %v2302_v46  ;;  %v3601_v35 = vpack.c.b16 %v3583_v62, %v3582_v37  ;;  %v2316_v30 = vor.u32 %v2315_v47, %v2311_v33  ;;  %v5046_v47 = vld [vmem:[#allocation2 + $0xb4] sm:$0xff] }
 0x1cf   : > { %v3997_v53 = vsel %vm3975_vm12, %v3964_v5, %v3545_v38  ;;  %v2321_v27 = vrot.slane %v2319_v34, 5  ;;  %3470 = vrot.lane.b32.xlu2 %v5030_v32, %s5209_s29  ;;  %v1878_v24 = vrot.slane %v6802_v44, 5  ;;  %v1881_v22 = vrot.slane %v6810_v31, 5 }
 0x1d0   : > { %v3265_v3 = vpack.c.b16 %v3247_v36, %v3246_v45  ;;  %v2307_v2 = vrot.slane %v2306_v48, 4  ;;  %v4030_v39 = vsel %vm4008_vm13, %v3997_v53, %v6729_v52  ;;  %3374 = vrot.lane.b32.xlu1 %v3345_v1, %s5208_s28  ;;  %v2317_v54 = vrot.slane %v2316_v30, 4  ;;  %v5193_v52 = vld [vmem:[#allocation2 + $0xb8] sm:$0xf]  ;;  %v4254_v46 = vpop.f32.mrf.mxu0  ;;  %v5194_v36 = vld [vmem:[#allocation2 + $0xbc] sm:$0x1] }
 0x1d1   : > { %v2909_v41 = vshrl.u32 %v2574_v42, 16  ;;  %v2912_v59 = vshll.u32 %v2574_v42, 16  ;;  %v1879_v49 = vsel %vm5560_vm1, %v4711_v51, %v1878_v24  ;;  %v1880_v21 = vrot.slane %v1878_v24, 4 }
 0x1d2   : > { %3294 = vrot.lane.b32.xlu0 %v3265_v3, %s5207_s27  ;;  %v2312_v14 = vsel %vm5543_vm15, %v2307_v2, %v2311_v33  ;;  %v3721_v12 = vpop.permute.xlu0 %3720  ;;  %v2918_v4 = vshll.u32 %v5193_v52, 16  ;;  %v2322_v1 = vsel %vm5543_vm15, %v2317_v54, %v2321_v27  ;;  %v3314_v60 = vunpack.c.l.b16 %v1879_v49 }
 0x1d3   : > { %v3502_v11 = vunpack.c.l.b16 %v2312_v14  ;;  %v4063_v23 = vsel %vm4041_vm14, %v4030_v39, %v3721_v12  ;;  %v3503_v45 = vunpack.c.l.b16 %v2322_v1  ;;  %v1882_v5 = vsel %vm5560_vm1, %v1880_v21, %v1881_v22  ;;  %v5005_v39 = vld [vmem:[#allocation2 + $0x30] sm:$0xff] }
 0x1d4   : > { %v4106_v37 = vsel %vm4074_vm0, %v4063_v23, %v6756_v58  ;;  %v2911_v40 = vrot.slane %v2909_v41, 4  ;;  %v3315_v17 = vunpack.c.l.b16 %v1882_v5  ;;  %v2914_v33 = vrot.slane %v2912_v59, 5  ;;  %v1954_v59 = vld [vmem:[#allocation2 + $0x64] sm:$0xf]  ;;  %v1978_v23 = vld [vmem:[#allocation2 + $0x68] sm:$0x1]  ;;  %v6860_v5 = vpop.f32.mrf.mxu1 }
 0x1d5   : > { %4301 = vmatmul.bf16.gmra.mxu2 %v4106_v37  ;;  %v2920_v6 = vrot.slane %v2918_v4, 5  ;;  %v2922_v62 = vshrl.u32 %v5193_v52, 16  ;;  %v3291_v34 = vpop.permute.xlu2 %3290  ;;  %v3521_v32 = vpack.c.b16 %v3503_v45, %v3502_v11  ;;  %v2928_v38 = vshll.u32 %v5194_v36, 16  ;;  %v1953_v45 = vld [vmem:[#allocation2 + $0x60] sm:$0xf] }
 0x1d6   : > { %v4344_v48 = vadd.f32 %v6571_v57, %v4254_v46  ;;  %v1545_v51 = vshrl.u32 %v1339_v50, 16  ;;  %v6835_v42 = vsel %vm3860_vm6, %v5012_v0, %v3291_v34  ;;  %v3339_v58 = vpack.c.b16 %v3315_v17, %v3314_v60 }
 0x1d7   : > { %v2915_v53 = vor.u32 %v2914_v33, %v2911_v40  ;;  %v2924_v30 = vrot.slane %v2922_v62, 4  ;;  %3726 = vrot.lane.b32.xlu2 %v5046_v47, %s5211_s5  ;;  %v2930_v27 = vrot.slane %v2928_v38, 5  ;;  %v1548_v41 = vshll.u32 %v1339_v50, 16 }
 0x1d8   : > { %v5061_v3 = vpack.c.bf16 %v4344_v48, %v6798_v55  ;;  %v6846_v57 = vadd.f32 %v4344_v48, %v6798_v55  ;;  %v4523_v2 = vmul.f32 %v4344_v48, %v4344_v48  ;;  %3630 = vrot.lane.b32.xlu1 %v3601_v35, %s5210_s30  ;;  %v1547_v22 = vrot.slane %v1545_v51, 4  ;;  %v2378_v35 = vld [vmem:[#allocation2 + $0x60] sm:$0xe] }
 0x1d9   : > { %v2916_v24 = vrot.slane %v2915_v53, 4  ;;  %v2925_v54 = vor.u32 %v2924_v30, %v2920_v6  ;;  %v3277_v14 = vpop.permute.xlu1 %3276  ;;  %v1554_v49 = vshll.u32 %v6802_v44, 16  ;;  %v1558_v55 = vshrl.u32 %v6802_v44, 16 }
 0x1da   : > { %3550 = vrot.lane.b32.xlu0 %v3521_v32, %s5212_s6  ;;  %5062 = vst [vmem:[%s6841_s11] sm:$0xff] %v5061_v3   ;;  %v6852_v12 = vadd.f32 %v4523_v2, %v6808_v43  ;;  %v1564_v21 = vshll.u32 %v6810_v31, 16  ;;  %v3875_v52 = vsel %vm3860_vm6, %v5005_v39, %v3277_v14  ;;  %v1550_v11 = vrot.slane %v1548_v41, 5 }
 0x1db   : > { %v2921_v4 = vsel %vm5543_vm15, %v2916_v24, %v2920_v6  ;;  %v2926_v1 = vrot.slane %v2925_v54, 4  ;;  %v1556_v46 = vrot.slane %v1554_v49, 5  ;;  %v1560_v50 = vrot.slane %v1558_v55, 4  ;;  %v4257_v24 = vpop.f32.mrf.mxu0 }
 0x1dc   : > { %v3758_v60 = vunpack.c.l.b16 %v2921_v4  ;;  %v1566_v43 = vrot.slane %v1564_v21, 5  ;;  %v1551_v31 = vor.u32 %v1550_v11, %v1547_v22  ;;  %v4727_v40 = vrot.slane %v2378_v35, 9 }
 0x1dd   : > { %v2931_v44 = vsel %vm5543_vm15, %v2926_v1, %v2930_v27  ;;  %v3357_v37 = vpop.permute.xlu0 %3356  ;;  %v2486_v0 = vrot.slane %v1954_v59, 5  ;;  %v6864_v17 = vpop.permute.xlu2 %3546  ;;  %v1561_v6 = vor.u32 %v1560_v50, %v1556_v46  ;;  %v2489_v47 = vrot.slane %v1978_v23, 5  ;;  %v5006_v50 = vld [vmem:[#allocation2 + $0x3c] sm:$0xff] }
 0x1de   : > { %v3759_v33 = vunpack.c.l.b16 %v2931_v44  ;;  %v3919_v62 = vsel %vm3909_vm8, %v3875_v52, %v3357_v37  ;;  %v1552_v34 = vrot.slane %v1551_v31, 4  ;;  %v2156_v38 = vshrl.u32 %v1953_v45, 16  ;;  %v1353_v37 = vld [vmem:[#allocation2 + $0xa8] sm:$0xf] }
 0x1df   : > { %v2487_v32 = vsel %vm5560_vm1, %v4727_v40, %v2486_v0  ;;  %v2488_v36 = vrot.slane %v2486_v0, 4  ;;  %3362 = vrot.lane.b32.xlu2 %v3339_v58, %s5208_s28  ;;  %v1562_v51 = vrot.slane %v1561_v6, 4  ;;  %v2159_v30 = vshll.u32 %v1953_v45, 16 }
 0x1e0   : > { %v3777_v48 = vpack.c.b16 %v3759_v33, %v3758_v60  ;;  %v3570_v53 = vunpack.c.l.b16 %v2487_v32  ;;  %v1557_v27 = vsel %vm5543_vm15, %v1552_v34, %v1556_v46  ;;  %v2158_v2 = vrot.slane %v2156_v38, 4  ;;  %v317_v60 = vld [vmem:[%s5331_s24 + $0x7c] sm:$0xf]  ;;  %v6891_v33 = vpop.f32.mrf.mxu1  ;;  %v6903_v34 = vld [vmem:[#allocation2 + $0xac] sm:$0xf] }
 0x1e1   : > { %v2490_v3 = vsel %vm5560_vm1, %v2488_v36, %v2489_v47  ;;  %v2165_v39 = vshll.u32 %v1954_v59, 16  ;;  %v1567_v54 = vsel %vm5543_vm15, %v1562_v51, %v1566_v43  ;;  %v3234_v58 = vunpack.c.l.b16 %v1557_v27  ;;  %v3453_v22 = vpop.permute.xlu1 %3452 }
 0x1e2   : > { %3806 = vrot.lane.b32.xlu1 %v3777_v48, %s5213_s7  ;;  %v3571_v41 = vunpack.c.l.b16 %v2490_v3  ;;  %v2161_v14 = vrot.slane %v2159_v30, 5  ;;  %v3235_v49 = vunpack.c.l.b16 %v1567_v54  ;;  %v3952_v55 = vsel %vm3942_vm11, %v3919_v62, %v3453_v22 }
 0x1e3   : > { %v2167_v21 = vrot.slane %v2165_v39, 5  ;;  %v2169_v35 = vshrl.u32 %v1954_v59, 16  ;;  %v2175_v1 = vshll.u32 %v1978_v23, 16  ;;  %v6879_v11 = vadd.f32 %v6603_v13, %v4257_v24 }
 0x1e4   : > { %v3595_v52 = vpack.c.b16 %v3571_v41, %v3570_v53  ;;  %v2162_v4 = vor.u32 %v2161_v14, %v2158_v2  ;;  %v3259_v46 = vpack.c.b16 %v3235_v49, %v3234_v58  ;;  %v3985_v43 = vsel %vm3975_vm12, %v3952_v55, %v6781_v63  ;;  %v6905_v53 = vld [vmem:[#allocation2 + $0xb0] sm:$0x1] }
 0x1e5   : > { %v2171_v45 = vrot.slane %v2169_v35, 4  ;;  %v583_v44 = vrot.slane %v6320_v10, 4  ;;  %v1157_v31 = vpop.permute.xlu0 %1156  ;;  %v3279_v40 = vpop.permute.xlu2 %3278  ;;  %v2177_v59 = vrot.slane %v2175_v1, 5  ;;  %v6887_v23 = vadd.f32 %v6846_v57, %v6879_v11  ;;  %v5024_v35 = vld [vmem:[#allocation2 + $0x60] sm:$0xff] }
 0x1e6   : > { %v2163_v0 = vrot.slane %v2162_v4, 4  ;;  %v4524_v13 = vmul.f32 %v6879_v11, %v6879_v11  ;;  %3282 = vrot.lane.b32.xlu0 %v3259_v46, %s5207_s27  ;;  %v6895_v63 = vsel %vm3860_vm6, %v5006_v50, %v3279_v40  ;;  %v585_v6 = vshrl.u32 %v317_v60, 16  ;;  %v4259_v46 = vpop.f32.mrf.mxu0 }
 0x1e7   : > { %v2172_v10 = vor.u32 %v2171_v45, %v2167_v21  ;;  %v588_v62 = vshll.u32 %v317_v60, 16  ;;  %3618 = vrot.lane.b32.xlu2 %v3595_v52, %s5210_s30  ;;  %v1713_v32 = vshrl.u32 %v1353_v37, 16  ;;  %v1716_v36 = vshll.u32 %v1353_v37, 16 }
 0x1e8   : > { %v2168_v47 = vsel %vm5543_vm15, %v2163_v0, %v2167_v21  ;;  %v6901_v57 = vadd.f32 %v6852_v12, %v4524_v13  ;;  %v587_v51 = vrot.slane %v585_v6, 7  ;;  %v1722_v30 = vshll.u32 %v6903_v34, 16  ;;  %v2562_v12 = vld [vmem:[#allocation2 + $0x6c] sm:$0xf]  ;;  %v5196_v13 = vld [vmem:[#allocation2 + $0x74] sm:$0x1] }
 0x1e9   : > { %v2173_v38 = vrot.slane %v2172_v10, 4  ;;  %v3490_v48 = vunpack.c.l.b16 %v2168_v47  ;;  %v3613_v27 = vpop.permute.xlu1 %3612  ;;  %v1715_v3 = vrot.slane %v1713_v32, 4  ;;  %v1718_v2 = vrot.slane %v1716_v36, 5  ;;  %v757_v36 = vld [vmem:[#allocation2 + $0xc8] sm:$0x1] }
 0x1ea   : > { %v1726_v39 = vshrl.u32 %v6903_v34, 16  ;;  %v1732_v24 = vshll.u32 %v6905_v53, 16  ;;  %v4018_v58 = vsel %vm4008_vm13, %v3985_v43, %v3613_v27  ;;  %v590_v22 = vor.u32 %v588_v62, %v587_v51  ;;  %v1967_v27 = vld [vmem:[#allocation2 + $0xb4] sm:$0xf] }
 0x1eb   : > { %v2178_v54 = vsel %vm5543_vm15, %v2173_v38, %v2177_v59  ;;  %v592_v41 = vrot.slane %v587_v51, 4  ;;  %v1719_v49 = vor.u32 %v1718_v2, %v1715_v3  ;;  %v1724_v55 = vrot.slane %v1722_v30, 5  ;;  %v5195_v59 = vld [vmem:[#allocation2 + $0x70] sm:$0xf]  ;;  %v6923_v38 = vpop.f32.mrf.mxu1 }
 0x1ec   : > { %v3491_v14 = vunpack.c.l.b16 %v2178_v54  ;;  %v1728_v21 = vrot.slane %v1726_v39, 4  ;;  %v591_v52 = vsel %vm5268_vm2, %v583_v44, %v590_v22  ;;  %v1734_v4 = vrot.slane %v1732_v24, 5 }
 0x1ed   : > { %v1930_v1 = vrot.slane %v6905_v53, 5  ;;  %v2765_v60 = vshrl.u32 %v2562_v12, 16  ;;  %756 = vst.msk [vmem:[#allocation2 + $0xc4] sm:$0xf] %vm642_vm7, %v591_v52  ;;  %v1720_v45 = vrot.slane %v1719_v49, 4  ;;  %v2768_v37 = vshll.u32 %v2562_v12, 16 }
 0x1ee   : > { %v3515_v50 = vpack.c.b16 %v3491_v14, %v3490_v48  ;;  %v1729_v43 = vor.u32 %v1728_v21, %v1724_v55  ;;  %v3789_v40 = vpop.permute.xlu0 %3788  ;;  %3458 = vrot.lane.b32.xlu0 %v5024_v35, %s5209_s29  ;;  %1321 = vst.msk [vmem:[#allocation2 + $0xc4] sm:$0xf] %vm1208_vm10, %v1157_v31  ;;  %v2774_v25 = vshll.u32 %v5195_v59, 16  ;;  %v2778_v44 = vshrl.u32 %v5195_v59, 16  ;;  %v1968_v21 = vld [vmem:[#allocation2 + $0xb8] sm:$0xf] }
 0x1ef   : > { %v2767_v0 = vrot.slane %v2765_v60, 4  ;;  %v2784_v10 = vshll.u32 %v5196_v13, 16  ;;  %v1725_v6 = vsel %vm5543_vm15, %v1720_v45, %v1724_v55  ;;  %v2770_v47 = vrot.slane %v2768_v37, 5  ;;  %v2385_v59 = vld [vmem:[#allocation2 + $0xb4] sm:$0xe] }
 0x1f0   : > { %3538 = vrot.lane.b32.xlu1 %v3515_v50, %s5212_s6  ;;  %v1730_v62 = vrot.slane %v1729_v43, 4  ;;  %v4349_v32 = vadd.f32 %v6631_v18, %v4259_v46  ;;  %v3248_v31 = vunpack.c.l.b16 %v1725_v6  ;;  %v2776_v48 = vrot.slane %v2774_v25, 5  ;;  %v1774_v50 = vld [vmem:[#allocation2 + $0xa8] sm:$0xe] }
 0x1f1   : > { %v2780_v51 = vrot.slane %v2778_v44, 4  ;;  %v2786_v30 = vrot.slane %v2784_v10, 5  ;;  %v2771_v2 = vor.u32 %v2770_v47, %v2767_v0  ;;  %v6931_v12 = vpop.permute.xlu1 %1158  ;;  %v758_v14 = vsel %vm5358_vm5, %v592_v41, %v757_v36  ;;  %v1985_v41 = vld [vmem:[#allocation2 + $0xbc] sm:$0x1] }
 0x1f2   : > { %v1735_v3 = vsel %vm5543_vm15, %v1730_v62, %v1734_v4  ;;  %v5066_v39 = vpack.c.bf16 %v4349_v32, %v6879_v11  ;;  %v6929_v24 = vadd.f32 %v6887_v23, %v4349_v32  ;;  %v4525_v22 = vmul.f32 %v4349_v32, %v4349_v32  ;;  %v5040_v23 = vld [vmem:[#allocation2 + $0x6c] sm:$0xff]  ;;  %759 = vst [vmem:[#allocation2 + $0xc8] sm:$0x1] %v758_v14 }
 0x1f3   : > { %v3249_v18 = vunpack.c.l.b16 %v1735_v3  ;;  %v2781_v54 = vor.u32 %v2780_v51, %v2776_v48  ;;  %v2772_v49 = vrot.slane %v2771_v2, 4  ;;  %v4051_v55 = vsel %vm4041_vm14, %v4018_v58, %v6804_v8 }
 0x1f4   : > { %5138 = vst [vmem:[%s6841_s11 + $0x8] sm:$0xff] %v5066_v39   ;;  %v2324_v35 = vshrl.u32 %v1967_v27, 16  ;;  %v2327_v52 = vshll.u32 %v1967_v27, 16  ;;  %v6939_v60 = vadd.f32 %v6901_v57, %v4525_v22  ;;  %v4088_v46 = vsel %vm4074_vm0, %v4051_v55, %v3789_v40  ;;  %v6951_v27 = vpop.f32.mrf.mxu1 }
 0x1f5   : > { %v3266_v11 = vpack.c.b16 %v3249_v18, %v3248_v31  ;;  %v2782_v4 = vrot.slane %v2781_v54, 4  ;;  %v2777_v20 = vsel %vm5543_vm15, %v2772_v49, %v2776_v48  ;;  %4271 = vmatmul.bf16.gmra.mxu0 %v4088_v46  ;;  %v2333_v58 = vshll.u32 %v1968_v21, 16  ;;  %v2994_v54 = vld [vmem:[#allocation2 + $0xc0] sm:$0xe]  ;;  %v2577_v55 = vld [vmem:[#allocation2 + $0xc4] sm:$0xf] }
 0x1f6   : > { %v2326_v45 = vrot.slane %v2324_v35, 4  ;;  %v2329_v8 = vrot.slane %v2327_v52, 5  ;;  %v3371_v43 = vpop.permute.xlu0 %3370  ;;  %v3746_v57 = vunpack.c.l.b16 %v2777_v20  ;;  %3714 = vrot.lane.b32.xlu0 %v5040_v23, %s5211_s5  ;;  %v2337_v0 = vshrl.u32 %v1968_v21, 16 }
 0x1f7   : > { %3296 = vrot.lane.b32.xlu2 %v3266_v11, %s5207_s27  ;;  %v2787_v37 = vsel %vm5543_vm15, %v2782_v4, %v2786_v30  ;;  %v2343_v40 = vshll.u32 %v1985_v41, 16  ;;  %v2335_v13 = vrot.slane %v2333_v58, 5  ;;  %v4718_v10 = vrot.slane %v1774_v50, 9 }
 0x1f8   : > { %v3747_v25 = vunpack.c.l.b16 %v2787_v37  ;;  %v2330_v44 = vor.u32 %v2329_v8, %v2326_v45  ;;  %v2339_v6 = vrot.slane %v2337_v0, 4  ;;  %v1927_v47 = vrot.slane %v6903_v34, 5  ;;  %v2576_v45 = vld [vmem:[#allocation2 + $0xc0] sm:$0xf]  ;;  %v6970_v8 = vpop.permute.xlu2 %3454 }
 0x1f9   : > { %v2345_v62 = vrot.slane %v2343_v40, 5  ;;  %v3933_v32 = vsel %vm3909_vm8, %v6835_v42, %v3371_v43  ;;  %v3467_v48 = vpop.permute.xlu1 %3466  ;;  %v4734_v51 = vrot.slane %v2385_v59, 9  ;;  %v2535_v30 = vrot.slane %v1968_v21, 5  ;;  %v1322_v34 = vld [vmem:[#allocation2 + $0xc8] sm:$0x1] }
 0x1fa   : > { %v3771_v36 = vpack.c.b16 %v3747_v25, %v3746_v57  ;;  %v2331_v31 = vrot.slane %v2330_v44, 4  ;;  %v2340_v3 = vor.u32 %v2339_v6, %v2335_v13  ;;  %v1928_v2 = vsel %vm5560_vm1, %v4718_v10, %v1927_v47  ;;  %v1355_v59 = vld [vmem:[#allocation2 + $0xb4] sm:$0xf] }
 0x1fb   : > { %v1929_v39 = vrot.slane %v1927_v47, 4  ;;  %v3966_v18 = vsel %vm3942_vm11, %v3933_v32, %v3467_v48  ;;  %v3328_v22 = vunpack.c.l.b16 %v1928_v2  ;;  %v2536_v14 = vsel %vm5560_vm1, %v4734_v51, %v2535_v30  ;;  %v5031_v44 = vld [vmem:[#allocation2 + $0xb4] sm:$0xff] }
 0x1fc   : > { %3794 = vrot.lane.b32.xlu1 %v3771_v36, %s5213_s7  ;;  %v2336_v42 = vsel %vm5543_vm15, %v2331_v31, %v2335_v13  ;;  %v2537_v49 = vrot.slane %v2535_v30, 4  ;;  %v1323_v21 = vsel %vm5424_vm9, %v6931_v12, %v1322_v34  ;;  %v2341_v35 = vrot.slane %v2340_v3, 4  ;;  %v1775_v47 = vld [vmem:[#allocation2 + $0xb4] sm:$0xe]  ;;  %v1356_v51 = vld [vmem:[#allocation2 + $0xb8] sm:$0xf] }
 0x1fd   : > { %v3504_v52 = vunpack.c.l.b16 %v2336_v42  ;;  %v1931_v11 = vsel %vm5560_vm1, %v1929_v39, %v1930_v1  ;;  %1324 = vst [vmem:[#allocation2 + $0xc8] sm:$0x1] %v1323_v21  ;;  %v2538_v23 = vrot.slane %v1985_v41, 5  ;;  %v3584_v46 = vunpack.c.l.b16 %v2536_v14  ;;  %v1372_v3 = vld [vmem:[#allocation2 + $0xbc] sm:$0x1] }
 0x1fe   : > { %v3329_v4 = vunpack.c.l.b16 %v1931_v11  ;;  %v3627_v50 = vpop.permute.xlu0 %3626  ;;  %v3999_v20 = vsel %vm3975_vm12, %v3966_v18, %v6864_v17  ;;  %v2346_v61 = vsel %vm5543_vm15, %v2341_v35, %v2345_v62  ;;  %v2946_v53 = vshrl.u32 %v2577_v55, 16 }
 0x1ff   : > { %v6975_v12 = vsel %vm4008_vm13, %v3999_v20, %v3627_v50  ;;  %v4750_v58 = vrot.slane %v2994_v54, 9  ;;  %v3505_v1 = vunpack.c.l.b16 %v2346_v61  ;;  %v2539_v41 = vsel %vm5560_vm1, %v2537_v49, %v2538_v23  ;;  %v6984_v54 = vpop.f32.mrf.mxu1 }
 0x200   : > { %v3346_v43 = vpack.c.b16 %v3329_v4, %v3328_v22  ;;  %v3144_v37 = vrot.slane %v2577_v55, 5  ;;  %v3585_v57 = vunpack.c.l.b16 %v2539_v41  ;;  %v2948_v0 = vrot.slane %v2946_v53, 4 }
 0x201   : > { %v2933_v17 = vshrl.u32 %v2576_v45, 16  ;;  %v2936_v40 = vshll.u32 %v2576_v45, 16  ;;  %v3522_v25 = vpack.c.b16 %v3505_v1, %v3504_v52  ;;  %v3723_v13 = vpop.permute.xlu1 %3722  ;;  %v2942_v62 = vshll.u32 %v2577_v55, 16 }
 0x202   : > { %3376 = vrot.lane.b32.xlu0 %v3346_v43, %s5208_s28  ;;  %v3145_v10 = vsel %vm5560_vm1, %v4750_v58, %v3144_v37  ;;  %v3146_v6 = vrot.slane %v3144_v37, 4  ;;  %v3602_v32 = vpack.c.b16 %v3585_v57, %v3584_v46  ;;  %v1737_v2 = vshrl.u32 %v1355_v59, 16  ;;  %v6988_v58 = vpop.permute.xlu2 %3710  ;;  %v5047_v57 = vld [vmem:[#allocation2 + $0xc0] sm:$0xff] }
 0x203   : > { %v3840_v36 = vunpack.c.l.b16 %v3145_v10  ;;  %v2935_v31 = vrot.slane %v2933_v17, 4  ;;  %v2938_v48 = vrot.slane %v2936_v40, 5  ;;  %3552 = vrot.lane.b32.xlu2 %v3522_v25, %s5212_s6  ;;  %v2944_v30 = vrot.slane %v2942_v62, 5 }
 0x204   : > { %3472 = vrot.lane.b32.xlu1 %v5031_v44, %s5209_s29  ;;  %v1740_v39 = vshll.u32 %v1355_v59, 16  ;;  %v1746_v18 = vshll.u32 %v1356_v51, 16  ;;  %v2594_v34 = vld [vmem:[#allocation2 + $0xc8] sm:$0x1]  ;;  %v1750_v22 = vshrl.u32 %v1356_v51, 16  ;;  %v1756_v14 = vshll.u32 %v1372_v3, 16 }
 0x205   : > { %v2939_v42 = vor.u32 %v2938_v48, %v2935_v31  ;;  %v4719_v49 = vrot.slane %v1775_v47, 9  ;;  %v2952_v55 = vshll.u32 %v2594_v34, 16  ;;  %v3147_v21 = vrot.slane %v2594_v34, 5  ;;  %v1970_v47 = vld [vmem:[#allocation2 + $0xc4] sm:$0xf] }
 0x206   : > { %v2949_v35 = vor.u32 %v2948_v0, %v2944_v30  ;;  %v1739_v52 = vrot.slane %v1737_v2, 4  ;;  %v1742_v4 = vrot.slane %v1740_v39, 5  ;;  %v1748_v23 = vrot.slane %v1746_v18, 5  ;;  %v1969_v34 = vld [vmem:[#allocation2 + $0xc0] sm:$0xf] }
 0x207   : > { %v2940_v11 = vrot.slane %v2939_v42, 4  ;;  %v1752_v46 = vrot.slane %v1750_v22, 4  ;;  %v3803_v50 = vpop.permute.xlu0 %3802  ;;  %v2954_v20 = vrot.slane %v2952_v55, 5  ;;  %v3148_v45 = vsel %vm5560_vm1, %v3146_v6, %v3147_v21  ;;  %v4292_v42 = vpop.f32.mrf.mxu2 }
 0x208   : > { %v2950_v61 = vrot.slane %v2949_v35, 4  ;;  %v1758_v53 = vrot.slane %v1756_v14, 5  ;;  %v3841_v1 = vunpack.c.l.b16 %v3148_v45  ;;  %v1743_v41 = vor.u32 %v1742_v4, %v1739_v52 }
 0x209   : > { %v2945_v43 = vsel %vm5543_vm15, %v2940_v11, %v2944_v30  ;;  %v1753_v37 = vor.u32 %v1752_v46, %v1748_v23  ;;  %v1934_v40 = vrot.slane %v1356_v51, 5  ;;  %v1937_v59 = vrot.slane %v1372_v3, 5  ;;  %v3359_v25 = vpop.permute.xlu1 %3358  ;;  %v1986_v51 = vld [vmem:[#allocation2 + $0xc8] sm:$0x1]  ;;  %v2386_v3 = vld [vmem:[#allocation2 + $0xc0] sm:$0xe] }
 0x20a   : > { %3632 = vrot.lane.b32.xlu0 %v3602_v32, %s5210_s30  ;;  %v2955_v0 = vsel %vm5543_vm15, %v2950_v61, %v2954_v20  ;;  %v3760_v17 = vunpack.c.l.b16 %v2945_v43  ;;  %v3858_v44 = vpack.c.b16 %v3841_v1, %v3840_v36  ;;  %v1744_v6 = vrot.slane %v1743_v41, 4 }
 0x20b   : > { %v3761_v10 = vunpack.c.l.b16 %v2955_v0  ;;  %v1754_v62 = vrot.slane %v1753_v37, 4  ;;  %v1935_v31 = vsel %vm5560_vm1, %v4719_v49, %v1934_v40  ;;  %v1936_v48 = vrot.slane %v1934_v40, 4  ;;  %v2578_v37 = vld [vmem:[#allocation2 + $0xcc] sm:$0xf]  ;;  %v7014_v0 = vpop.permute.xlu2 %3372 }
 0x20c   : > { %3728 = vrot.lane.b32.xlu1 %v5047_v57, %s5211_s5  ;;  %v3921_v32 = vsel %vm3909_vm8, %v6895_v63, %v3359_v25  ;;  %v4065_v30 = vsel %vm4041_vm14, %v6975_v12, %v3723_v13  ;;  %4994 = vmatmul.msk.bf16.gmra.mxu3 %vm3860_vm6, %v3858_v44  ;;  %v1749_v2 = vsel %vm5543_vm15, %v1744_v6, %v1748_v23  ;;  %v3330_v18 = vunpack.c.l.b16 %v1935_v31  ;;  %v4381_v13 = vpop.f32.mrf.mxu1 }
 0x20d   : > { %v3778_v36 = vpack.c.b16 %v3761_v10, %v3760_v17  ;;  %v1759_v39 = vsel %vm5543_vm15, %v1754_v62, %v1758_v53  ;;  %v3250_v22 = vunpack.c.l.b16 %v1749_v2  ;;  %v1938_v63 = vsel %vm5560_vm1, %v1936_v48, %v1937_v59  ;;  %v7022_v62 = vld [vmem:[#allocation2 + $0xd0] sm:$0xf] }
 0x20e   : > { %v3251_v14 = vunpack.c.l.b16 %v1759_v39  ;;  %v4109_v12 = vsel %vm4074_vm0, %v4065_v30, %v3803_v50  ;;  %v3331_v49 = vunpack.c.l.b16 %v1938_v63  ;;  %v4735_v55 = vrot.slane %v2386_v3, 9  ;;  %v7024_v3 = vld [vmem:[#allocation2 + $0xd4] sm:$0x1] }
 0x20f   : > { %3808 = vrot.lane.b32.xlu2 %v3778_v36, %s5213_s7  ;;  %4306 = vmatmul.bf16.gmra.mxu2 %v4109_v12  ;;  %v2542_v21 = vrot.slane %v1970_v47, 5  ;;  %v2545_v35 = vrot.slane %v1986_v51, 5  ;;  %v2348_v11 = vshrl.u32 %v1969_v34, 16  ;;  %v2351_v4 = vshll.u32 %v1969_v34, 16  ;;  %v3535_v46 = vpop.permute.xlu0 %3534 }
 0x210   : > { %v3267_v52 = vpack.c.b16 %v3251_v14, %v3250_v22  ;;  %v2357_v23 = vshll.u32 %v1970_v47, 16  ;;  %v3347_v20 = vpack.c.b16 %v3331_v49, %v3330_v18  ;;  %v2361_v61 = vshrl.u32 %v1970_v47, 16  ;;  %v5032_v47 = vld [vmem:[#allocation2 + $0xc0] sm:$0xff]  ;;  %v4294_v14 = vpop.f32.mrf.mxu2 }
 0x211   : > { %v2544_v45 = vrot.slane %v2542_v21, 4  ;;  %v2543_v50 = vsel %vm5560_vm1, %v4735_v55, %v2542_v21  ;;  %v2350_v53 = vrot.slane %v2348_v11, 4  ;;  %v2353_v1 = vrot.slane %v2351_v4, 5  ;;  %v3615_v41 = vpop.permute.xlu1 %3614  ;;  %v4262_v57 = vpop.f32.mrf.mxu0 }
 0x212   : > { %3298 = vrot.lane.b32.xlu0 %v3267_v52, %s5207_s27  ;;  %v2359_v43 = vrot.slane %v2357_v23, 5  ;;  %v2363_v40 = vrot.slane %v2361_v61, 4  ;;  %v2367_v59 = vshll.u32 %v1986_v51, 16  ;;  %v3954_v25 = vsel %vm3942_vm11, %v3921_v32, %v6970_v8 }
 0x213   : > { %v2546_v17 = vsel %vm5560_vm1, %v2544_v45, %v2545_v35  ;;  %v2354_v10 = vor.u32 %v2353_v1, %v2350_v53  ;;  %v3987_v6 = vsel %vm3975_vm12, %v3954_v25, %v3535_v46  ;;  %v3586_v31 = vunpack.c.l.b16 %v2543_v50  ;;  %v5013_v25 = vld [vmem:[#allocation2 + $0x90] sm:$0xff] }
 0x214   : > { %3378 = vrot.lane.b32.xlu1 %v3347_v20, %s5208_s28  ;;  %v3587_v44 = vunpack.c.l.b16 %v2546_v17  ;;  %v2364_v48 = vor.u32 %v2363_v40, %v2359_v43  ;;  %v2369_v30 = vrot.slane %v2367_v59, 5  ;;  %v2957_v36 = vshrl.u32 %v2578_v37, 16  ;;  %v4383_v21 = vpop.f32.mrf.mxu1  ;;  %v3629_v40 = vpop.permute.xlu2 %3628  ;;  %s228_s28 = scalar_lea.vmem %s7195_s4, %s4703_s17 }
 0x215   : > { %v2355_v2 = vrot.slane %v2354_v10, 4  ;;  %v4020_v51 = vsel %vm4008_vm13, %v3987_v6, %v3615_v41  ;;  %v7027_v39 = vadd.f32 %v4381_v13, %v4292_v42  ;;  %v2960_v8 = vshll.u32 %v2578_v37, 16 }
 0x216   : > { %v2365_v32 = vrot.slane %v2364_v48, 4  ;;  %v2959_v18 = vrot.slane %v2957_v36, 4  ;;  %v2966_v34 = vshll.u32 %v7022_v62, 16  ;;  %v2970_v22 = vshrl.u32 %v7022_v62, 16 }
 0x217   : > { %3474 = vrot.lane.b32.xlu2 %v5032_v47, %s5209_s29  ;;  %v3603_v63 = vpack.c.b16 %v3587_v44, %v3586_v31  ;;  %v2360_v12 = vsel %vm5543_vm15, %v2355_v2, %v2359_v43  ;;  %v2962_v49 = vrot.slane %v2960_v8, 5  ;;  %v2976_v55 = vshll.u32 %v7024_v3, 16  ;;  %v5048_v43 = vld [vmem:[#allocation2 + $0xcc] sm:$0xff] }
 0x218   : > { %v2370_v42 = vsel %vm5543_vm15, %v2365_v32, %v2369_v30  ;;  %v2968_v13 = vrot.slane %v2966_v34, 5  ;;  %v2972_v35 = vrot.slane %v2970_v22, 4  ;;  %v4053_v52 = vsel %vm4041_vm14, %v4020_v51, %v6988_v58 }
 0x219   : > { %v3506_v11 = vunpack.c.l.b16 %v2360_v12  ;;  %v3507_v4 = vunpack.c.l.b16 %v2370_v42  ;;  %v2963_v23 = vor.u32 %v2962_v49, %v2959_v18  ;;  %v3293_v46 = vpop.permute.xlu1 %3292  ;;  %v7039_v45 = vadd.f32 %v4383_v21, %v4294_v14  ;;  %v4264_v41 = vpop.f32.mrf.mxu0  ;;  %v5007_v21 = vld [vmem:[#allocation2 + $0x48] sm:$0xff] }
 0x21a   : > { %v3791_v20 = vpop.permute.xlu0 %3790  ;;  %v2973_v61 = vor.u32 %v2972_v35, %v2968_v13  ;;  %v2978_v50 = vrot.slane %v2976_v55, 5  ;;  %v4352_v1 = vadd.f32 %v6660_v9, %v4262_v57  ;;  %v4354_v57 = vadd.f32 %v6679_v19, %v4264_v41  ;;  %v4386_v42 = vpop.f32.mrf.mxu3 }
 0x21b   : > { %v4091_v53 = vsel %vm4074_vm0, %v4053_v52, %v3791_v20  ;;  %v3523_v37 = vpack.c.b16 %v3507_v4, %v3506_v11  ;;  %v2964_v58 = vrot.slane %v2963_v23, 4  ;;  %v5101_v17 = vpack.c.bf16 %v7039_v45, %v7027_v39 }
 0x21c   : > { %3634 = vrot.lane.b32.xlu1 %v3603_v63, %s5210_s30  ;;  %4276 = vmatmul.bf16.gmra.mxu0 %v4091_v53  ;;  %v2974_v59 = vrot.slane %v2973_v61, 4  ;;  %v4488_v44 = vadd.f32 %v6929_v24, %v4352_v1  ;;  %v4526_v10 = vmul.f32 %v4352_v1, %v4352_v1  ;;  %v3899_v31 = vsel %vm3860_vm6, %v5013_v25, %v3293_v46  ;;  %v3805_v34 = vpop.permute.xlu2 %3804 }
 0x21d   : > { %3554 = vrot.lane.b32.xlu0 %v3523_v37, %s5212_s6  ;;  %v2969_v9 = vsel %vm5543_vm15, %v2964_v58, %v2968_v13  ;;  %5145 = vst [vmem:[%s6841_s11 + $0x40] sm:$0xff] %v5101_v17   ;;  %v5071_v30 = vpack.c.bf16 %v4354_v57, %v4352_v1  ;;  %v4527_v2 = vmul.f32 %v4354_v57, %v4354_v57  ;;  %vm4591_vm2 = vcmask 1040384  }
 0x21e   : > { %v2979_v6 = vsel %vm5543_vm15, %v2974_v59, %v2978_v50  ;;  %v3762_v47 = vunpack.c.l.b16 %v2969_v9  ;;  %v4557_v48 = vadd.f32 %v6939_v60, %v4526_v10  ;;  %v4489_v36 = vadd.f32 %v4488_v44, %v4354_v57 }
 0x21f   : > { %3730 = vrot.lane.b32.xlu2 %v5048_v43, %s5211_s5  ;;  %v3763_v24 = vunpack.c.l.b16 %v2979_v6  ;;  %5139 = vst [vmem:[%s6841_s11 + $0x10] sm:$0xff] %v5071_v30   ;;  %v3935_v7 = vsel %vm3909_vm8, %v3899_v31, %v7014_v0  ;;  %v5014_v6 = vld [vmem:[#allocation2 + $0x9c] sm:$0xff] }
 0x220   : > { %v4558_v32 = vadd.f32 %v4557_v48, %v4527_v2 }
 0x221   : > { %v3779_v51 = vpack.c.b16 %v3763_v24, %v3762_v47 }
 0x222   : > { %v3469_v8 = vpop.permute.xlu0 %3468  ;;  %v3549_v18 = vpop.permute.xlu1 %3548 }
 0x223   : > { %v3968_v19 = vsel %vm3942_vm11, %v3935_v7, %v3469_v8  ;;  %v4388_v53 = vpop.f32.mrf.mxu3 }
 0x224   : > { %v4001_v60 = vsel %vm3975_vm12, %v3968_v19, %v3549_v18  ;;  %v3537_v55 = vpop.permute.xlu2 %3536 }
 0x225   : > { %3810 = vrot.lane.b32.xlu0 %v3779_v51, %s5213_s7  ;;  %v4034_v14 = vsel %vm4008_vm13, %v4001_v60, %v3629_v40 }
 0x22a   : > { %v3725_v22 = vpop.permute.xlu0 %3724  ;;  %v3281_v63 = vpop.permute.xlu1 %3280 }
 0x22b   : > { %v4067_v12 = vsel %vm4041_vm14, %v4034_v14, %v3725_v22  ;;  %v3881_v13 = vsel %vm3860_vm6, %v5007_v21, %v3281_v63 }
 0x22c   : > { %v4112_v49 = vsel %vm4074_vm0, %v4067_v12, %v3805_v34  ;;  %v3793_v20 = vpop.permute.xlu2 %3792 }
 0x22d   : > { %4311 = vmatmul.bf16.gmra.mxu2 %v4112_v49 }
 0x232   : > { %v3361_v0 = vpop.permute.xlu0 %3360  ;;  %v3457_v35 = vpop.permute.xlu1 %3456 }
 0x233   : > { %v3923_v52 = vsel %vm3909_vm8, %v3881_v13, %v3361_v0 }
 0x234   : > { %v4297_v11 = vpop.f32.mrf.mxu2  ;;  %v3956_v4 = vsel %vm3942_vm11, %v3923_v52, %v3457_v35  ;;  %v3471_v57 = vpop.permute.xlu2 %3470 }
 0x235   : > { %v3989_v46 = vsel %vm3975_vm12, %v3956_v4, %v3537_v55  ;;  %v7073_v37 = vadd.f32 %v4386_v42, %v4297_v11  ;;  %v5008_v55 = vld [vmem:[#allocation2 + $0x54] sm:$0xff] }
 0x23a   : > { %v3617_v23 = vpop.permute.xlu0 %3616  ;;  %v3713_v61 = vpop.permute.xlu1 %3712 }
 0x23b   : > { %v4022_v50 = vsel %vm4008_vm13, %v3989_v46, %v3617_v23 }
 0x23c   : > { %v4055_v1 = vsel %vm4041_vm14, %v4022_v50, %v3713_v61  ;;  %v4299_v43 = vpop.f32.mrf.mxu2  ;;  %v3727_v34 = vpop.permute.xlu2 %3726 }
 0x23d   : > { %v4094_v41 = vsel %vm4074_vm0, %v4055_v1, %v3793_v20  ;;  %v7075_v58 = vadd.f32 %v4388_v53, %v4299_v43 }
 0x23e   : > { %4281 = vmatmul.bf16.gmra.mxu0 %v4094_v41 }
 0x23f   : > { %v5106_v17 = vpack.c.bf16 %v7075_v58, %v7073_v37 }
 0x241   : > { %5146 = vst [vmem:[%s6841_s11 + $0x48] sm:$0xff] %v5106_v17   ;;  %v4267_v40 = vpop.f32.mrf.mxu0 }
 0x242   : > { %v4357_v59 = vadd.f32 %v6703_v28, %v4267_v40  ;;  %v3375_v25 = vpop.permute.xlu1 %3374  ;;  %v2995_v40 = vld [vmem:[#allocation2 + $0xcc] sm:$0xe] }
 0x244   : > { %v3295_v44 = vpop.permute.xlu0 %3294  ;;  %v4490_v10 = vadd.f32 %v4489_v36, %v4357_v59  ;;  %v4528_v9 = vmul.f32 %v4357_v59, %v4357_v59  ;;  %v3363_v12 = vpop.permute.xlu2 %3362 }
 0x245   : > { %v3902_v31 = vsel %vm3860_vm6, %v5014_v6, %v3295_v44  ;;  %v4751_v44 = vrot.slane %v2995_v40, 9 }
 0x246   : > { %v4559_v47 = vadd.f32 %v4558_v32, %v4528_v9  ;;  %v3937_v24 = vsel %vm3909_vm8, %v3902_v31, %v3375_v25  ;;  %v3154_v25 = vrot.slane %v7024_v3, 5 }
 0x247   : > { %v3970_v7 = vsel %vm3942_vm11, %v3937_v24, %v3471_v57 }
 0x249   : > { %v4269_v48 = vpop.f32.mrf.mxu0 }
 0x24a   : > { %v4359_v30 = vadd.f32 %v6735_v26, %v4269_v48  ;;  %v3631_v2 = vpop.permute.xlu1 %3630  ;;  %v4391_v26 = vpop.f32.mrf.mxu3 }
 0x24c   : > { %v3551_v51 = vpop.permute.xlu0 %3550  ;;  %v5076_v8 = vpack.c.bf16 %v4359_v30, %v4357_v59  ;;  %v4491_v18 = vadd.f32 %v4490_v10, %v4359_v30  ;;  %v4529_v28 = vmul.f32 %v4359_v30, %v4359_v30  ;;  %v3619_v11 = vpop.permute.xlu2 %3618  ;;  %v3151_v59 = vrot.slane %v7022_v62, 5  ;;  %v5015_v10 = vld [vmem:[#allocation2 + $0xa8] sm:$0xff] }
 0x24d   : > { %v4003_v36 = vsel %vm3975_vm12, %v3970_v7, %v3551_v51 }
 0x24e   : > { %5140 = vst [vmem:[%s6841_s11 + $0x18] sm:$0xff] %v5076_v8   ;;  %v4560_v19 = vadd.f32 %v4559_v47, %v4529_v28  ;;  %v4036_v32 = vsel %vm4008_vm13, %v4003_v36, %v3631_v2  ;;  %v3153_v57 = vrot.slane %v3151_v59, 4  ;;  %v3152_v31 = vsel %vm5560_vm1, %v4751_v44, %v3151_v59 }
 0x24f   : > { %v4069_v22 = vsel %vm4041_vm14, %v4036_v32, %v3727_v34  ;;  %v3842_v30 = vunpack.c.l.b16 %v3152_v31 }
 0x250   : > { %v3155_v24 = vsel %vm5560_vm1, %v3153_v57, %v3154_v25 }
 0x251   : > { %v3843_v8 = vunpack.c.l.b16 %v3155_v24 }
 0x252   : > { %v4393_v21 = vpop.f32.mrf.mxu3 }
 0x253   : > { %v3859_v36 = vpack.c.b16 %v3843_v8, %v3842_v30 }
 0x254   : > { %v3807_v60 = vpop.permute.xlu1 %3806  ;;  %v3297_v43 = vpop.permute.xlu2 %3296 }
 0x255   : > { %v4115_v14 = vsel %vm4074_vm0, %v4069_v22, %v3807_v60  ;;  %v3905_v48 = vsel %vm3860_vm6, %v5015_v10, %v3297_v43  ;;  %4995 = vmatmul.msk.bf16.gmra.mxu3 %vm3860_vm6, %v3859_v36 }
 0x256   : > { %4316 = vmatmul.bf16.gmra.mxu2 %v4115_v14 }
 0x258   : > { %v4302_v63 = vpop.f32.mrf.mxu2  ;;  %v3283_v49 = vpop.permute.xlu0 %3282 }
 0x259   : > { %v3884_v0 = vsel %vm3860_vm6, %v5008_v55, %v3283_v49  ;;  %v7091_v35 = vadd.f32 %v4391_v26, %v4302_v63 }
 0x25a   : > { %v3925_v46 = vsel %vm3909_vm8, %v3884_v0, %v3363_v12  ;;  %v5016_v0 = vld [vmem:[#allocation2 + $0xb4] sm:$0xff] }
 0x25d   : > { %v3553_v28 = vpop.permute.xlu2 %3552 }
 0x260   : > { %v4304_v42 = vpop.f32.mrf.mxu2  ;;  %v3459_v13 = vpop.permute.xlu0 %3458 }
 0x261   : > { %v7093_v52 = vadd.f32 %v4393_v21, %v4304_v42  ;;  %v3958_v20 = vsel %vm3942_vm11, %v3925_v46, %v3459_v13 }
 0x262   : > { %v3539_v23 = vpop.permute.xlu1 %3538 }
 0x263   : > { %v5111_v4 = vpack.c.bf16 %v7093_v52, %v7091_v35  ;;  %v3991_v61 = vsel %vm3975_vm12, %v3958_v20, %v3539_v23 }
 0x264   : > { %v4024_v53 = vsel %vm4008_vm13, %v3991_v61, %v3619_v11 }
 0x265   : > { %5147 = vst [vmem:[%s6841_s11 + $0x50] sm:$0xff] %v5111_v4   ;;  %v4396_v4 = vpop.f32.mrf.mxu3 }
 0x268   : > { %v3715_v50 = vpop.permute.xlu0 %3714 }
 0x269   : > { %v4057_v1 = vsel %vm4041_vm14, %v4024_v53, %v3715_v50  ;;  %v3809_v12 = vpop.permute.xlu2 %3808 }
 0x26d   : > { %v4398_v59 = vpop.f32.mrf.mxu3 }
 0x26e   : > { %v3795_v41 = vpop.permute.xlu1 %3794 }
 0x26f   : > { %v4097_v17 = vsel %vm4074_vm0, %v4057_v1, %v3795_v41 }
 0x270   : > { %4286 = vmatmul.bf16.gmra.mxu0 %v4097_v17 }
 0x272   : > { %v4272_v9 = vpop.f32.mrf.mxu0 }
 0x273   : > { %v4362_v47 = vadd.f32 %v6764_v56, %v4272_v9 }
 0x274   : > { %v3377_v6 = vpop.permute.xlu0 %3376 }
 0x275   : > { %v3939_v62 = vsel %vm3909_vm8, %v3905_v48, %v3377_v6  ;;  %v4492_v3 = vadd.f32 %v4491_v18, %v4362_v47  ;;  %v4530_v51 = vmul.f32 %v4362_v47, %v4362_v47 }
 0x276   : > { %v3473_v2 = vpop.permute.xlu1 %3472 }
 0x277   : > { %v4561_v7 = vadd.f32 %v4560_v19, %v4530_v51  ;;  %v3972_v56 = vsel %vm3942_vm11, %v3939_v62, %v3473_v2 }
 0x278   : > { %v4005_v15 = vsel %vm3975_vm12, %v3972_v56, %v3553_v28 }
 0x27a   : > { %v4274_v34 = vpop.f32.mrf.mxu0 }
 0x27b   : > { %v4364_v60 = vadd.f32 %v6787_v29, %v4274_v34  ;;  %v3475_v29 = vpop.permute.xlu2 %3474 }
 0x27c   : > { %v3633_v32 = vpop.permute.xlu0 %3632 }
 0x27d   : > { %v4038_v22 = vsel %vm4008_vm13, %v4005_v15, %v3633_v32  ;;  %v5081_v18 = vpack.c.bf16 %v4364_v60, %v4362_v47  ;;  %v4493_v26 = vadd.f32 %v4492_v3, %v4364_v60  ;;  %v4531_v63 = vmul.f32 %v4364_v60, %v4364_v60  ;;  %v4401_v3 = vpop.f32.mrf.mxu3 }
 0x27e   : > { %v3729_v14 = vpop.permute.xlu1 %3728 }
 0x27f   : > { %v4071_v19 = vsel %vm4041_vm14, %v4038_v22, %v3729_v14  ;;  %5141 = vst [vmem:[%s6841_s11 + $0x20] sm:$0xff] %v5081_v18   ;;  %v4562_v55 = vadd.f32 %v4561_v7, %v4531_v63 }
 0x280   : > { %v4118_v49 = vsel %vm4074_vm0, %v4071_v19, %v3809_v12 }
 0x281   : > { %4321 = vmatmul.bf16.gmra.mxu2 %v4118_v49 }
 0x283   : > { %v3731_v1 = vpop.permute.xlu2 %3730 }
 0x284   : > { %v3299_v21 = vpop.permute.xlu0 %3298 }
 0x285   : > { %v3908_v13 = vsel %vm3860_vm6, %v5016_v0, %v3299_v21  ;;  %v4403_v8 = vpop.f32.mrf.mxu3 }
 0x286   : > { %v3379_v42 = vpop.permute.xlu1 %3378 }
 0x287   : > { %v3941_v11 = vsel %vm3909_vm8, %v3908_v13, %v3379_v42 }
 0x288   : > { %v3974_v46 = vsel %vm3942_vm11, %v3941_v11, %v3475_v29 }
 0x28d   : > { %v4406_v18 = vpop.f32.mrf.mxu3 }
 0x28e   : > { %v3635_v20 = vpop.permute.xlu1 %3634 }
 0x28f   : > { %v3555_v23 = vpop.permute.xlu0 %3554 }
 0x290   : > { %v4007_v61 = vsel %vm3975_vm12, %v3974_v46, %v3555_v23 }
 0x291   : > { %v4040_v53 = vsel %vm4008_vm13, %v4007_v61, %v3635_v20 }
 0x292   : > { %v4307_v50 = vpop.f32.mrf.mxu2  ;;  %v4073_v43 = vsel %vm4041_vm14, %v4040_v53, %v3731_v1  ;;  %v4538_v53 = vmul.f32 %v7027_v39, %v7027_v39 }
 0x293   : > { %v7129_v10 = vadd.f32 %v4396_v4, %v4307_v50 }
 0x295   : > { %v4408_v63 = vpop.f32.mrf.mxu3 }
 0x297   : > { %v3811_v41 = vpop.permute.xlu0 %3810 }
 0x298   : > { %v4121_v17 = vsel %vm4074_vm0, %v4073_v43, %v3811_v41 }
 0x299   : > { %v4277_v40 = vpop.f32.mrf.mxu0  ;;  %4326 = vmatmul.bf16.gmra.mxu2 %v4121_v17 }
 0x29a   : > { %v4309_v25 = vpop.f32.mrf.mxu2  ;;  %v4367_v44 = vadd.f32 %v6824_v16, %v4277_v40 }
 0x29b   : > { %v7131_v9 = vadd.f32 %v4398_v59, %v4309_v25  ;;  %v4541_v25 = vmul.f32 %v7075_v58, %v7075_v58 }
 0x29c   : > { %v4494_v57 = vadd.f32 %v4493_v26, %v4367_v44  ;;  %v4532_v6 = vmul.f32 %v4367_v44, %v4367_v44 }
 0x29d   : > { %v5116_v47 = vpack.c.bf16 %v7131_v9, %v7129_v10 }
 0x29e   : > { %v4563_v31 = vadd.f32 %v4562_v55, %v4532_v6  ;;  %v4411_v6 = vpop.f32.mrf.mxu3 }
 0x29f   : > { %5148 = vst [vmem:[%s6841_s11 + $0x58] sm:$0xff] %v5116_v47  }
 0x2a1   : > { %v4279_v48 = vpop.f32.mrf.mxu0 }
 0x2a2   : > { %v4369_v24 = vadd.f32 %v6860_v5, %v4279_v48 }
 0x2a4   : > { %v5086_v30 = vpack.c.bf16 %v4369_v24, %v4367_v44  ;;  %v4495_v2 = vadd.f32 %v4494_v57, %v4369_v24  ;;  %v4533_v62 = vmul.f32 %v4369_v24, %v4369_v24 }
 0x2a6   : > { %5142 = vst [vmem:[%s6841_s11 + $0x28] sm:$0xff] %v5086_v30   ;;  %v4564_v16 = vadd.f32 %v4563_v31, %v4533_v62  ;;  %v4543_v31 = vmul.f32 %v7093_v52, %v7093_v52 }
 0x2b0   : > { %v4312_v51 = vpop.f32.mrf.mxu2 }
 0x2b1   : > { %v7138_v7 = vadd.f32 %v4401_v3, %v4312_v51 }
 0x2b8   : > { %v4314_v28 = vpop.f32.mrf.mxu2 }
 0x2b9   : > { %v7140_v36 = vadd.f32 %v4403_v8, %v4314_v28 }
 0x2bb   : > { %v5121_v56 = vpack.c.bf16 %v7140_v36, %v7138_v7  ;;  %v4282_v34 = vpop.f32.mrf.mxu0 }
 0x2bc   : > { %v4372_v5 = vadd.f32 %v6891_v33, %v4282_v34  ;;  %v4546_v34 = vmul.f32 %v7138_v7, %v7138_v7 }
 0x2bd   : > { %5149 = vst [vmem:[%s6841_s11 + $0x60] sm:$0xff] %v5121_v56  }
 0x2be   : > { %v4496_v15 = vadd.f32 %v4495_v2, %v4372_v5  ;;  %v4534_v42 = vmul.f32 %v4372_v5, %v4372_v5 }
 0x2c0   : > { %v4565_v13 = vadd.f32 %v4564_v16, %v4534_v42  ;;  %v4413_v16 = vpop.f32.mrf.mxu3 }
 0x2c3   : > { %v4284_v32 = vpop.f32.mrf.mxu0 }
 0x2c4   : > { %v4374_v60 = vadd.f32 %v6923_v38, %v4284_v32 }
 0x2c6   : > { %v5091_v22 = vpack.c.bf16 %v4374_v60, %v4372_v5  ;;  %v4497_v14 = vadd.f32 %v4496_v15, %v4374_v60  ;;  %v4535_v0 = vmul.f32 %v4374_v60, %v4374_v60 }
 0x2c8   : > { %5143 = vst [vmem:[%s6841_s11 + $0x30] sm:$0xff] %v5091_v22   ;;  %v4566_v11 = vadd.f32 %v4565_v13, %v4535_v0 }
 0x2d9   : > { %v4317_v26 = vpop.f32.mrf.mxu2 }
 0x2da   : > { %v4407_v19 = vadd.f32 %v4406_v18, %v4317_v26  ;;  %v4416_v18 = vpop.f32.mrf.mxu3 }
 0x2dc   : > { %v4548_v22 = vmul.f32 %v4407_v19, %v4407_v19 }
 0x2e1   : > { %v4319_v12 = vpop.f32.mrf.mxu2 }
 0x2e2   : > { %v4409_v49 = vadd.f32 %v4408_v63, %v4319_v12 }
 0x2e4   : > { %v5126_v55 = vpack.c.bf16 %v4409_v49, %v4407_v19  ;;  %v4549_v26 = vmul.f32 %v4409_v49, %v4409_v49 }
 0x2e6   : > { %5150 = vst [vmem:[%s6841_s11 + $0x68] sm:$0xff] %v5126_v55  }
 0x2ed   : > { %v4287_v21 = vpop.f32.mrf.mxu0 }
 0x2ee   : > { %v4377_v33 = vadd.f32 %v6951_v27, %v4287_v21  ;;  %v4539_v27 = vmul.f32 %v7039_v45, %v7039_v45 }
 0x2f0   : > { %v4536_v29 = vmul.f32 %v4377_v33, %v4377_v33  ;;  %v4498_v4 = vadd.f32 %v4497_v14, %v4377_v33 }
 0x2f2   : > { %v4567_v46 = vadd.f32 %v4566_v11, %v4536_v29 }
 0x2f5   : > { %v4289_v38 = vpop.f32.mrf.mxu0 }
 0x2f6   : > { %v4379_v23 = vadd.f32 %v6984_v54, %v4289_v38  ;;  %v4540_v54 = vmul.f32 %v7073_v37, %v7073_v37  ;;  %v4418_v38 = vpop.f32.mrf.mxu3 }
 0x2f8   : > { %v5096_v20 = vpack.c.bf16 %v4379_v23, %v4377_v33  ;;  %v4499_v61 = vadd.f32 %v4498_v4, %v4379_v23  ;;  %v4537_v50 = vmul.f32 %v4379_v23, %v4379_v23 }
 0x2fa   : > { %5144 = vst [vmem:[%s6841_s11 + $0x38] sm:$0xff] %v5096_v20   ;;  %v4500_v1 = vadd.f32 %v4499_v61, %v7027_v39  ;;  %v4568_v43 = vadd.f32 %v4567_v46, %v4537_v50  ;;  %v4542_v39 = vmul.f32 %v7091_v35, %v7091_v35 }
 0x2fc   : > { %v4501_v41 = vadd.f32 %v4500_v1, %v7039_v45  ;;  %v4569_v17 = vadd.f32 %v4568_v43, %v4538_v53 }
 0x2fe   : > { %v4502_v40 = vadd.f32 %v4501_v41, %v7073_v37  ;;  %v4570_v59 = vadd.f32 %v4569_v17, %v4539_v27 }
 0x300   : > { %v4503_v44 = vadd.f32 %v4502_v40, %v7075_v58  ;;  %v4571_v57 = vadd.f32 %v4570_v59, %v4540_v54  ;;  %v4544_v58 = vmul.f32 %v7129_v10, %v7129_v10 }
 0x302   : > { %v4504_v47 = vadd.f32 %v4503_v44, %v7091_v35  ;;  %v4572_v45 = vadd.f32 %v4571_v57, %v4541_v25  ;;  %v4545_v35 = vmul.f32 %v7131_v9, %v7131_v9 }
 0x304   : > { %v4505_v48 = vadd.f32 %v4504_v47, %v7093_v52  ;;  %v4573_v37 = vadd.f32 %v4572_v45, %v4542_v39  ;;  %v4322_v24 = vpop.f32.mrf.mxu2 }
 0x305   : > { %v4412_v8 = vadd.f32 %v4411_v6, %v4322_v24 }
 0x306   : > { %v4574_v30 = vadd.f32 %v4573_v37, %v4543_v31  ;;  %v4506_v2 = vadd.f32 %v4505_v48, %v7129_v10  ;;  %v4547_v10 = vmul.f32 %v7140_v36, %v7140_v36 }
 0x307   : > { %v4550_v42 = vmul.f32 %v4412_v8, %v4412_v8 }
 0x308   : > { %v4575_v62 = vadd.f32 %v4574_v30, %v4544_v58  ;;  %v4507_v3 = vadd.f32 %v4506_v2, %v7131_v9 }
 0x30a   : > { %v4576_v52 = vadd.f32 %v4575_v62, %v4545_v35  ;;  %v4508_v5 = vadd.f32 %v4507_v3, %v7138_v7 }
 0x30c   : > { %v4324_v51 = vpop.f32.mrf.mxu2  ;;  %v4577_v32 = vadd.f32 %v4576_v52, %v4546_v34  ;;  %v4509_v15 = vadd.f32 %v4508_v5, %v7140_v36 }
 0x30d   : > { %v4414_v28 = vadd.f32 %v4413_v16, %v4324_v51 }
 0x30e   : > { %v4578_v60 = vadd.f32 %v4577_v32, %v4547_v10  ;;  %v4510_v9 = vadd.f32 %v4509_v15, %v4407_v19 }
 0x30f   : > { %v5131_v56 = vpack.c.bf16 %v4414_v28, %v4412_v8  ;;  %v4551_v13 = vmul.f32 %v4414_v28, %v4414_v28 }
 0x310   : > { %v4579_v14 = vadd.f32 %v4578_v60, %v4548_v22  ;;  %v4511_v63 = vadd.f32 %v4510_v9, %v4409_v49 }
 0x311   : > { %5151 = vst [vmem:[%s6841_s11 + $0x70] sm:$0xff] %v5131_v56  }
 0x312   : > { %v4580_v55 = vadd.f32 %v4579_v14, %v4549_v26  ;;  %v4512_v21 = vadd.f32 %v4511_v63, %v4412_v8 }
 0x314   : > { %v4581_v33 = vadd.f32 %v4580_v55, %v4550_v42  ;;  %v4513_v0 = vadd.f32 %v4512_v21, %v4414_v28 }
 0x316   : > { %v4582_v36 = vadd.f32 %v4581_v33, %v4551_v13 }
 0x31c   : > { %v4327_v12 = vpop.f32.mrf.mxu2 }
 0x31d   : > { %v4417_v7 = vadd.f32 %v4416_v18, %v4327_v12 }
 0x31f   : > { %v4552_v29 = vmul.f32 %v4417_v7, %v4417_v7  ;;  %v4514_v4 = vadd.f32 %v4513_v0, %v4417_v7 }
 0x321   : > { %v4583_v19 = vadd.f32 %v4582_v36, %v4552_v29 }
 0x324   : > { %v4329_v11 = vpop.f32.mrf.mxu2 }
 0x325   : > { %v4419_v23 = vadd.f32 %v4418_v38, %v4329_v11 }
 0x327   : > { %v5136_v46 = vpack.c.bf16 %v4419_v23, %v4417_v7  ;;  %v4515_v20 = vadd.f32 %v4514_v4, %v4419_v23  ;;  %v4553_v49 = vmul.f32 %v4419_v23, %v4419_v23 }
 0x329   : > { %5152 = vst [vmem:[%s6841_s11 + $0x78] sm:$0xff] %v5136_v46   ;;  %v4516_v61 = vrot.slane %v4515_v20, 4  ;;  %v4584_v50 = vadd.f32 %v4583_v19, %v4553_v49 }
 0x32b   : > { %v4517_v53 = vadd.f32 %v4516_v61, %v4515_v20  ;;  %v4585_v1 = vrot.slane %v4584_v50, 4 }
 0x32d   : > { %v4518_v43 = vrot.slane %v4517_v53, 2  ;;  %v4586_v27 = vadd.f32 %v4585_v1, %v4584_v50 }
 0x32f   : > { %v4519_v41 = vadd.f32 %v4518_v43, %v4517_v53  ;;  %v4587_v17 = vrot.slane %v4586_v27, 2 }
 0x331   : > { %v4520_v54 = vrot.slane %v4519_v41, 1  ;;  %v4588_v40 = vadd.f32 %v4587_v17, %v4586_v27 }
 0x333   : > { %v4589_v59 = vrot.slane %v4588_v40, 1  ;;  %v4521_v25 = vadd.f32 %v4520_v54, %v4519_v41 }
 0x335   : > { %v4590_v44 = vadd.f32 %v4589_v59, %v4588_v40 }
 0x337   : > { %v4592_v57 = vsel %vm4591_vm2, %v4521_v25, %v4590_v44 }
 0x338   : > { %4593 = vst [vmem:[%s228_s28] sm:$0x3] %v4592_v57 }
 0x339 PF: > { %s15_s15 = sadd.s32 1, %s5203_s15  }
 0x33a   : > { %p12_p4 = scmp.ge.s32.totalorder %s15_s15, 4  }
 0x33c   :  { %14 = sbr.rel (!%p12_p4) target bundleno = 1 (0x1), region = 79 }

// kernel: upsample_block_forward.6
= control target key start
LH: loop header
LB: loop body
LE: loop exit
PB: predicated region body
PF: predicated region fallthrough
CT: control target
= control target key end

     0   :  { %s5967_s18 = smov 0   ;;  %s7781_s0 = inlined_call_operand.vmem [shape: bf16[2,16,16,128], index: 0, kind: input, shape index: {}]   ;;  %s7782_s1 = inlined_call_operand.vmem [shape: f32[1,128], index: 1, kind: input, shape index: {}]   ;;  %s7783_s2 = inlined_call_operand.vmem [shape: f32[1,128], index: 2, kind: input, shape index: {}]   ;;  %s7784_s3 = inlined_call_operand.vmem [shape: bf16[1152,128], index: 3, kind: input, shape index: {}]   ;;  %s7785_s4 = inlined_call_operand.vmem [shape: bf16[2,16,16,128], index: 4, kind: output, shape index: {0}]   ;;  %s7786_s5 = inlined_call_operand.vmem [shape: f32[2,2,128], index: 5, kind: output, shape index: {1}]  }
   0x1 LB: > { %s5023_s19 = sadd.s32 4294967295, %s5934_s18   ;;  %p5027_p0 = scmp.ge.s32.totalorder %s5934_s18, 1  ;;  %s5934_s18 = sphi %s5967_s18, %s16_s18  }
   0x2   : > { %p190_p1 = scmp.lt.s32.totalorder %s5934_s18, 3 }
   0x4   : > { %p191_p2 = pnand %p5027_p0, %p190_p1 }
   0x6   : > { %194 = sbr.rel (%p191_p2) target bundleno = 801 (0x321), region = 36 }
   0xb   : > { %v5620_v0 = vld [vmem:[%s7784_s3 + $0x38] sm:$0xff]  ;;  %p222_p3 = scmp.lt.s32.totalorder %s5023_s19, 1  ;;  %v5936_v1 = vmov 0   ;;  %v5619_v2 = vld [vmem:[%s7784_s3 + $0x30] sm:$0xff]  ;;  %v5996_v3 = vld [vmem:[%s7782_s1] ss:$0 sm:$0xff] }
   0xc   : > { %417 = vst [vmem:[#allocation2 + $0x30] sm:$0xf] %v5936_v1  ;;  %5859 = vmatpush.bf16.msra.mxu1 %v5620_v0  ;;  %5860 = vmatpush.bf16.msra.mxu2 %v5620_v0  ;;  %v5618_v4 = vld [vmem:[%s7784_s3 + $0x28] sm:$0xff]  ;;  %v6008_v9 = vld [vmem:[%s7783_s2] ss:$0 sm:$0xff]  ;;  %v5616_v25 = vld [vmem:[%s7784_s3 + $0x18] sm:$0xff] }
   0xd   : > { %s7832_s19 = smov (!%p222_p3, %s5023_s19), 1  ;;  %5861 = vmatpush.bf16.msra.mxu3 %v5620_v0  ;;  %3963 = vmatpush.bf16.msra.mxu0 %v5620_v0  ;;  %418 = vst [vmem:[#allocation2 + $0x34] sm:$0xf] %v5936_v1  ;;  %v5617_v16 = vld [vmem:[%s7784_s3 + $0x20] sm:$0xff]  ;;  %vm491_vm0 = vsmask.f32 256 }
   0xe   : > { %s5563_s24 = sshll.u32 %s7832_s19, 7  ;;  %405 = vst [vmem:[#allocation2] sm:$0xf] %v5936_v1  ;;  %vm492_vm1 = vsmask.f32 4368  ;;  %vm815_vm2 = vcmask 1043456  }
   0xf   : > { %s5991_s27 = scalar_lea.vmem %s7781_s0, %s5563_s24  ;;  %406 = vst [vmem:[#allocation2 + $0x4] sm:$0xf] %v5936_v1  ;;  %vm816_vm3 = vsmask.f32 7938  ;;  %v5615_v36 = vld [vmem:[%s7784_s3 + $0x10] sm:$0xff]  ;;  %vm6044_vm4 = vmor %vm491_vm0, %vm492_vm1  ;;  %v5614_v49 = vld [vmem:[%s7784_s3 + $0x8] sm:$0xff]  ;;  %s7591_s30 = scalar_lea.vmem %s7785_s4, %s5563_s24 }
  0x10   : > { %5862 = vmatpush.bf16.msra.mxu1 %v5619_v2  ;;  %5863 = vmatpush.bf16.msra.mxu2 %v5619_v2  ;;  %v5831_v5 = vld [vmem:[%s5991_s27 + $0x18] sm:$0xff]   ;;  %407 = vst [vmem:[#allocation2 + $0x8] sm:$0x1] %v5936_v1  ;;  %vm6055_vm5 = vmand %vm815_vm2, %vm816_vm3  ;;  %v5613_v56 = vld [vmem:[%s7784_s3] sm:$0xff]  ;;  %vm822_vm6 = vcmask 1040384   ;;  %vm1431_vm11 = vcmask 1042432  }
  0x11   : > { %v5835_v6 = vld [vmem:[%s5991_s27 + $0x38] sm:$0xff]   ;;  %5864 = vmatpush.bf16.msra.mxu3 %v5619_v2  ;;  %3964 = vmatpush.bf16.msra.mxu0 %v5619_v2  ;;  %v5699_v7 = vunpack.c.l.bf16 %v5831_v5  ;;  %v5700_v8 = vunpack.c.h.bf16 %v5831_v5  ;;  %408 = vst [vmem:[#allocation2 + $0xc] sm:$0xf] %v5936_v1  ;;  %v5832_v61 = vld [vmem:[%s5991_s27 + $0x20] sm:$0xff]   ;;  %vm6442_vm7 = vmand %vm822_vm6, %vm491_vm0  ;;  %vm980_vm8 = vsmask.f32 3328 }
  0x12   : > { %v5715_v10 = vunpack.c.l.bf16 %v5835_v6  ;;  %v5716_v11 = vunpack.c.h.bf16 %v5835_v6  ;;  %409 = vst [vmem:[#allocation2 + $0x10] sm:$0xf] %v5936_v1  ;;  %v5839_v17 = vld [vmem:[%s5991_s27 + $0x58] sm:$0xff]   ;;  %v5836_v62 = vld [vmem:[%s5991_s27 + $0x40] sm:$0xff]   ;;  %v5704_v5 = vunpack.c.h.bf16 %v5832_v61  ;;  %vm981_vm9 = vsmask.f32 7440 }
  0x13   : > { %v311_v12 = vmul.f32 %v5996_v3, %v5699_v7  ;;  %v312_v13 = vmul.f32 %v5996_v3, %v5700_v8  ;;  %410 = vst [vmem:[#allocation2 + $0x14] sm:$0x1] %v5936_v1  ;;  %v5731_v22 = vunpack.c.l.bf16 %v5839_v17  ;;  %v5732_v26 = vunpack.c.h.bf16 %v5839_v17  ;;  %v841_v43 = vld [vmem:[#allocation2 + $0x30] sm:$0xf]  ;;  %v5840_v63 = vld [vmem:[%s5991_s27 + $0x60] sm:$0xff]   ;;  %vm6501_vm10 = vmor %vm980_vm8, %vm981_vm9  ;;  %s5032_s24 = sshll.u32 %s7832_s19, 1 }
  0x14   : > { %v319_v14 = vmul.f32 %v5996_v3, %v5715_v10  ;;  %v320_v15 = vmul.f32 %v5996_v3, %v5716_v11  ;;  %5865 = vmatpush.bf16.msra.mxu1 %v5618_v4  ;;  %5866 = vmatpush.bf16.msra.mxu2 %v5618_v4  ;;  %411 = vst [vmem:[#allocation2 + $0x18] sm:$0xf] %v5936_v1  ;;  %v5719_v7 = vunpack.c.l.bf16 %v5836_v62  ;;  %v5720_v8 = vunpack.c.h.bf16 %v5836_v62  ;;  %s235_s8 = scalar_lea.vmem %s7786_s5, %s5032_s24 }
  0x15   : > { %5867 = vmatpush.bf16.msra.mxu3 %v5618_v4  ;;  %3965 = vmatpush.bf16.msra.mxu0 %v5618_v4  ;;  %v347_v18 = vadd.f32 %v6008_v9, %v311_v12  ;;  %v348_v19 = vadd.f32 %v6008_v9, %v312_v13  ;;  %412 = vst [vmem:[#allocation2 + $0x1c] sm:$0xf] %v5936_v1  ;;  %v5703_v4 = vunpack.c.l.bf16 %v5832_v61  ;;  %v5735_v10 = vunpack.c.l.bf16 %v5840_v63 }
  0x16   : > { %v355_v20 = vadd.f32 %v6008_v9, %v319_v14  ;;  %v356_v21 = vadd.f32 %v6008_v9, %v320_v15  ;;  %413 = vst [vmem:[#allocation2 + $0x20] sm:$0x1] %v5936_v1  ;;  %v327_v31 = vmul.f32 %v5996_v3, %v5731_v22  ;;  %v328_v37 = vmul.f32 %v5996_v3, %v5732_v26 }
  0x17   : > { %v379_v23 = vmax.f32 %v347_v18, 0.0  ;;  %v380_v24 = vmax.f32 %v348_v19, 0.0  ;;  %414 = vst [vmem:[#allocation2 + $0x24] sm:$0xf] %v5936_v1  ;;  %v313_v12 = vmul.f32 %v5996_v3, %v5703_v4  ;;  %v314_v13 = vmul.f32 %v5996_v3, %v5704_v5 }
  0x18   : > { %5868 = vmatpush.bf16.msra.mxu1 %v5617_v16  ;;  %5869 = vmatpush.bf16.msra.mxu2 %v5617_v16  ;;  %415 = vst [vmem:[#allocation2 + $0x28] sm:$0xf] %v5936_v1  ;;  %v387_v29 = vmax.f32 %v355_v20, 0.0  ;;  %v388_v30 = vmax.f32 %v356_v21, 0.0  ;;  %v363_v44 = vadd.f32 %v6008_v9, %v327_v31  ;;  %v364_v50 = vadd.f32 %v6008_v9, %v328_v37  ;;  %v5686_v20 = vld [vmem:[%s5991_s27] sm:$0xff]  }
  0x19   : > { %5870 = vmatpush.bf16.msra.mxu3 %v5617_v16  ;;  %3966 = vmatpush.bf16.msra.mxu0 %v5617_v16  ;;  %v465_v27 = vpack.c.bf16 %v379_v23, %v379_v23  ;;  %v466_v28 = vpack.c.bf16 %v380_v24, %v380_v24  ;;  %416 = vst [vmem:[#allocation2 + $0x2c] sm:$0x1] %v5936_v1  ;;  %v5736_v14 = vunpack.c.h.bf16 %v5840_v63  ;;  %v5635_v63 = vld [vmem:[%s7784_s3 + $0xb0] sm:$0xff]  ;;  %vm1432_vm12 = vcmask 1046532  }
  0x1a   : > { %419 = vst [vmem:[#allocation2 + $0x38] sm:$0x1] %v5936_v1  ;;  %v6051_v41 = vpack.c.bf16 %v387_v29, %v387_v29  ;;  %v474_v48 = vpack.c.bf16 %v388_v30, %v388_v30  ;;  %v395_v54 = vmax.f32 %v363_v44, 0.0  ;;  %v396_v57 = vmax.f32 %v364_v50, 0.0  ;;  %v5565_v50 = vld [vmem:[#allocation2] sm:$0xff]  ;;  %vm6525_vm13 = vmor %vm1431_vm11, %vm1432_vm12 }
  0x1b   : > { %v546_v32 = vshrl.u32 %v465_v27, 16  ;;  %v549_v33 = vshll.u32 %v465_v27, 16  ;;  %v554_v34 = vshrl.u32 %v466_v28, 16  ;;  %v557_v35 = vshll.u32 %v466_v28, 16  ;;  %420 = vst [vmem:[#allocation2 + $0x3c] sm:$0xf] %v5936_v1 }
  0x1c   : > { %5871 = vmatpush.bf16.msra.mxu1 %v5616_v25  ;;  %5872 = vmatpush.bf16.msra.mxu2 %v5616_v25  ;;  %421 = vst [vmem:[#allocation2 + $0x40] sm:$0xf] %v5936_v1  ;;  %v614_v53 = vshrl.u32 %v6051_v41, 16  ;;  %v622_v55 = vshrl.u32 %v474_v48, 16  ;;  %v617_v59 = vshll.u32 %v6051_v41, 16  ;;  %v6083_v60 = vpack.c.bf16 %v395_v54, %v395_v54 }
  0x1d   : > { %5873 = vmatpush.bf16.msra.mxu3 %v5616_v25  ;;  %3967 = vmatpush.bf16.msra.mxu0 %v5616_v25  ;;  %v548_v39 = vrot.slane %v546_v32, 7  ;;  %v6048_v40 = vrot.slane %v554_v34, 7  ;;  %422 = vst [vmem:[#allocation2 + $0x44] sm:$0x1] %v5936_v1  ;;  %v625_v2 = vshll.u32 %v474_v48, 16  ;;  %v6092_v6 = vpack.c.bf16 %v396_v57, %v396_v57 }
  0x1e   : > { %423 = vst [vmem:[#allocation2 + $0x48] sm:$0xf] %v5936_v1  ;;  %v6079_v58 = vrot.slane %v614_v53, 7  ;;  %v6089_v0 = vrot.slane %v622_v55, 7  ;;  %v682_v16 = vshrl.u32 %v6083_v60, 16  ;;  %v321_v17 = vmul.f32 %v5996_v3, %v5719_v7  ;;  %v5628_v55 = vld [vmem:[%s7784_s3 + $0x78] sm:$0xff] }
  0x1f   : > { %v551_v45 = vor.u32 %v549_v33, %v548_v39  ;;  %v552_v46 = vrot.slane %v548_v39, 4  ;;  %v559_v47 = vor.u32 %v557_v35, %v6048_v40  ;;  %424 = vst [vmem:[#allocation2 + $0x4c] sm:$0xf] %v5936_v1  ;;  %v322_v18 = vmul.f32 %v5996_v3, %v5720_v8  ;;  %v5643_v7 = vld [vmem:[%s7784_s3 + $0xf0] sm:$0xff] }
  0x20   : > { %5874 = vmatpush.bf16.msra.mxu1 %v5615_v36  ;;  %5875 = vmatpush.bf16.msra.mxu2 %v5615_v36  ;;  %425 = vst [vmem:[#allocation2 + $0x50] sm:$0x1] %v5936_v1  ;;  %v620_v11 = vrot.slane %v6079_v58, 4  ;;  %v329_v19 = vmul.f32 %v5996_v3, %v5735_v10  ;;  %v627_v21 = vor.u32 %v625_v2, %v6089_v0  ;;  %v690_v25 = vshrl.u32 %v6092_v6, 16  ;;  %v5652_v2 = vld [vmem:[%s7784_s3 + $0x138] sm:$0xff]  ;;  %v5627_v8 = vld [vmem:[%s7784_s3 + $0x70] sm:$0xff] }
  0x21   : > { %5876 = vmatpush.bf16.msra.mxu3 %v5615_v36  ;;  %3968 = vmatpush.bf16.msra.mxu0 %v5615_v36  ;;  %v560_v51 = vsel %vm6044_vm4, %v552_v46, %v559_v47  ;;  %v842_v52 = vsel %vm6055_vm5, %v551_v45, %v841_v43  ;;  %426 = vst [vmem:[#allocation2 + $0x54] sm:$0xf] %v5936_v1  ;;  %v5687_v32 = vunpack.c.l.bf16 %v5686_v20  ;;  %v6117_v33 = vrot.slane %v682_v16, 7 }
  0x22   : > { %843 = vst [vmem:[#allocation2 + $0x30] sm:$0xf] %v842_v52  ;;  %v349_v22 = vadd.f32 %v6008_v9, %v313_v12  ;;  %v350_v23 = vadd.f32 %v6008_v9, %v314_v13  ;;  %v330_v24 = vmul.f32 %v5996_v3, %v5736_v14  ;;  %v357_v26 = vadd.f32 %v6008_v9, %v321_v17 }
  0x23   : > { %844 = vst [vmem:[#allocation2 + $0x34] sm:$0xf] %v560_v51  ;;  %v358_v27 = vadd.f32 %v6008_v9, %v322_v18  ;;  %v365_v28 = vadd.f32 %v6008_v9, %v329_v19  ;;  %v685_v34 = vshll.u32 %v6083_v60, 16  ;;  %v693_v37 = vshll.u32 %v6092_v6, 16  ;;  %v5644_v51 = vld [vmem:[%s7784_s3 + $0xf8] sm:$0xff] }
  0x24   : > { %5877 = vmatpush.bf16.msra.mxu1 %v5614_v49  ;;  %5878 = vmatpush.bf16.msra.mxu2 %v5614_v49  ;;  %427 = vst [vmem:[#allocation2 + $0x58] sm:$0xf] %v5936_v1  ;;  %v381_v29 = vmax.f32 %v349_v22, 0.0  ;;  %v382_v30 = vmax.f32 %v350_v23, 0.0  ;;  %v366_v31 = vadd.f32 %v6008_v9, %v330_v24  ;;  %v389_v35 = vmax.f32 %v357_v26, 0.0 }
  0x25   : > { %5879 = vmatpush.bf16.msra.mxu3 %v5614_v49  ;;  %3969 = vmatpush.bf16.msra.mxu0 %v5614_v49  ;;  %428 = vst [vmem:[#allocation2 + $0x5c] sm:$0x1] %v5936_v1  ;;  %v390_v36 = vmax.f32 %v358_v27, 0.0  ;;  %v5688_v44 = vunpack.c.h.bf16 %v5686_v20  ;;  %v6123_v45 = vrot.slane %v690_v25, 7  ;;  %v397_v47 = vmax.f32 %v365_v28, 0.0  ;;  %v5636_v49 = vld [vmem:[%s7784_s3 + $0xb8] sm:$0xff] }
  0x26   : > { %429 = vst [vmem:[#allocation2 + $0x60] sm:$0xf] %v5936_v1  ;;  %v467_v39 = vpack.c.bf16 %v381_v29, %v381_v29  ;;  %v468_v43 = vpack.c.bf16 %v382_v30, %v382_v30  ;;  %v475_v46 = vpack.c.bf16 %v389_v35, %v389_v35  ;;  %v398_v48 = vmax.f32 %v366_v31, 0.0  ;;  %v6184_v22 = vld [vmem:[#allocation2 + $0x3c] sm:$0xf] }
  0x27   : > { %430 = vst [vmem:[#allocation2 + $0x64] sm:$0xf] %v5936_v1  ;;  %v305_v53 = vmul.f32 %v5996_v3, %v5687_v32  ;;  %v688_v54 = vrot.slane %v6117_v33, 4  ;;  %v6138_v57 = vpack.c.bf16 %v390_v36, %v390_v36  ;;  %v6140_v61 = vpack.c.bf16 %v397_v47, %v397_v47 }
  0x28   : > { %5880 = vmatpush.bf16.msra.mxu1 %v5613_v56  ;;  %5881 = vmatpush.bf16.msra.mxu2 %v5613_v56  ;;  %431 = vst [vmem:[#allocation2 + $0x68] sm:$0x1] %v5936_v1  ;;  %v563_v52 = vshrl.u32 %v467_v39, 16  ;;  %v6146_v62 = vor.u32 %v617_v59, %v6079_v58  ;;  %v571_v5 = vshrl.u32 %v468_v43, 16  ;;  %v306_v6 = vmul.f32 %v5996_v3, %v5688_v44 }
  0x29   : > { %5882 = vmatpush.bf16.msra.mxu3 %v5613_v56  ;;  %3970 = vmatpush.bf16.msra.mxu0 %v5613_v56  ;;  %432 = vst [vmem:[#allocation2 + $0x6c] sm:$0xf] %v5936_v1  ;;  %v566_v56 = vshll.u32 %v467_v39, 16  ;;  %v6160_v41 = vsel %vm6044_vm4, %v620_v11, %v627_v21  ;;  %v695_v59 = vor.u32 %v693_v37, %v6123_v45  ;;  %v574_v10 = vshll.u32 %v468_v43, 16  ;;  %v5837_v39 = vld [vmem:[%s5991_s27 + $0x48] sm:$0xff]  }
  0x2a   : > { %v5569_v15 = vld [vmem:[#allocation2 + $0x30] sm:$0xff]  ;;  %433 = vst [vmem:[#allocation2 + $0x70] sm:$0xf] %v5936_v1  ;;  %v565_v4 = vrot.slane %v563_v52, 7  ;;  %v631_v12 = vshrl.u32 %v475_v46, 16  ;;  %v6172_v11 = vrot.slane %v571_v5, 7  ;;  %v484_v14 = vpack.c.bf16 %v398_v48, %v398_v48 }
  0x2b   : > { %3991 = vmatmul.bf16.vlgmr.msra.gmra.mxu1 %v5569_v15  ;;  %434 = vst [vmem:[#allocation2 + $0x74] sm:$0x1] %v5936_v1  ;;  %v634_v13 = vshll.u32 %v475_v46, 16  ;;  %v341_v15 = vadd.f32 %v6008_v9, %v305_v53  ;;  %v639_v18 = vshrl.u32 %v6138_v57, 16  ;;  %v699_v19 = vshrl.u32 %v6140_v61, 16 }
  0x2c   : > { %435 = vst [vmem:[#allocation2 + $0x78] sm:$0xf] %v5936_v1  ;;  %4141 = vmatpush.bf16.msrb.mxu2 %v5636_v49  ;;  %3971 = vmatmul.bf16.vlgmr.msra.gmra.mxu0 %v5565_v50  ;;  %v6176_v16 = vor.u32 %v566_v56, %v565_v4  ;;  %v6178_v17 = vrot.slane %v631_v12, 7  ;;  %v569_v20 = vrot.slane %v565_v4, 4  ;;  %v576_v21 = vor.u32 %v574_v10, %v6172_v11  ;;  %v5841_v4 = vld [vmem:[%s5991_s27 + $0x68] sm:$0xff]  }
  0x2d   : > { %436 = vst [vmem:[#allocation2 + $0x7c] sm:$0xf] %v5936_v1  ;;  %4230 = vmatpush.bf16.msrb.mxu3 %v5644_v51  ;;  %4052 = vmatpush.bf16.msrb.mxu1 %v5628_v55  ;;  %v6170_v58 = vld [vmem:[#allocation2 + $0x60] sm:$0xf]  ;;  %v642_v23 = vshll.u32 %v6138_v57, 16  ;;  %v342_v24 = vadd.f32 %v6008_v9, %v306_v6  ;;  %v6192_v25 = vor.u32 %v685_v34, %v6117_v33  ;;  %v6197_v27 = vrot.slane %v639_v18, 7 }
  0x2e   : > { %437 = vst [vmem:[#allocation2 + $0x80] sm:$0x1] %v5936_v1  ;;  %4319 = vmatpush.bf16.msrb.mxu0 %v5652_v2  ;;  %v6195_v26 = vor.u32 %v634_v13, %v6178_v17  ;;  %v702_v29 = vshll.u32 %v6140_v61, 16  ;;  %v6205_v30 = vsel %vm6044_vm4, %v688_v54, %v695_v59  ;;  %v6207_v60 = vrot.slane %v699_v19, 7  ;;  %v5833_v33 = vld [vmem:[%s5991_s27 + $0x28] sm:$0xff]   ;;  %v5651_v19 = vld [vmem:[%s7784_s3 + $0x130] sm:$0xff] }
  0x2f   : > { %438 = vst [vmem:[#allocation2 + $0x84] sm:$0xf] %v5936_v1  ;;  %v707_v31 = vshrl.u32 %v484_v14, 16  ;;  %v373_v32 = vmax.f32 %v341_v15, 0.0  ;;  %v870_v34 = vsel %vm6055_vm5, %v6146_v62, %v6170_v58  ;;  %v849_v35 = vsel %vm6055_vm5, %v6176_v16, %v6184_v22  ;;  %v5634_v15 = vld [vmem:[%s7784_s3 + $0xa8] sm:$0xff] }
  0x30   : > { %439 = vst [vmem:[#allocation2 + $0x88] sm:$0xf] %v5936_v1  ;;  %4142 = vmatpush.bf16.msrb.mxu2 %v5635_v63  ;;  %v6199_v28 = vld [vmem:[#allocation2 + $0x6c] sm:$0xf]  ;;  %v637_v36 = vrot.slane %v6178_v17, 4  ;;  %v710_v37 = vshll.u32 %v484_v14, 16  ;;  %v6226_v44 = vsel %vm6044_vm4, %v569_v20, %v576_v21  ;;  %v644_v46 = vor.u32 %v642_v23, %v6197_v27 }
  0x31   : > { %440 = vst [vmem:[#allocation2 + $0x8c] sm:$0x1] %v5936_v1  ;;  %4231 = vmatpush.bf16.msrb.mxu3 %v5643_v7  ;;  %4053 = vmatpush.bf16.msrb.mxu1 %v5627_v8  ;;  %v6229_v47 = vrot.slane %v707_v31, 7  ;;  %v374_v48 = vmax.f32 %v342_v24, 0.0  ;;  %v877_v49 = vsel %vm6055_vm5, %v6195_v26, %v6199_v28  ;;  %v459_v50 = vpack.c.bf16 %v373_v32, %v373_v32  ;;  %v5642_v18 = vld [vmem:[%s7784_s3 + $0xe8] sm:$0xff] }
  0x32   : > { %441 = vst [vmem:[#allocation2 + $0x90] sm:$0xf] %v5936_v1  ;;  %v5707_v51 = vunpack.c.l.bf16 %v5833_v33  ;;  %v5708_v52 = vunpack.c.h.bf16 %v5833_v33  ;;  %v6238_v53 = vor.u32 %v702_v29, %v6207_v60  ;;  %v5723_v55 = vunpack.c.l.bf16 %v5837_v39  ;;  %v6279_v29 = vld [vmem:[#allocation2 + $0xc] sm:$0xf]  ;;  %4320 = vmatpush.bf16.msrb.mxu0 %v5651_v19 }
  0x33   : > { %442 = vst [vmem:[#allocation2 + $0x94] sm:$0xf] %v5936_v1  ;;  %v460_v54 = vpack.c.bf16 %v374_v48, %v374_v48  ;;  %v5724_v56 = vunpack.c.h.bf16 %v5837_v39  ;;  %v495_v61 = vshrl.u32 %v459_v50, 16  ;;  %v498_v63 = vshll.u32 %v459_v50, 16  ;;  %v5641_v39 = vld [vmem:[%s7784_s3 + $0xe0] sm:$0xff]  ;;  %v5650_v50 = vld [vmem:[%s7784_s3 + $0x128] sm:$0xff] }
  0x34   : > { %443 = vst [vmem:[#allocation2 + $0x98] sm:$0x1] %v5936_v1  ;;  %v315_v2 = vmul.f32 %v5996_v3, %v5707_v51  ;;  %v705_v5 = vrot.slane %v6207_v60, 4  ;;  %v712_v6 = vor.u32 %v710_v37, %v6229_v47  ;;  %v316_v12 = vmul.f32 %v5996_v3, %v5708_v52  ;;  %v5626_v60 = vld [vmem:[%s7784_s3 + $0x68] sm:$0xff]  ;;  %4143 = vmatpush.bf16.msrb.mxu2 %v5634_v15  ;;  %v5633_v37 = vld [vmem:[%s7784_s3 + $0xa0] sm:$0xff] }
  0x35   : > { %444 = vst [vmem:[#allocation2 + $0x9c] sm:$0xf] %v5936_v1  ;;  %v503_v59 = vshrl.u32 %v460_v54, 16  ;;  %v506_v7 = vshll.u32 %v460_v54, 16  ;;  %v6253_v10 = vrot.slane %v495_v61, 7  ;;  %v323_v14 = vmul.f32 %v5996_v3, %v5723_v55  ;;  %4232 = vmatpush.bf16.msrb.mxu3 %v5642_v18  ;;  %4054 = vmatpush.bf16.msrb.mxu1 %v5626_v60  ;;  %v5625_v51 = vld [vmem:[%s7784_s3 + $0x60] sm:$0xff] }
  0x36   : > { %445 = vst [vmem:[#allocation2 + $0xa0] sm:$0xf] %v5936_v1  ;;  %v351_v13 = vadd.f32 %v6008_v9, %v315_v2  ;;  %v324_v20 = vmul.f32 %v5996_v3, %v5724_v56  ;;  %v5739_v21 = vunpack.c.l.bf16 %v5841_v4  ;;  %v5740_v23 = vunpack.c.h.bf16 %v5841_v4  ;;  %4321 = vmatpush.bf16.msrb.mxu0 %v5650_v50 }
  0x37   : > { %446 = vst [vmem:[#allocation2 + $0xa4] sm:$0x1] %v5936_v1  ;;  %v6262_v17 = vrot.slane %v503_v59, 7  ;;  %v6274_v24 = vsel %vm6044_vm4, %v637_v36, %v644_v46  ;;  %v352_v31 = vadd.f32 %v6008_v9, %v316_v12  ;;  %v359_v32 = vadd.f32 %v6008_v9, %v323_v14 }
  0x38   : > { %447 = vst [vmem:[#allocation2 + $0xa8] sm:$0xf] %v5936_v1  ;;  %v501_v36 = vrot.slane %v6253_v10, 4  ;;  %v360_v46 = vadd.f32 %v6008_v9, %v324_v20  ;;  %v713_v48 = vsel %vm6044_vm4, %v705_v5, %v712_v6  ;;  %v331_v55 = vmul.f32 %v5996_v3, %v5739_v21  ;;  %4144 = vmatpush.bf16.msrb.mxu2 %v5633_v37 }
  0x39   : > { %448 = vst [vmem:[#allocation2 + $0xac] sm:$0xf] %v5936_v1  ;;  %v6222_v43 = vld [vmem:[#allocation2 + $0x90] sm:$0xf]  ;;  %v384_v52 = vmax.f32 %v352_v31, 0.0  ;;  %v391_v54 = vmax.f32 %v359_v32, 0.0  ;;  %4233 = vmatpush.bf16.msrb.mxu3 %v5641_v39  ;;  %4055 = vmatpush.bf16.msrb.mxu1 %v5625_v51 }
  0x3a   : > { %449 = vst [vmem:[#allocation2 + $0xb0] sm:$0x1] %v5936_v1  ;;  %v898_v57 = vsel %vm6055_vm5, %v6192_v25, %v6222_v43  ;;  %v6277_v25 = vor.u32 %v498_v63, %v6253_v10  ;;  %v383_v43 = vmax.f32 %v351_v13, 0.0  ;;  %v392_v61 = vmax.f32 %v360_v46, 0.0  ;;  %v855_v13 = vld [vmem:[#allocation2 + $0x48] sm:$0xf] }
  0x3b   : > { %450 = vst [vmem:[#allocation2 + $0xb4] sm:$0xf] %v5936_v1  ;;  %v332_v63 = vmul.f32 %v5996_v3, %v5740_v23  ;;  %v470_v4 = vpack.c.bf16 %v384_v52, %v384_v52  ;;  %v477_v5 = vpack.c.bf16 %v391_v54, %v391_v54  ;;  %v367_v6 = vadd.f32 %v6008_v9, %v331_v55  ;;  %v5838_v10 = vld [vmem:[%s5991_s27 + $0x50] sm:$0xff]  }
  0x3c   : > { %451 = vst [vmem:[#allocation2 + $0xb8] sm:$0xf] %v5936_v1  ;;  %v6251_v8 = vld [vmem:[#allocation2 + $0x9c] sm:$0xf]  ;;  %v469_v56 = vpack.c.bf16 %v383_v43, %v383_v43  ;;  %v819_v2 = vsel %vm6055_vm5, %v6277_v25, %v6279_v29  ;;  %v5834_v43 = vld [vmem:[%s5991_s27 + $0x30] sm:$0xff]  }
  0x3d   : > { %452 = vst [vmem:[#allocation2 + $0xbc] sm:$0x1] %v5936_v1  ;;  %v905_v33 = vsel %vm6055_vm5, %v6238_v53, %v6251_v8  ;;  %v368_v59 = vadd.f32 %v6008_v9, %v332_v63  ;;  %v591_v12 = vshll.u32 %v470_v4, 16  ;;  %v648_v14 = vshrl.u32 %v477_v5, 16 }
  0x3e   : > { %453 = vst [vmem:[#allocation2 + $0xc0] sm:$0xf] %v5936_v1  ;;  %v580_v62 = vshrl.u32 %v469_v56, 16  ;;  %v583_v58 = vshll.u32 %v469_v56, 16  ;;  %v651_v15 = vshll.u32 %v477_v5, 16  ;;  %v399_v20 = vmax.f32 %v367_v6, 0.0 }
  0x3f   : > { %454 = vst [vmem:[#allocation2 + $0xc4] sm:$0xf] %v5936_v1  ;;  %v650_v21 = vrot.slane %v648_v14, 7  ;;  %v400_v23 = vmax.f32 %v368_v59, 0.0  ;;  %v911_v55 = vld [vmem:[#allocation2 + $0xa8] sm:$0xf]  ;;  %v5711_v56 = vunpack.c.l.bf16 %v5834_v43 }
  0x40   : > { %455 = vst [vmem:[#allocation2 + $0xc8] sm:$0x1] %v5936_v1  ;;  %v485_v60 = vpack.c.bf16 %v399_v20, %v399_v20  ;;  %v5640_v6 = vld [vmem:[%s7784_s3 + $0xd8] sm:$0xff]  ;;  %v5842_v14 = vld [vmem:[%s5991_s27 + $0x70] sm:$0xff]  }
  0x41   : > { %456 = vst [vmem:[#allocation2 + $0xcc] sm:$0xf] %v5936_v1  ;;  %v653_v31 = vor.u32 %v651_v15, %v650_v21  ;;  %v654_v32 = vrot.slane %v650_v21, 4  ;;  %4234 = vmatpush.bf16.msrb.mxu3 %v5640_v6 }
  0x42   : > { %457 = vst [vmem:[#allocation2 + $0xd0] sm:$0xf] %v5936_v1  ;;  %v716_v8 = vshrl.u32 %v485_v60, 16 }
  0x43   : > { %458 = vst [vmem:[#allocation2 + $0xd4] sm:$0x1] %v5936_v1  ;;  %v508_v1 = vor.u32 %v506_v7, %v6262_v17  ;;  %v5829_v7 = vld [vmem:[%s5991_s27 + $0x8] sm:$0xff]  }
  0x44   : > { %871 = vst [vmem:[#allocation2 + $0x60] sm:$0xf] %v870_v34  ;;  %v478_v34 = vpack.c.bf16 %v392_v61, %v392_v61  ;;  %v5691_v25 = vunpack.c.l.bf16 %v5829_v7  ;;  %v5692_v37 = vunpack.c.h.bf16 %v5829_v7  ;;  %v5712_v61 = vunpack.c.h.bf16 %v5834_v43 }
  0x45   : > { %872 = vst [vmem:[#allocation2 + $0x64] sm:$0xf] %v6160_v41  ;;  %v588_v41 = vshrl.u32 %v470_v4, 16  ;;  %v509_v26 = vsel %vm6044_vm4, %v501_v36, %v508_v1 }
  0x46   : > { %899 = vst [vmem:[#allocation2 + $0x90] sm:$0xf] %v898_v57  ;;  %v582_v57 = vrot.slane %v580_v62, 7  ;;  %v656_v18 = vshrl.u32 %v478_v34, 16  ;;  %v659_v19 = vshll.u32 %v478_v34, 16  ;;  %v307_v54 = vmul.f32 %v5996_v3, %v5691_v25  ;;  %v5648_v25 = vld [vmem:[%s7784_s3 + $0x118] sm:$0xff] }
  0x47   : > { %900 = vst [vmem:[#allocation2 + $0x94] sm:$0xf] %v6205_v30  ;;  %v6331_v30 = vrot.slane %v588_v41, 7  ;;  %v308_v1 = vmul.f32 %v5996_v3, %v5692_v37  ;;  %v5727_v62 = vunpack.c.l.bf16 %v5838_v10  ;;  %v5649_v41 = vld [vmem:[%s7784_s3 + $0x120] sm:$0xff] }
  0x48   : > { %850 = vst [vmem:[#allocation2 + $0x3c] sm:$0xf] %v849_v35  ;;  %v585_v29 = vor.u32 %v583_v58, %v582_v57  ;;  %v586_v16 = vrot.slane %v582_v57, 4  ;;  %v6338_v22 = vrot.slane %v656_v18, 7  ;;  %v883_v35 = vld [vmem:[#allocation2 + $0x78] sm:$0xf]  ;;  %v343_v5 = vadd.f32 %v6008_v9, %v307_v54  ;;  %4322 = vmatpush.bf16.msrb.mxu0 %v5649_v41 }
  0x49   : > { %851 = vst [vmem:[#allocation2 + $0x40] sm:$0xf] %v6226_v44  ;;  %v593_v44 = vor.u32 %v591_v12, %v6331_v30  ;;  %v884_v53 = vsel %vm6055_vm5, %v653_v31, %v883_v35  ;;  %v5728_v58 = vunpack.c.h.bf16 %v5838_v10  ;;  %v344_v7 = vadd.f32 %v6008_v9, %v308_v1  ;;  %v5624_v12 = vld [vmem:[%s7784_s3 + $0x58] sm:$0xff]  ;;  %v5631_v18 = vld [vmem:[%s7784_s3 + $0x90] sm:$0xff] }
  0x4a   : > { %878 = vst [vmem:[#allocation2 + $0x6c] sm:$0xf] %v877_v49  ;;  %v856_v28 = vsel %vm6055_vm5, %v585_v29, %v855_v13  ;;  %v661_v49 = vor.u32 %v659_v19, %v6338_v22  ;;  %v317_v13 = vmul.f32 %v5996_v3, %v5711_v56  ;;  %v375_v57 = vmax.f32 %v343_v5, 0.0  ;;  %4056 = vmatpush.bf16.msrb.mxu1 %v5624_v12 }
  0x4b   : > { %879 = vst [vmem:[#allocation2 + $0x70] sm:$0xf] %v6274_v24  ;;  %v486_v24 = vpack.c.bf16 %v400_v23, %v400_v23  ;;  %v594_v46 = vsel %vm6044_vm4, %v586_v16, %v593_v44  ;;  %v318_v19 = vmul.f32 %v5996_v3, %v5712_v61  ;;  %v376_v21 = vmax.f32 %v344_v7, 0.0  ;;  %v5639_v23 = vld [vmem:[%s7784_s3 + $0xd0] sm:$0xff] }
  0x4c   : > { %v5573_v39 = vld [vmem:[#allocation2 + $0x60] sm:$0xff]  ;;  %906 = vst [vmem:[#allocation2 + $0x9c] sm:$0xf] %v905_v33  ;;  %v719_v33 = vshll.u32 %v485_v60, 16  ;;  %v662_v36 = vsel %vm6044_vm4, %v654_v32, %v661_v49  ;;  %v353_v29 = vadd.f32 %v6008_v9, %v317_v13  ;;  %v461_v35 = vpack.c.bf16 %v375_v57, %v375_v57  ;;  %v5623_v60 = vld [vmem:[%s7784_s3 + $0x50] sm:$0xff]  ;;  %4235 = vmatpush.bf16.msrb.mxu3 %v5639_v23 }
  0x4d   : > { %907 = vst [vmem:[#allocation2 + $0xa0] sm:$0xf] %v713_v48  ;;  %4011 = vmatmul.bf16.vlgmr.msra.gmra.mxu2 %v5573_v39  ;;  %v724_v51 = vshrl.u32 %v486_v24, 16  ;;  %v727_v52 = vshll.u32 %v486_v24, 16  ;;  %v718_v48 = vrot.slane %v716_v8, 7  ;;  %v354_v44 = vadd.f32 %v6008_v9, %v318_v19  ;;  %4323 = vmatpush.bf16.msrb.mxu0 %v5648_v25 }
  0x4e   : > { %v5577_v50 = vld [vmem:[#allocation2 + $0x90] sm:$0xff]  ;;  %820 = vst [vmem:[#allocation2 + $0xc] sm:$0xf] %v819_v2  ;;  %v5632_v2 = vld [vmem:[%s7784_s3 + $0x98] sm:$0xff]  ;;  %v5743_v31 = vunpack.c.l.bf16 %v5842_v14  ;;  %v462_v32 = vpack.c.bf16 %v376_v21, %v376_v21  ;;  %v385_v37 = vmax.f32 %v353_v29, 0.0  ;;  %v325_v39 = vmul.f32 %v5996_v3, %v5727_v62  ;;  %4057 = vmatpush.bf16.msrb.mxu1 %v5623_v60 }
  0x4f   : > { %821 = vst [vmem:[#allocation2 + $0x10] sm:$0xf] %v509_v26  ;;  %4031 = vmatmul.bf16.vlgmr.msra.gmra.mxu3 %v5577_v50  ;;  %v6364_v4 = vrot.slane %v724_v51, 7  ;;  %v721_v34 = vor.u32 %v719_v33, %v718_v48  ;;  %v722_v59 = vrot.slane %v718_v48, 4  ;;  %4145 = vmatpush.bf16.msrb.mxu2 %v5632_v2  ;;  %v326_v26 = vmul.f32 %v5996_v3, %v5728_v58  ;;  %v827_v48 = vld [vmem:[#allocation2 + $0x18] sm:$0xf] }
  0x50   : > { %v5570_v63 = vld [vmem:[#allocation2 + $0x3c] sm:$0xff]  ;;  %857 = vst [vmem:[#allocation2 + $0x48] sm:$0xf] %v856_v28  ;;  %v512_v49 = vshrl.u32 %v461_v35, 16  ;;  %v515_v24 = vshll.u32 %v461_v35, 16  ;;  %v386_v43 = vmax.f32 %v354_v44, 0.0  ;;  %v471_v33 = vpack.c.bf16 %v385_v37, %v385_v37 }
  0x51   : > { %858 = vst [vmem:[#allocation2 + $0x4c] sm:$0xf] %v594_v46  ;;  %3996 = vmatmul.bf16.gmra.mxu1 %v5570_v63  ;;  %v729_v15 = vor.u32 %v727_v52, %v6364_v4  ;;  %v912_v20 = vsel %vm6055_vm5, %v721_v34, %v911_v55  ;;  %v5744_v46 = vunpack.c.h.bf16 %v5842_v14  ;;  %v523_v8 = vshll.u32 %v462_v32, 16  ;;  %v862_v13 = vld [vmem:[#allocation2 + $0x54] sm:$0xf] }
  0x52   : > { %885 = vst [vmem:[#allocation2 + $0x78] sm:$0xf] %v884_v53  ;;  %v520_v53 = vshrl.u32 %v462_v32, 16  ;;  %v361_v10 = vadd.f32 %v6008_v9, %v325_v39  ;;  %v514_v50 = vrot.slane %v512_v49, 7  ;;  %v362_v51 = vadd.f32 %v6008_v9, %v326_v26  ;;  %v5574_v61 = vld [vmem:[#allocation2 + $0x6c] sm:$0xff] }
  0x53   : > { %886 = vst [vmem:[#allocation2 + $0x7c] sm:$0xf] %v662_v36  ;;  %v730_v16 = vsel %vm6044_vm4, %v722_v59, %v729_v15  ;;  %4146 = vmatpush.bf16.msrb.mxu2 %v5631_v18  ;;  %v472_v36 = vpack.c.bf16 %v386_v43, %v386_v43  ;;  %v333_v52 = vmul.f32 %v5996_v3, %v5743_v31  ;;  %v597_v55 = vshrl.u32 %v471_v33, 16  ;;  %v5830_v21 = vld [vmem:[%s5991_s27 + $0x10] sm:$0xff]   ;;  %v890_v32 = vld [vmem:[#allocation2 + $0x84] sm:$0xf] }
  0x54   : > { %913 = vst [vmem:[#allocation2 + $0xa8] sm:$0xf] %v912_v20  ;;  %v6407_v54 = vrot.slane %v520_v53, 7  ;;  %v600_v1 = vshll.u32 %v471_v33, 16  ;;  %v393_v56 = vmax.f32 %v361_v10, 0.0  ;;  %v517_v63 = vor.u32 %v515_v24, %v514_v50  ;;  %v5578_v7 = vld [vmem:[#allocation2 + $0x9c] sm:$0xff] }
  0x55   : > { %914 = vst [vmem:[#allocation2 + $0xac] sm:$0xf] %v730_v16  ;;  %v518_v2 = vrot.slane %v514_v50, 4  ;;  %v605_v5 = vshrl.u32 %v472_v36, 16  ;;  %v608_v6 = vshll.u32 %v472_v36, 16  ;;  %v599_v58 = vrot.slane %v597_v55, 7 }
  0x56   : > { %v5566_v28 = vld [vmem:[#allocation2 + $0xc] sm:$0xff]  ;;  %v525_v62 = vor.u32 %v523_v8, %v6407_v54  ;;  %v394_v34 = vmax.f32 %v362_v51, 0.0  ;;  %v334_v59 = vmul.f32 %v5996_v3, %v5744_v46  ;;  %v828_v41 = vsel %vm6055_vm5, %v517_v63, %v827_v48  ;;  %v5629_v48 = vld [vmem:[%s7784_s3 + $0x80] sm:$0xff] }
  0x57   : > { %3976 = vmatmul.bf16.gmra.mxu0 %v5566_v28  ;;  %v6413_v12 = vrot.slane %v605_v5, 7  ;;  %v479_v14 = vpack.c.bf16 %v393_v56, %v393_v56  ;;  %v369_v15 = vadd.f32 %v6008_v9, %v333_v52  ;;  %829 = vst [vmem:[#allocation2 + $0x18] sm:$0xf] %v828_v41  ;;  %v602_v18 = vor.u32 %v600_v1, %v599_v58  ;;  %v5630_v28 = vld [vmem:[%s7784_s3 + $0x88] sm:$0xff]  ;;  %v5647_v8 = vld [vmem:[%s7784_s3 + $0x110] sm:$0xff] }
  0x58   : > { %v526_v57 = vsel %vm6044_vm4, %v518_v2, %v525_v62  ;;  %v603_v19 = vrot.slane %v599_v58, 4  ;;  %v480_v20 = vpack.c.bf16 %v394_v34, %v394_v34  ;;  %v510_v23 = vrot.slane %v6262_v17, 4  ;;  %v5571_v25 = vld [vmem:[#allocation2 + $0x48] sm:$0xff]  ;;  %4147 = vmatpush.bf16.msrb.mxu2 %v5630_v28  ;;  %4324 = vmatpush.bf16.msrb.mxu0 %v5647_v8  ;;  %v824_v2 = vld [vmem:[#allocation2 + $0x14] sm:$0x1] }
  0x59   : > { %830 = vst [vmem:[#allocation2 + $0x1c] sm:$0xf] %v526_v57  ;;  %v610_v29 = vor.u32 %v608_v6, %v6413_v12  ;;  %v665_v16 = vshrl.u32 %v479_v14, 16  ;;  %v668_v35 = vshll.u32 %v479_v14, 16  ;;  %v863_v60 = vsel %vm6055_vm5, %v602_v18, %v862_v13  ;;  %v5638_v24 = vld [vmem:[%s7784_s3 + $0xc8] sm:$0xff] }
  0x5a   : > { %v673_v44 = vshrl.u32 %v480_v20, 16  ;;  %v676_v31 = vshll.u32 %v480_v20, 16  ;;  %v370_v37 = vadd.f32 %v6008_v9, %v334_v59  ;;  %864 = vst [vmem:[#allocation2 + $0x54] sm:$0xf] %v863_v60  ;;  %v401_v26 = vmax.f32 %v369_v15, 0.0  ;;  %v5622_v33 = vld [vmem:[%s7784_s3 + $0x48] sm:$0xff]  ;;  %4236 = vmatpush.bf16.msrb.mxu3 %v5638_v24 }
  0x5b   : > { %v611_v39 = vsel %vm6044_vm4, %v603_v19, %v610_v29  ;;  %v667_v17 = vrot.slane %v665_v16, 7  ;;  %v5695_v49 = vunpack.c.l.bf16 %v5830_v21  ;;  %v5696_v53 = vunpack.c.h.bf16 %v5830_v21  ;;  %v5646_v63 = vld [vmem:[%s7784_s3 + $0x108] sm:$0xff]  ;;  %4058 = vmatpush.bf16.msrb.mxu1 %v5622_v33  ;;  %v932_v34 = vld [vmem:[#allocation2] sm:$0xf]  ;;  %v918_v20 = vld [vmem:[#allocation2 + $0xb4] sm:$0xf] }
  0x5c   : > { %865 = vst [vmem:[#allocation2 + $0x58] sm:$0xf] %v611_v39  ;;  %v6432_v43 = vrot.slane %v673_v44, 7  ;;  %v402_v46 = vmax.f32 %v370_v37, 0.0  ;;  %v487_v51 = vpack.c.bf16 %v401_v26, %v401_v26  ;;  %4148 = vmatpush.bf16.msrb.mxu2 %v5629_v48  ;;  %v825_v18 = vsel %vm6442_vm7, %v510_v23, %v824_v2  ;;  %4325 = vmatpush.bf16.msrb.mxu0 %v5646_v63  ;;  %v6474_v60 = vld [vmem:[#allocation2 + $0x4] sm:$0xf] }
  0x5d   : > { %4016 = vmatmul.bf16.gmra.mxu2 %v5574_v61  ;;  %v670_v50 = vor.u32 %v668_v35, %v667_v17  ;;  %v671_v36 = vrot.slane %v667_v17, 4  ;;  %v309_v52 = vmul.f32 %v5996_v3, %v5695_v49  ;;  %v310_v56 = vmul.f32 %v5996_v3, %v5696_v53  ;;  %v5637_v61 = vld [vmem:[%s7784_s3 + $0xc0] sm:$0xff]  ;;  %826 = vst [vmem:[#allocation2 + $0x14] sm:$0x1] %v825_v18  ;;  %v5575_v37 = vld [vmem:[#allocation2 + $0x78] sm:$0xff]  ;;  %v5579_v24 = vld [vmem:[#allocation2 + $0xa8] sm:$0xff] }
  0x5e   : > { %v678_v55 = vor.u32 %v676_v31, %v6432_v43  ;;  %v488_v1 = vpack.c.bf16 %v402_v46, %v402_v46  ;;  %v733_v6 = vshrl.u32 %v487_v51, 16  ;;  %v736_v62 = vshll.u32 %v487_v51, 16  ;;  %v5621_v3 = vld [vmem:[%s7784_s3 + $0x40] sm:$0xff]  ;;  %4237 = vmatpush.bf16.msrb.mxu3 %v5637_v61  ;;  %v6479_v28 = vld [vmem:[#allocation2 + $0x8] sm:$0x1]  ;;  %v5684_v18 = vld [vmem:[%s7784_s3 + $0x238] sm:$0xff] }
  0x5f   : > { %4036 = vmatmul.bf16.gmra.mxu3 %v5578_v7  ;;  %v891_v5 = vsel %vm6055_vm5, %v670_v50, %v890_v32  ;;  %v345_v58 = vadd.f32 %v6008_v9, %v309_v52  ;;  %v346_v14 = vadd.f32 %v6008_v9, %v310_v56  ;;  %v984_v29 = vshrl.u32 %v932_v34, 16  ;;  %4059 = vmatpush.bf16.msrb.mxu1 %v5621_v3  ;;  %v834_v33 = vld [vmem:[#allocation2 + $0x24] sm:$0xf] }
  0x60   : > { %v5567_v59 = vld [vmem:[#allocation2 + $0x18] sm:$0xff]  ;;  %v679_v7 = vsel %vm6044_vm4, %v671_v36, %v678_v55  ;;  %892 = vst [vmem:[#allocation2 + $0x84] sm:$0xf] %v891_v5  ;;  %v741_v41 = vshrl.u32 %v488_v1, 16  ;;  %v744_v13 = vshll.u32 %v488_v1, 16  ;;  %v735_v15 = vrot.slane %v733_v6, 7 }
  0x61   : > { %4001 = vmatmul.bf16.gmra.mxu1 %v5571_v25  ;;  %893 = vst [vmem:[#allocation2 + $0x88] sm:$0xf] %v679_v7  ;;  %v377_v57 = vmax.f32 %v345_v58, 0.0  ;;  %v378_v21 = vmax.f32 %v346_v14, 0.0  ;;  %v5645_v25 = vld [vmem:[%s7784_s3 + $0x100] sm:$0xff]  ;;  %v987_v44 = vshll.u32 %v932_v34, 16 }
  0x62   : > { %v6469_v19 = vrot.slane %v741_v41, 7  ;;  %v738_v9 = vor.u32 %v736_v62, %v735_v15  ;;  %v739_v16 = vrot.slane %v735_v15, 4  ;;  %v986_v32 = vrot.slane %v984_v29, 4  ;;  %4326 = vmatpush.bf16.msrb.mxu0 %v5645_v25  ;;  %v1546_v5 = vld [vmem:[#allocation2 + $0xc] sm:$0xf]  ;;  %v5668_v34 = vld [vmem:[%s7784_s3 + $0x1b8] sm:$0xff] }
  0x63   : > { %v463_v35 = vpack.c.bf16 %v377_v57, %v377_v57  ;;  %v464_v31 = vpack.c.bf16 %v378_v21, %v378_v21  ;;  %v989_v49 = vrot.slane %v987_v44, 5  ;;  %v993_v50 = vshll.u32 %v6474_v60, 16  ;;  %v5572_v56 = vld [vmem:[#allocation2 + $0x54] sm:$0xff]  ;;  %4497 = vmatpush.bf16.msra.mxu2 %v5668_v34 }
  0x64   : > { %v746_v23 = vor.u32 %v744_v13, %v6469_v19  ;;  %v919_v39 = vsel %vm6055_vm5, %v738_v9, %v918_v20  ;;  %v997_v52 = vshrl.u32 %v6474_v60, 16  ;;  %v1003_v1 = vshll.u32 %v6479_v28, 16  ;;  %v5676_v7 = vld [vmem:[%s7784_s3 + $0x1f8] sm:$0xff]  ;;  %v1578_v21 = vld [vmem:[#allocation2 + $0x14] sm:$0x1] }
  0x65   : > { %v529_v17 = vshrl.u32 %v463_v35, 16  ;;  %v532_v26 = vshll.u32 %v463_v35, 16  ;;  %920 = vst [vmem:[#allocation2 + $0xb4] sm:$0xf] %v919_v39  ;;  %v537_v53 = vshrl.u32 %v464_v31, 16  ;;  %v540_v8 = vshll.u32 %v464_v31, 16  ;;  %4586 = vmatpush.bf16.msra.mxu3 %v5676_v7 }
  0x66   : > { %v747_v46 = vsel %vm6044_vm4, %v739_v16, %v746_v23  ;;  %v990_v51 = vor.u32 %v989_v49, %v986_v32  ;;  %v995_v55 = vrot.slane %v993_v50, 5  ;;  %v999_v2 = vrot.slane %v997_v52, 4  ;;  %v5660_v57 = vld [vmem:[%s7784_s3 + $0x178] sm:$0xff]  ;;  %4675 = vmatpush.bf16.msra.mxu0 %v5684_v18  ;;  %v934_v23 = vld [vmem:[#allocation2 + $0xc] sm:$0xf] }
  0x67   : > { %3981 = vmatmul.bf16.gmra.mxu0 %v5567_v59  ;;  %921 = vst [vmem:[#allocation2 + $0xb8] sm:$0xf] %v747_v46  ;;  %v531_v36 = vrot.slane %v529_v17, 7  ;;  %v6485_v48 = vrot.slane %v537_v53, 7  ;;  %v1547_v59 = vld [vmem:[#allocation2 + $0x10] sm:$0xf]  ;;  %4408 = vmatpush.bf16.msra.mxu1 %v5660_v57 }
  0x68   : > { %v991_v58 = vrot.slane %v990_v51, 4  ;;  %v1000_v3 = vor.u32 %v999_v2, %v995_v55  ;;  %v1005_v14 = vrot.slane %v1003_v1, 5  ;;  %v1595_v15 = vshrl.u32 %v1546_v5, 16  ;;  %v6515_v17 = vld [vmem:[#allocation2 + $0x10] sm:$0xf] }
  0x69   : > { %v534_v61 = vor.u32 %v532_v26, %v531_v36  ;;  %v535_v63 = vrot.slane %v531_v36, 4  ;;  %v542_v6 = vor.u32 %v540_v8, %v6485_v48  ;;  %v1598_v25 = vshll.u32 %v1546_v5, 16  ;;  %v1367_v50 = vld [vmem:[#allocation2] sm:$0xe]  ;;  %v831_v52 = vld [vmem:[#allocation2 + $0x20] sm:$0x1] }
  0x6a   : > { %v1001_v20 = vrot.slane %v1000_v3, 4  ;;  %v1597_v29 = vrot.slane %v1595_v15, 4  ;;  %v1604_v9 = vshll.u32 %v1547_v59, 16  ;;  %v1608_v16 = vshrl.u32 %v1547_v59, 16  ;;  %v6521_v2 = vld [vmem:[#allocation2 + $0x14] sm:$0x1] }
  0x6b   : > { %v835_v62 = vsel %vm6055_vm5, %v534_v61, %v834_v33  ;;  %v543_v41 = vsel %vm6044_vm4, %v535_v63, %v542_v6  ;;  %v996_v35 = vsel %vm6501_vm10, %v991_v58, %v995_v55  ;;  %v1600_v44 = vrot.slane %v1598_v25, 5  ;;  %v5576_v55 = vld [vmem:[#allocation2 + $0x84] sm:$0xff]  ;;  %v1548_v58 = vld [vmem:[#allocation2 + $0x18] sm:$0xf]  ;;  %v5897_v10 = vld [vmem:[#allocation2 + $0x14] sm:$0x1] }
  0x6c   : > { %836 = vst [vmem:[#allocation2 + $0x24] sm:$0xf] %v835_v62  ;;  %v1006_v31 = vsel %vm6501_vm10, %v1001_v20, %v1005_v14  ;;  %v1606_v32 = vrot.slane %v1604_v9, 5  ;;  %v1614_v39 = vshll.u32 %v1578_v21, 16  ;;  %v527_v26 = vrot.slane %v6407_v54, 4 }
  0x6d   : > { %4021 = vmatmul.bf16.gmra.mxu2 %v5575_v37  ;;  %837 = vst [vmem:[#allocation2 + $0x28] sm:$0xf] %v543_v41  ;;  %v1610_v37 = vrot.slane %v1608_v16, 4  ;;  %v1601_v49 = vor.u32 %v1600_v44, %v1597_v29  ;;  %v1008_v53 = vshrl.u32 %v934_v23, 16  ;;  %v2843_v8 = vunpack.c.l.b16 %v996_v35  ;;  %v1549_v21 = vld [vmem:[#allocation2 + $0x1c] sm:$0xf] }
  0x6e   : > { %v2844_v33 = vunpack.c.l.b16 %v1006_v31  ;;  %v1011_v36 = vshll.u32 %v934_v23, 16  ;;  %v1017_v51 = vshll.u32 %v6515_v17, 16  ;;  %v1616_v63 = vrot.slane %v1614_v39, 5  ;;  %v5580_v3 = vld [vmem:[#allocation2 + $0xb4] sm:$0xff] }
  0x6f   : > { %4041 = vmatmul.bf16.gmra.mxu3 %v5579_v24  ;;  %v1436_v24 = vrot.slane %v6474_v60, 5  ;;  %v1611_v46 = vor.u32 %v1610_v37, %v1606_v32  ;;  %v1021_v54 = vshrl.u32 %v6515_v17, 16  ;;  %v1010_v60 = vrot.slane %v1008_v53, 4  ;;  %v936_v31 = vld [vmem:[#allocation2 + $0x18] sm:$0xf] }
  0x70   : > { %v1013_v5 = vrot.slane %v1011_v36, 5  ;;  %v1019_v6 = vrot.slane %v1017_v51, 5  ;;  %v2875_v34 = vpack.c.b16 %v2844_v33, %v2843_v8  ;;  %v5033_v59 = vrot.slane %v1367_v50, 9  ;;  %v838_v33 = vld [vmem:[#allocation2 + $0x2c] sm:$0x1] }
  0x71   : > { %4006 = vmatmul.bf16.gmra.mxu1 %v5572_v56  ;;  %v1602_v56 = vrot.slane %v1601_v49, 4  ;;  %v1612_v61 = vrot.slane %v1611_v46, 4  ;;  %v1023_v62 = vrot.slane %v1021_v54, 4  ;;  %v1438_v7 = vrot.slane %v1436_v24, 4 }
  0x72   : > { %v1439_v41 = vrot.slane %v6479_v28, 5  ;;  %v1027_v18 = vshll.u32 %v6521_v2, 16  ;;  %v832_v20 = vsel %vm6442_vm7, %v527_v26, %v831_v52  ;;  %v1014_v25 = vor.u32 %v1013_v5, %v1010_v60 }
  0x73   : > { %v1607_v15 = vsel %vm6501_vm10, %v1602_v56, %v1606_v32  ;;  %v1617_v57 = vsel %vm6501_vm10, %v1612_v61, %v1616_v63  ;;  %v1024_v28 = vor.u32 %v1023_v62, %v1019_v6  ;;  %833 = vst [vmem:[#allocation2 + $0x20] sm:$0x1] %v832_v20  ;;  %v1619_v29 = vshrl.u32 %v1548_v58, 16  ;;  %v6539_v32 = vld [vmem:[#allocation2 + $0x1c] sm:$0xf] }
  0x74   : > { %v5568_v1 = vld [vmem:[#allocation2 + $0x24] sm:$0xff]  ;;  %v1622_v9 = vshll.u32 %v1548_v58, 16  ;;  %v544_v16 = vrot.slane %v6485_v48, 4  ;;  %v1437_v35 = vsel %vm6525_vm13, %v5033_v59, %v1436_v24  ;;  %v1628_v44 = vshll.u32 %v1549_v21, 16 }
  0x75   : > { %v1632_v23 = vshrl.u32 %v1549_v21, 16  ;;  %v1440_v37 = vsel %vm6525_vm13, %v1438_v7, %v1439_v41  ;;  %v3051_v39 = vunpack.c.l.b16 %v1607_v15  ;;  %v3052_v26 = vunpack.c.l.b16 %v1617_v57  ;;  %v1368_v21 = vld [vmem:[#allocation2 + $0xc] sm:$0xe] }
  0x76   : > { %v1029_v49 = vrot.slane %v1027_v18, 5  ;;  %v1015_v46 = vrot.slane %v1014_v25, 4  ;;  %v1025_v53 = vrot.slane %v1024_v28, 4  ;;  %v1621_v8 = vrot.slane %v1619_v29, 4 }
  0x77   : > { %3986 = vmatmul.bf16.gmra.mxu0 %v5568_v1  ;;  %v1624_v48 = vrot.slane %v1622_v9, 5  ;;  %v1032_v50 = vshrl.u32 %v936_v31, 16  ;;  %v1035_v36 = vshll.u32 %v936_v31, 16  ;;  %v1041_v24 = vshll.u32 %v6539_v32, 16 }
  0x78   : > { %v1630_v51 = vrot.slane %v1628_v44, 5  ;;  %v1634_v52 = vrot.slane %v1632_v23, 4  ;;  %v2907_v1 = vunpack.c.l.b16 %v1437_v35  ;;  %v2908_v56 = vunpack.c.l.b16 %v1440_v37  ;;  %v1550_v23 = vld [vmem:[#allocation2 + $0x24] sm:$0xf] }
  0x79   : > { %v839_v63 = vsel %vm6442_vm7, %v544_v16, %v838_v33  ;;  %v3083_v54 = vpack.c.b16 %v3052_v26, %v3051_v39  ;;  %v1020_v60 = vsel %vm6501_vm10, %v1015_v46, %v1019_v6  ;;  %v1030_v5 = vsel %vm6501_vm10, %v1025_v53, %v1029_v49  ;;  %v5581_v16 = vld [vmem:[#allocation2 + $0xc] sm:$0xff]  ;;  %v1551_v39 = vld [vmem:[#allocation2 + $0x28] sm:$0xf] }
  0x7a   : > { %v1579_v61 = vld [vmem:[#allocation2 + $0x20] sm:$0x1]  ;;  %v1625_v62 = vor.u32 %v1624_v48, %v1621_v8  ;;  %840 = vst [vmem:[#allocation2 + $0x2c] sm:$0x1] %v839_v63  ;;  %v1034_v58 = vrot.slane %v1032_v50, 4  ;;  %v1635_v7 = vor.u32 %v1634_v52, %v1630_v51  ;;  %v2939_v57 = vpack.c.b16 %v2908_v56, %v2907_v1  ;;  %v5683_v1 = vld [vmem:[%s7784_s3 + $0x230] sm:$0xff] }
  0x7b   : > { %v1638_v41 = vshll.u32 %v1579_v61, 16  ;;  %v6553_v15 = vld [vmem:[#allocation2 + $0x20] sm:$0x1]  ;;  %v2845_v18 = vunpack.c.l.b16 %v1020_v60  ;;  %v2846_v20 = vunpack.c.l.b16 %v1030_v5  ;;  %v1443_v6 = vrot.slane %v6515_v17, 5  ;;  %v845_v50 = vld [vmem:[#allocation2 + $0x38] sm:$0x1]  ;;  %4676 = vmatpush.bf16.msra.mxu0 %v5683_v1 }
  0x7c   : > { %v1626_v25 = vrot.slane %v1625_v62, 4  ;;  %v1051_v9 = vshll.u32 %v6553_v15, 16  ;;  %v1636_v35 = vrot.slane %v1635_v7, 4  ;;  %v561_v31 = vrot.slane %v6048_v40, 4  ;;  %v5667_v40 = vld [vmem:[%s7784_s3 + $0x1b0] sm:$0xff] }
  0x7d   : > { %4026 = vmatmul.bf16.gmra.mxu2 %v5576_v55  ;;  %v1045_v55 = vshrl.u32 %v6539_v32, 16  ;;  %v1640_v44 = vrot.slane %v1638_v41, 5  ;;  %v5034_v37 = vrot.slane %v1368_v21, 9  ;;  %v2876_v26 = vpack.c.b16 %v2846_v20, %v2845_v18  ;;  %v6582_v60 = vld [vmem:[#allocation2 + $0x28] sm:$0xf] }
  0x7e   : > { %v1445_v49 = vrot.slane %v1443_v6, 4  ;;  %v1446_v17 = vrot.slane %v6521_v2, 5  ;;  %v1631_v46 = vsel %vm6501_vm10, %v1626_v25, %v1630_v51  ;;  %v1053_v48 = vrot.slane %v1051_v9, 5  ;;  %v5675_v2 = vld [vmem:[%s7784_s3 + $0x1f0] sm:$0xff]  ;;  %4498 = vmatpush.bf16.msra.mxu2 %v5667_v40 }
  0x7f   : > { %4046 = vmatmul.bf16.gmra.mxu3 %v5580_v3  ;;  %v1037_v3 = vrot.slane %v1035_v36, 5  ;;  %v1047_v59 = vrot.slane %v1045_v55, 4  ;;  %v1643_v33 = vshrl.u32 %v1550_v23, 16  ;;  %v1641_v36 = vsel %vm6501_vm10, %v1636_v35, %v1640_v44  ;;  %v5659_v51 = vld [vmem:[%s7784_s3 + $0x170] sm:$0xff]  ;;  %v1369_v44 = vld [vmem:[#allocation2 + $0x18] sm:$0xe] }
  0x80   : > { %v1652_v52 = vshll.u32 %v1551_v39, 16  ;;  %v1656_v55 = vshrl.u32 %v1551_v39, 16  ;;  %v846_v56 = vsel %vm6442_vm7, %v561_v31, %v845_v50  ;;  %v1444_v61 = vsel %vm6525_vm13, %v5034_v37, %v1443_v6  ;;  %4587 = vmatpush.bf16.msra.mxu3 %v5675_v2  ;;  %4409 = vmatpush.bf16.msra.mxu1 %v5659_v51  ;;  %v1552_v50 = vld [vmem:[#allocation2 + $0x30] sm:$0xf] }
  0x81   : > { %4060 = vmatmul.bf16.vlgmr.msrb.gmra.mxu1 %v2875_v34  ;;  %v6551_v34 = vrot.slane %v1041_v24, 5  ;;  %v1038_v28 = vor.u32 %v1037_v3, %v1034_v58  ;;  %v1646_v24 = vshll.u32 %v1550_v23, 16  ;;  %v1447_v63 = vsel %vm6525_vm13, %v1445_v49, %v1446_v17  ;;  %847 = vst [vmem:[#allocation2 + $0x38] sm:$0x1] %v846_v56  ;;  %v1580_v18 = vld [vmem:[#allocation2 + $0x2c] sm:$0x1] }
  0x82   : > { %v3053_v5 = vunpack.c.l.b16 %v1631_v46  ;;  %v3054_v62 = vunpack.c.l.b16 %v1641_v36  ;;  %v1645_v3 = vrot.slane %v1643_v33, 4  ;;  %v1654_v41 = vrot.slane %v1652_v52, 5  ;;  %v5582_v36 = vld [vmem:[#allocation2 + $0x18] sm:$0xff] }
  0x83   : > { %v1048_v29 = vor.u32 %v1047_v59, %v6551_v34  ;;  %v1039_v53 = vrot.slane %v1038_v28, 4  ;;  %v1648_v7 = vrot.slane %v1646_v24, 5  ;;  %v1065_v6 = vshll.u32 %v6582_v60, 16 }
  0x84   : > { %v1069_v25 = vshrl.u32 %v6582_v60, 16  ;;  %v2909_v28 = vunpack.c.l.b16 %v1444_v61  ;;  %v1662_v37 = vshll.u32 %v1580_v18, 16  ;;  %v578_v46 = vrot.slane %v6172_v11, 4 }
  0x85   : > { %v1049_v8 = vrot.slane %v1048_v29, 4  ;;  %v1044_v58 = vsel %vm6501_vm10, %v1039_v53, %v6551_v34  ;;  %v2910_v34 = vunpack.c.l.b16 %v1447_v63  ;;  %v3084_v29 = vpack.c.b16 %v3054_v62, %v3053_v5  ;;  %v852_v5 = vld [vmem:[#allocation2 + $0x44] sm:$0x1] }
  0x86   : > { %v2847_v9 = vunpack.c.l.b16 %v1044_v58  ;;  %v1649_v23 = vor.u32 %v1648_v7, %v1645_v3  ;;  %v1067_v49 = vrot.slane %v1065_v6, 5  ;;  %v1071_v17 = vrot.slane %v1069_v25, 4 }
  0x87   : > { %4327 = vmatmul.bf16.vlgmr.msrb.gmra.mxu0 %v3083_v54  ;;  %v938_v54 = vld [vmem:[#allocation2 + $0x24] sm:$0xf]  ;;  %v1054_v59 = vsel %vm6501_vm10, %v1049_v8, %v1053_v48  ;;  %v2940_v53 = vpack.c.b16 %v2910_v34, %v2909_v28  ;;  %v6593_v8 = vld [vmem:[#allocation2 + $0x2c] sm:$0x1]  ;;  %v5035_v48 = vrot.slane %v1369_v44, 9  ;;  %v1453_v33 = vrot.slane %v6553_v15, 5 }
  0x88   : > { %v1056_v20 = vshrl.u32 %v938_v54, 16  ;;  %v1059_v21 = vshll.u32 %v938_v54, 16  ;;  %v2848_v35 = vunpack.c.l.b16 %v1054_v59  ;;  %v1650_v24 = vrot.slane %v1649_v23, 4  ;;  %v940_v34 = vld [vmem:[#allocation2 + $0x30] sm:$0xf] }
  0x89   : > { %v1072_v1 = vor.u32 %v1071_v17, %v1067_v49  ;;  %v1075_v56 = vshll.u32 %v6593_v8, 16  ;;  %v1667_v11 = vshrl.u32 %v1552_v50, 16  ;;  %v1670_v61 = vshll.u32 %v1552_v50, 16 }
  0x8a   : > { %v1058_v39 = vrot.slane %v1056_v20, 4  ;;  %v2877_v2 = vpack.c.b16 %v2848_v35, %v2847_v9  ;;  %v1655_v62 = vsel %vm6501_vm10, %v1650_v24, %v1654_v41  ;;  %v853_v3 = vsel %vm6442_vm7, %v578_v46, %v852_v5  ;;  %v1581_v9 = vld [vmem:[#allocation2 + $0x38] sm:$0x1] }
  0x8b   : > { %v1077_v18 = vrot.slane %v1075_v56, 5  ;;  %v1669_v20 = vrot.slane %v1667_v11, 4  ;;  %v3055_v28 = vunpack.c.l.b16 %v1655_v62  ;;  %854 = vst [vmem:[#allocation2 + $0x44] sm:$0x1] %v853_v3  ;;  %v6621_v56 = vld [vmem:[#allocation2 + $0x38] sm:$0x1] }
  0x8c   : > { %v595_v11 = vrot.slane %v6331_v30, 4 }
  0x8d   : > { %4149 = vmatmul.bf16.vlgmr.msrb.gmra.mxu2 %v2939_v57  ;;  %v1658_v57 = vrot.slane %v1656_v55, 4  ;;  %v1664_v55 = vrot.slane %v1662_v37, 5  ;;  %v1083_v37 = vshll.u32 %v940_v34, 16 }
  0x8f   : > { %4238 = vmatmul.bf16.vlgmr.msrb.gmra.mxu3 %v5581_v16  ;;  %v1450_v16 = vrot.slane %v6539_v32, 5  ;;  %v1659_v31 = vor.u32 %v1658_v57, %v1654_v41  ;;  %v1553_v32 = vld [vmem:[#allocation2 + $0x34] sm:$0xf]  ;;  %v1073_v57 = vrot.slane %v1072_v1, 4  ;;  %v1085_v24 = vrot.slane %v1083_v37, 5  ;;  %v5658_v37 = vld [vmem:[%s7784_s3 + $0x168] sm:$0xff] }
  0x90   : > { %v1676_v63 = vshll.u32 %v1553_v32, 16  ;;  %v1680_v54 = vshrl.u32 %v1553_v32, 16  ;;  %4410 = vmatpush.bf16.msra.mxu1 %v5658_v37 }
  0x91   : > { %4065 = vmatmul.bf16.gmra.mxu1 %v2876_v26  ;;  %v1061_v26 = vrot.slane %v1059_v21, 5  ;;  %v1452_v40 = vrot.slane %v1450_v16, 4  ;;  %v1660_v52 = vrot.slane %v1659_v31, 4  ;;  %v1451_v15 = vsel %vm6525_vm13, %v5035_v48, %v1450_v16 }
  0x92   : > { %v1672_v21 = vrot.slane %v1670_v61, 5  ;;  %v6607_v6 = vrot.slane %v1676_v63, 5  ;;  %v1682_v25 = vrot.slane %v1680_v54, 4  ;;  %v2911_v16 = vunpack.c.l.b16 %v1451_v15  ;;  %v5583_v61 = vld [vmem:[#allocation2 + $0x24] sm:$0xff]  ;;  %v1554_v63 = vld [vmem:[#allocation2 + $0x3c] sm:$0xf] }
  0x93   : > { %v1062_v51 = vor.u32 %v1061_v26, %v1058_v39  ;;  %v1665_v58 = vsel %vm6501_vm10, %v1660_v52, %v1664_v55  ;;  %v1454_v59 = vsel %vm6525_vm13, %v1452_v40, %v1453_v33  ;;  %v1078_v23 = vsel %vm6501_vm10, %v1073_v57, %v1077_v18  ;;  %v1555_v15 = vld [vmem:[#allocation2 + $0x40] sm:$0xf]  ;;  %v859_v18 = vld [vmem:[#allocation2 + $0x50] sm:$0x1] }
  0x94   : > { %v3056_v41 = vunpack.c.l.b16 %v1665_v58  ;;  %v2912_v35 = vunpack.c.l.b16 %v1454_v59  ;;  %v1080_v31 = vshrl.u32 %v940_v34, 16  ;;  %v1673_v46 = vor.u32 %v1672_v21, %v1669_v20 }
  0x95   : > { %v1063_v7 = vrot.slane %v1062_v51, 4  ;;  %v1686_v48 = vshll.u32 %v1581_v9, 16  ;;  %v2850_v32 = vunpack.c.l.b16 %v1078_v23  ;;  %v1099_v59 = vshll.u32 %v6621_v56, 16 }
  0x96   : > { %v3085_v17 = vpack.c.b16 %v3056_v41, %v3055_v28  ;;  %v2941_v33 = vpack.c.b16 %v2912_v35, %v2911_v16  ;;  %v1082_v40 = vrot.slane %v1080_v31, 4  ;;  %v1691_v57 = vshrl.u32 %v1554_v63, 16  ;;  %v5674_v28 = vld [vmem:[%s7784_s3 + $0x1e8] sm:$0xff] }
  0x97   : > { %4332 = vmatmul.bf16.gmra.mxu0 %v3084_v29  ;;  %v6609_v29 = vld [vmem:[#allocation2 + $0x34] sm:$0xf]  ;;  %v1068_v44 = vsel %vm6501_vm10, %v1063_v7, %v1067_v49  ;;  %v1370_v49 = vld [vmem:[#allocation2 + $0x24] sm:$0xe]  ;;  %v1688_v1 = vrot.slane %v1686_v48, 5  ;;  %v1694_v20 = vshll.u32 %v1554_v63, 16  ;;  %4588 = vmatpush.bf16.msra.mxu3 %v5674_v28 }
  0x98   : > { %v1089_v39 = vshll.u32 %v6609_v29, 16  ;;  %v1093_v26 = vshrl.u32 %v6609_v29, 16  ;;  %v2849_v50 = vunpack.c.l.b16 %v1068_v44  ;;  %v5036_v54 = vrot.slane %v1370_v49, 9  ;;  %v942_v44 = vld [vmem:[#allocation2 + $0x3c] sm:$0xf] }
  0x99   : > { %v1086_v58 = vor.u32 %v1085_v24, %v1082_v40  ;;  %v1700_v21 = vshll.u32 %v1555_v15, 16  ;;  %v1101_v35 = vrot.slane %v1099_v59, 5  ;;  %v1107_v49 = vshll.u32 %v942_v44, 16 }
  0x9a   : > { %v6619_v52 = vrot.slane %v1089_v39, 5  ;;  %v1095_v55 = vrot.slane %v1093_v26, 4  ;;  %v2878_v62 = vpack.c.b16 %v2850_v32, %v2849_v50  ;;  %v5682_v39 = vld [vmem:[%s7784_s3 + $0x228] sm:$0xff]  ;;  %v6650_v26 = vld [vmem:[#allocation2 + $0x40] sm:$0xf] }
  0x9b   : > { %v1087_v9 = vrot.slane %v1086_v58, 4  ;;  %v1582_v32 = vld [vmem:[#allocation2 + $0x44] sm:$0x1]  ;;  %4677 = vmatpush.bf16.msra.mxu0 %v5682_v39 }
  0x9c   : > { %v1096_v3 = vor.u32 %v1095_v55, %v6619_v52  ;;  %v1113_v55 = vshll.u32 %v6650_v26, 16 }
  0x9d   : > { %4154 = vmatmul.bf16.gmra.mxu2 %v2940_v53  ;;  %v1683_v53 = vor.u32 %v1682_v25, %v6607_v6  ;;  %v1704_v25 = vshrl.u32 %v1555_v15, 16  ;;  %v1092_v40 = vsel %vm6501_vm10, %v1087_v9, %v6619_v52  ;;  %v612_v52 = vrot.slane %v6413_v12, 4 }
  0x9e   : > { %v1097_v16 = vrot.slane %v1096_v3, 4  ;;  %v1115_v3 = vrot.slane %v1113_v55, 5 }
  0x9f   : > { %4243 = vmatmul.bf16.gmra.mxu3 %v5582_v36  ;;  %v1457_v36 = vrot.slane %v6582_v60, 5  ;;  %v1684_v51 = vrot.slane %v1683_v53, 4  ;;  %v1460_v60 = vrot.slane %v6593_v8, 5  ;;  %v5666_v8 = vld [vmem:[%s7784_s3 + $0x1a8] sm:$0xff]  ;;  %v6652_v53 = vrot.slane %v1700_v21, 5 }
  0xa0   : > { %4499 = vmatpush.bf16.msra.mxu2 %v5666_v8  ;;  %v1706_v48 = vrot.slane %v1704_v25, 4  ;;  %v1102_v24 = vsel %vm6501_vm10, %v1097_v16, %v1101_v35  ;;  %v1557_v8 = vld [vmem:[#allocation2 + $0x4c] sm:$0xf] }
  0xa1   : > { %4070 = vmatmul.bf16.gmra.mxu1 %v2877_v2  ;;  %v1674_v2 = vrot.slane %v1673_v46, 4  ;;  %v1459_v5 = vrot.slane %v1457_v36, 4  ;;  %v1689_v30 = vsel %vm6501_vm10, %v1684_v51, %v1688_v1  ;;  %v1458_v41 = vsel %vm6525_vm13, %v5036_v54, %v1457_v36  ;;  %v1371_v1 = vld [vmem:[#allocation2 + $0x30] sm:$0xe] }
  0xa2   : > { %v3058_v31 = vunpack.c.l.b16 %v1689_v30  ;;  %v1696_v46 = vrot.slane %v1694_v20, 5  ;;  %v1104_v36 = vshrl.u32 %v942_v44, 16  ;;  %v1707_v63 = vor.u32 %v1706_v48, %v6652_v53  ;;  %v5584_v20 = vld [vmem:[#allocation2 + $0x30] sm:$0xff] }
  0xa3   : > { %v1679_v7 = vsel %vm6501_vm10, %v1674_v2, %v6607_v6  ;;  %v860_v6 = vsel %vm6442_vm7, %v595_v11, %v859_v18  ;;  %v1461_v34 = vsel %vm6525_vm13, %v1459_v5, %v1460_v60  ;;  %v1117_v2 = vshrl.u32 %v6650_v26, 16  ;;  %v6667_v18 = vld [vmem:[#allocation2 + $0x44] sm:$0x1] }
  0xa4   : > { %861 = vst [vmem:[#allocation2 + $0x50] sm:$0x1] %v860_v6  ;;  %v3057_v23 = vunpack.c.l.b16 %v1679_v7  ;;  %v2914_v50 = vunpack.c.l.b16 %v1461_v34  ;;  %v1464_v11 = vrot.slane %v6609_v29, 5  ;;  %v1710_v54 = vshll.u32 %v1582_v32, 16  ;;  %v1556_v7 = vld [vmem:[#allocation2 + $0x48] sm:$0xf] }
  0xa5   : > { %v2851_v5 = vunpack.c.l.b16 %v1092_v40  ;;  %v2852_v60 = vunpack.c.l.b16 %v1102_v24  ;;  %v1106_v15 = vrot.slane %v1104_v36, 4  ;;  %v1119_v59 = vrot.slane %v1117_v2, 4 }
  0xa6   : > { %v3086_v51 = vpack.c.b16 %v3058_v31, %v3057_v23  ;;  %v1467_v29 = vrot.slane %v6621_v56, 5  ;;  %v1466_v21 = vrot.slane %v1464_v11, 4  ;;  %v1708_v28 = vrot.slane %v1707_v63, 4  ;;  %v866_v31 = vld [vmem:[#allocation2 + $0x5c] sm:$0x1] }
  0xa7   : > { %4337 = vmatmul.bf16.gmra.mxu0 %v3085_v17  ;;  %v1693_v17 = vrot.slane %v1691_v57, 4  ;;  %v5037_v57 = vrot.slane %v1371_v1, 9  ;;  %v1712_v6 = vrot.slane %v1710_v54, 5  ;;  %v1715_v34 = vshrl.u32 %v1556_v7, 16 }
  0xa8   : > { %v6664_v30 = vpop.f32.mrf.mxu1  ;;  %v1718_v9 = vshll.u32 %v1556_v7, 16  ;;  %v1120_v16 = vor.u32 %v1119_v59, %v1115_v3  ;;  %v1123_v35 = vshll.u32 %v6667_v18, 16  ;;  %v1724_v44 = vshll.u32 %v1557_v8, 16 }
  0xa9   : > { %v1728_v23 = vshrl.u32 %v1557_v8, 16  ;;  %v1465_v56 = vsel %vm6525_vm13, %v5037_v57, %v1464_v11  ;;  %v1713_v39 = vsel %vm6501_vm10, %v1708_v28, %v1712_v6  ;;  %v1468_v48 = vsel %vm6525_vm13, %v1466_v21, %v1467_v29  ;;  %v1372_v21 = vld [vmem:[#allocation2 + $0x3c] sm:$0xe] }
  0xaa   : > { %v1720_v32 = vrot.slane %v1718_v9, 5  ;;  %v1121_v36 = vrot.slane %v1120_v16, 4  ;;  %v3060_v2 = vunpack.c.l.b16 %v1713_v39  ;;  %v2915_v1 = vunpack.c.l.b16 %v1465_v56 }
  0xab   : > { %v1583_v40 = vld [vmem:[#allocation2 + $0x50] sm:$0x1]  ;;  %v1730_v24 = vrot.slane %v1728_v23, 4  ;;  %v2916_v11 = vunpack.c.l.b16 %v1468_v48  ;;  %v629_v9 = vrot.slane %v6089_v0, 4  ;;  %v5585_v23 = vld [vmem:[#allocation2 + $0x3c] sm:$0xff] }
  0xac   : > { %v6702_v56 = vld [vmem:[#allocation2 + $0x50] sm:$0x1] }
  0xad   : > { %4159 = vmatmul.bf16.gmra.mxu2 %v2941_v33  ;;  %v2913_v33 = vunpack.c.l.b16 %v1458_v41  ;;  %v2879_v41 = vpack.c.b16 %v2852_v60, %v2851_v5  ;;  %v1734_v60 = vshll.u32 %v1583_v40, 16  ;;  %v2943_v29 = vpack.c.b16 %v2916_v11, %v2915_v1 }
  0xae   : > { %v1147_v40 = vshll.u32 %v6702_v56, 16 }
  0xaf   : > { %4248 = vmatmul.bf16.gmra.mxu3 %v5583_v61  ;;  %v1697_v61 = vor.u32 %v1696_v46, %v1693_v17  ;;  %v2942_v58 = vpack.c.b16 %v2914_v50, %v2913_v33  ;;  %v867_v17 = vsel %vm6442_vm7, %v612_v52, %v866_v31  ;;  %v6679_v46 = vpop.f32.mrf.mxu0  ;;  %v1717_v50 = vrot.slane %v1715_v34, 4  ;;  %v1558_v34 = vld [vmem:[#allocation2 + $0x54] sm:$0xf] }
  0xb0   : > { %868 = vst [vmem:[#allocation2 + $0x5c] sm:$0x1] %v867_v17  ;;  %v6687_v63 = vpop.f32.mrf.mxu1  ;;  %v1736_v6 = vrot.slane %v1734_v60, 5  ;;  %v5038_v31 = vrot.slane %v1372_v21, 9  ;;  %v1474_v17 = vrot.slane %v6667_v18, 5  ;;  %v1739_v48 = vshrl.u32 %v1558_v34, 16 }
  0xb1   : > { %4075 = vmatmul.bf16.gmra.mxu1 %v2878_v62  ;;  %v1109_v62 = vrot.slane %v1107_v49, 5  ;;  %v1698_v25 = vrot.slane %v1697_v61, 4  ;;  %v1125_v49 = vrot.slane %v1123_v35, 5  ;;  %v6685_v61 = vld [vmem:[#allocation2 + $0x4c] sm:$0xf]  ;;  %v1721_v5 = vor.u32 %v1720_v32, %v1717_v50  ;;  %v5657_v21 = vld [vmem:[%s7784_s3 + $0x160] sm:$0xff] }
  0xb2   : > { %v1137_v7 = vshll.u32 %v6685_v61, 16  ;;  %v1141_v57 = vshrl.u32 %v6685_v61, 16  ;;  %v1742_v32 = vshll.u32 %v1558_v34, 16  ;;  %v873_v18 = vld [vmem:[#allocation2 + $0x68] sm:$0x1]  ;;  %4411 = vmatpush.bf16.msra.mxu1 %v5657_v21 }
  0xb3   : > { %v1110_v12 = vor.u32 %v1109_v62, %v1106_v15  ;;  %v1703_v37 = vsel %vm6501_vm10, %v1698_v25, %v6652_v53  ;;  %v6683_v53 = vrot.slane %v1724_v44, 5  ;;  %v1126_v15 = vsel %vm6501_vm10, %v1121_v36, %v1125_v49 }
  0xb4   : > { %v3059_v55 = vunpack.c.l.b16 %v1703_v37  ;;  %v1722_v25 = vrot.slane %v1721_v5, 4  ;;  %v6700_v35 = vrot.slane %v1137_v7, 5  ;;  %v1143_v44 = vrot.slane %v1141_v57, 4  ;;  %v1559_v37 = vld [vmem:[#allocation2 + $0x58] sm:$0xf] }
  0xb5   : > { %v1111_v33 = vrot.slane %v1110_v12, 4  ;;  %v1731_v62 = vor.u32 %v1730_v24, %v6683_v53  ;;  %v1748_v24 = vshll.u32 %v1559_v37, 16  ;;  %v1741_v5 = vrot.slane %v1739_v48, 4 }
  0xb6   : > { %v3087_v59 = vpack.c.b16 %v3060_v2, %v3059_v55  ;;  %v1727_v0 = vsel %vm6501_vm10, %v1722_v25, %v6683_v53  ;;  %v1144_v49 = vor.u32 %v1143_v44, %v6700_v35  ;;  %v1752_v55 = vshrl.u32 %v1559_v37, 16  ;;  %v5665_v2 = vld [vmem:[%s7784_s3 + $0x1a0] sm:$0xff] }
  0xb7   : > { %4342 = vmatmul.bf16.gmra.mxu0 %v3086_v51  ;;  %v944_v51 = vld [vmem:[#allocation2 + $0x48] sm:$0xf]  ;;  %v1116_v54 = vsel %vm6501_vm10, %v1111_v33, %v1115_v3  ;;  %v1471_v3 = vrot.slane %v6650_v26, 5  ;;  %v1732_v28 = vrot.slane %v1731_v62, 4  ;;  %v6698_v16 = vpop.f32.mrf.mxu0  ;;  %v5673_v53 = vld [vmem:[%s7784_s3 + $0x1e0] sm:$0xff]  ;;  %v3061_v60 = vunpack.c.l.b16 %v1727_v0  ;;  %4500 = vmatpush.bf16.msra.mxu2 %v5665_v2 }
  0xb8   : > { %v1128_v52 = vshrl.u32 %v944_v51, 16  ;;  %v2853_v8 = vunpack.c.l.b16 %v1116_v54  ;;  %v1145_v57 = vrot.slane %v1144_v49, 4  ;;  %4589 = vmatpush.bf16.msra.mxu3 %v5673_v53  ;;  %v1584_v25 = vld [vmem:[#allocation2 + $0x5c] sm:$0x1]  ;;  %v1560_v49 = vld [vmem:[#allocation2 + $0x60] sm:$0xf] }
  0xb9   : > { %v1473_v39 = vrot.slane %v1471_v3, 4  ;;  %v1737_v33 = vsel %vm6501_vm10, %v1732_v28, %v1736_v6  ;;  %v1472_v11 = vsel %vm6525_vm13, %v5038_v31, %v1471_v3  ;;  %v5681_v3 = vld [vmem:[%s7784_s3 + $0x220] sm:$0xff]  ;;  %v1758_v48 = vshll.u32 %v1584_v25, 16 }
  0xba   : > { %4678 = vmatpush.bf16.msra.mxu0 %v5681_v3 }
  0xbb   : > { %v1475_v54 = vsel %vm6525_vm13, %v1473_v39, %v1474_v17 }
  0xbc   : > { %v2918_v44 = vunpack.c.l.b16 %v1475_v54  ;;  %v1373_v54 = vld [vmem:[#allocation2 + $0x48] sm:$0xe] }
  0xbd   : > { %4164 = vmatmul.bf16.gmra.mxu2 %v2942_v58  ;;  %v1131_v58 = vshll.u32 %v944_v51, 16  ;;  %v874_v51 = vsel %vm6442_vm7, %v629_v9, %v873_v18  ;;  %v2917_v9 = vunpack.c.l.b16 %v1472_v11 }
  0xbe   : > { %875 = vst [vmem:[#allocation2 + $0x68] sm:$0x1] %v874_v51  ;;  %v1561_v51 = vld [vmem:[#allocation2 + $0x64] sm:$0xf] }
  0xbf   : > { %4253 = vmatmul.bf16.gmra.mxu3 %v5584_v20  ;;  %v2854_v20 = vunpack.c.l.b16 %v1126_v15  ;;  %v1133_v12 = vrot.slane %v1131_v58, 5  ;;  %v3062_v15 = vunpack.c.l.b16 %v1737_v33  ;;  %v946_v58 = vld [vmem:[#allocation2 + $0x54] sm:$0xf]  ;;  %v1776_v3 = vshrl.u32 %v1561_v51, 16 }
  0xc0   : > { %v1152_v28 = vshrl.u32 %v946_v58, 16  ;;  %v1155_v6 = vshll.u32 %v946_v58, 16  ;;  %v5586_v58 = vld [vmem:[#allocation2 + $0x48] sm:$0xff] }
  0xc1   : > { %4080 = vmatmul.bf16.gmra.mxu1 %v2879_v41  ;;  %v1130_v41 = vrot.slane %v1128_v52, 4  ;;  %v2880_v26 = vpack.c.b16 %v2854_v20, %v2853_v8  ;;  %v1744_v52 = vrot.slane %v1742_v32, 5  ;;  %v6732_v8 = vrot.slane %v1748_v24, 5 }
  0xc2   : > { %v1754_v20 = vrot.slane %v1752_v55, 4  ;;  %v1154_v0 = vrot.slane %v1152_v28, 4  ;;  %v1157_v33 = vrot.slane %v1155_v6, 5  ;;  %v2944_v24 = vpack.c.b16 %v2918_v44, %v2917_v9  ;;  %v6756_v55 = vld [vmem:[#allocation2 + $0x5c] sm:$0x1] }
  0xc3   : > { %v1134_v50 = vor.u32 %v1133_v12, %v1130_v41  ;;  %v1745_v31 = vor.u32 %v1744_v52, %v1741_v5  ;;  %v646_v52 = vrot.slane %v6197_v27, 4  ;;  %v5039_v28 = vrot.slane %v1373_v54, 9 }
  0xc4   : > { %v1755_v17 = vor.u32 %v1754_v20, %v6732_v8  ;;  %v1171_v20 = vshll.u32 %v6756_v55, 16 }
  0xc5   : > { %v1135_v62 = vrot.slane %v1134_v50, 4  ;;  %v1746_v53 = vrot.slane %v1745_v31, 4  ;;  %v880_v31 = vld [vmem:[#allocation2 + $0x74] sm:$0x1] }
  0xc6   : > { %v1756_v5 = vrot.slane %v1755_v17, 4  ;;  %v1173_v17 = vrot.slane %v1171_v20, 5 }
  0xc7   : > { %4347 = vmatmul.bf16.gmra.mxu0 %v3087_v59  ;;  %v6728_v59 = vld [vmem:[#allocation2 + $0x58] sm:$0xf]  ;;  %v1751_v27 = vsel %vm6501_vm10, %v1746_v53, %v6732_v8  ;;  %v1585_v8 = vld [vmem:[#allocation2 + $0x68] sm:$0x1] }
  0xc8   : > { %v1161_v41 = vshll.u32 %v6728_v59, 16  ;;  %v1165_v12 = vshrl.u32 %v6728_v59, 16 }
  0xca   : > { %v6752_v50 = vrot.slane %v1161_v41, 5  ;;  %v1167_v32 = vrot.slane %v1165_v12, 4  ;;  %v1481_v41 = vrot.slane %v6702_v56, 5 }
  0xcd   : > { %4169 = vmatmul.bf16.gmra.mxu2 %v2943_v29  ;;  %v1149_v29 = vrot.slane %v1147_v40, 5 }
  0xce   : > { %v6710_v36 = vpop.f32.mrf.mxu1 }
  0xcf   : > { %4258 = vmatmul.bf16.gmra.mxu3 %v5585_v23  ;;  %v3088_v23 = vpack.c.b16 %v3062_v15, %v3061_v60  ;;  %v1150_v39 = vsel %vm6501_vm10, %v1145_v57, %v1149_v29  ;;  %v1760_v60 = vrot.slane %v1758_v48, 5  ;;  %v1763_v15 = vshrl.u32 %v1560_v49, 16 }
  0xd0   : > { %v6722_v1 = vpop.f32.mrf.mxu2  ;;  %v2856_v2 = vunpack.c.l.b16 %v1150_v39  ;;  %v1158_v57 = vor.u32 %v1157_v33, %v1154_v0  ;;  %v1168_v29 = vor.u32 %v1167_v32, %v6752_v50  ;;  %v881_v48 = vsel %vm6442_vm7, %v646_v52, %v880_v31  ;;  %v948_v32 = vld [vmem:[#allocation2 + $0x60] sm:$0xf] }
  0xd1   : > { %4085 = vmatmul.bf16.gmra.mxu1 %v2880_v26  ;;  %v1140_v26 = vsel %vm6501_vm10, %v1135_v62, %v6700_v35  ;;  %v1478_v35 = vrot.slane %v6685_v61, 5  ;;  %v1766_v62 = vshll.u32 %v1560_v49, 16  ;;  %v1772_v61 = vshll.u32 %v1561_v51, 16  ;;  %882 = vst [vmem:[#allocation2 + $0x74] sm:$0x1] %v881_v48 }
  0xd2   : > { %v6730_v7 = vpop.f32.mrf.mxu3  ;;  %v2855_v18 = vunpack.c.l.b16 %v1140_v26  ;;  %v1761_v9 = vsel %vm6501_vm10, %v1756_v5, %v1760_v60  ;;  %v1765_v44 = vrot.slane %v1763_v15, 4  ;;  %v1159_v26 = vrot.slane %v1158_v57, 4  ;;  %v6786_v51 = vld [vmem:[#allocation2 + $0x64] sm:$0xf] }
  0xd3   : > { %7797 = vst [vmem:[#allocation3_spill] sm:$0xff] %v6730_v7  ;;  %v1480_v6 = vrot.slane %v1478_v35, 4  ;;  %v1169_v39 = vrot.slane %v1168_v29, 4  ;;  %v6778_v0 = vrot.slane %v1772_v61, 5  ;;  %v1778_v33 = vrot.slane %v1776_v3, 4 }
  0xd4   : > { %v6742_v34 = vpop.f32.mrf.mxu0  ;;  %v2881_v25 = vpack.c.b16 %v2856_v2, %v2855_v18  ;;  %v3063_v2 = vunpack.c.l.b16 %v1751_v27  ;;  %v3064_v53 = vunpack.c.l.b16 %v1761_v9  ;;  %v1164_v54 = vsel %vm6501_vm10, %v1159_v26, %v6752_v50 }
  0xd5   : > { %v1482_v18 = vsel %vm6525_vm13, %v1480_v6, %v1481_v41  ;;  %v1174_v5 = vsel %vm6501_vm10, %v1169_v39, %v1173_v17  ;;  %v1176_v52 = vshrl.u32 %v948_v32, 16  ;;  %v1185_v20 = vshll.u32 %v6786_v51, 16  ;;  %v1374_v6 = vld [vmem:[#allocation2 + $0x54] sm:$0xe] }
  0xd6   : > { %v6744_v37 = vpop.f32.mrf.mxu1  ;;  %v2920_v29 = vunpack.c.l.b16 %v1482_v18  ;;  %v1189_v61 = vshrl.u32 %v6786_v51, 16  ;;  %v3089_v3 = vpack.c.b16 %v3064_v53, %v3063_v2  ;;  %v2857_v50 = vunpack.c.l.b16 %v1164_v54  ;;  %v6808_v18 = vld [vmem:[#allocation2 + $0x68] sm:$0x1]  ;;  %v5587_v2 = vld [vmem:[#allocation2 + $0x54] sm:$0xff] }
  0xd7   : > { %4352 = vmatmul.bf16.gmra.mxu0 %v3088_v23  ;;  %v1768_v23 = vrot.slane %v1766_v62, 5  ;;  %v1779_v62 = vor.u32 %v1778_v33, %v6778_v0  ;;  %v1485_v41 = vrot.slane %v6728_v59, 5  ;;  %v1178_v31 = vrot.slane %v1176_v52, 4  ;;  %v1562_v33 = vld [vmem:[#allocation2 + $0x6c] sm:$0xf] }
  0xd8   : > { %v6754_v40 = vpop.f32.mrf.mxu2  ;;  %v6803_v17 = vrot.slane %v1185_v20, 5  ;;  %v1191_v48 = vrot.slane %v1189_v61, 4  ;;  %v1563_v59 = vld [vmem:[#allocation2 + $0x70] sm:$0xf]  ;;  %v1790_v52 = vshll.u32 %v1562_v33, 16 }
  0xd9   : > { %v1769_v60 = vor.u32 %v1768_v23, %v1765_v44  ;;  %v1780_v44 = vrot.slane %v1779_v62, 4  ;;  %v1487_v54 = vrot.slane %v1485_v41, 4  ;;  %v1796_v20 = vshll.u32 %v1563_v59, 16 }
  0xda   : > { %v6759_v11 = vpop.f32.mrf.mxu3  ;;  %v1800_v61 = vshrl.u32 %v1563_v59, 16 }
  0xdb   : > { %7798 = vst [vmem:[#allocation4_spill] sm:$0xff] %v6759_v11  ;;  %v1770_v27 = vrot.slane %v1769_v60, 4 }
  0xdc   : > { %v6764_v21 = vpop.f32.mrf.mxu0  ;;  %v1802_v59 = vrot.slane %v1800_v61, 4 }
  0xdd   : > { %4174 = vmatmul.bf16.gmra.mxu2 %v2944_v24  ;;  %v1479_v24 = vsel %vm6525_vm13, %v5039_v28, %v1478_v35  ;;  %v1782_v35 = vshll.u32 %v1585_v8, 16  ;;  %v2858_v28 = vunpack.c.l.b16 %v1174_v5  ;;  %v663_v8 = vrot.slane %v6338_v22, 4 }
  0xde   : > { %v6767_v12 = vpop.f32.mrf.mxu1  ;;  %v2919_v57 = vunpack.c.l.b16 %v1479_v24  ;;  %v5040_v24 = vrot.slane %v1374_v6, 9  ;;  %v1488_v5 = vrot.slane %v6756_v55, 5  ;;  %v1775_v60 = vsel %vm6501_vm10, %v1770_v27, %v6778_v0  ;;  %v5664_v6 = vld [vmem:[%s7784_s3 + $0x198] sm:$0xff] }
  0xdf   : > { %4263 = vmatmul.bf16.gmra.mxu3 %v5586_v58  ;;  %v1179_v58 = vshll.u32 %v948_v32, 16  ;;  %v1784_v23 = vrot.slane %v1782_v35, 5  ;;  %v2882_v53 = vpack.c.b16 %v2858_v28, %v2857_v50  ;;  %v1787_v35 = vshrl.u32 %v1562_v33, 16  ;;  %v5672_v27 = vld [vmem:[%s7784_s3 + $0x1d8] sm:$0xff]  ;;  %4501 = vmatpush.bf16.msra.mxu2 %v5664_v6 }
  0xe0   : > { %v6776_v56 = vpop.f32.mrf.mxu2  ;;  %v2945_v39 = vpack.c.b16 %v2920_v29, %v2919_v57  ;;  %v1192_v57 = vor.u32 %v1191_v48, %v6803_v17  ;;  %v1195_v29 = vshll.u32 %v6808_v18, 16  ;;  %v1486_v0 = vsel %vm6525_vm13, %v5040_v24, %v1485_v41  ;;  %4590 = vmatpush.bf16.msra.mxu3 %v5672_v27 }
  0xe1   : > { %4090 = vmatmul.bf16.gmra.mxu1 %v2881_v25  ;;  %v1181_v26 = vrot.slane %v1179_v58, 5  ;;  %v1785_v62 = vsel %vm6501_vm10, %v1780_v44, %v1784_v23  ;;  %v1489_v50 = vsel %vm6525_vm13, %v1487_v54, %v1488_v5  ;;  %v3065_v28 = vunpack.c.l.b16 %v1775_v60  ;;  %v1586_v54 = vld [vmem:[#allocation2 + $0x74] sm:$0x1]  ;;  %v950_v5 = vld [vmem:[#allocation2 + $0x6c] sm:$0xf]  ;;  %v5680_v60 = vld [vmem:[%s7784_s3 + $0x218] sm:$0xff] }
  0xe2   : > { %v6780_v49 = vpop.f32.mrf.mxu3  ;;  %v1789_v41 = vrot.slane %v1787_v35, 4  ;;  %v1193_v48 = vrot.slane %v1192_v57, 4  ;;  %v1197_v33 = vrot.slane %v1195_v29, 5  ;;  %v6836_v24 = vrot.slane %v1796_v20, 5  ;;  %4679 = vmatpush.bf16.msra.mxu0 %v5680_v60 }
  0xe3   : > { %7799 = vst [vmem:[#allocation5_spill] sm:$0xff] %v6780_v49  ;;  %v1182_v22 = vor.u32 %v1181_v26, %v1178_v31  ;;  %v3066_v31 = vunpack.c.l.b16 %v1785_v62  ;;  %v2921_v62 = vunpack.c.l.b16 %v1486_v0  ;;  %v1806_v61 = vshll.u32 %v1586_v54, 16 }
  0xe4   : > { %v6793_v15 = vpop.f32.mrf.mxu0  ;;  %v1198_v29 = vsel %vm6501_vm10, %v1193_v48, %v1197_v33  ;;  %v1803_v20 = vor.u32 %v1802_v59, %v6836_v24  ;;  %v1200_v6 = vshrl.u32 %v950_v5, 16  ;;  %v1203_v27 = vshll.u32 %v950_v5, 16 }
  0xe5   : > { %v1183_v26 = vrot.slane %v1182_v22, 4  ;;  %v2922_v22 = vunpack.c.l.b16 %v1489_v50  ;;  %v3090_v35 = vpack.c.b16 %v3066_v31, %v3065_v28  ;;  %v1808_v59 = vrot.slane %v1806_v61, 5 }
  0xe6   : > { %v6798_v25 = vpop.f32.mrf.mxu1  ;;  %v1804_v33 = vrot.slane %v1803_v20, 4  ;;  %v1202_v5 = vrot.slane %v1200_v6, 4  ;;  %v680_v49 = vrot.slane %v6432_v43, 4 }
  0xe7   : > { %4357 = vmatmul.bf16.gmra.mxu0 %v3089_v3  ;;  %v887_v3 = vld [vmem:[#allocation2 + $0x80] sm:$0x1]  ;;  %v1188_v57 = vsel %vm6501_vm10, %v1183_v26, %v6803_v17  ;;  %v2946_v17 = vpack.c.b16 %v2922_v22, %v2921_v62  ;;  %v1492_v26 = vrot.slane %v6786_v51, 5  ;;  %v6868_v22 = vld [vmem:[#allocation2 + $0x74] sm:$0x1] }
  0xe8   : > { %v6801_v9 = vpop.f32.mrf.mxu2  ;;  %v888_v44 = vsel %vm6442_vm7, %v663_v8, %v887_v3  ;;  %v5656_v8 = vld [vmem:[%s7784_s3 + $0x158] sm:$0xff]  ;;  %v2859_v31 = vunpack.c.l.b16 %v1188_v57  ;;  %v5588_v62 = vld [vmem:[#allocation2 + $0x60] sm:$0xff]  ;;  %v1809_v61 = vsel %vm6501_vm10, %v1804_v33, %v1808_v59 }
  0xe9   : > { %889 = vst [vmem:[#allocation2 + $0x80] sm:$0x1] %v888_v44  ;;  %4412 = vmatpush.bf16.msra.mxu1 %v5656_v8  ;;  %v1205_v8 = vrot.slane %v1203_v27, 5  ;;  %v1494_v57 = vrot.slane %v1492_v26, 4  ;;  %v3068_v59 = vunpack.c.l.b16 %v1809_v61 }
  0xea   : > { %v6806_v32 = vpop.f32.mrf.mxu3 }
  0xeb   : > { %7800 = vst [vmem:[#allocation6_spill] sm:$0xff] %v6806_v32  ;;  %v1564_v32 = vld [vmem:[#allocation2 + $0x78] sm:$0xf]  ;;  %v1206_v43 = vor.u32 %v1205_v8, %v1202_v5 }
  0xec   : > { %v6816_v58 = vpop.f32.mrf.mxu0  ;;  %v1811_v6 = vshrl.u32 %v1564_v32, 16  ;;  %v952_v8 = vld [vmem:[#allocation2 + $0x78] sm:$0xf] }
  0xed   : > { %4179 = vmatmul.bf16.gmra.mxu2 %v2945_v39  ;;  %v1792_v39 = vrot.slane %v1790_v52, 5 }
  0xee   : > { %v6820_v55 = vpop.f32.mrf.mxu1  ;;  %v1813_v5 = vrot.slane %v1811_v6, 4 }
  0xef   : > { %4268 = vmatmul.bf16.gmra.mxu3 %v5587_v2  ;;  %v1793_v52 = vor.u32 %v1792_v39, %v1789_v41  ;;  %v2860_v41 = vunpack.c.l.b16 %v1198_v29  ;;  %v1375_v39 = vld [vmem:[#allocation2 + $0x60] sm:$0xe]  ;;  %v1565_v29 = vld [vmem:[#allocation2 + $0x7c] sm:$0xf] }
  0xf0   : > { %v6834_v23 = vpop.f32.mrf.mxu2  ;;  %v5041_v51 = vrot.slane %v1375_v39, 9  ;;  %v1814_v39 = vshll.u32 %v1564_v32, 16 }
  0xf1   : > { %7801 = vst [vmem:[#allocation7_spill] sm:$0xff] %v6834_v23  ;;  %4095 = vmatmul.bf16.gmra.mxu1 %v2882_v53  ;;  %v6846_v53 = vld [vmem:[#allocation2 + $0x70] sm:$0xf]  ;;  %v1794_v48 = vrot.slane %v1793_v52, 4  ;;  %v1495_v52 = vrot.slane %v6808_v18, 5  ;;  %v2883_v20 = vpack.c.b16 %v2860_v41, %v2859_v31  ;;  %v1820_v31 = vshll.u32 %v1565_v29, 16 }
  0xf2   : > { %v6838_v2 = vpop.f32.mrf.mxu3  ;;  %v1209_v0 = vshll.u32 %v6846_v53, 16  ;;  %v1213_v50 = vshrl.u32 %v6846_v53, 16  ;;  %v894_v18 = vld [vmem:[#allocation2 + $0x8c] sm:$0x1]  ;;  %v1824_v41 = vshrl.u32 %v1565_v29, 16  ;;  %v1493_v33 = vsel %vm6525_vm13, %v5041_v51, %v1492_v26 }
  0xf3   : > { %7802 = vst [vmem:[#allocation8_spill] sm:$0xff] %v6838_v2  ;;  %v1207_v29 = vrot.slane %v1206_v43, 4  ;;  %v6894_v7 = vrot.slane %v1820_v31, 5  ;;  %v2923_v51 = vunpack.c.l.b16 %v1493_v33  ;;  %v1376_v33 = vld [vmem:[#allocation2 + $0x6c] sm:$0xe] }
  0xf4   : > { %v6858_v28 = vpop.f32.mrf.mxu0  ;;  %v6865_v60 = vrot.slane %v1209_v0, 5  ;;  %v1215_v2 = vrot.slane %v1213_v50, 4  ;;  %v1219_v50 = vshll.u32 %v6868_v22, 16  ;;  %v1826_v26 = vrot.slane %v1824_v41, 4  ;;  %v6917_v23 = vld [vmem:[#allocation2 + $0x80] sm:$0x1] }
  0xf6   : > { %v6854_v3 = vpop.f32.mrf.mxu1  ;;  %v1216_v0 = vor.u32 %v1215_v2, %v6865_v60  ;;  %v1496_v2 = vsel %vm6525_vm13, %v1494_v57, %v1495_v52  ;;  %v1221_v11 = vrot.slane %v1219_v50, 5  ;;  %v1227_v57 = vshll.u32 %v952_v8, 16 }
  0xf7   : > { %4362 = vmatmul.bf16.gmra.mxu0 %v3090_v35  ;;  %v1799_v35 = vsel %vm6501_vm10, %v1794_v48, %v6836_v24  ;;  %v895_v24 = vsel %vm6442_vm7, %v680_v49, %v894_v18  ;;  %v1816_v49 = vrot.slane %v1814_v39, 5  ;;  %v6892_v18 = vld [vmem:[#allocation2 + $0x7c] sm:$0xf]  ;;  %v1212_v43 = vsel %vm6501_vm10, %v1207_v29, %v6865_v60  ;;  %v1566_v29 = vld [vmem:[#allocation2 + $0x84] sm:$0xf] }
  0xf8   : > { %v6860_v44 = vpop.f32.mrf.mxu2  ;;  %896 = vst [vmem:[#allocation2 + $0x8c] sm:$0x1] %v895_v24  ;;  %v3067_v32 = vunpack.c.l.b16 %v1799_v35  ;;  %v1587_v24 = vld [vmem:[#allocation2 + $0x80] sm:$0x1]  ;;  %v1233_v35 = vshll.u32 %v6892_v18, 16  ;;  %v1237_v61 = vshrl.u32 %v6892_v18, 16 }
  0xf9   : > { %7803 = vst [vmem:[#allocation9_spill] sm:$0xff] %v6860_v44  ;;  %v1499_v50 = vrot.slane %v6846_v53, 5  ;;  %v1817_v39 = vor.u32 %v1816_v49, %v1813_v5  ;;  %v1229_v60 = vrot.slane %v1227_v57, 5  ;;  %v2861_v44 = vunpack.c.l.b16 %v1212_v43  ;;  %v1567_v5 = vld [vmem:[#allocation2 + $0x88] sm:$0xf] }
  0xfa   : > { %v6863_v54 = vpop.f32.mrf.mxu3  ;;  %v3091_v52 = vpack.c.b16 %v3068_v59, %v3067_v32  ;;  %v1830_v32 = vshll.u32 %v1587_v24, 16  ;;  %v1239_v53 = vrot.slane %v1237_v61, 4  ;;  %v1835_v43 = vshrl.u32 %v1566_v29, 16 }
  0xfb   : > { %7804 = vst [vmem:[#allocation10_spill] sm:$0xff] %v6863_v54  ;;  %v1217_v54 = vrot.slane %v1216_v0, 4  ;;  %v1818_v24 = vrot.slane %v1817_v39, 4  ;;  %v1844_v61 = vshll.u32 %v1567_v5, 16 }
  0xfc   : > { %v1832_v57 = vrot.slane %v1830_v32, 5  ;;  %v901_v32 = vld [vmem:[#allocation2 + $0x98] sm:$0x1] }
  0xfd   : > { %4184 = vmatmul.bf16.gmra.mxu2 %v2946_v17  ;;  %v6880_v17 = vpop.f32.mrf.mxu0  ;;  %v1222_v0 = vsel %vm6501_vm10, %v1217_v54, %v1221_v11  ;;  %v6912_v54 = vrot.slane %v1233_v35, 5 }
  0xfe   : > { %v6876_v27 = vpop.f32.mrf.mxu1  ;;  %v2862_v11 = vunpack.c.l.b16 %v1222_v0  ;;  %v1838_v0 = vshll.u32 %v1566_v29, 16 }
  0xff   : > { %4273 = vmatmul.bf16.gmra.mxu3 %v5588_v62 }
 0x100   : > { %v6884_v48 = vpop.f32.mrf.mxu2 }
 0x101   : > { %7805 = vst [vmem:[#allocation11_spill] sm:$0xff] %v6884_v48  ;;  %4100 = vmatmul.bf16.gmra.mxu1 %v2883_v20  ;;  %v2924_v20 = vunpack.c.l.b16 %v1496_v2  ;;  %v1224_v48 = vshrl.u32 %v952_v8, 16  ;;  %v1827_v2 = vor.u32 %v1826_v26, %v6894_v7  ;;  %v1502_v26 = vrot.slane %v6868_v22, 5 }
 0x102   : > { %v6890_v62 = vpop.f32.mrf.mxu3  ;;  %v4062_v22 = vadd.f32 %v6876_v27, %v6679_v46  ;;  %v5663_v27 = vld [vmem:[%s7784_s3 + $0x190] sm:$0xff] }
 0x103   : > { %7806 = vst [vmem:[#allocation12_spill] sm:$0xff] %v6890_v62  ;;  %v2947_v8 = vpack.c.b16 %v2924_v20, %v2923_v51  ;;  %v1226_v62 = vrot.slane %v1224_v48, 4  ;;  %v697_v48 = vrot.slane %v6123_v45, 4  ;;  %v5589_v51 = vld [vmem:[#allocation2 + $0x6c] sm:$0xff]  ;;  %v1828_v20 = vrot.slane %v1827_v2, 4  ;;  %4502 = vmatpush.bf16.msra.mxu2 %v5663_v27 }
 0x105   : > { %v6904_v31 = vpop.f32.mrf.mxu0  ;;  %v1230_v35 = vor.u32 %v1229_v60, %v1226_v62  ;;  %v1823_v62 = vsel %vm6501_vm10, %v1818_v24, %v6894_v7  ;;  %v1833_v46 = vsel %vm6501_vm10, %v1828_v20, %v1832_v57  ;;  %v5671_v60 = vld [vmem:[%s7784_s3 + $0x1d0] sm:$0xff]  ;;  %v902_v7 = vsel %vm6442_vm7, %v697_v48, %v901_v32  ;;  %v954_v48 = vld [vmem:[#allocation2 + $0x84] sm:$0xf] }
 0x106   : > { %v4063_v6 = vpop.f32.mrf.mxu1  ;;  %903 = vst [vmem:[#allocation2 + $0x98] sm:$0x1] %v902_v7  ;;  %v3069_v57 = vunpack.c.l.b16 %v1823_v62  ;;  %4591 = vmatpush.bf16.msra.mxu3 %v5671_v60  ;;  %v1251_v62 = vshll.u32 %v954_v48, 16 }
 0x107   : > { %v6907_v41 = vadd.f32 %v4063_v6, %v6698_v16  ;;  %4367 = vmatmul.bf16.gmra.mxu0 %v3091_v52  ;;  %v5042_v16 = vrot.slane %v1376_v33, 9  ;;  %v1501_v6 = vrot.slane %v1499_v50, 4  ;;  %v1240_v52 = vor.u32 %v1239_v53, %v6912_v54 }
 0x108   : > { %v6910_v59 = vpop.f32.mrf.mxu2  ;;  %v1243_v33 = vshll.u32 %v6917_v23, 16  ;;  %v1840_v53 = vrot.slane %v1838_v0, 5 }
 0x109   : > { %7807 = vst [vmem:[#allocation13_spill] sm:$0xff] %v6910_v59  ;;  %v1848_v59 = vshrl.u32 %v1567_v5, 16  ;;  %v1500_v45 = vsel %vm6525_vm13, %v5042_v16, %v1499_v50  ;;  %v1503_v2 = vsel %vm6525_vm13, %v1501_v6, %v1502_v26  ;;  %v1837_v50 = vrot.slane %v1835_v43, 4 }
 0x10a   : > { %v6914_v49 = vpop.f32.mrf.mxu3  ;;  %v1241_v6 = vrot.slane %v1240_v52, 4  ;;  %v1245_v26 = vrot.slane %v1243_v33, 5  ;;  %v2926_v20 = vunpack.c.l.b16 %v1503_v2  ;;  %v3070_v43 = vunpack.c.l.b16 %v1833_v46 }
 0x10b   : > { %7808 = vst [vmem:[#allocation14_spill] sm:$0xff] %v6914_v49  ;;  %v2884_v49 = vpack.c.b16 %v2862_v11, %v2861_v44  ;;  %v1231_v11 = vrot.slane %v1230_v35, 4  ;;  %v1850_v5 = vrot.slane %v1848_v59, 4  ;;  %v5655_v35 = vld [vmem:[%s7784_s3 + $0x150] sm:$0xff]  ;;  %v1841_v52 = vor.u32 %v1840_v53, %v1837_v50 }
 0x10c   : > { %v5679_v59 = vld [vmem:[%s7784_s3 + $0x210] sm:$0xff]  ;;  %4413 = vmatpush.bf16.msra.mxu1 %v5655_v35  ;;  %v1248_v2 = vshrl.u32 %v954_v48, 16  ;;  %v3092_v27 = vpack.c.b16 %v3070_v43, %v3069_v57  ;;  %v1506_v53 = vrot.slane %v6892_v18, 5 }
 0x10d   : > { %4189 = vmatmul.bf16.gmra.mxu2 %v2947_v8  ;;  %v6931_v44 = vpop.f32.mrf.mxu0  ;;  %v1236_v0 = vsel %vm6501_vm10, %v1231_v11, %v6912_v54  ;;  %4680 = vmatpush.bf16.msra.mxu0 %v5679_v59  ;;  %v1568_v48 = vld [vmem:[#allocation2 + $0x90] sm:$0xf]  ;;  %v5590_v59 = vld [vmem:[#allocation2 + $0x78] sm:$0xff] }
 0x10e   : > { %v4066_v39 = vpop.f32.mrf.mxu1  ;;  %v1250_v43 = vrot.slane %v1248_v2, 4 }
 0x10f   : > { %4278 = vmatmul.bf16.gmra.mxu3 %v5589_v51  ;;  %v6934_v8 = vadd.f32 %v4066_v39, %v6742_v34  ;;  %v6946_v34 = vrot.slane %v1844_v61, 5  ;;  %v2925_v51 = vunpack.c.l.b16 %v1500_v45  ;;  %v1588_v39 = vld [vmem:[#allocation2 + $0x8c] sm:$0x1]  ;;  %v1377_v61 = vld [vmem:[#allocation2 + $0x78] sm:$0xe] }
 0x110   : > { %v4150_v29 = vpop.f32.mrf.mxu2  ;;  %v1854_v45 = vshll.u32 %v1588_v39, 16  ;;  %v5043_v11 = vrot.slane %v1377_v61, 9  ;;  %v1253_v39 = vrot.slane %v1251_v62, 5  ;;  %v1508_v61 = vrot.slane %v1506_v53, 4 }
 0x111   : > { %v4151_v16 = vadd.f32 %v4150_v29, %v4062_v22  ;;  %4105 = vmatmul.bf16.gmra.mxu1 %v2884_v49  ;;  %v6954_v49 = vld [vmem:[#allocation2 + $0x88] sm:$0xf]  ;;  %v1851_v33 = vor.u32 %v1850_v5, %v6946_v34  ;;  %v1246_v22 = vsel %vm6501_vm10, %v1241_v6, %v1245_v26  ;;  %v2948_v46 = vpack.c.b16 %v2926_v20, %v2925_v51 }
 0x112   : > { %v4239_v24 = vpop.f32.mrf.mxu3  ;;  %v1257_v7 = vshll.u32 %v6954_v49, 16  ;;  %v1261_v29 = vshrl.u32 %v6954_v49, 16  ;;  %v2863_v6 = vunpack.c.l.b16 %v1236_v0  ;;  %v2864_v26 = vunpack.c.l.b16 %v1246_v22 }
 0x113   : > { %v4240_v32 = vadd.f32 %v4239_v24, %v4151_v16  ;;  %v1842_v24 = vrot.slane %v1841_v52, 4  ;;  %v1852_v51 = vrot.slane %v1851_v33, 4  ;;  %v1856_v57 = vrot.slane %v1854_v45, 5  ;;  %v6978_v52 = vld [vmem:[#allocation2 + $0x8c] sm:$0x1] }
 0x114   : > { %v6975_v18 = vrot.slane %v1257_v7, 5  ;;  %v1509_v0 = vrot.slane %v6917_v23, 5  ;;  %v1569_v33 = vld [vmem:[#allocation2 + $0x94] sm:$0xf]  ;;  %v1507_v22 = vsel %vm6525_vm13, %v5043_v11, %v1506_v53  ;;  %v1859_v45 = vshrl.u32 %v1568_v48, 16 }
 0x115   : > { %v6964_v54 = vpop.f32.mrf.mxu0  ;;  %v6971_v5 = vadd.f32 %v6904_v31, %v4240_v32  ;;  %v1263_v31 = vrot.slane %v1261_v29, 4  ;;  %v1857_v2 = vsel %vm6501_vm10, %v1852_v51, %v1856_v57  ;;  %v1254_v62 = vor.u32 %v1253_v39, %v1250_v43 }
 0x116   : > { %v4068_v60 = vpop.f32.mrf.mxu1  ;;  %v1267_v29 = vshll.u32 %v6978_v52, 16  ;;  %v1868_v11 = vshll.u32 %v1569_v33, 16  ;;  %v1872_v53 = vshrl.u32 %v1569_v33, 16  ;;  %v3072_v43 = vunpack.c.l.b16 %v1857_v2 }
 0x117   : > { %v6967_v50 = vadd.f32 %v4068_v60, %v6764_v21  ;;  %v714_v21 = vrot.slane %v6229_v47, 4  ;;  %4372 = vmatmul.bf16.gmra.mxu0 %v3092_v27  ;;  %v1847_v47 = vsel %vm6501_vm10, %v1842_v24, %v6946_v34  ;;  %v1862_v27 = vshll.u32 %v1568_v48, 16 }
 0x118   : > { %v4152_v16 = vpop.f32.mrf.mxu2  ;;  %v1264_v7 = vor.u32 %v1263_v31, %v6975_v18  ;;  %v2927_v24 = vunpack.c.l.b16 %v1507_v22  ;;  %v3071_v51 = vunpack.c.l.b16 %v1847_v47  ;;  %v1255_v39 = vrot.slane %v1254_v62, 4  ;;  %v1589_v22 = vld [vmem:[#allocation2 + $0x98] sm:$0x1] }
 0x119   : > { %v4153_v20 = vadd.f32 %v4152_v16, %v6907_v41  ;;  %v2885_v41 = vpack.c.b16 %v2864_v26, %v2863_v6  ;;  %v908_v16 = vld [vmem:[#allocation2 + $0xa4] sm:$0x1]  ;;  %v1864_v48 = vrot.slane %v1862_v27, 5  ;;  %v1874_v33 = vrot.slane %v1872_v53, 4  ;;  %v1378_v27 = vld [vmem:[#allocation2 + $0x84] sm:$0xe] }
 0x11a   : > { %v4241_v35 = vpop.f32.mrf.mxu3  ;;  %v909_v6 = vsel %vm6442_vm7, %v714_v21, %v908_v16  ;;  %v1265_v31 = vrot.slane %v1264_v7, 4  ;;  %v1269_v21 = vrot.slane %v1267_v29, 5  ;;  %v3093_v62 = vpack.c.b16 %v3072_v43, %v3071_v51 }
 0x11b   : > { %v4242_v32 = vadd.f32 %v4241_v35, %v4153_v20  ;;  %v1861_v20 = vrot.slane %v1859_v45, 4  ;;  %910 = vst [vmem:[#allocation2 + $0xa4] sm:$0x1] %v909_v6  ;;  %v956_v35 = vld [vmem:[#allocation2 + $0x90] sm:$0xf]  ;;  %v1260_v7 = vsel %vm6501_vm10, %v1255_v39, %v6975_v18  ;;  %v1878_v53 = vshll.u32 %v1589_v22, 16 }
 0x11c   : > { %v1272_v47 = vshrl.u32 %v956_v35, 16  ;;  %v1275_v45 = vshll.u32 %v956_v35, 16  ;;  %v1270_v29 = vsel %vm6501_vm10, %v1265_v31, %v1269_v21  ;;  %v5044_v43 = vrot.slane %v1378_v27, 9 }
 0x11d   : > { %4194 = vmatmul.bf16.gmra.mxu2 %v2948_v46  ;;  %v6988_v23 = vadd.f32 %v6931_v44, %v4242_v32  ;;  %v6992_v34 = vpop.f32.mrf.mxu0  ;;  %v1510_v44 = vsel %vm6525_vm13, %v1508_v61, %v1509_v0  ;;  %v7004_v32 = vrot.slane %v1868_v11, 5  ;;  %v2866_v31 = vunpack.c.l.b16 %v1270_v29 }
 0x11e   : > { %v4071_v60 = vpop.f32.mrf.mxu1  ;;  %v2928_v0 = vunpack.c.l.b16 %v1510_v44  ;;  %v1274_v44 = vrot.slane %v1272_v47, 4  ;;  %v1277_v51 = vrot.slane %v1275_v45, 5  ;;  %v1516_v21 = vrot.slane %v6978_v52, 5 }
 0x11f   : > { %7809 = vst [vmem:[#allocation15_spill] sm:$0xff] %v6988_v23  ;;  %4283 = vmatmul.bf16.gmra.mxu3 %v5590_v59  ;;  %v6995_v46 = vadd.f32 %v4071_v60, %v6793_v15  ;;  %v7002_v15 = vld [vmem:[#allocation2 + $0x94] sm:$0xf]  ;;  %v1865_v60 = vor.u32 %v1864_v48, %v1861_v20  ;;  %v1875_v11 = vor.u32 %v1874_v33, %v7004_v32  ;;  %v1570_v20 = vld [vmem:[#allocation2 + $0x9c] sm:$0xf]  ;;  %v1880_v47 = vrot.slane %v1878_v53, 5 }
 0x120   : > { %v4155_v26 = vpop.f32.mrf.mxu2  ;;  %v1285_v2 = vshrl.u32 %v7002_v15, 16  ;;  %v7024_v33 = vld [vmem:[#allocation2 + $0x98] sm:$0x1]  ;;  %v1883_v45 = vshrl.u32 %v1570_v20, 16  ;;  %v731_v27 = vrot.slane %v6364_v4, 4  ;;  %v1886_v23 = vshll.u32 %v1570_v20, 16 }
 0x121   : > { %v4156_v57 = vadd.f32 %v4155_v26, %v6934_v8  ;;  %4110 = vmatmul.bf16.gmra.mxu1 %v2885_v41  ;;  %v1513_v8 = vrot.slane %v6954_v49, 5  ;;  %v1281_v41 = vshll.u32 %v7002_v15, 16  ;;  %v2949_v49 = vpack.c.b16 %v2928_v0, %v2927_v24  ;;  %v1571_v24 = vld [vmem:[#allocation2 + $0xa0] sm:$0xf]  ;;  %v915_v20 = vld [vmem:[#allocation2 + $0xb0] sm:$0x1] }
 0x122   : > { %v4244_v59 = vpop.f32.mrf.mxu3  ;;  %v1287_v18 = vrot.slane %v1285_v2, 4  ;;  %v1866_v0 = vrot.slane %v1865_v60, 4  ;;  %v1876_v22 = vrot.slane %v1875_v11, 4  ;;  %v1278_v2 = vor.u32 %v1277_v51, %v1274_v44 }
 0x123   : > { %v4245_v61 = vadd.f32 %v4244_v59, %v4156_v57  ;;  %v1515_v48 = vrot.slane %v1513_v8, 4  ;;  %v7020_v35 = vrot.slane %v1281_v41, 5  ;;  %v2865_v59 = vunpack.c.l.b16 %v1260_v7 }
 0x124   : > { %v1291_v7 = vshll.u32 %v7024_v33, 16  ;;  %v1892_v52 = vshll.u32 %v1571_v24, 16  ;;  %v1896_v29 = vshrl.u32 %v1571_v24, 16  ;;  %v1871_v44 = vsel %vm6501_vm10, %v1866_v0, %v7004_v32  ;;  %v5670_v32 = vld [vmem:[%s7784_s3 + $0x1c8] sm:$0xff] }
 0x125   : > { %v7015_v6 = vpop.f32.mrf.mxu0  ;;  %v7032_v60 = vadd.f32 %v6964_v54, %v4245_v61  ;;  %v1517_v53 = vsel %vm6525_vm13, %v1515_v48, %v1516_v21  ;;  %v1885_v51 = vrot.slane %v1883_v45, 4  ;;  %v5662_v61 = vld [vmem:[%s7784_s3 + $0x188] sm:$0xff]  ;;  %v1888_v48 = vrot.slane %v1886_v23, 5  ;;  %v958_v23 = vld [vmem:[#allocation2 + $0x9c] sm:$0xf]  ;;  %4592 = vmatpush.bf16.msra.mxu3 %v5670_v32 }
 0x126   : > { %v4073_v16 = vpop.f32.mrf.mxu1  ;;  %v7057_v21 = vrot.slane %v1892_v52, 5  ;;  %v2930_v0 = vunpack.c.l.b16 %v1517_v53  ;;  %4503 = vmatpush.bf16.msra.mxu2 %v5662_v61  ;;  %v5654_v52 = vld [vmem:[%s7784_s3 + $0x148] sm:$0xff]  ;;  %v1523_v61 = vrot.slane %v7024_v33, 5 }
 0x127   : > { %v7018_v26 = vadd.f32 %v4073_v16, %v6816_v58  ;;  %4377 = vmatmul.bf16.gmra.mxu0 %v3093_v62  ;;  %v5591_v16 = vld [vmem:[#allocation2 + $0x84] sm:$0xff]  ;;  %v1514_v62 = vsel %vm6525_vm13, %v5044_v43, %v1513_v8  ;;  %4414 = vmatpush.bf16.msra.mxu1 %v5654_v52 }
 0x128   : > { %v4157_v57 = vpop.f32.mrf.mxu2  ;;  %v1590_v43 = vld [vmem:[#allocation2 + $0xa4] sm:$0x1] }
 0x129   : > { %v4158_v39 = vadd.f32 %v4157_v57, %v6967_v50  ;;  %v1288_v50 = vor.u32 %v1287_v18, %v7020_v35  ;;  %v2886_v57 = vpack.c.b16 %v2866_v31, %v2865_v59  ;;  %v916_v18 = vsel %vm6442_vm7, %v731_v27, %v915_v20  ;;  %v7061_v27 = vld [vmem:[#allocation2 + $0xa0] sm:$0xf]  ;;  %v7086_v52 = vld [vmem:[#allocation2 + $0xa4] sm:$0x1] }
 0x12a   : > { %v4246_v58 = vpop.f32.mrf.mxu3  ;;  %v1293_v31 = vrot.slane %v1291_v7, 5  ;;  %917 = vst [vmem:[#allocation2 + $0xb0] sm:$0x1] %v916_v18  ;;  %v1902_v7 = vshll.u32 %v1590_v43, 16  ;;  %v1572_v43 = vld [vmem:[#allocation2 + $0xa8] sm:$0xf] }
 0x12b   : > { %v4247_v41 = vadd.f32 %v4246_v58, %v4158_v39  ;;  %v1289_v59 = vrot.slane %v1288_v50, 4  ;;  %v2929_v58 = vunpack.c.l.b16 %v1514_v62  ;;  %v1379_v50 = vld [vmem:[#allocation2 + $0x90] sm:$0xe]  ;;  %v1296_v62 = vshrl.u32 %v958_v23, 16 }
 0x12c   : > { %v5045_v20 = vrot.slane %v1379_v50, 9 }
 0x12d   : > { %4199 = vmatmul.bf16.gmra.mxu2 %v2949_v49  ;;  %v7035_v4 = vadd.f32 %v6992_v34, %v4247_v41  ;;  %v1881_v49 = vsel %vm6501_vm10, %v1876_v22, %v1880_v47  ;;  %v7044_v8 = vpop.f32.mrf.mxu0  ;;  %v1279_v34 = vrot.slane %v1278_v2, 4  ;;  %v3073_v47 = vunpack.c.l.b16 %v1871_v44 }
 0x12e   : > { %v4076_v11 = vpop.f32.mrf.mxu1  ;;  %v3074_v45 = vunpack.c.l.b16 %v1881_v49  ;;  %v1520_v41 = vrot.slane %v7002_v15, 5  ;;  %v1294_v15 = vsel %vm6501_vm10, %v1289_v59, %v1293_v31  ;;  %v2950_v53 = vpack.c.b16 %v2930_v0, %v2929_v58  ;;  %v1573_v31 = vld [vmem:[#allocation2 + $0xac] sm:$0xf] }
 0x12f   : > { %4288 = vmatmul.bf16.gmra.mxu3 %v5591_v16  ;;  %v7047_v54 = vadd.f32 %v4076_v11, %v6858_v28  ;;  %v1898_v28 = vrot.slane %v1896_v29, 4  ;;  %v1284_v2 = vsel %vm6501_vm10, %v1279_v34, %v7020_v35  ;;  %v5678_v29 = vld [vmem:[%s7784_s3 + $0x208] sm:$0xff]  ;;  %v1299_v11 = vshll.u32 %v958_v23, 16 }
 0x130   : > { %v4160_v39 = vpop.f32.mrf.mxu2  ;;  %4681 = vmatpush.bf16.msra.mxu0 %v5678_v29  ;;  %v1305_v35 = vshll.u32 %v7061_v27, 16  ;;  %v1309_v44 = vshrl.u32 %v7061_v27, 16  ;;  %v3094_v49 = vpack.c.b16 %v3074_v45, %v3073_v47  ;;  %v1522_v34 = vrot.slane %v1520_v41, 4 }
 0x131   : > { %v4161_v24 = vadd.f32 %v4160_v39, %v6995_v46  ;;  %4115 = vmatmul.bf16.gmra.mxu1 %v2886_v57  ;;  %v1889_v46 = vor.u32 %v1888_v48, %v1885_v51  ;;  %v1899_v57 = vor.u32 %v1898_v28, %v7057_v21  ;;  %v2867_v18 = vunpack.c.l.b16 %v1284_v2 }
 0x132   : > { %v4249_v22 = vpop.f32.mrf.mxu3  ;;  %v2868_v39 = vunpack.c.l.b16 %v1294_v15  ;;  %v1904_v58 = vrot.slane %v1902_v7, 5  ;;  %v1298_v0 = vrot.slane %v1296_v62, 4  ;;  %v1301_v23 = vrot.slane %v1299_v11, 5 }
 0x133   : > { %v4250_v16 = vadd.f32 %v4249_v22, %v4161_v24  ;;  %v1890_v59 = vrot.slane %v1889_v46, 4  ;;  %v1900_v24 = vrot.slane %v1899_v57, 4  ;;  %v7084_v47 = vrot.slane %v1305_v35, 5  ;;  %v5592_v57 = vld [vmem:[#allocation2 + $0x90] sm:$0xff] }
 0x134   : > { %v1311_v33 = vrot.slane %v1309_v44, 4  ;;  %v1907_v45 = vshrl.u32 %v1572_v43, 16  ;;  %v1916_v2 = vshll.u32 %v1573_v31, 16  ;;  %v1920_v29 = vshrl.u32 %v1573_v31, 16  ;;  %v5843_v31 = vld [vmem:[%s5991_s27 + $0x78] sm:$0xff]  }
 0x135   : > { %v7078_v48 = vpop.f32.mrf.mxu0  ;;  %v748_v46 = vrot.slane %v6469_v19, 4  ;;  %v7091_v7 = vsel %vm6525_vm13, %v5045_v20, %v1520_v41  ;;  %v1895_v62 = vsel %vm6501_vm10, %v1890_v59, %v7057_v21  ;;  %v1905_v11 = vsel %vm6501_vm10, %v1900_v24, %v1904_v58  ;;  %v1591_v24 = vld [vmem:[#allocation2 + $0xb0] sm:$0x1] }
 0x136   : > { %v4078_v51 = vpop.f32.mrf.mxu1  ;;  %v1302_v35 = vor.u32 %v1301_v23, %v1298_v0  ;;  %v2887_v19 = vpack.c.b16 %v2868_v39, %v2867_v18  ;;  %v1312_v44 = vor.u32 %v1311_v33, %v7084_v47  ;;  %v7108_v21 = vadd.f32 %v7015_v6, %v4250_v16  ;;  %v1380_v23 = vld [vmem:[#allocation2 + $0x9c] sm:$0xe] }
 0x137   : > { %v7081_v32 = vadd.f32 %v4078_v51, %v6880_v17  ;;  %4382 = vmatmul.bf16.gmra.mxu0 %v3094_v49  ;;  %v1910_v17 = vshll.u32 %v1572_v43, 16  ;;  %v1315_v49 = vshll.u32 %v7086_v52, 16  ;;  %v1909_v51 = vrot.slane %v1907_v45, 4 }
 0x138   : > { %v4162_v28 = vpop.f32.mrf.mxu2  ;;  %v7104_v43 = vrot.slane %v1916_v2, 5  ;;  %v3075_v39 = vunpack.c.l.b16 %v1895_v62  ;;  %v1303_v0 = vrot.slane %v1302_v35, 4  ;;  %v5747_v2 = vunpack.c.l.bf16 %v5843_v31 }
 0x139   : > { %v4163_v22 = vadd.f32 %v4162_v28, %v7018_v26  ;;  %v1524_v26 = vsel %vm6525_vm13, %v1522_v34, %v1523_v61  ;;  %v1912_v20 = vrot.slane %v1910_v17, 5  ;;  %v1922_v34 = vrot.slane %v1920_v29, 4  ;;  %v922_v61 = vld [vmem:[#allocation2 + $0xbc] sm:$0x1]  ;;  %v7120_v17 = vld [vmem:[#allocation2 + $0xac] sm:$0xf] }
 0x13a   : > { %v4251_v50 = vpop.f32.mrf.mxu3  ;;  %v2932_v18 = vunpack.c.l.b16 %v1524_v26  ;;  %v3076_v28 = vunpack.c.l.b16 %v1905_v11  ;;  %v923_v33 = vsel %vm6442_vm7, %v748_v46, %v922_v61  ;;  %v1317_v45 = vrot.slane %v1315_v49, 5 }
 0x13b   : > { %v4252_v15 = vadd.f32 %v4251_v50, %v4163_v22  ;;  %v1527_v22 = vrot.slane %v7061_v27, 5  ;;  %v960_v50 = vld [vmem:[#allocation2 + $0xa8] sm:$0xf]  ;;  %v5748_v29 = vunpack.c.h.bf16 %v5843_v31  ;;  %v1913_v26 = vor.u32 %v1912_v20, %v1909_v51  ;;  %924 = vst [vmem:[#allocation2 + $0xbc] sm:$0x1] %v923_v33 }
 0x13c   : > { %v1923_v27 = vor.u32 %v1922_v34, %v7104_v43  ;;  %v1926_v62 = vshll.u32 %v1591_v24, 16  ;;  %v5046_v11 = vrot.slane %v1380_v23, 9  ;;  %v1333_v49 = vshrl.u32 %v7120_v17, 16  ;;  %v5894_v51 = vld [vmem:[%s7782_s1] ss:$0 sm:$0xff] }
 0x13d   : > { %4204 = vmatmul.bf16.gmra.mxu2 %v2950_v53  ;;  %v7110_v59 = vpop.f32.mrf.mxu0  ;;  %v2931_v53 = vunpack.c.l.b16 %v7091_v7  ;;  %v7117_v6 = vadd.f32 %v7044_v8, %v4252_v15  ;;  %v1313_v7 = vrot.slane %v1312_v44, 4  ;;  %v1320_v8 = vshrl.u32 %v960_v50, 16 }
 0x13e   : > { %v7102_v41 = vpop.f32.mrf.mxu1  ;;  %v1323_v15 = vshll.u32 %v960_v50, 16  ;;  %v1529_v35 = vrot.slane %v1527_v22, 4  ;;  %v3095_v61 = vpack.c.b16 %v3076_v28, %v3075_v39  ;;  %v1308_v44 = vsel %vm6501_vm10, %v1303_v0, %v7084_v47 }
 0x13f   : > { %4293 = vmatmul.bf16.gmra.mxu3 %v5592_v57  ;;  %7810 = vst [vmem:[#allocation16_spill] sm:$0xff] %v7117_v6  ;;  %v335_v20 = vmul.f32 %v5894_v51, %v5747_v2  ;;  %v336_v34 = vmul.f32 %v5894_v51, %v5748_v29  ;;  %v1914_v24 = vrot.slane %v1913_v26, 4  ;;  %v1928_v23 = vrot.slane %v1926_v62, 5 }
 0x140   : > { %v4165_v58 = vpop.f32.mrf.mxu2  ;;  %v2951_v39 = vpack.c.b16 %v2932_v18, %v2931_v53  ;;  %v1528_v47 = vsel %vm6525_vm13, %v5046_v11, %v1527_v22  ;;  %v1322_v28 = vrot.slane %v1320_v8, 4  ;;  %v1325_v0 = vrot.slane %v1323_v15, 5  ;;  %v5895_v53 = vld [vmem:[%s7783_s2] ss:$0 sm:$0xff] }
 0x141   : > { %v4166_v16 = vadd.f32 %v4165_v58, %v7047_v54  ;;  %4120 = vmatmul.bf16.gmra.mxu1 %v2887_v19  ;;  %v1530_v54 = vrot.slane %v7086_v52, 5  ;;  %v1329_v19 = vshll.u32 %v7120_v17, 16  ;;  %v1318_v52 = vsel %vm6501_vm10, %v1313_v7, %v1317_v45  ;;  %v1574_v45 = vld [vmem:[#allocation2 + $0xb4] sm:$0xf] }
 0x142   : > { %v4254_v57 = vpop.f32.mrf.mxu3  ;;  %v1924_v58 = vrot.slane %v1923_v27, 4  ;;  %v2869_v50 = vunpack.c.l.b16 %v1308_v44  ;;  %v2870_v26 = vunpack.c.l.b16 %v1318_v52  ;;  %v7145_v27 = vld [vmem:[#allocation2 + $0xb0] sm:$0x1]  ;;  %v371_v18 = vadd.f32 %v5895_v53, %v335_v20 }
 0x143   : > { %v4255_v46 = vadd.f32 %v4254_v57, %v4166_v16  ;;  %v1531_v2 = vsel %vm6525_vm13, %v1529_v35, %v1530_v54  ;;  %v7142_v29 = vrot.slane %v1329_v19, 5  ;;  %v1335_v57 = vrot.slane %v1333_v49, 4  ;;  %v1575_v54 = vld [vmem:[#allocation2 + $0xb8] sm:$0xf] }
 0x144   : > { %v372_v22 = vadd.f32 %v5895_v53, %v336_v34  ;;  %v1919_v11 = vsel %vm6501_vm10, %v1914_v24, %v7104_v43  ;;  %v1929_v8 = vsel %vm6501_vm10, %v1924_v58, %v1928_v23  ;;  %v1326_v35 = vor.u32 %v1325_v0, %v1322_v28 }
 0x145   : > { %v7136_v33 = vpop.f32.mrf.mxu0  ;;  %v1931_v19 = vshrl.u32 %v1574_v45, 16  ;;  %v1934_v49 = vshll.u32 %v1574_v45, 16  ;;  %v2933_v44 = vunpack.c.l.b16 %v1528_v47  ;;  %v2934_v51 = vunpack.c.l.b16 %v1531_v2 }
 0x146   : > { %v7132_v31 = vpop.f32.mrf.mxu1  ;;  %v1336_v20 = vor.u32 %v1335_v57, %v7142_v29  ;;  %v1339_v34 = vshll.u32 %v7145_v27, 16  ;;  %v2888_v43 = vpack.c.b16 %v2870_v26, %v2869_v50  ;;  %v403_v52 = vmax.f32 %v371_v18, 0.0  ;;  %v5669_v57 = vld [vmem:[%s7784_s3 + $0x1c0] sm:$0xff] }
 0x147   : > { %4387 = vmatmul.bf16.gmra.mxu0 %v3095_v61  ;;  %v4082_v61 = vadd.f32 %v7102_v41, %v6664_v30  ;;  %v404_v24 = vmax.f32 %v372_v22, 0.0  ;;  %v7161_v23 = vunpack.c.l.b16 %v1919_v11  ;;  %v7163_v28 = vunpack.c.l.b16 %v1929_v8  ;;  %v5661_v30 = vld [vmem:[%s7784_s3 + $0x180] sm:$0xff]  ;;  %v962_v22 = vld [vmem:[#allocation2 + $0xb4] sm:$0xf]  ;;  %4593 = vmatpush.bf16.msra.mxu3 %v5669_v57 }
 0x148   : > { %v4167_v16 = vpop.f32.mrf.mxu2  ;;  %v1940_v0 = vshll.u32 %v1575_v54, 16  ;;  %v7166_v47 = vadd.f32 %v7078_v48, %v4255_v46  ;;  %v1327_v2 = vrot.slane %v1326_v35, 4  ;;  %v1933_v41 = vrot.slane %v1931_v19, 4  ;;  %4504 = vmatpush.bf16.msra.mxu2 %v5661_v30  ;;  %v1381_v35 = vld [vmem:[#allocation2 + $0xa8] sm:$0xe] }
 0x149   : > { %v4168_v7 = vadd.f32 %v4167_v16, %v7081_v32  ;;  %v5593_v32 = vld [vmem:[#allocation2 + $0x9c] sm:$0xff]  ;;  %v1944_v50 = vshrl.u32 %v1575_v54, 16  ;;  %v1341_v26 = vrot.slane %v1339_v34, 5  ;;  %v489_v48 = vpack.c.bf16 %v403_v52, %v403_v52 }
 0x14a   : > { %v4256_v62 = vpop.f32.mrf.mxu3  ;;  %7811 = vst [vmem:[#allocation17_spill] sm:$0xff] %v7166_v47  ;;  %v7179_v18 = vpack.c.b16 %v2934_v51, %v2933_v44  ;;  %v4084_v8 = vadd.f32 %v7132_v31, %v6687_v63  ;;  %v1534_v54 = vrot.slane %v7120_v17, 5  ;;  %v7186_v19 = vrot.slane %v1940_v0, 5  ;;  %v5653_v44 = vld [vmem:[%s7784_s3 + $0x140] sm:$0xff]  ;;  %v1592_v34 = vld [vmem:[#allocation2 + $0xbc] sm:$0x1] }
 0x14b   : > { %v4257_v15 = vadd.f32 %v4256_v62, %v4168_v7  ;;  %v1337_v7 = vrot.slane %v1336_v20, 4  ;;  %v490_v62 = vpack.c.bf16 %v404_v24, %v404_v24  ;;  %v5677_v63 = vld [vmem:[%s7784_s3 + $0x200] sm:$0xff]  ;;  %v750_v31 = vshrl.u32 %v489_v48, 16  ;;  %4415 = vmatpush.bf16.msra.mxu1 %v5653_v44  ;;  %v5594_v47 = vld [vmem:[#allocation2 + $0xa8] sm:$0xff] }
 0x14c   : > { %v753_v51 = vshll.u32 %v489_v48, 16  ;;  %v1332_v17 = vsel %vm6501_vm10, %v1327_v2, %v7142_v29  ;;  %4682 = vmatpush.bf16.msra.mxu0 %v5677_v63  ;;  %v1347_v52 = vshll.u32 %v962_v22, 16  ;;  %v5047_v30 = vrot.slane %v1381_v35, 9 }
 0x14d   : > { %4209 = vmatmul.bf16.gmra.mxu2 %v2951_v39  ;;  %v7168_v16 = vpop.f32.mrf.mxu0  ;;  %v1936_v39 = vrot.slane %v1934_v49, 5  ;;  %v7177_v46 = vadd.f32 %v7110_v59, %v4257_v15  ;;  %v7188_v59 = vld [vmem:[#allocation2 + $0xb8] sm:$0xf]  ;;  %v1946_v49 = vrot.slane %v1944_v50, 4  ;;  %v1342_v20 = vsel %vm6501_vm10, %v1337_v7, %v1341_v26  ;;  %v925_v26 = vld [vmem:[#allocation2 + $0xc0] sm:$0xf] }
 0x14e   : > { %v7159_v58 = vpop.f32.mrf.mxu1  ;;  %v1353_v24 = vshll.u32 %v7188_v59, 16  ;;  %v1536_v50 = vrot.slane %v1534_v54, 4  ;;  %v1537_v57 = vrot.slane %v7145_v27, 5  ;;  %v1357_v29 = vshrl.u32 %v7188_v59, 16 }
 0x14f   : > { %4298 = vmatmul.bf16.gmra.mxu3 %v5593_v32  ;;  %7812 = vst [vmem:[#allocation18_spill] sm:$0xff] %v7177_v46  ;;  %v3096_v32 = vpack.c.b16 %v7163_v28, %v7161_v23  ;;  %v752_v23 = vrot.slane %v750_v31, 7  ;;  %v758_v28 = vshrl.u32 %v490_v62, 16  ;;  %v761_v44 = vshll.u32 %v490_v62, 16  ;;  %v7216_v62 = vld [vmem:[#allocation2 + $0xbc] sm:$0x1] }
 0x150   : > { %v4170_v45 = vpop.f32.mrf.mxu2  ;;  %v1349_v35 = vrot.slane %v1347_v52, 5  ;;  %v7209_v31 = vrot.slane %v1353_v24, 5  ;;  %v1359_v6 = vrot.slane %v1357_v29, 4  ;;  %v929_v52 = vld [vmem:[#allocation2 + $0xc8] sm:$0x1] }
 0x151   : > { %v4171_v53 = vadd.f32 %v4170_v45, %v4082_v61  ;;  %4125 = vmatmul.bf16.gmra.mxu1 %v2888_v43  ;;  %v1937_v61 = vor.u32 %v1936_v39, %v1933_v41  ;;  %v1344_v43 = vshrl.u32 %v962_v22, 16  ;;  %v2871_v45 = vunpack.c.l.b16 %v1332_v17 }
 0x152   : > { %v4259_v11 = vpop.f32.mrf.mxu3  ;;  %v1947_v41 = vor.u32 %v1946_v49, %v7186_v19  ;;  %v1950_v39 = vshll.u32 %v1592_v34, 16  ;;  %v755_v7 = vor.u32 %v753_v51, %v752_v23  ;;  %v760_v27 = vrot.slane %v758_v28, 7 }
 0x153   : > { %v4260_v15 = vadd.f32 %v4259_v11, %v4171_v53  ;;  %v2872_v53 = vunpack.c.l.b16 %v1342_v20  ;;  %v1938_v22 = vrot.slane %v1937_v61, 4  ;;  %v1346_v11 = vrot.slane %v1344_v43, 4 }
 0x154   : > { %v756_v17 = vrot.slane %v752_v23, 4  ;;  %v926_v49 = vsel %vm6055_vm5, %v755_v7, %v925_v26  ;;  %v1948_v34 = vrot.slane %v1947_v41, 4  ;;  %v1952_v61 = vrot.slane %v1950_v39, 5 }
 0x155   : > { %v7206_v2 = vpop.f32.mrf.mxu0  ;;  %v7214_v51 = vadd.f32 %v7136_v33, %v4260_v15  ;;  %927 = vst [vmem:[#allocation2 + $0xc0] sm:$0xf] %v926_v49  ;;  %v763_v43 = vor.u32 %v761_v44, %v760_v27  ;;  %v2889_v42 = vpack.c.b16 %v2872_v53, %v2871_v45  ;;  %v1350_v24 = vor.u32 %v1349_v35, %v1346_v11 }
 0x156   : > { %v7202_v0 = vpop.f32.mrf.mxu1  ;;  %v765_v33 = vrot.slane %v760_v27, 4  ;;  %v1943_v23 = vsel %vm6501_vm10, %v1938_v22, %v7186_v19  ;;  %v1363_v28 = vshll.u32 %v7216_v62, 16  ;;  %v2047_v44 = vrot.slane %v5897_v10, 5 }
 0x157   : > { %4392 = vmatmul.bf16.gmra.mxu0 %v3096_v32  ;;  %v1538_v32 = vsel %vm6525_vm13, %v1536_v50, %v1537_v57  ;;  %v5896_v57 = vld [vmem:[#allocation2 + $0x10] sm:$0xf]  ;;  %v1351_v39 = vrot.slane %v1350_v24, 4 }
 0x158   : > { %v4172_v48 = vpop.f32.mrf.mxu2  ;;  %v930_v19 = vsel %vm6442_vm7, %v765_v33, %v929_v52  ;;  %v2936_v41 = vunpack.c.l.b16 %v1538_v32  ;;  %v1365_v26 = vrot.slane %v1363_v28, 5  ;;  %v1541_v28 = vrot.slane %v7188_v59, 5 }
 0x159   : > { %v4173_v63 = vadd.f32 %v4172_v48, %v4084_v8  ;;  %v1535_v8 = vsel %vm6525_vm13, %v5047_v30, %v1534_v54  ;;  %v1360_v54 = vor.u32 %v1359_v6, %v7209_v31  ;;  %v764_v30 = vsel %vm6044_vm4, %v756_v17, %v763_v43  ;;  %931 = vst [vmem:[#allocation2 + $0xc8] sm:$0x1] %v930_v19 }
 0x15a   : > { %v4261_v46 = vpop.f32.mrf.mxu3  ;;  %928 = vst [vmem:[#allocation2 + $0xc4] sm:$0xf] %v764_v30  ;;  %v2044_v6 = vrot.slane %v5896_v57, 5  ;;  %v2935_v38 = vunpack.c.l.b16 %v1535_v8  ;;  %v4089_v43 = vadd.f32 %v7202_v0, %v6744_v37  ;;  %v1382_v57 = vld [vmem:[#allocation2 + $0xb4] sm:$0xe] }
 0x15b   : > { %v4262_v20 = vadd.f32 %v4261_v46, %v4173_v63  ;;  %v1361_v7 = vrot.slane %v1360_v54, 4  ;;  %v1356_v63 = vsel %vm6501_vm10, %v1351_v39, %v7209_v31 }
 0x15c   : > { %v1576_v48 = vld [vmem:[#allocation2 + $0xc0] sm:$0xf]  ;;  %v2046_v49 = vrot.slane %v2044_v6, 4  ;;  %v2873_v54 = vunpack.c.l.b16 %v1356_v63 }
 0x15d   : > { %4214 = vmatmul.bf16.gmra.mxu2 %v7179_v18  ;;  %v7224_v46 = vadd.f32 %v7168_v16, %v4262_v20  ;;  %v4087_v18 = vadd.f32 %v7159_v58, %v6710_v36  ;;  %v7237_v50 = vpop.f32.mrf.mxu0  ;;  %v1953_v16 = vsel %vm6501_vm10, %v1948_v34, %v1952_v61  ;;  %v3079_v58 = vunpack.c.l.b16 %v1943_v23  ;;  %v1978_v23 = vld [vmem:[#allocation2 + $0xc] sm:$0xe] }
 0x15e   : > { %v7226_v15 = vpop.f32.mrf.mxu1  ;;  %v1955_v22 = vshrl.u32 %v1576_v48, 16  ;;  %v1958_v11 = vshll.u32 %v1576_v48, 16  ;;  %v2953_v20 = vpack.c.b16 %v2936_v41, %v2935_v38  ;;  %v1366_v8 = vsel %vm6501_vm10, %v1361_v7, %v1365_v26 }
 0x15f   : > { %4303 = vmatmul.bf16.gmra.mxu3 %v5594_v47  ;;  %v3080_v47 = vunpack.c.l.b16 %v1953_v16  ;;  %v2874_v19 = vunpack.c.l.b16 %v1366_v8  ;;  %v2048_v41 = vsel %vm6525_vm13, %v2046_v49, %v2047_v44  ;;  %v5048_v7 = vrot.slane %v1382_v57, 9 }
 0x160   : > { %v4175_v29 = vpop.f32.mrf.mxu2  ;;  %v1957_v35 = vrot.slane %v1955_v22, 4  ;;  %v1960_v27 = vrot.slane %v1958_v11, 5  ;;  %v3116_v26 = vunpack.c.l.b16 %v2048_v41  ;;  %v1544_v22 = vrot.slane %v7216_v62, 5  ;;  %v2156_v62 = vld [vmem:[#allocation2 + $0x1c] sm:$0xf] }
 0x161   : > { %v4176_v45 = vadd.f32 %v4175_v29, %v4087_v18  ;;  %4130 = vmatmul.bf16.gmra.mxu1 %v2889_v42  ;;  %v3097_v34 = vpack.c.b16 %v3080_v47, %v3079_v58  ;;  %v1577_v32 = vld [vmem:[#allocation2 + $0xc4] sm:$0xf]  ;;  %v1593_v42 = vld [vmem:[#allocation2 + $0xc8] sm:$0x1]  ;;  %v5049_v18 = vrot.slane %v1978_v23, 9  ;;  %v2890_v48 = vpack.c.b16 %v2874_v19, %v2873_v54 }
 0x162   : > { %v4264_v36 = vpop.f32.mrf.mxu3  ;;  %v1961_v31 = vor.u32 %v1960_v27, %v1957_v35  ;;  %v1964_v24 = vshll.u32 %v1577_v32, 16  ;;  %v1968_v33 = vshrl.u32 %v1577_v32, 16  ;;  %v1974_v30 = vshll.u32 %v1593_v42, 16 }
 0x163   : > { %v4265_v53 = vadd.f32 %v4264_v36, %v4176_v45  ;;  %v2045_v0 = vsel %vm6525_vm13, %v5049_v18, %v2044_v6  ;;  %v5595_v36 = vld [vmem:[#allocation2 + $0xb4] sm:$0xff]  ;;  %v4092_v44 = vadd.f32 %v7226_v15, %v6767_v12  ;;  %v1542_v8 = vsel %vm6525_vm13, %v5048_v7, %v1541_v28 }
 0x164   : > { %v1966_v29 = vrot.slane %v1964_v24, 5  ;;  %v1970_v45 = vrot.slane %v1968_v33, 4  ;;  %v1962_v37 = vrot.slane %v1961_v31, 4  ;;  %v1976_v59 = vrot.slane %v1974_v30, 5  ;;  %v2155_v6 = vld [vmem:[#allocation2 + $0x18] sm:$0xf] }
 0x165   : > { %v7247_v17 = vadd.f32 %v7206_v2, %v4265_v53  ;;  %v4358_v52 = vpop.f32.mrf.mxu0  ;;  %v3115_v47 = vunpack.c.l.b16 %v2045_v0  ;;  %v1543_v53 = vrot.slane %v1541_v28, 4  ;;  %v2207_v12 = vshll.u32 %v2155_v6, 16 }
 0x166   : > { %v7249_v61 = vpop.f32.mrf.mxu1  ;;  %v1971_v58 = vor.u32 %v1970_v45, %v1966_v29  ;;  %v1967_v49 = vsel %vm6501_vm10, %v1962_v37, %v1966_v29  ;;  %v2213_v24 = vshll.u32 %v2156_v62, 16  ;;  %v2217_v33 = vshrl.u32 %v2156_v62, 16  ;;  %v2587_v37 = vld [vmem:[#allocation2 + $0x18] sm:$0xe] }
 0x167   : > { %4397 = vmatmul.bf16.gmra.mxu0 %v3097_v34  ;;  %v7261_v63 = vpack.c.b16 %v3116_v26, %v3115_v47  ;;  %v3081_v42 = vunpack.c.l.b16 %v1967_v49  ;;  %v2209_v19 = vrot.slane %v2207_v12, 5  ;;  %v4094_v45 = vadd.f32 %v7249_v61, %v6798_v25  ;;  %v2157_v25 = vld [vmem:[#allocation2 + $0x24] sm:$0xf]  ;;  %v7285_v61 = vld [vmem:[#allocation2 + $0x28] sm:$0xf] }
 0x168   : > { %v4177_v2 = vpop.f32.mrf.mxu2  ;;  %v1972_v11 = vrot.slane %v1971_v58, 4  ;;  %v7280_v57 = vrot.slane %v2213_v24, 5  ;;  %v2219_v29 = vrot.slane %v2217_v33, 4  ;;  %v2653_v0 = vrot.slane %v2156_v62, 5  ;;  %v5898_v62 = vld [vmem:[#allocation2 + $0x1c] sm:$0xf] }
 0x169   : > { %v4178_v16 = vadd.f32 %v4177_v2, %v4089_v43  ;;  %v2204_v43 = vshrl.u32 %v2155_v6, 16  ;;  %v2937_v2 = vunpack.c.l.b16 %v1542_v8  ;;  %v5065_v7 = vrot.slane %v2587_v37, 9 }
 0x16a   : > { %v4266_v38 = vpop.f32.mrf.mxu3  ;;  %v2220_v47 = vor.u32 %v2219_v29, %v7280_v57  ;;  %v2237_v24 = vshll.u32 %v7285_v61, 16  ;;  %v2241_v33 = vshrl.u32 %v7285_v61, 16 }
 0x16b   : > { %v4267_v39 = vadd.f32 %v4266_v38, %v4178_v16  ;;  %v2206_v30 = vrot.slane %v2204_v43, 4 }
 0x16d   : > { %4219 = vmatmul.bf16.gmra.mxu2 %v2953_v20  ;;  %v7264_v35 = vadd.f32 %v7237_v50, %v4267_v39  ;;  %v4360_v27 = vpop.f32.mrf.mxu0  ;;  %v1977_v20 = vsel %vm6501_vm10, %v1972_v11, %v1976_v59  ;;  %v1545_v50 = vsel %vm6525_vm13, %v1543_v53, %v1544_v22  ;;  %v2187_v39 = vld [vmem:[#allocation2 + $0x20] sm:$0x1]  ;;  %v2655_v22 = vrot.slane %v2653_v0, 4 }
 0x16e   : > { %v4096_v10 = vpop.f32.mrf.mxu1  ;;  %v3082_v31 = vunpack.c.l.b16 %v1977_v20  ;;  %v2938_v54 = vunpack.c.l.b16 %v1545_v50  ;;  %v2223_v53 = vshll.u32 %v2187_v39, 16  ;;  %v2656_v11 = vrot.slane %v2187_v39, 5 }
 0x16f   : > { %4308 = vmatmul.bf16.gmra.mxu3 %v5595_v36  ;;  %v2654_v20 = vsel %vm6525_vm13, %v5065_v7, %v2653_v0  ;;  %v4097_v8 = vadd.f32 %v4096_v10, %v6820_v55  ;;  %v2221_v50 = vrot.slane %v2220_v47, 4  ;;  %v7304_v39 = vrot.slane %v2237_v24, 5  ;;  %v2588_v7 = vld [vmem:[#allocation2 + $0x24] sm:$0xe] }
 0x170   : > { %v4180_v34 = vpop.f32.mrf.mxu2  ;;  %v3098_v16 = vpack.c.b16 %v3082_v31, %v3081_v42  ;;  %v2954_v58 = vpack.c.b16 %v2938_v54, %v2937_v2  ;;  %v2225_v43 = vrot.slane %v2223_v53, 5  ;;  %v2657_v12 = vsel %vm6525_vm13, %v2655_v22, %v2656_v11 }
 0x171   : > { %v4181_v32 = vadd.f32 %v4180_v34, %v4092_v44  ;;  %4135 = vmatmul.bf16.gmra.mxu1 %v2890_v48  ;;  %v5596_v48 = vld [vmem:[#allocation2 + $0xc0] sm:$0xff]  ;;  %v2051_v34 = vrot.slane %v5898_v62, 5  ;;  %v2228_v42 = vshrl.u32 %v2157_v25, 16  ;;  %v2231_v31 = vshll.u32 %v2157_v25, 16 }
 0x172   : > { %v4269_v15 = vpop.f32.mrf.mxu3  ;;  %v3323_v2 = vunpack.c.l.b16 %v2654_v20  ;;  %v3324_v10 = vunpack.c.l.b16 %v2657_v12  ;;  %v2226_v37 = vsel %vm6501_vm10, %v2221_v50, %v2225_v43  ;;  %v5066_v43 = vrot.slane %v2588_v7, 9  ;;  %v5901_v7 = vld [vmem:[#allocation2 + $0x2c] sm:$0x1] }
 0x173   : > { %v4270_v23 = vadd.f32 %v4269_v15, %v4181_v32  ;;  %v1979_v15 = vld [vmem:[#allocation2 + $0x18] sm:$0xe]  ;;  %v2230_v0 = vrot.slane %v2228_v42, 4  ;;  %v3260_v11 = vunpack.c.l.b16 %v2226_v37 }
 0x174   : > { %v5050_v54 = vrot.slane %v1979_v15, 9 }
 0x175   : > { %v7276_v18 = vadd.f32 %v4358_v52, %v4270_v23  ;;  %v4363_v38 = vpop.f32.mrf.mxu0  ;;  %v2210_v52 = vor.u32 %v2209_v19, %v2206_v30  ;;  %v2053_v30 = vrot.slane %v2051_v34, 4 }
 0x176   : > { %v7278_v28 = vpop.f32.mrf.mxu1  ;;  %v2052_v47 = vsel %vm6525_vm13, %v5050_v54, %v2051_v34 }
 0x177   : > { %4402 = vmatmul.bf16.gmra.mxu0 %v3098_v16  ;;  %v2211_v49 = vrot.slane %v2210_v52, 4  ;;  %v5899_v16 = vld [vmem:[#allocation2 + $0x20] sm:$0x1]  ;;  %v3117_v34 = vunpack.c.l.b16 %v2052_v47 }
 0x178   : > { %v4182_v41 = vpop.f32.mrf.mxu2  ;;  %v2054_v19 = vrot.slane %v5899_v16, 5 }
 0x179   : > { %v4183_v36 = vadd.f32 %v4182_v41, %v4094_v45  ;;  %v2216_v45 = vsel %vm6501_vm10, %v2211_v49, %v7280_v57  ;;  %v2233_v41 = vrot.slane %v2231_v31, 5 }
 0x17a   : > { %v4271_v59 = vpop.f32.mrf.mxu3  ;;  %v2055_v57 = vsel %vm6525_vm13, %v2053_v30, %v2054_v19  ;;  %v3259_v22 = vunpack.c.l.b16 %v2216_v45  ;;  %v2159_v30 = vld [vmem:[#allocation2 + $0x30] sm:$0xf]  ;;  %v2160_v45 = vld [vmem:[#allocation2 + $0x34] sm:$0xf] }
 0x17b   : > { %v4272_v26 = vadd.f32 %v4271_v59, %v4183_v36  ;;  %v2188_v36 = vld [vmem:[#allocation2 + $0x2c] sm:$0x1]  ;;  %v3355_v59 = vpack.c.b16 %v3324_v10, %v3323_v2  ;;  %v2234_v25 = vor.u32 %v2233_v41, %v2230_v0  ;;  %v3118_v50 = vunpack.c.l.b16 %v2055_v57  ;;  %v5900_v10 = vld [vmem:[#allocation2 + $0x28] sm:$0xf] }
 0x17c   : > { %v2247_v20 = vshll.u32 %v2188_v36, 16  ;;  %v3291_v42 = vpack.c.b16 %v3260_v11, %v3259_v22  ;;  %v2058_v54 = vrot.slane %v5900_v10, 5  ;;  %v2255_v47 = vshll.u32 %v2159_v30, 16 }
 0x17d   : > { %4224 = vmatmul.bf16.gmra.mxu2 %v2954_v58  ;;  %v7287_v6 = vadd.f32 %v4360_v27, %v4272_v26  ;;  %v4365_v32 = vpop.f32.mrf.mxu0  ;;  %v2660_v26 = vrot.slane %v7285_v61, 5  ;;  %v2663_v61 = vrot.slane %v2188_v36, 5  ;;  %v3148_v24 = vpack.c.b16 %v3118_v50, %v3117_v34 }
 0x17e   : > { %v7289_v44 = vpop.f32.mrf.mxu1  ;;  %v2249_v31 = vrot.slane %v2247_v20, 5  ;;  %v2265_v11 = vshrl.u32 %v2160_v45, 16  ;;  %v2257_v50 = vrot.slane %v2255_v47, 5  ;;  %v5902_v47 = vld [vmem:[#allocation2 + $0x34] sm:$0xf] }
 0x17f   : > { %4313 = vmatmul.bf16.gmra.mxu3 %v5596_v48  ;;  %v4099_v48 = vadd.f32 %v7278_v28, %v6854_v3  ;;  %v2662_v15 = vrot.slane %v2660_v26, 4  ;;  %v2235_v3 = vrot.slane %v2234_v25, 4  ;;  %v4102_v16 = vadd.f32 %v7289_v44, %v6722_v1 }
 0x180   : > { %v4185_v27 = vpop.f32.mrf.mxu2  ;;  %v2060_v44 = vrot.slane %v2058_v54, 4 }
 0x181   : > { %v4186_v23 = vadd.f32 %v4185_v27, %v4097_v8  ;;  %4416 = vmatmul.bf16.vlgmr.msra.gmra.mxu1 %v7261_v63  ;;  %v2243_v63 = vrot.slane %v2241_v33, 4  ;;  %v5597_v8 = vld [vmem:[#allocation2 + $0x18] sm:$0xff]  ;;  %v2661_v33 = vsel %vm6525_vm13, %v5066_v43, %v2660_v26  ;;  %v2061_v26 = vrot.slane %v5901_v7, 5 }
 0x182   : > { %v4274_v55 = vpop.f32.mrf.mxu3  ;;  %v3325_v41 = vunpack.c.l.b16 %v2661_v33 }
 0x183   : > { %v4275_v29 = vadd.f32 %v4274_v55, %v4186_v23  ;;  %v2244_v49 = vor.u32 %v2243_v63, %v7304_v39  ;;  %v2664_v55 = vsel %vm6525_vm13, %v2662_v15, %v2663_v61  ;;  %v2062_v34 = vsel %vm6525_vm13, %v2060_v44, %v2061_v26  ;;  %v2189_v61 = vld [vmem:[#allocation2 + $0x38] sm:$0x1] }
 0x184   : > { %v3326_v36 = vunpack.c.l.b16 %v2664_v55  ;;  %v3120_v33 = vunpack.c.l.b16 %v2062_v34 }
 0x185   : > { %v7306_v58 = vadd.f32 %v4363_v38, %v4275_v29  ;;  %v4368_v53 = vpop.f32.mrf.mxu0  ;;  %v2245_v28 = vrot.slane %v2244_v49, 4  ;;  %v1980_v29 = vld [vmem:[#allocation2 + $0x24] sm:$0xe] }
 0x186   : > { %v7308_v52 = vpop.f32.mrf.mxu1  ;;  %v5051_v1 = vrot.slane %v1980_v29, 9 }
 0x187   : > { %4683 = vmatmul.bf16.vlgmr.msra.gmra.mxu0 %v3355_v59  ;;  %v2250_v0 = vsel %vm6501_vm10, %v2245_v28, %v2249_v31  ;;  %v2252_v59 = vshrl.u32 %v2159_v30, 16  ;;  %v5598_v31 = vld [vmem:[#allocation2 + $0x24] sm:$0xff]  ;;  %v2271_v30 = vshll.u32 %v2189_v61, 16 }
 0x188   : > { %v4187_v38 = vpop.f32.mrf.mxu2  ;;  %v3262_v25 = vunpack.c.l.b16 %v2250_v0  ;;  %v2161_v0 = vld [vmem:[#allocation2 + $0x3c] sm:$0xf] }
 0x189   : > { %v4188_v62 = vadd.f32 %v4187_v38, %v4099_v48  ;;  %v2261_v48 = vshll.u32 %v2160_v45, 16  ;;  %v2254_v49 = vrot.slane %v2252_v59, 4  ;;  %v2273_v26 = vrot.slane %v2271_v30, 5 }
 0x18a   : > { %v4276_v12 = vpop.f32.mrf.mxu3 }
 0x18b   : > { %v4277_v27 = vadd.f32 %v4276_v12, %v4188_v62  ;;  %v7341_v43 = vrot.slane %v2261_v48, 5  ;;  %v4104_v12 = vadd.f32 %v7308_v52, %v6754_v40  ;;  %v2670_v52 = vrot.slane %v2189_v61, 5 }
 0x18d   : > { %4505 = vmatmul.bf16.vlgmr.msra.gmra.mxu2 %v5597_v8  ;;  %v7320_v23 = vadd.f32 %v4365_v32, %v4277_v27  ;;  %v4370_v19 = vpop.f32.mrf.mxu0  ;;  %v2240_v32 = vsel %vm6501_vm10, %v2235_v3, %v7304_v39  ;;  %v3356_v39 = vpack.c.b16 %v3326_v36, %v3325_v41  ;;  %v2059_v8 = vsel %vm6525_vm13, %v5051_v1, %v2058_v54 }
 0x18e   : > { %v7322_v2 = vpop.f32.mrf.mxu1  ;;  %v3261_v38 = vunpack.c.l.b16 %v2240_v32  ;;  %v2267_v27 = vrot.slane %v2265_v11, 4  ;;  %v2258_v54 = vor.u32 %v2257_v50, %v2254_v49  ;;  %v2276_v11 = vshrl.u32 %v2161_v0, 16 }
 0x18f   : > { %4594 = vmatmul.bf16.vlgmr.msra.gmra.mxu3 %v3291_v42  ;;  %v2589_v42 = vld [vmem:[#allocation2 + $0x30] sm:$0xe]  ;;  %v4107_v1 = vadd.f32 %v7322_v2, %v6776_v56 }
 0x190   : > { %v4190_v37 = vpop.f32.mrf.mxu2  ;;  %v3292_v10 = vpack.c.b16 %v3262_v25, %v3261_v38  ;;  %v2259_v36 = vrot.slane %v2258_v54, 4  ;;  %v2279_v38 = vshll.u32 %v2161_v0, 16 }
 0x191   : > { %v4191_v63 = vadd.f32 %v4190_v37, %v4102_v16  ;;  %4421 = vmatmul.bf16.gmra.mxu1 %v3148_v24  ;;  %v3119_v24 = vunpack.c.l.b16 %v2059_v8  ;;  %v5067_v16 = vrot.slane %v2589_v42, 9  ;;  %v2268_v37 = vor.u32 %v2267_v27, %v7341_v43 }
 0x192   : > { %v4279_v57 = vpop.f32.mrf.mxu3  ;;  %v2264_v42 = vsel %vm6501_vm10, %v2259_v36, %v7341_v43 }
 0x193   : > { %v4280_v22 = vadd.f32 %v4279_v57, %v4191_v63  ;;  %v3149_v32 = vpack.c.b16 %v3120_v33, %v3119_v24  ;;  %v2065_v57 = vrot.slane %v5902_v47, 5  ;;  %v2269_v7 = vrot.slane %v2268_v37, 4  ;;  %v2190_v33 = vld [vmem:[#allocation2 + $0x44] sm:$0x1] }
 0x195   : > { %v7333_v20 = vadd.f32 %v4368_v53, %v4280_v22  ;;  %v4373_v15 = vpop.f32.mrf.mxu0  ;;  %v2667_v53 = vrot.slane %v2160_v45, 5  ;;  %v7346_v45 = vld [vmem:[#allocation2 + $0x40] sm:$0xf]  ;;  %v2067_v50 = vrot.slane %v2065_v57, 4 }
 0x196   : > { %v7335_v62 = vpop.f32.mrf.mxu1  ;;  %v2285_v25 = vshll.u32 %v7346_v45, 16 }
 0x197   : > { %4688 = vmatmul.bf16.gmra.mxu0 %v3356_v39  ;;  %v2669_v40 = vrot.slane %v2667_v53, 4  ;;  %v2668_v59 = vsel %vm6525_vm13, %v5067_v16, %v2667_v53  ;;  %v2289_v39 = vshrl.u32 %v7346_v45, 16  ;;  %v2274_v53 = vsel %vm6501_vm10, %v2269_v7, %v2273_v26  ;;  %v2590_v16 = vld [vmem:[#allocation2 + $0x3c] sm:$0xe] }
 0x198   : > { %v4192_v3 = vpop.f32.mrf.mxu2  ;;  %v3327_v8 = vunpack.c.l.b16 %v2668_v59  ;;  %v4109_v37 = vadd.f32 %v7335_v62, %v6801_v9  ;;  %v2295_v59 = vshll.u32 %v2190_v33, 16  ;;  %v5068_v26 = vrot.slane %v2590_v16, 9 }
 0x199   : > { %v4193_v28 = vadd.f32 %v4192_v3, %v4104_v12  ;;  %v2671_v48 = vsel %vm6525_vm13, %v2669_v40, %v2670_v52  ;;  %v5903_v12 = vld [vmem:[#allocation2 + $0x38] sm:$0x1]  ;;  %v2278_v3 = vrot.slane %v2276_v11, 4  ;;  %v2291_v24 = vrot.slane %v2289_v39, 4 }
 0x19a   : > { %v4281_v55 = vpop.f32.mrf.mxu3  ;;  %v3328_v56 = vunpack.c.l.b16 %v2671_v48  ;;  %v2068_v61 = vrot.slane %v5903_v12, 5  ;;  %v3263_v52 = vunpack.c.l.b16 %v2264_v42  ;;  %v7813_v12 = vld [vmem:[#allocation7_spill] sm:$0xff] }
 0x19b   : > { %v4282_v29 = vadd.f32 %v4281_v55, %v4193_v28  ;;  %v2281_v28 = vrot.slane %v2279_v38, 5  ;;  %v2297_v38 = vrot.slane %v2295_v59, 5  ;;  %v1982_v42 = vld [vmem:[#allocation2 + $0x3c] sm:$0xe] }
 0x19c   : > { %v2069_v43 = vsel %vm6525_vm13, %v2067_v50, %v2068_v61  ;;  %v2163_v50 = vld [vmem:[#allocation2 + $0x48] sm:$0xf] }
 0x19d   : > { %4510 = vmatmul.bf16.gmra.mxu2 %v5598_v31  ;;  %v7348_v41 = vadd.f32 %v4370_v19, %v4282_v29  ;;  %v4375_v44 = vpop.f32.mrf.mxu0  ;;  %v1981_v19 = vld [vmem:[#allocation2 + $0x30] sm:$0xe]  ;;  %v7365_v31 = vrot.slane %v2285_v25, 5  ;;  %v2674_v29 = vrot.slane %v7346_v45, 5  ;;  %v2282_v0 = vor.u32 %v2281_v28, %v2278_v3 }
 0x19e   : > { %v7350_v63 = vpop.f32.mrf.mxu1  ;;  %v5052_v2 = vrot.slane %v1981_v19, 9  ;;  %v3122_v7 = vunpack.c.l.b16 %v2069_v43  ;;  %v2677_v45 = vrot.slane %v2190_v33, 5  ;;  %v2303_v43 = vshll.u32 %v2163_v50, 16 }
 0x19f   : > { %4599 = vmatmul.bf16.gmra.mxu3 %v3292_v10  ;;  %v3357_v10 = vpack.c.b16 %v3328_v56, %v3327_v8  ;;  %v2292_v36 = vor.u32 %v2291_v24, %v7365_v31  ;;  %v2676_v19 = vrot.slane %v2674_v29, 4  ;;  %v2283_v9 = vrot.slane %v2282_v0, 4  ;;  %v5904_v56 = vld [vmem:[#allocation2 + $0x40] sm:$0xf] }
 0x1a0   : > { %v4195_v22 = vpop.f32.mrf.mxu2  ;;  %v2066_v30 = vsel %vm6525_vm13, %v5052_v2, %v2065_v57  ;;  %v2675_v39 = vsel %vm6525_vm13, %v5068_v26, %v2674_v29  ;;  %v2072_v2 = vrot.slane %v5904_v56, 5  ;;  %v4112_v61 = vadd.f32 %v7350_v63, %v7813_v12 }
 0x1a1   : > { %v4196_v49 = vadd.f32 %v4195_v22, %v4107_v1  ;;  %4426 = vmatmul.bf16.gmra.mxu1 %v3149_v32  ;;  %v3264_v32 = vunpack.c.l.b16 %v2274_v53  ;;  %v5599_v1 = vld [vmem:[#allocation2 + $0x30] sm:$0xff]  ;;  %v3121_v57 = vunpack.c.l.b16 %v2066_v30  ;;  %v2293_v62 = vrot.slane %v2292_v36, 4  ;;  %v2164_v53 = vld [vmem:[#allocation2 + $0x4c] sm:$0xf] }
 0x1a2   : > { %v4284_v34 = vpop.f32.mrf.mxu3  ;;  %v3329_v24 = vunpack.c.l.b16 %v2675_v39  ;;  %v2300_v30 = vshrl.u32 %v2163_v50, 16  ;;  %v5053_v63 = vrot.slane %v1982_v42, 9  ;;  %v2074_v29 = vrot.slane %v2072_v2, 4 }
 0x1a3   : > { %v4285_v27 = vadd.f32 %v4284_v34, %v4196_v49  ;;  %v3293_v11 = vpack.c.b16 %v3264_v32, %v3263_v52  ;;  %v3150_v25 = vpack.c.b16 %v3122_v7, %v3121_v57  ;;  %v2678_v34 = vsel %vm6525_vm13, %v2676_v19, %v2677_v45  ;;  %v7814_v45 = vld [vmem:[#allocation9_spill] sm:$0xff] }
 0x1a4   : > { %v2298_v28 = vsel %vm6501_vm10, %v2293_v62, %v2297_v38  ;;  %v2309_v32 = vshll.u32 %v2164_v53, 16  ;;  %v2313_v0 = vshrl.u32 %v2164_v53, 16  ;;  %v2073_v7 = vsel %vm6525_vm13, %v5053_v63, %v2072_v2  ;;  %v2591_v38 = vld [vmem:[#allocation2 + $0x48] sm:$0xe] }
 0x1a5   : > { %v7367_v55 = vadd.f32 %v4373_v15, %v4285_v27  ;;  %v4378_v40 = vpop.f32.mrf.mxu0  ;;  %v3266_v59 = vunpack.c.l.b16 %v2298_v28  ;;  %v3123_v56 = vunpack.c.l.b16 %v2073_v7 }
 0x1a6   : > { %v7369_v54 = vpop.f32.mrf.mxu1  ;;  %v7402_v19 = vrot.slane %v2309_v32, 5  ;;  %v2315_v62 = vrot.slane %v2313_v0, 4 }
 0x1a7   : > { %4693 = vmatmul.bf16.gmra.mxu0 %v3357_v10  ;;  %v3330_v10 = vunpack.c.l.b16 %v2678_v34  ;;  %v5600_v34 = vld [vmem:[#allocation2 + $0x3c] sm:$0xff] }
 0x1a8   : > { %v4197_v15 = vpop.f32.mrf.mxu2  ;;  %v2316_v28 = vor.u32 %v2315_v62, %v7402_v19 }
 0x1a9   : > { %v4198_v47 = vadd.f32 %v4197_v15, %v4109_v37  ;;  %v5905_v37 = vld [vmem:[#allocation2 + $0x44] sm:$0x1] }
 0x1aa   : > { %v4286_v48 = vpop.f32.mrf.mxu3  ;;  %v2075_v52 = vrot.slane %v5905_v37, 5  ;;  %v2317_v0 = vrot.slane %v2316_v28, 4 }
 0x1ab   : > { %v4287_v22 = vadd.f32 %v4286_v48, %v4198_v47  ;;  %v2302_v47 = vrot.slane %v2300_v30, 4  ;;  %v2305_v48 = vrot.slane %v2303_v43, 5 }
 0x1ac   : > { %v2076_v26 = vsel %vm6525_vm13, %v2074_v29, %v2075_v52  ;;  %v5906_v29 = vld [vmem:[#allocation2 + $0x4c] sm:$0xf]  ;;  %v7815_v52 = vld [vmem:[#allocation11_spill] sm:$0xff] }
 0x1ad   : > { %4515 = vmatmul.bf16.gmra.mxu2 %v5599_v1  ;;  %v7381_v49 = vadd.f32 %v4375_v44, %v4287_v22  ;;  %v4380_v27 = vpop.f32.mrf.mxu0  ;;  %v2288_v44 = vsel %vm6501_vm10, %v2283_v9, %v7365_v31  ;;  %v3358_v31 = vpack.c.b16 %v3330_v10, %v3329_v24  ;;  %v4114_v22 = vadd.f32 %v7369_v54, %v7814_v45  ;;  %v2191_v9 = vld [vmem:[#allocation2 + $0x50] sm:$0x1]  ;;  %v2165_v10 = vld [vmem:[#allocation2 + $0x54] sm:$0xf] }
 0x1ae   : > { %v7383_v8 = vpop.f32.mrf.mxu1  ;;  %v3265_v36 = vunpack.c.l.b16 %v2288_v44  ;;  %v3124_v50 = vunpack.c.l.b16 %v2076_v26  ;;  %v2319_v42 = vshll.u32 %v2191_v9, 16  ;;  %v2684_v24 = vrot.slane %v2191_v9, 5 }
 0x1af   : > { %4604 = vmatmul.bf16.gmra.mxu3 %v3293_v11  ;;  %v2079_v37 = vrot.slane %v5906_v29, 5  ;;  %v4117_v32 = vadd.f32 %v7383_v8, %v7815_v52  ;;  %v2327_v7 = vshll.u32 %v2165_v10, 16 }
 0x1b0   : > { %v4200_v3 = vpop.f32.mrf.mxu2  ;;  %v3294_v12 = vpack.c.b16 %v3266_v59, %v3265_v36  ;;  %v2321_v36 = vrot.slane %v2319_v42, 5  ;;  %v2192_v42 = vld [vmem:[#allocation2 + $0x5c] sm:$0x1] }
 0x1b1   : > { %v4201_v33 = vadd.f32 %v4200_v3, %v4112_v61  ;;  %4431 = vmatmul.bf16.gmra.mxu1 %v3150_v25  ;;  %v2306_v61 = vor.u32 %v2305_v48, %v2302_v47  ;;  %v5069_v3 = vrot.slane %v2591_v38, 9  ;;  %v2324_v47 = vshrl.u32 %v2165_v10, 16  ;;  %v7816_v10 = vld [vmem:[#allocation13_spill] sm:$0xff] }
 0x1b2   : > { %v4289_v16 = vpop.f32.mrf.mxu3  ;;  %v2081_v38 = vrot.slane %v2079_v37, 4 }
 0x1b3   : > { %v4290_v15 = vadd.f32 %v4289_v16, %v4201_v33  ;;  %v3151_v33 = vpack.c.b16 %v3124_v50, %v3123_v56  ;;  %v2307_v16 = vrot.slane %v2306_v61, 4  ;;  %v2322_v56 = vsel %vm6501_vm10, %v2317_v0, %v2321_v36 }
 0x1b4   : > { %v2326_v50 = vrot.slane %v2324_v47, 4  ;;  %v3268_v52 = vunpack.c.l.b16 %v2322_v56  ;;  %v2343_v36 = vshll.u32 %v2192_v42, 16  ;;  %v2167_v56 = vld [vmem:[#allocation2 + $0x60] sm:$0xf] }
 0x1b5   : > { %v7394_v1 = vadd.f32 %v4378_v40, %v4290_v15  ;;  %v4383_v11 = vpop.f32.mrf.mxu0  ;;  %v2681_v40 = vrot.slane %v2164_v53, 5  ;;  %v7407_v53 = vld [vmem:[#allocation2 + $0x58] sm:$0xf] }
 0x1b6   : > { %v7396_v57 = vpop.f32.mrf.mxu1  ;;  %v2333_v26 = vshll.u32 %v7407_v53, 16  ;;  %v2337_v48 = vshrl.u32 %v7407_v53, 16 }
 0x1b7   : > { %4698 = vmatmul.bf16.gmra.mxu0 %v3358_v31  ;;  %v2683_v54 = vrot.slane %v2681_v40, 4  ;;  %v2682_v63 = vsel %vm6525_vm13, %v5069_v3, %v2681_v40  ;;  %v5907_v40 = vld [vmem:[#allocation2 + $0x50] sm:$0x1] }
 0x1b8   : > { %v4202_v25 = vpop.f32.mrf.mxu2  ;;  %v2339_v61 = vrot.slane %v2337_v48, 4 }
 0x1b9   : > { %v4203_v39 = vadd.f32 %v4202_v25, %v4114_v22  ;;  %v2685_v59 = vsel %vm6525_vm13, %v2683_v54, %v2684_v24  ;;  %v3331_v22 = vunpack.c.l.b16 %v2682_v63  ;;  %v2082_v25 = vrot.slane %v5907_v40, 5  ;;  %v2592_v24 = vld [vmem:[#allocation2 + $0x54] sm:$0xe] }
 0x1ba   : > { %v4291_v2 = vpop.f32.mrf.mxu3  ;;  %v3332_v8 = vunpack.c.l.b16 %v2685_v59  ;;  %v5070_v47 = vrot.slane %v2592_v24, 9 }
 0x1bb   : > { %v4292_v44 = vadd.f32 %v4291_v2, %v4203_v39  ;;  %v2329_v2 = vrot.slane %v2327_v7, 5 }
 0x1bd   : > { %4520 = vmatmul.bf16.gmra.mxu2 %v5600_v34  ;;  %v7409_v30 = vadd.f32 %v4380_v27, %v4292_v44  ;;  %v4385_v15 = vpop.f32.mrf.mxu0  ;;  %v1983_v27 = vld [vmem:[#allocation2 + $0x48] sm:$0xe]  ;;  %v2312_v34 = vsel %vm6501_vm10, %v2307_v16, %v7402_v19  ;;  %v3359_v44 = vpack.c.b16 %v3332_v8, %v3331_v22  ;;  %v2083_v19 = vsel %vm6525_vm13, %v2081_v38, %v2082_v25 }
 0x1be   : > { %v7411_v43 = vpop.f32.mrf.mxu1  ;;  %v5054_v62 = vrot.slane %v1983_v27, 9  ;;  %v4119_v16 = vadd.f32 %v7396_v57, %v7816_v10  ;;  %v3267_v29 = vunpack.c.l.b16 %v2312_v34  ;;  %v5601_v27 = vld [vmem:[#allocation2 + $0x48] sm:$0xff] }
 0x1bf   : > { %4609 = vmatmul.bf16.gmra.mxu3 %v3294_v12  ;;  %v7426_v12 = vrot.slane %v2333_v26, 5 }
 0x1c0   : > { %v4205_v31 = vpop.f32.mrf.mxu2  ;;  %v2080_v54 = vsel %vm6525_vm13, %v5054_v62, %v2079_v37 }
 0x1c1   : > { %v4206_v45 = vadd.f32 %v4205_v31, %v4117_v32  ;;  %4436 = vmatmul.bf16.gmra.mxu1 %v3151_v33  ;;  %v2688_v33 = vrot.slane %v7407_v53, 5  ;;  %v2330_v32 = vor.u32 %v2329_v2, %v2326_v50  ;;  %v2340_v0 = vor.u32 %v2339_v61, %v7426_v12  ;;  %v7817_v50 = vld [vmem:[#allocation3_spill] sm:$0xff] }
 0x1c2   : > { %v4294_v9 = vpop.f32.mrf.mxu3  ;;  %v3125_v37 = vunpack.c.l.b16 %v2080_v54  ;;  %v3126_v31 = vunpack.c.l.b16 %v2083_v19  ;;  %v2691_v53 = vrot.slane %v2192_v42, 5  ;;  %v4122_v2 = vadd.f32 %v7411_v43, %v7817_v50  ;;  %v1984_v42 = vld [vmem:[#allocation2 + $0x54] sm:$0xe] }
 0x1c3   : > { %v4295_v39 = vadd.f32 %v4294_v9, %v4206_v45  ;;  %v2690_v26 = vrot.slane %v2688_v33, 4  ;;  %v3295_v45 = vpack.c.b16 %v3268_v52, %v3267_v29  ;;  %v2331_v57 = vrot.slane %v2330_v32, 4  ;;  %v5909_v32 = vld [vmem:[#allocation2 + $0x5c] sm:$0x1] }
 0x1c4   : > { %v2341_v22 = vrot.slane %v2340_v0, 4  ;;  %v2345_v9 = vrot.slane %v2343_v36, 5  ;;  %v3152_v8 = vpack.c.b16 %v3126_v31, %v3125_v37  ;;  %v2689_v62 = vsel %vm6525_vm13, %v5070_v47, %v2688_v33 }
 0x1c5   : > { %v7428_v3 = vadd.f32 %v4383_v11, %v4295_v39  ;;  %v4388_v63 = vpop.f32.mrf.mxu0  ;;  %v2692_v25 = vsel %vm6525_vm13, %v2690_v26, %v2691_v53  ;;  %v5908_v39 = vld [vmem:[#allocation2 + $0x58] sm:$0xf]  ;;  %v3333_v24 = vunpack.c.l.b16 %v2689_v62  ;;  %v2351_v29 = vshll.u32 %v2167_v56, 16  ;;  %v2193_v62 = vld [vmem:[#allocation2 + $0x68] sm:$0x1] }
 0x1c6   : > { %v7430_v28 = vpop.f32.mrf.mxu1  ;;  %v2086_v34 = vrot.slane %v5908_v39, 5  ;;  %v2346_v19 = vsel %vm6501_vm10, %v2341_v22, %v2345_v9  ;;  %v3334_v10 = vunpack.c.l.b16 %v2692_v25  ;;  %v5055_v43 = vrot.slane %v1984_v42, 9  ;;  %v7818_v22 = vld [vmem:[#allocation4_spill] sm:$0xff] }
 0x1c7   : > { %4703 = vmatmul.bf16.gmra.mxu0 %v3359_v44  ;;  %v2168_v44 = vld [vmem:[#allocation2 + $0x64] sm:$0xf]  ;;  %v2089_v0 = vrot.slane %v5909_v32, 5  ;;  %v3270_v31 = vunpack.c.l.b16 %v2346_v19  ;;  %v4124_v9 = vadd.f32 %v7430_v28, %v7818_v22  ;;  %v2593_v39 = vld [vmem:[#allocation2 + $0x60] sm:$0xe] }
 0x1c8   : > { %v4207_v11 = vpop.f32.mrf.mxu2  ;;  %v2357_v36 = vshll.u32 %v2168_v44, 16  ;;  %v2087_v53 = vsel %vm6525_vm13, %v5055_v43, %v2086_v34  ;;  %v2169_v43 = vld [vmem:[#allocation2 + $0x6c] sm:$0xf] }
 0x1c9   : > { %v4208_v59 = vadd.f32 %v4207_v11, %v4119_v16  ;;  %v2348_v16 = vshrl.u32 %v2167_v56, 16  ;;  %v2088_v11 = vrot.slane %v2086_v34, 4  ;;  %v3127_v42 = vunpack.c.l.b16 %v2087_v53 }
 0x1ca   : > { %v4296_v7 = vpop.f32.mrf.mxu3  ;;  %v2372_v22 = vshrl.u32 %v2169_v43, 16 }
 0x1cb   : > { %v4297_v48 = vadd.f32 %v4296_v7, %v4208_v59  ;;  %v2350_v47 = vrot.slane %v2348_v16, 4 }
 0x1cd   : > { %4525 = vmatmul.bf16.gmra.mxu2 %v5601_v27  ;;  %v7442_v38 = vadd.f32 %v4385_v15, %v4297_v48  ;;  %v4390_v61 = vpop.f32.mrf.mxu0  ;;  %v2336_v15 = vsel %vm6501_vm10, %v2331_v57, %v7426_v12  ;;  %v2361_v27 = vshrl.u32 %v2168_v44, 16  ;;  %v3360_v12 = vpack.c.b16 %v3334_v10, %v3333_v24 }
 0x1ce   : > { %v7444_v40 = vpop.f32.mrf.mxu1  ;;  %v3269_v37 = vunpack.c.l.b16 %v2336_v15  ;;  %v2090_v48 = vsel %vm6525_vm13, %v2088_v11, %v2089_v0  ;;  %v7463_v57 = vrot.slane %v2357_v36, 5  ;;  %v2367_v24 = vshll.u32 %v2193_v62, 16 }
 0x1cf   : > { %4614 = vmatmul.bf16.gmra.mxu3 %v3295_v45  ;;  %v2353_v45 = vrot.slane %v2351_v29, 5  ;;  %v2363_v25 = vrot.slane %v2361_v27, 4  ;;  %v2698_v29 = vrot.slane %v2193_v62, 5 }
 0x1d0   : > { %v4210_v54 = vpop.f32.mrf.mxu2  ;;  %v3296_v15 = vpack.c.b16 %v3270_v31, %v3269_v37  ;;  %v7819_v37 = vld [vmem:[#allocation5_spill] sm:$0xff]  ;;  %v2369_v53 = vrot.slane %v2367_v24, 5  ;;  %v2374_v24 = vrot.slane %v2372_v22, 4 }
 0x1d1   : > { %v4211_v33 = vadd.f32 %v4210_v54, %v4122_v2  ;;  %4441 = vmatmul.bf16.gmra.mxu1 %v3152_v8  ;;  %v5602_v2 = vld [vmem:[#allocation2 + $0x54] sm:$0xff]  ;;  %v3128_v54 = vunpack.c.l.b16 %v2090_v48  ;;  %v2354_v19 = vor.u32 %v2353_v45, %v2350_v47  ;;  %v2364_v16 = vor.u32 %v2363_v25, %v7463_v57 }
 0x1d2   : > { %v4299_v52 = vpop.f32.mrf.mxu3  ;;  %v4127_v31 = vadd.f32 %v7444_v40, %v7819_v37  ;;  %v7820_v37 = vld [vmem:[#allocation6_spill] sm:$0xff] }
 0x1d3   : > { %v4300_v59 = vadd.f32 %v4299_v52, %v4211_v33  ;;  %v5071_v33 = vrot.slane %v2593_v39, 9  ;;  %v3153_v52 = vpack.c.b16 %v3128_v54, %v3127_v42  ;;  %v2355_v0 = vrot.slane %v2354_v19, 4  ;;  %v5911_v42 = vld [vmem:[#allocation2 + $0x68] sm:$0x1] }
 0x1d4   : > { %v2365_v47 = vrot.slane %v2364_v16, 4  ;;  %v2096_v54 = vrot.slane %v5911_v42, 5 }
 0x1d5   : > { %v7455_v7 = vadd.f32 %v4388_v63, %v4300_v59  ;;  %v4393_v8 = vpop.f32.mrf.mxu0  ;;  %v2695_v63 = vrot.slane %v2168_v44, 5  ;;  %v7468_v44 = vld [vmem:[#allocation2 + $0x70] sm:$0xf]  ;;  %v5910_v59 = vld [vmem:[#allocation2 + $0x64] sm:$0xf] }
 0x1d6   : > { %v7457_v26 = vpop.f32.mrf.mxu1  ;;  %v2093_v27 = vrot.slane %v5910_v59, 5  ;;  %v2381_v62 = vshll.u32 %v7468_v44, 16  ;;  %v2385_v25 = vshrl.u32 %v7468_v44, 16  ;;  %v2370_v19 = vsel %vm6501_vm10, %v2365_v47, %v2369_v53 }
 0x1d7   : > { %4708 = vmatmul.bf16.gmra.mxu0 %v3360_v12  ;;  %v2697_v28 = vrot.slane %v2695_v63, 4  ;;  %v2696_v36 = vsel %vm6525_vm13, %v5071_v33, %v2695_v63  ;;  %v2702_v59 = vrot.slane %v7468_v44, 5 }
 0x1d8   : > { %v4212_v56 = vpop.f32.mrf.mxu2  ;;  %v3335_v63 = vunpack.c.l.b16 %v2696_v36  ;;  %v2387_v16 = vrot.slane %v2385_v25, 4 }
 0x1d9   : > { %v4213_v50 = vadd.f32 %v4212_v56, %v4124_v9  ;;  %v2699_v48 = vsel %vm6525_vm13, %v2697_v28, %v2698_v29  ;;  %v2375_v9 = vshll.u32 %v2169_v43, 16  ;;  %v2194_v28 = vld [vmem:[#allocation2 + $0x74] sm:$0x1] }
 0x1da   : > { %v4301_v34 = vpop.f32.mrf.mxu3  ;;  %v3336_v40 = vunpack.c.l.b16 %v2699_v48  ;;  %v3272_v48 = vunpack.c.l.b16 %v2370_v19  ;;  %v2391_v22 = vshll.u32 %v2194_v28, 16  ;;  %v2705_v44 = vrot.slane %v2194_v28, 5  ;;  %v2171_v28 = vld [vmem:[#allocation2 + $0x78] sm:$0xf] }
 0x1db   : > { %v4302_v10 = vadd.f32 %v4301_v34, %v4213_v50  ;;  %v2377_v33 = vrot.slane %v2375_v9, 5 }
 0x1dc   : > { %v2393_v42 = vrot.slane %v2391_v22, 5 }
 0x1dd   : > { %4530 = vmatmul.bf16.gmra.mxu2 %v5602_v2  ;;  %v7470_v11 = vadd.f32 %v4390_v61, %v4302_v10  ;;  %v4395_v12 = vpop.f32.mrf.mxu0  ;;  %v1985_v61 = vld [vmem:[#allocation2 + $0x60] sm:$0xe]  ;;  %v2095_v2 = vrot.slane %v2093_v27, 4  ;;  %v7487_v10 = vrot.slane %v2381_v62, 5 }
 0x1de   : > { %v7472_v32 = vpop.f32.mrf.mxu1  ;;  %v5056_v50 = vrot.slane %v1985_v61, 9  ;;  %v2378_v61 = vor.u32 %v2377_v33, %v2374_v24  ;;  %v5603_v62 = vld [vmem:[#allocation2 + $0x60] sm:$0xff]  ;;  %v5912_v33 = vld [vmem:[#allocation2 + $0x70] sm:$0xf] }
 0x1df   : > { %4619 = vmatmul.bf16.gmra.mxu3 %v3296_v15  ;;  %v2360_v15 = vsel %vm6501_vm10, %v2355_v0, %v7463_v57  ;;  %v2097_v57 = vsel %vm6525_vm13, %v2095_v2, %v2096_v54  ;;  %v2594_v0 = vld [vmem:[#allocation2 + $0x6c] sm:$0xe] }
 0x1e0   : > { %v4215_v45 = vpop.f32.mrf.mxu2  ;;  %v2094_v36 = vsel %vm6525_vm13, %v5056_v50, %v2093_v27  ;;  %v3271_v53 = vunpack.c.l.b16 %v2360_v15  ;;  %v3130_v25 = vunpack.c.l.b16 %v2097_v57 }
 0x1e1   : > { %v4216_v39 = vadd.f32 %v4215_v45, %v4127_v31  ;;  %4446 = vmatmul.bf16.gmra.mxu1 %v3153_v52  ;;  %v3361_v52 = vpack.c.b16 %v3336_v40, %v3335_v63  ;;  %v4129_v31 = vadd.f32 %v7457_v26, %v7820_v37  ;;  %v2388_v45 = vor.u32 %v2387_v16, %v7487_v10  ;;  %v2172_v37 = vld [vmem:[#allocation2 + $0x7c] sm:$0xf] }
 0x1e2   : > { %v4304_v56 = vpop.f32.mrf.mxu3  ;;  %v3129_v27 = vunpack.c.l.b16 %v2094_v36  ;;  %v3297_v50 = vpack.c.b16 %v3272_v48, %v3271_v53  ;;  %v2379_v26 = vrot.slane %v2378_v61, 4  ;;  %v2100_v16 = vrot.slane %v5912_v33, 5 }
 0x1e3   : > { %v4305_v34 = vadd.f32 %v4304_v56, %v4216_v39  ;;  %v5072_v39 = vrot.slane %v2594_v0, 9  ;;  %v2704_v56 = vrot.slane %v2702_v59, 4  ;;  %v2389_v2 = vrot.slane %v2388_v45, 4  ;;  %v1986_v0 = vld [vmem:[#allocation2 + $0x6c] sm:$0xe] }
 0x1e4   : > { %v3154_v54 = vpack.c.b16 %v3130_v25, %v3129_v27  ;;  %v2396_v61 = vshrl.u32 %v2171_v28, 16  ;;  %v2399_v45 = vshll.u32 %v2171_v28, 16  ;;  %v2405_v25 = vshll.u32 %v2172_v37, 16 }
 0x1e5   : > { %v7489_v29 = vadd.f32 %v4393_v8, %v4305_v34  ;;  %v4398_v47 = vpop.f32.mrf.mxu0  ;;  %v2703_v34 = vsel %vm6525_vm13, %v5072_v39, %v2702_v59  ;;  %v2706_v24 = vsel %vm6525_vm13, %v2704_v56, %v2705_v44  ;;  %v2394_v59 = vsel %vm6501_vm10, %v2389_v2, %v2393_v42 }
 0x1e6   : > { %v7491_v43 = vpop.f32.mrf.mxu1  ;;  %v3337_v53 = vunpack.c.l.b16 %v2703_v34  ;;  %v3274_v44 = vunpack.c.l.b16 %v2394_v59  ;;  %v2407_v34 = vrot.slane %v2405_v25, 5  ;;  %v5604_v59 = vld [vmem:[#allocation2 + $0x6c] sm:$0xff] }
 0x1e7   : > { %4713 = vmatmul.bf16.gmra.mxu0 %v3361_v52  ;;  %v7821_v52 = vld [vmem:[#allocation8_spill] sm:$0xff] }
 0x1e8   : > { %v4217_v8 = vpop.f32.mrf.mxu2  ;;  %v4132_v36 = vadd.f32 %v7472_v32, %v7821_v52  ;;  %v5057_v32 = vrot.slane %v1986_v0, 9  ;;  %v2195_v52 = vld [vmem:[#allocation2 + $0x80] sm:$0x1]  ;;  %v2595_v0 = vld [vmem:[#allocation2 + $0x78] sm:$0xe] }
 0x1e9   : > { %v4218_v9 = vadd.f32 %v4217_v8, %v4129_v31  ;;  %v3338_v8 = vunpack.c.l.b16 %v2706_v24  ;;  %v7822_v24 = vld [vmem:[#allocation10_spill] sm:$0xff] }
 0x1ea   : > { %v4306_v63 = vpop.f32.mrf.mxu3  ;;  %v2101_v42 = vsel %vm6525_vm13, %v5057_v32, %v2100_v16  ;;  %v4134_v33 = vadd.f32 %v7491_v43, %v7822_v24  ;;  %v2712_v43 = vrot.slane %v2195_v52, 5 }
 0x1eb   : > { %v4307_v40 = vadd.f32 %v4306_v63, %v4218_v9  ;;  %v2102_v9 = vrot.slane %v2100_v16, 4  ;;  %v2409_v63 = vshrl.u32 %v2172_v37, 16 }
 0x1ed   : > { %4535 = vmatmul.bf16.gmra.mxu2 %v5603_v62  ;;  %v7503_v15 = vadd.f32 %v4395_v12, %v4307_v40  ;;  %v4400_v57 = vpop.f32.mrf.mxu0  ;;  %v2384_v12 = vsel %vm6501_vm10, %v2379_v26, %v7487_v10  ;;  %v5913_v62 = vld [vmem:[#allocation2 + $0x74] sm:$0x1]  ;;  %v2398_v10 = vrot.slane %v2396_v61, 4  ;;  %v2401_v40 = vrot.slane %v2399_v45, 5 }
 0x1ee   : > { %v7505_v19 = vpop.f32.mrf.mxu1  ;;  %v2103_v27 = vrot.slane %v5913_v62, 5  ;;  %v3273_v56 = vunpack.c.l.b16 %v2384_v12  ;;  %v3362_v26 = vpack.c.b16 %v3338_v8, %v3337_v53  ;;  %v3131_v53 = vunpack.c.l.b16 %v2101_v42 }
 0x1ef   : > { %4624 = vmatmul.bf16.gmra.mxu3 %v3297_v50  ;;  %v2402_v8 = vor.u32 %v2401_v40, %v2398_v10  ;;  %v2415_v45 = vshll.u32 %v2195_v52, 16  ;;  %v5914_v10 = vld [vmem:[#allocation2 + $0x7c] sm:$0xf]  ;;  %v2173_v52 = vld [vmem:[#allocation2 + $0x84] sm:$0xf] }
 0x1f0   : > { %v4220_v31 = vpop.f32.mrf.mxu2  ;;  %v3298_v16 = vpack.c.b16 %v3274_v44, %v3273_v56  ;;  %v2107_v40 = vrot.slane %v5914_v10, 5  ;;  %v7823_v56 = vld [vmem:[#allocation12_spill] sm:$0xff] }
 0x1f1   : > { %v4221_v48 = vadd.f32 %v4220_v31, %v4132_v36  ;;  %4451 = vmatmul.bf16.gmra.mxu1 %v3154_v54  ;;  %v2104_v54 = vsel %vm6525_vm13, %v2102_v9, %v2103_v27  ;;  %v2411_v36 = vrot.slane %v2409_v63, 4  ;;  %v2709_v31 = vrot.slane %v2172_v37, 5 }
 0x1f2   : > { %v4309_v22 = vpop.f32.mrf.mxu3  ;;  %v2403_v25 = vrot.slane %v2402_v8, 4  ;;  %v4137_v44 = vadd.f32 %v7505_v19, %v7823_v56  ;;  %v7824_v56 = vld [vmem:[#allocation14_spill] sm:$0xff] }
 0x1f3   : > { %v4310_v39 = vadd.f32 %v4309_v22, %v4221_v48  ;;  %v3132_v48 = vunpack.c.l.b16 %v2104_v54  ;;  %v5073_v22 = vrot.slane %v2595_v0, 9  ;;  %v2412_v9 = vor.u32 %v2411_v36, %v2407_v34 }
 0x1f4   : > { %v2711_v62 = vrot.slane %v2709_v31, 4  ;;  %v2417_v54 = vrot.slane %v2415_v45, 5  ;;  %v2408_v0 = vsel %vm6501_vm10, %v2403_v25, %v2407_v34  ;;  %v2420_v45 = vshrl.u32 %v2173_v52, 16 }
 0x1f5   : > { %v7516_v50 = vadd.f32 %v4398_v47, %v4310_v39  ;;  %v4403_v28 = vpop.f32.mrf.mxu0  ;;  %v3155_v27 = vpack.c.b16 %v3132_v48, %v3131_v53  ;;  %v2710_v63 = vsel %vm6525_vm13, %v5073_v22, %v2709_v31  ;;  %v2413_v42 = vrot.slane %v2412_v9, 4  ;;  %v5915_v48 = vld [vmem:[#allocation2 + $0x80] sm:$0x1] }
 0x1f6   : > { %v7518_v2 = vpop.f32.mrf.mxu1  ;;  %v2713_v24 = vsel %vm6525_vm13, %v2711_v62, %v2712_v43  ;;  %v3339_v31 = vunpack.c.l.b16 %v2710_v63  ;;  %v2109_v53 = vrot.slane %v2107_v40, 4  ;;  %v2110_v8 = vrot.slane %v5915_v48, 5 }
 0x1f7   : > { %4718 = vmatmul.bf16.gmra.mxu0 %v3362_v26  ;;  %v2423_v22 = vshll.u32 %v2173_v52, 16  ;;  %v3275_v62 = vunpack.c.l.b16 %v2408_v0 }
 0x1f8   : > { %v4222_v47 = vpop.f32.mrf.mxu2  ;;  %v2111_v10 = vsel %vm6525_vm13, %v2109_v53, %v2110_v8 }
 0x1f9   : > { %v4223_v12 = vadd.f32 %v4222_v47, %v4134_v33  ;;  %v1987_v33 = vld [vmem:[#allocation2 + $0x78] sm:$0xe]  ;;  %v2174_v47 = vld [vmem:[#allocation2 + $0x88] sm:$0xf] }
 0x1fa   : > { %v4311_v61 = vpop.f32.mrf.mxu3  ;;  %v5058_v19 = vrot.slane %v1987_v33, 9  ;;  %v2433_v9 = vshrl.u32 %v2174_v47, 16  ;;  %v2596_v33 = vld [vmem:[#allocation2 + $0x84] sm:$0xe] }
 0x1fb   : > { %v4312_v32 = vadd.f32 %v4311_v61, %v4223_v12  ;;  %v5074_v53 = vrot.slane %v2596_v33, 9 }
 0x1fc   : > { %v2108_v63 = vsel %vm6525_vm13, %v5058_v19, %v2107_v40  ;;  %v2196_v40 = vld [vmem:[#allocation2 + $0x8c] sm:$0x1] }
 0x1fd   : > { %4540 = vmatmul.bf16.gmra.mxu2 %v5604_v59  ;;  %v7526_v39 = vadd.f32 %v4400_v57, %v4312_v32  ;;  %v4405_v26 = vpop.f32.mrf.mxu0  ;;  %v3340_v59 = vunpack.c.l.b16 %v2713_v24  ;;  %v2429_v32 = vshll.u32 %v2174_v47, 16  ;;  %v2425_v24 = vrot.slane %v2423_v22, 5 }
 0x1fe   : > { %v7528_v37 = vpop.f32.mrf.mxu1  ;;  %v2439_v22 = vshll.u32 %v2196_v40, 16 }
 0x1ff   : > { %4629 = vmatmul.bf16.gmra.mxu3 %v3298_v16  ;;  %v2418_v16 = vsel %vm6501_vm10, %v2413_v42, %v2417_v54  ;;  %v2422_v54 = vrot.slane %v2420_v45, 4  ;;  %v2431_v52 = vrot.slane %v2429_v32, 5 }
 0x200   : > { %v4225_v57 = vpop.f32.mrf.mxu2  ;;  %v3276_v34 = vunpack.c.l.b16 %v2418_v16  ;;  %v2719_v16 = vrot.slane %v2196_v40, 5 }
 0x201   : > { %v4226_v36 = vadd.f32 %v4225_v57, %v4137_v44  ;;  %4456 = vmatmul.bf16.gmra.mxu1 %v3155_v27  ;;  %v3363_v27 = vpack.c.b16 %v3340_v59, %v3339_v31  ;;  %v4139_v44 = vadd.f32 %v7518_v2, %v7824_v56  ;;  %v5605_v31 = vld [vmem:[#allocation2 + $0x78] sm:$0xff]  ;;  %v3134_v59 = vunpack.c.l.b16 %v2111_v10  ;;  %v2175_v56 = vld [vmem:[#allocation2 + $0x90] sm:$0xf]  ;;  %v5916_v10 = vld [vmem:[#allocation2 + $0x88] sm:$0xf] }
 0x202   : > { %v4314_v12 = vpop.f32.mrf.mxu3  ;;  %v3299_v48 = vpack.c.b16 %v3276_v34, %v3275_v62  ;;  %v2426_v2 = vor.u32 %v2425_v24, %v2422_v54  ;;  %v7556_v62 = vld [vmem:[#allocation2 + $0x94] sm:$0xf]  ;;  %v1988_v24 = vld [vmem:[#allocation2 + $0x84] sm:$0xe] }
 0x203   : > { %v4315_v61 = vadd.f32 %v4314_v12, %v4226_v36  ;;  %v2435_v36 = vrot.slane %v2433_v9, 4  ;;  %v3133_v12 = vunpack.c.l.b16 %v2108_v63 }
 0x205   : > { %v7540_v43 = vadd.f32 %v4403_v28, %v4315_v61  ;;  %v7550_v42 = vpop.f32.mrf.mxu0  ;;  %v2716_v28 = vrot.slane %v2174_v47, 5  ;;  %v2436_v45 = vor.u32 %v2435_v36, %v2431_v52  ;;  %v3156_v47 = vpack.c.b16 %v3134_v59, %v3133_v12 }
 0x206   : > { %v7542_v25 = vpop.f32.mrf.mxu1  ;;  %v2441_v36 = vrot.slane %v2439_v22, 5  ;;  %v2453_v12 = vshll.u32 %v7556_v62, 16  ;;  %v2457_v59 = vshrl.u32 %v7556_v62, 16 }
 0x207   : > { %4723 = vmatmul.bf16.gmra.mxu0 %v3363_v27  ;;  %v2718_v61 = vrot.slane %v2716_v28, 4  ;;  %v2717_v63 = vsel %vm6525_vm13, %v5074_v53, %v2716_v28  ;;  %v2427_v27 = vrot.slane %v2426_v2, 4 }
 0x208   : > { %v4227_v57 = vpop.f32.mrf.mxu2  ;;  %v3341_v28 = vunpack.c.l.b16 %v2717_v63  ;;  %v7568_v22 = vrot.slane %v2453_v12, 5 }
 0x209   : > { %v4228_v0 = vadd.f32 %v4227_v57, %v4139_v44  ;;  %v2114_v44 = vrot.slane %v5916_v10, 5  ;;  %v2720_v54 = vsel %vm6525_vm13, %v2718_v61, %v2719_v16  ;;  %v2437_v57 = vrot.slane %v2436_v45, 4 }
 0x20a   : > { %v4316_v19 = vpop.f32.mrf.mxu3  ;;  %v2432_v16 = vsel %vm6501_vm10, %v2427_v27, %v2431_v52  ;;  %v7826_v27 = vld [vmem:[#allocation15_spill] sm:$0xff] }
 0x20b   : > { %v4317_v8 = vadd.f32 %v4316_v19, %v4228_v0  ;;  %v2447_v0 = vshll.u32 %v2175_v56, 16  ;;  %v3342_v19 = vunpack.c.l.b16 %v2720_v54  ;;  %v2116_v53 = vrot.slane %v2114_v44, 4 }
 0x20c   : > { %v2442_v45 = vsel %vm6501_vm10, %v2437_v57, %v2441_v36  ;;  %v3277_v36 = vunpack.c.l.b16 %v2432_v16 }
 0x20d   : > { %4545 = vmatmul.bf16.gmra.mxu2 %v5605_v31  ;;  %v7552_v32 = vadd.f32 %v4405_v26, %v4317_v8  ;;  %v4686_v34 = vpop.f32.mrf.mxu0  ;;  %v2444_v26 = vshrl.u32 %v2175_v56, 16  ;;  %v4418_v31 = vadd.f32 %v7528_v37, %v6971_v5  ;;  %v5917_v8 = vld [vmem:[#allocation2 + $0x8c] sm:$0x1]  ;;  %v2449_v37 = vrot.slane %v2447_v0, 5  ;;  %v2197_v0 = vld [vmem:[#allocation2 + $0x98] sm:$0x1] }
 0x20e   : > { %v4422_v9 = vpop.f32.mrf.mxu1  ;;  %v2117_v2 = vrot.slane %v5917_v8, 5  ;;  %v3364_v56 = vpack.c.b16 %v3342_v19, %v3341_v28  ;;  %v5606_v19 = vld [vmem:[#allocation2 + $0x84] sm:$0xff] }
 0x20f   : > { %7825 = vst [vmem:[#allocation7_spill] sm:$0xff] %v7552_v32  ;;  %4634 = vmatmul.bf16.gmra.mxu3 %v3299_v48  ;;  %v5059_v48 = vrot.slane %v1988_v24, 9  ;;  %v2446_v5 = vrot.slane %v2444_v26, 4  ;;  %v2723_v24 = vrot.slane %v7556_v62, 5  ;;  %v3278_v26 = vunpack.c.l.b16 %v2442_v45 }
 0x210   : > { %v4506_v33 = vpop.f32.mrf.mxu2  ;;  %v2118_v54 = vsel %vm6525_vm13, %v2116_v53, %v2117_v2  ;;  %v2463_v62 = vshll.u32 %v2197_v0, 16  ;;  %v2726_v2 = vrot.slane %v2197_v0, 5 }
 0x211   : > { %4461 = vmatmul.bf16.gmra.mxu1 %v3156_v47  ;;  %v4507_v61 = vadd.f32 %v4506_v33, %v4418_v31  ;;  %v2459_v47 = vrot.slane %v2457_v59, 4  ;;  %v2115_v10 = vsel %vm6525_vm13, %v5059_v48, %v2114_v44  ;;  %v4420_v33 = vadd.f32 %v7542_v25, %v7826_v27  ;;  %v2597_v31 = vld [vmem:[#allocation2 + $0x90] sm:$0xe] }
 0x212   : > { %v4595_v40 = vpop.f32.mrf.mxu3  ;;  %v2450_v12 = vor.u32 %v2449_v37, %v2446_v5  ;;  %v3135_v44 = vunpack.c.l.b16 %v2115_v10  ;;  %v3136_v48 = vunpack.c.l.b16 %v2118_v54  ;;  %v2725_v25 = vrot.slane %v2723_v24, 4 }
 0x213   : > { %v4596_v52 = vadd.f32 %v4595_v40, %v4507_v61  ;;  %v2460_v53 = vor.u32 %v2459_v47, %v7568_v22  ;;  %v5075_v40 = vrot.slane %v2597_v31, 9  ;;  %v3300_v45 = vpack.c.b16 %v3278_v26, %v3277_v36  ;;  %v7584_v47 = vld [vmem:[#allocation2 + $0xa0] sm:$0xf] }
 0x214   : > { %v4423_v27 = vadd.f32 %v4422_v9, %v7032_v60  ;;  %v3157_v37 = vpack.c.b16 %v3136_v48, %v3135_v44  ;;  %v2451_v10 = vrot.slane %v2450_v12, 4  ;;  %v2727_v9 = vsel %vm6525_vm13, %v2725_v25, %v2726_v2  ;;  %v1989_v12 = vld [vmem:[#allocation2 + $0x90] sm:$0xe] }
 0x215   : > { %v7579_v57 = vpop.f32.mrf.mxu0  ;;  %v4685_v61 = vadd.f32 %v7550_v42, %v4596_v52  ;;  %v2461_v54 = vrot.slane %v2460_v53, 4  ;;  %v2465_v42 = vrot.slane %v2463_v62, 5  ;;  %v2724_v60 = vsel %vm6525_vm13, %v5075_v40, %v2723_v24 }
 0x216   : > { %v7570_v63 = vpop.f32.mrf.mxu1  ;;  %v2477_v48 = vshll.u32 %v7584_v47, 16  ;;  %v2481_v24 = vshrl.u32 %v7584_v47, 16  ;;  %v2456_v62 = vsel %vm6501_vm10, %v2451_v10, %v7568_v22  ;;  %v3343_v40 = vunpack.c.l.b16 %v2724_v60  ;;  %v2198_v22 = vld [vmem:[#allocation2 + $0xa4] sm:$0x1] }
 0x217   : > { %4728 = vmatmul.bf16.gmra.mxu0 %v3364_v56  ;;  %v4865_v36 = vmul.f32 %v4685_v61, %v4685_v61  ;;  %v3344_v2 = vunpack.c.l.b16 %v2727_v9 }
 0x218   : > { %v4508_v28 = vpop.f32.mrf.mxu2 }
 0x219   : > { %v4509_v59 = vadd.f32 %v4508_v28, %v4420_v33  ;;  %v2177_v33 = vld [vmem:[#allocation2 + $0x9c] sm:$0xf]  ;;  %v3365_v10 = vpack.c.b16 %v3344_v2, %v3343_v40  ;;  %v2487_v40 = vshll.u32 %v2198_v22, 16  ;;  %v5607_v2 = vld [vmem:[#allocation2 + $0x90] sm:$0xff] }
 0x21a   : > { %v4597_v8 = vpop.f32.mrf.mxu3  ;;  %v2471_v44 = vshll.u32 %v2177_v33, 16 }
 0x21b   : > { %v4598_v16 = vadd.f32 %v4597_v8, %v4509_v59 }
 0x21d   : > { %v4687_v5 = vadd.f32 %v4686_v34, %v4598_v16  ;;  %4550 = vmatmul.bf16.gmra.mxu2 %v5606_v19  ;;  %v5918_v34 = vld [vmem:[#allocation2 + $0x94] sm:$0xf]  ;;  %v4691_v28 = vpop.f32.mrf.mxu0  ;;  %v2468_v19 = vshrl.u32 %v2177_v33, 16 }
 0x21e   : > { %v7593_v56 = vpop.f32.mrf.mxu1  ;;  %v2121_v52 = vrot.slane %v5918_v34, 5  ;;  %v2466_v34 = vsel %vm6501_vm10, %v2461_v54, %v2465_v42  ;;  %v2730_v54 = vrot.slane %v7584_v47, 5 }
 0x21f   : > { %v5752_v26 = vpack.c.bf16 %v4687_v5, %v4685_v61  ;;  %v4828_v0 = vadd.f32 %v4687_v5, %v4685_v61  ;;  %v4866_v31 = vmul.f32 %v4687_v5, %v4687_v5  ;;  %4639 = vmatmul.bf16.gmra.mxu3 %v3300_v45  ;;  %v5060_v61 = vrot.slane %v1989_v12, 9  ;;  %v5919_v45 = vld [vmem:[#allocation2 + $0x98] sm:$0x1] }
 0x220   : > { %v4511_v59 = vpop.f32.mrf.mxu2  ;;  %v2123_v16 = vrot.slane %v2121_v52, 4  ;;  %v2124_v5 = vrot.slane %v5919_v45, 5  ;;  %v2470_v32 = vrot.slane %v2468_v19, 4  ;;  %v4425_v19 = vadd.f32 %v7570_v63, %v7035_v4  ;;  %v2179_v63 = vld [vmem:[#allocation2 + $0xa8] sm:$0xf] }
 0x221   : > { %5753 = vst [vmem:[%s7591_s30] sm:$0xff] %v5752_v26   ;;  %v4897_v53 = vadd.f32 %v4866_v31, %v4865_v36  ;;  %v4512_v8 = vadd.f32 %v4511_v59, %v4423_v27  ;;  %4466 = vmatmul.bf16.gmra.mxu1 %v3157_v37  ;;  %v2473_v26 = vrot.slane %v2471_v44, 5  ;;  %v7607_v36 = vrot.slane %v2477_v48, 5  ;;  %v2598_v48 = vld [vmem:[#allocation2 + $0x9c] sm:$0xe] }
 0x222   : > { %v4600_v25 = vpop.f32.mrf.mxu3  ;;  %v2483_v27 = vrot.slane %v2481_v24, 4  ;;  %v3279_v31 = vunpack.c.l.b16 %v2456_v62  ;;  %v2122_v9 = vsel %vm6525_vm13, %v5060_v61, %v2121_v52  ;;  %v2125_v12 = vsel %vm6525_vm13, %v2123_v16, %v2124_v5 }
 0x223   : > { %v4601_v33 = vadd.f32 %v4600_v25, %v4512_v8  ;;  %v2474_v8 = vor.u32 %v2473_v26, %v2470_v32  ;;  %v3137_v61 = vunpack.c.l.b16 %v2122_v9  ;;  %v3138_v16 = vunpack.c.l.b16 %v2125_v12 }
 0x224   : > { %v2484_v62 = vor.u32 %v2483_v27, %v7607_v36  ;;  %v5076_v47 = vrot.slane %v2598_v48, 9  ;;  %v2733_v5 = vrot.slane %v2198_v22, 5  ;;  %v5920_v22 = vld [vmem:[#allocation2 + $0xa0] sm:$0xf] }
 0x225   : > { %v4690_v37 = vadd.f32 %v7579_v57, %v4601_v33  ;;  %v4694_v44 = vpop.f32.mrf.mxu0  ;;  %v3280_v57 = vunpack.c.l.b16 %v2466_v34  ;;  %v4428_v34 = vadd.f32 %v7593_v56, %v7108_v21  ;;  %v2475_v32 = vrot.slane %v2474_v8, 4 }
 0x226   : > { %v7610_v60 = vpop.f32.mrf.mxu1  ;;  %v3158_v27 = vpack.c.b16 %v3138_v16, %v3137_v61  ;;  %v2128_v12 = vrot.slane %v5920_v22, 5  ;;  %v2492_v21 = vshrl.u32 %v2179_v63, 16  ;;  %v2495_v8 = vshll.u32 %v2179_v63, 16 }
 0x227   : > { %v4829_v42 = vadd.f32 %v4828_v0, %v4690_v37  ;;  %v4867_v59 = vmul.f32 %v4690_v37, %v4690_v37  ;;  %4733 = vmatmul.bf16.gmra.mxu0 %v3365_v10  ;;  %v2732_v0 = vrot.slane %v2730_v54, 4  ;;  %v3301_v4 = vpack.c.b16 %v3280_v57, %v3279_v31 }
 0x228   : > { %v4513_v24 = vpop.f32.mrf.mxu2  ;;  %v2731_v10 = vsel %vm6525_vm13, %v5076_v47, %v2730_v54  ;;  %v2497_v63 = vrot.slane %v2495_v8, 5  ;;  %v7827_v8 = vld [vmem:[#allocation16_spill] sm:$0xff] }
 0x229   : > { %v4898_v25 = vadd.f32 %v4897_v53, %v4867_v59  ;;  %v4514_v52 = vadd.f32 %v4513_v24, %v4425_v19  ;;  %v2485_v53 = vrot.slane %v2484_v62, 4  ;;  %v2489_v59 = vrot.slane %v2487_v40, 5  ;;  %v7622_v19 = vld [vmem:[#allocation2 + $0xac] sm:$0xf]  ;;  %v1990_v24 = vld [vmem:[#allocation2 + $0x9c] sm:$0xe] }
 0x22a   : > { %v4602_v45 = vpop.f32.mrf.mxu3  ;;  %v2734_v31 = vsel %vm6525_vm13, %v2732_v0, %v2733_v5  ;;  %v2480_v40 = vsel %vm6501_vm10, %v2475_v32, %v7607_v36  ;;  %v2501_v54 = vshll.u32 %v7622_v19, 16  ;;  %v5061_v47 = vrot.slane %v1990_v24, 9  ;;  %v5921_v5 = vld [vmem:[#allocation2 + $0xa4] sm:$0x1] }
 0x22b   : > { %v4603_v33 = vadd.f32 %v4602_v45, %v4514_v52  ;;  %v2505_v52 = vshrl.u32 %v7622_v19, 16  ;;  %v3346_v45 = vunpack.c.l.b16 %v2734_v31  ;;  %v2130_v0 = vrot.slane %v2128_v12, 4 }
 0x22c   : > { %v2494_v36 = vrot.slane %v2492_v21, 4  ;;  %v7638_v32 = vrot.slane %v2501_v54, 5  ;;  %v2737_v31 = vrot.slane %v7622_v19, 5 }
 0x22d   : > { %v4692_v26 = vadd.f32 %v4691_v28, %v4603_v33  ;;  %4555 = vmatmul.bf16.gmra.mxu2 %v5607_v2  ;;  %v4696_v48 = vpop.f32.mrf.mxu0  ;;  %v2131_v33 = vrot.slane %v5921_v5, 5 }
 0x22e   : > { %v7624_v9 = vpop.f32.mrf.mxu1  ;;  %v2739_v19 = vrot.slane %v2737_v31, 4 }
 0x22f   : > { %v5757_v56 = vpack.c.bf16 %v4692_v26, %v4690_v37  ;;  %v4830_v28 = vadd.f32 %v4829_v42, %v4692_v26  ;;  %v4868_v57 = vmul.f32 %v4692_v26, %v4692_v26  ;;  %4644 = vmatmul.bf16.gmra.mxu3 %v3301_v4  ;;  %v2490_v37 = vsel %vm6501_vm10, %v2485_v53, %v2489_v59 }
 0x230   : > { %v4516_v62 = vpop.f32.mrf.mxu2  ;;  %v3345_v42 = vunpack.c.l.b16 %v2731_v10  ;;  %v2507_v26 = vrot.slane %v2505_v52, 4  ;;  %v2129_v59 = vsel %vm6525_vm13, %v5061_v47, %v2128_v12  ;;  %v2132_v10 = vsel %vm6525_vm13, %v2130_v0, %v2131_v33  ;;  %v5608_v12 = vld [vmem:[#allocation2 + $0x9c] sm:$0xff] }
 0x231   : > { %5844 = vst [vmem:[%s7591_s30 + $0x8] sm:$0xff] %v5757_v56   ;;  %v4899_v2 = vadd.f32 %v4898_v25, %v4868_v57  ;;  %v4517_v61 = vadd.f32 %v4516_v62, %v4428_v34  ;;  %4471 = vmatmul.bf16.gmra.mxu1 %v3158_v27  ;;  %v3281_v25 = vunpack.c.l.b16 %v2480_v40  ;;  %v3282_v34 = vunpack.c.l.b16 %v2490_v37  ;;  %v2199_v27 = vld [vmem:[#allocation2 + $0xb0] sm:$0x1]  ;;  %v2599_v56 = vld [vmem:[#allocation2 + $0xa8] sm:$0xe] }
 0x232   : > { %v4605_v16 = vpop.f32.mrf.mxu3  ;;  %v3366_v57 = vpack.c.b16 %v3346_v45, %v3345_v42  ;;  %v2498_v40 = vor.u32 %v2497_v63, %v2494_v36  ;;  %v2508_v52 = vor.u32 %v2507_v26, %v7638_v32  ;;  %v5077_v37 = vrot.slane %v2599_v56, 9  ;;  %v7828_v56 = vld [vmem:[#allocation17_spill] sm:$0xff] }
 0x233   : > { %v4606_v4 = vadd.f32 %v4605_v16, %v4517_v61  ;;  %v2511_v61 = vshll.u32 %v2199_v27, 16  ;;  %v3139_v45 = vunpack.c.l.b16 %v2129_v59  ;;  %v3140_v47 = vunpack.c.l.b16 %v2132_v10 }
 0x234   : > { %v3302_v33 = vpack.c.b16 %v3282_v34, %v3281_v25  ;;  %v2738_v26 = vsel %vm6525_vm13, %v5077_v37, %v2737_v31  ;;  %v4433_v59 = vadd.f32 %v7624_v9, %v7828_v56  ;;  %v5922_v25 = vld [vmem:[#allocation2 + $0xac] sm:$0xf]  ;;  %v1991_v9 = vld [vmem:[#allocation2 + $0xa8] sm:$0xe] }
 0x235   : > { %v4695_v22 = vadd.f32 %v4694_v44, %v4606_v4  ;;  %v4430_v44 = vadd.f32 %v7610_v60, %v7827_v8  ;;  %v4699_v62 = vpop.f32.mrf.mxu0  ;;  %v2499_v4 = vrot.slane %v2498_v40, 4  ;;  %v2509_v60 = vrot.slane %v2508_v52, 4 }
 0x236   : > { %v7640_v53 = vpop.f32.mrf.mxu1  ;;  %v2513_v8 = vrot.slane %v2511_v61, 5  ;;  %v3159_v63 = vpack.c.b16 %v3140_v47, %v3139_v45  ;;  %v2135_v34 = vrot.slane %v5922_v25, 5  ;;  %v3347_v61 = vunpack.c.l.b16 %v2738_v26 }
 0x237   : > { %v4831_v21 = vadd.f32 %v4830_v28, %v4695_v22  ;;  %v4869_v24 = vmul.f32 %v4695_v22, %v4695_v22  ;;  %4738 = vmatmul.bf16.gmra.mxu0 %v3366_v57  ;;  %v2740_v28 = vrot.slane %v2199_v27, 5  ;;  %v7658_v57 = vld [vmem:[#allocation2 + $0xb8] sm:$0xf]  ;;  %v2504_v31 = vsel %vm6501_vm10, %v2499_v4, %v7638_v32 }
 0x238   : > { %v4518_v54 = vpop.f32.mrf.mxu2  ;;  %v2514_v52 = vsel %vm6501_vm10, %v2509_v60, %v2513_v8 }
 0x239   : > { %v4900_v42 = vadd.f32 %v4899_v2, %v4869_v24  ;;  %v4519_v16 = vadd.f32 %v4518_v54, %v4430_v44  ;;  %v2181_v2 = vld [vmem:[#allocation2 + $0xb4] sm:$0xf]  ;;  %v2741_v27 = vsel %vm6525_vm13, %v2739_v19, %v2740_v28  ;;  %v2137_v19 = vrot.slane %v2135_v34, 4  ;;  %v5923_v28 = vld [vmem:[#allocation2 + $0xb0] sm:$0x1] }
 0x23a   : > { %v4607_v0 = vpop.f32.mrf.mxu3  ;;  %v2516_v37 = vshrl.u32 %v2181_v2, 16  ;;  %v2138_v32 = vrot.slane %v5923_v28, 5  ;;  %v3284_v26 = vunpack.c.l.b16 %v2514_v52  ;;  %v2744_v52 = vrot.slane %v7658_v57, 5 }
 0x23b   : > { %v4608_v5 = vadd.f32 %v4607_v0, %v4519_v16  ;;  %v2519_v16 = vshll.u32 %v2181_v2, 16  ;;  %v5062_v0 = vrot.slane %v1991_v9, 9 }
 0x23c   : > { %v2518_v4 = vrot.slane %v2516_v37, 4  ;;  %v2139_v56 = vsel %vm6525_vm13, %v2137_v19, %v2138_v32  ;;  %v2746_v32 = vrot.slane %v2744_v52, 4 }
 0x23d   : > { %v4697_v36 = vadd.f32 %v4696_v48, %v4608_v5  ;;  %4560 = vmatmul.bf16.gmra.mxu2 %v5608_v12  ;;  %v4701_v40 = vpop.f32.mrf.mxu0  ;;  %v2529_v5 = vshrl.u32 %v7658_v57, 16  ;;  %v2521_v60 = vrot.slane %v2519_v16, 5 }
 0x23e   : > { %v7654_v10 = vpop.f32.mrf.mxu1 }
 0x23f   : > { %v5762_v48 = vpack.c.bf16 %v4697_v36, %v4695_v22  ;;  %v4832_v24 = vadd.f32 %v4831_v21, %v4697_v36  ;;  %v4870_v44 = vmul.f32 %v4697_v36, %v4697_v36  ;;  %4649 = vmatmul.bf16.gmra.mxu3 %v3302_v33  ;;  %v3348_v22 = vunpack.c.l.b16 %v2741_v27 }
 0x240   : > { %v4521_v54 = vpop.f32.mrf.mxu2  ;;  %v2525_v21 = vshll.u32 %v7658_v57, 16  ;;  %v3283_v36 = vunpack.c.l.b16 %v2504_v31  ;;  %v2531_v27 = vrot.slane %v2529_v5, 4  ;;  %v2200_v31 = vld [vmem:[#allocation2 + $0xbc] sm:$0x1]  ;;  %v2522_v37 = vor.u32 %v2521_v60, %v2518_v4  ;;  %v2183_v60 = vld [vmem:[#allocation2 + $0xc0] sm:$0xf] }
 0x241   : > { %5845 = vst [vmem:[%s7591_s30 + $0x10] sm:$0xff] %v5762_v48   ;;  %v4901_v12 = vadd.f32 %v4900_v42, %v4870_v44  ;;  %v4522_v45 = vadd.f32 %v4521_v54, %v4433_v59  ;;  %4476 = vmatmul.bf16.gmra.mxu1 %v3159_v63  ;;  %v3367_v2 = vpack.c.b16 %v3348_v22, %v3347_v61  ;;  %v7829_v44 = vld [vmem:[#allocation18_spill] sm:$0xff]  ;;  %v2747_v5 = vrot.slane %v2200_v31, 5 }
 0x242   : > { %v4610_v47 = vpop.f32.mrf.mxu3  ;;  %v2136_v63 = vsel %vm6525_vm13, %v5062_v0, %v2135_v34  ;;  %v7674_v59 = vrot.slane %v2525_v21, 5  ;;  %v4435_v9 = vadd.f32 %v7640_v53, %v7829_v44  ;;  %v2600_v54 = vld [vmem:[#allocation2 + $0xb4] sm:$0xe]  ;;  %v3142_v21 = vunpack.c.l.b16 %v2139_v56 }
 0x243   : > { %v4611_v33 = vadd.f32 %v4610_v47, %v4522_v45  ;;  %v5609_v45 = vld [vmem:[#allocation2 + $0xa8] sm:$0xff]  ;;  %v3141_v22 = vunpack.c.l.b16 %v2136_v63  ;;  %v2535_v0 = vshll.u32 %v2200_v31, 16  ;;  %v5078_v19 = vrot.slane %v2600_v54, 9  ;;  %v7684_v63 = vld [vmem:[#allocation2 + $0xc4] sm:$0xf] }
 0x244   : > { %v3303_v28 = vpack.c.b16 %v3284_v26, %v3283_v36  ;;  %v4438_v57 = vadd.f32 %v7654_v10, %v7214_v51  ;;  %v2523_v4 = vrot.slane %v2522_v37, 4  ;;  %v5924_v26 = vld [vmem:[#allocation2 + $0xb8] sm:$0xf]  ;;  %v2748_v10 = vsel %vm6525_vm13, %v2746_v32, %v2747_v5  ;;  %v1992_v31 = vld [vmem:[#allocation2 + $0xb4] sm:$0xe] }
 0x245   : > { %v4700_v8 = vadd.f32 %v4699_v62, %v4611_v33  ;;  %v7678_v62 = vpop.f32.mrf.mxu0  ;;  %v2745_v36 = vsel %vm6525_vm13, %v5078_v19, %v2744_v52  ;;  %v2543_v37 = vshll.u32 %v2183_v60, 16  ;;  %v5925_v19 = vld [vmem:[#allocation2 + $0xbc] sm:$0x1] }
 0x246   : > { %v7668_v42 = vpop.f32.mrf.mxu1 }
 0x247   : > { %v4833_v25 = vadd.f32 %v4832_v24, %v4700_v8  ;;  %v4871_v48 = vmul.f32 %v4700_v8, %v4700_v8  ;;  %4743 = vmatmul.bf16.gmra.mxu0 %v3367_v2  ;;  %v2532_v24 = vor.u32 %v2531_v27, %v7674_v59  ;;  %v2537_v27 = vrot.slane %v2535_v0, 5 }
 0x248   : > { %v4523_v61 = vpop.f32.mrf.mxu2 }
 0x249   : > { %v4902_v34 = vadd.f32 %v4901_v12, %v4871_v48  ;;  %v4524_v16 = vadd.f32 %v4523_v61, %v4435_v9  ;;  %v3160_v12 = vpack.c.b16 %v3142_v21, %v3141_v22  ;;  %v2533_v2 = vrot.slane %v2532_v24, 4 }
 0x24a   : > { %v4612_v47 = vpop.f32.mrf.mxu3  ;;  %v2142_v48 = vrot.slane %v5924_v26, 5  ;;  %v2540_v61 = vshrl.u32 %v2183_v60, 16  ;;  %v5063_v24 = vrot.slane %v1992_v31, 9  ;;  %v4440_v31 = vadd.f32 %v7668_v42, %v7224_v46 }
 0x24b   : > { %v4613_v53 = vadd.f32 %v4612_v47, %v4524_v16  ;;  %v2549_v16 = vshll.u32 %v7684_v63, 16  ;;  %v3350_v47 = vunpack.c.l.b16 %v2748_v10  ;;  %v2538_v32 = vsel %vm6501_vm10, %v2533_v2, %v2537_v27 }
 0x24c   : > { %v2144_v0 = vrot.slane %v2142_v48, 4  ;;  %v2542_v5 = vrot.slane %v2540_v61, 4  ;;  %v2751_v2 = vrot.slane %v7684_v63, 5 }
 0x24d   : > { %v4702_v33 = vadd.f32 %v4701_v40, %v4613_v53  ;;  %4565 = vmatmul.bf16.gmra.mxu2 %v5609_v45  ;;  %v4706_v51 = vpop.f32.mrf.mxu0  ;;  %v2553_v45 = vshrl.u32 %v7684_v63, 16  ;;  %v2145_v53 = vrot.slane %v5925_v19, 5 }
 0x24e   : > { %v7686_v56 = vpop.f32.mrf.mxu1  ;;  %v2753_v63 = vrot.slane %v2751_v2, 4 }
 0x24f   : > { %v5767_v40 = vpack.c.bf16 %v4702_v33, %v4700_v8  ;;  %v4834_v44 = vadd.f32 %v4833_v25, %v4702_v33  ;;  %v4872_v9 = vmul.f32 %v4702_v33, %v4702_v33  ;;  %4654 = vmatmul.bf16.gmra.mxu3 %v3303_v28  ;;  %v2528_v8 = vsel %vm6501_vm10, %v2523_v4, %v7674_v59  ;;  %v2201_v59 = vld [vmem:[#allocation2 + $0xc8] sm:$0x1]  ;;  %v2601_v4 = vld [vmem:[#allocation2 + $0xc0] sm:$0xe] }
 0x250   : > { %v4526_v54 = vpop.f32.mrf.mxu2  ;;  %v3349_v25 = vunpack.c.l.b16 %v2745_v36  ;;  %v2545_v33 = vrot.slane %v2543_v37, 5  ;;  %v3285_v60 = vunpack.c.l.b16 %v2528_v8 }
 0x251   : > { %5846 = vst [vmem:[%s7591_s30 + $0x18] sm:$0xff] %v5767_v40   ;;  %v4903_v52 = vadd.f32 %v4902_v34, %v4872_v9  ;;  %v4527_v22 = vadd.f32 %v4526_v54, %v4438_v57  ;;  %4481 = vmatmul.bf16.gmra.mxu1 %v3160_v12  ;;  %v7700_v34 = vrot.slane %v2549_v16, 5  ;;  %v2555_v57 = vrot.slane %v2553_v45, 4 }
 0x252   : > { %v4615_v21 = vpop.f32.mrf.mxu3  ;;  %v3368_v36 = vpack.c.b16 %v3350_v47, %v3349_v25  ;;  %v2143_v40 = vsel %vm6525_vm13, %v5063_v24, %v2142_v48  ;;  %v2146_v9 = vsel %vm6525_vm13, %v2144_v0, %v2145_v53  ;;  %v3286_v54 = vunpack.c.l.b16 %v2538_v32  ;;  %v5610_v25 = vld [vmem:[#allocation2 + $0xb4] sm:$0xff] }
 0x253   : > { %v4616_v28 = vadd.f32 %v4615_v21, %v4527_v22  ;;  %v2546_v37 = vor.u32 %v2545_v33, %v2542_v5  ;;  %v2556_v16 = vor.u32 %v2555_v57, %v7700_v34  ;;  %v2559_v45 = vshll.u32 %v2201_v59, 16  ;;  %v5926_v57 = vld [vmem:[#allocation2 + $0xc4] sm:$0xf] }
 0x254   : > { %v5079_v22 = vrot.slane %v2601_v4, 9  ;;  %v3143_v21 = vunpack.c.l.b16 %v2143_v40  ;;  %v3144_v47 = vunpack.c.l.b16 %v2146_v9  ;;  %v3304_v19 = vpack.c.b16 %v3286_v54, %v3285_v60 }
 0x255   : > { %v4705_v12 = vadd.f32 %v7678_v62, %v4616_v28  ;;  %v4709_v62 = vpop.f32.mrf.mxu0  ;;  %v2547_v46 = vrot.slane %v2546_v37, 4  ;;  %v2557_v42 = vrot.slane %v2556_v16, 4  ;;  %v2561_v53 = vrot.slane %v2559_v45, 5  ;;  %v2186_v16 = vld [vmem:[#allocation2 + $0xd0] sm:$0xf] }
 0x256   : > { %v7703_v26 = vpop.f32.mrf.mxu1  ;;  %v3161_v32 = vpack.c.b16 %v3144_v47, %v3143_v21  ;;  %v2752_v5 = vsel %vm6525_vm13, %v5079_v22, %v2751_v2  ;;  %v2149_v4 = vrot.slane %v5926_v57, 5 }
 0x257   : > { %v4835_v27 = vadd.f32 %v4834_v44, %v4705_v12  ;;  %v4873_v10 = vmul.f32 %v4705_v12, %v4705_v12  ;;  %4748 = vmatmul.bf16.gmra.mxu0 %v3368_v36  ;;  %v2754_v44 = vrot.slane %v2201_v59, 5  ;;  %v2185_v59 = vld [vmem:[#allocation2 + $0xcc] sm:$0xf]  ;;  %v2552_v2 = vsel %vm6501_vm10, %v2547_v46, %v7700_v34 }
 0x258   : > { %v4528_v61 = vpop.f32.mrf.mxu2  ;;  %v2562_v54 = vsel %vm6501_vm10, %v2557_v42, %v2561_v53  ;;  %v2564_v45 = vshrl.u32 %v2185_v59, 16  ;;  %v2151_v22 = vrot.slane %v2149_v4, 4  ;;  %v2567_v21 = vshll.u32 %v2185_v59, 16  ;;  %v2602_v59 = vld [vmem:[#allocation2 + $0xcc] sm:$0xe] }
 0x259   : > { %v4904_v8 = vadd.f32 %v4903_v52, %v4873_v10  ;;  %v4529_v48 = vadd.f32 %v4528_v61, %v4440_v31  ;;  %v2755_v33 = vsel %vm6525_vm13, %v2753_v63, %v2754_v44  ;;  %v1993_v10 = vld [vmem:[#allocation2 + $0xc0] sm:$0xe]  ;;  %v3351_v61 = vunpack.c.l.b16 %v2752_v5 }
 0x25a   : > { %v4617_v24 = vpop.f32.mrf.mxu3  ;;  %v2577_v34 = vshrl.u32 %v2186_v16, 16  ;;  %v3287_v44 = vunpack.c.l.b16 %v2552_v2  ;;  %v2566_v53 = vrot.slane %v2564_v45, 4  ;;  %v5611_v2 = vld [vmem:[#allocation2 + $0xc0] sm:$0xff] }
 0x25b   : > { %v4618_v0 = vadd.f32 %v4617_v24, %v4529_v48  ;;  %v5927_v48 = vld [vmem:[#allocation2 + $0xc8] sm:$0x1]  ;;  %v2573_v24 = vshll.u32 %v2186_v16, 16 }
 0x25d   : > { %v4707_v28 = vadd.f32 %v4706_v51, %v4618_v0  ;;  %4570 = vmatmul.bf16.gmra.mxu2 %v5610_v25  ;;  %v4443_v51 = vadd.f32 %v7686_v56, %v7247_v17  ;;  %v4711_v9 = vpop.f32.mrf.mxu0  ;;  %v5064_v56 = vrot.slane %v1993_v10, 9  ;;  %v2152_v25 = vrot.slane %v5927_v48, 5 }
 0x25e   : > { %v7715_v52 = vpop.f32.mrf.mxu1  ;;  %v3288_v0 = vunpack.c.l.b16 %v2562_v54 }
 0x25f   : > { %v5772_v36 = vpack.c.bf16 %v4707_v28, %v4705_v12  ;;  %v4836_v60 = vadd.f32 %v4835_v27, %v4707_v28  ;;  %v4874_v40 = vmul.f32 %v4707_v28, %v4707_v28  ;;  %4659 = vmatmul.bf16.gmra.mxu3 %v3304_v19  ;;  %v3352_v27 = vunpack.c.l.b16 %v2755_v33 }
 0x260   : > { %v4531_v31 = vpop.f32.mrf.mxu2  ;;  %v2153_v42 = vsel %vm6525_vm13, %v2151_v22, %v2152_v25  ;;  %v2569_v28 = vrot.slane %v2567_v21, 5  ;;  %v4445_v33 = vadd.f32 %v7703_v26, %v7264_v35 }
 0x261   : > { %5847 = vst [vmem:[%s7591_s30 + $0x20] sm:$0xff] %v5772_v36   ;;  %v4905_v37 = vadd.f32 %v4904_v8, %v4874_v40  ;;  %v4532_v12 = vadd.f32 %v4531_v31, %v4443_v51  ;;  %4486 = vmatmul.bf16.gmra.mxu1 %v3161_v32  ;;  %v3369_v19 = vpack.c.b16 %v3352_v27, %v3351_v61  ;;  %v2575_v40 = vrot.slane %v2573_v24, 5  ;;  %v2202_v61 = vld [vmem:[#allocation2 + $0xd4] sm:$0x1] }
 0x262   : > { %v4620_v17 = vpop.f32.mrf.mxu3  ;;  %v2150_v8 = vsel %vm6525_vm13, %v5064_v56, %v2149_v4  ;;  %v2579_v51 = vrot.slane %v2577_v34, 4  ;;  %v3146_v54 = vunpack.c.l.b16 %v2153_v42  ;;  %v2570_v27 = vor.u32 %v2569_v28, %v2566_v53 }
 0x263   : > { %v4621_v47 = vadd.f32 %v4620_v17, %v4532_v12  ;;  %v3145_v4 = vunpack.c.l.b16 %v2150_v8  ;;  %v3305_v17 = vpack.c.b16 %v3288_v0, %v3287_v44  ;;  %v2761_v35 = vrot.slane %v2202_v61, 5 }
 0x264   : > { %v2580_v26 = vor.u32 %v2579_v51, %v2575_v40  ;;  %v2583_v22 = vshll.u32 %v2202_v61, 16  ;;  %v2571_v21 = vrot.slane %v2570_v27, 4  ;;  %v5612_v27 = vld [vmem:[#allocation2 + $0xcc] sm:$0xff] }
 0x265   : > { %v4710_v63 = vadd.f32 %v4709_v62, %v4621_v47  ;;  %v4714_v57 = vpop.f32.mrf.mxu0  ;;  %v2758_v62 = vrot.slane %v2186_v16, 5  ;;  %v3162_v48 = vpack.c.b16 %v3146_v54, %v3145_v4 }
 0x266   : > { %v4449_v46 = vpop.f32.mrf.mxu1  ;;  %v2581_v8 = vrot.slane %v2580_v26, 4  ;;  %v2585_v42 = vrot.slane %v2583_v22, 5 }
 0x267   : > { %v4837_v32 = vadd.f32 %v4836_v60, %v4710_v63  ;;  %v4875_v5 = vmul.f32 %v4710_v63, %v4710_v63  ;;  %4753 = vmatmul.bf16.gmra.mxu0 %v3369_v19  ;;  %v5080_v60 = vrot.slane %v2602_v59, 9  ;;  %v2760_v56 = vrot.slane %v2758_v62, 4 }
 0x268   : > { %v4533_v36 = vpop.f32.mrf.mxu2 }
 0x269   : > { %v4906_v10 = vadd.f32 %v4905_v37, %v4875_v5  ;;  %v4534_v31 = vadd.f32 %v4533_v36, %v4445_v33  ;;  %v4448_v37 = vadd.f32 %v7715_v52, %v7276_v18  ;;  %v2759_v47 = vsel %vm6525_vm13, %v5080_v60, %v2758_v62 }
 0x26a   : > { %v4622_v12 = vpop.f32.mrf.mxu3  ;;  %v2762_v0 = vsel %vm6525_vm13, %v2760_v56, %v2761_v35  ;;  %v3353_v52 = vunpack.c.l.b16 %v2759_v47 }
 0x26b   : > { %v4623_v45 = vadd.f32 %v4622_v12, %v4534_v31  ;;  %v3354_v5 = vunpack.c.l.b16 %v2762_v0 }
 0x26d   : > { %v4712_v16 = vadd.f32 %v4711_v9, %v4623_v45  ;;  %4575 = vmatmul.bf16.gmra.mxu2 %v5611_v2  ;;  %v4716_v44 = vpop.f32.mrf.mxu0  ;;  %v3370_v62 = vpack.c.b16 %v3354_v5, %v3353_v52 }
 0x26e   : > { %v4452_v25 = vpop.f32.mrf.mxu1 }
 0x26f   : > { %v5777_v24 = vpack.c.bf16 %v4712_v16, %v4710_v63  ;;  %v4838_v34 = vadd.f32 %v4837_v32, %v4712_v16  ;;  %v4876_v19 = vmul.f32 %v4712_v16, %v4712_v16  ;;  %4664 = vmatmul.bf16.gmra.mxu3 %v3305_v17  ;;  %v2576_v63 = vsel %vm6501_vm10, %v2571_v21, %v2575_v40 }
 0x270   : > { %v4536_v9 = vpop.f32.mrf.mxu2  ;;  %v2586_v32 = vsel %vm6501_vm10, %v2581_v8, %v2585_v42  ;;  %v3289_v14 = vunpack.c.l.b16 %v2576_v63  ;;  %v4453_v26 = vadd.f32 %v4452_v25, %v7306_v58 }
 0x271   : > { %5848 = vst [vmem:[%s7591_s30 + $0x28] sm:$0xff] %v5777_v24   ;;  %v4907_v53 = vadd.f32 %v4906_v10, %v4876_v19  ;;  %v4537_v28 = vadd.f32 %v4536_v9, %v4448_v37  ;;  %4491 = vmatmul.bf16.gmra.mxu1 %v3162_v48  ;;  %v4450_v10 = vadd.f32 %v4449_v46, %v7287_v6  ;;  %v3290_v4 = vunpack.c.l.b16 %v2586_v32 }
 0x272   : > { %v4625_v18 = vpop.f32.mrf.mxu3 }
 0x273   : > { %v4626_v33 = vadd.f32 %v4625_v18, %v4537_v28  ;;  %v3306_v13 = vpack.c.b16 %v3290_v4, %v3289_v14 }
 0x275   : > { %v4715_v59 = vadd.f32 %v4714_v57, %v4626_v33  ;;  %v4719_v2 = vpop.f32.mrf.mxu0 }
 0x276   : > { %v4454_v36 = vpop.f32.mrf.mxu1 }
 0x277   : > { %v4839_v51 = vadd.f32 %v4838_v34, %v4715_v59  ;;  %v4877_v31 = vmul.f32 %v4715_v59, %v4715_v59  ;;  %4758 = vmatmul.bf16.gmra.mxu0 %v3370_v62  ;;  %v4455_v19 = vadd.f32 %v4454_v36, %v7320_v23 }
 0x278   : > { %v4538_v54 = vpop.f32.mrf.mxu2 }
 0x279   : > { %v4908_v61 = vadd.f32 %v4907_v53, %v4877_v31  ;;  %v4539_v12 = vadd.f32 %v4538_v54, %v4450_v10 }
 0x27a   : > { %v4627_v60 = vpop.f32.mrf.mxu3 }
 0x27b   : > { %v4628_v40 = vadd.f32 %v4627_v60, %v4539_v12 }
 0x27d   : > { %v4717_v45 = vadd.f32 %v4716_v44, %v4628_v40  ;;  %4580 = vmatmul.bf16.gmra.mxu2 %v5612_v27  ;;  %v4721_v6 = vpop.f32.mrf.mxu0 }
 0x27e   : > { %v4457_v57 = vpop.f32.mrf.mxu1 }
 0x27f   : > { %v5782_v17 = vpack.c.bf16 %v4717_v45, %v4715_v59  ;;  %v4840_v56 = vadd.f32 %v4839_v51, %v4717_v45  ;;  %v4878_v35 = vmul.f32 %v4717_v45, %v4717_v45  ;;  %4669 = vmatmul.bf16.gmra.mxu3 %v3306_v13  ;;  %v4458_v5 = vadd.f32 %v4457_v57, %v7333_v20 }
 0x280   : > { %v4541_v46 = vpop.f32.mrf.mxu2 }
 0x281   : > { %5849 = vst [vmem:[%s7591_s30 + $0x30] sm:$0xff] %v5782_v17   ;;  %v4909_v22 = vadd.f32 %v4908_v61, %v4878_v35  ;;  %v4542_v16 = vadd.f32 %v4541_v46, %v4453_v26 }
 0x282   : > { %v4630_v48 = vpop.f32.mrf.mxu3 }
 0x283   : > { %v4631_v37 = vadd.f32 %v4630_v48, %v4542_v16 }
 0x285   : > { %v4720_v21 = vadd.f32 %v4719_v2, %v4631_v37  ;;  %v4724_v44 = vpop.f32.mrf.mxu0 }
 0x286   : > { %v4459_v47 = vpop.f32.mrf.mxu1 }
 0x287   : > { %v4841_v24 = vadd.f32 %v4840_v56, %v4720_v21  ;;  %v4879_v34 = vmul.f32 %v4720_v21, %v4720_v21  ;;  %v4460_v10 = vadd.f32 %v4459_v47, %v7348_v41 }
 0x288   : > { %v4543_v0 = vpop.f32.mrf.mxu2 }
 0x289   : > { %v4910_v9 = vadd.f32 %v4909_v22, %v4879_v34  ;;  %v4544_v8 = vadd.f32 %v4543_v0, %v4455_v19 }
 0x28a   : > { %v4632_v58 = vpop.f32.mrf.mxu3 }
 0x28b   : > { %v4633_v25 = vadd.f32 %v4632_v58, %v4544_v8 }
 0x28d   : > { %v4722_v42 = vadd.f32 %v4721_v6, %v4633_v25  ;;  %v4726_v33 = vpop.f32.mrf.mxu0 }
 0x28e   : > { %v4462_v53 = vpop.f32.mrf.mxu1 }
 0x28f   : > { %v5787_v28 = vpack.c.bf16 %v4722_v42, %v4720_v21  ;;  %v4842_v18 = vadd.f32 %v4841_v24, %v4722_v42  ;;  %v4880_v52 = vmul.f32 %v4722_v42, %v4722_v42  ;;  %v4463_v57 = vadd.f32 %v4462_v53, %v7367_v55 }
 0x290   : > { %v4546_v63 = vpop.f32.mrf.mxu2 }
 0x291   : > { %5850 = vst [vmem:[%s7591_s30 + $0x38] sm:$0xff] %v5787_v28   ;;  %v4911_v32 = vadd.f32 %v4910_v9, %v4880_v52  ;;  %v4547_v59 = vadd.f32 %v4546_v63, %v4458_v5 }
 0x292   : > { %v4635_v14 = vpop.f32.mrf.mxu3 }
 0x293   : > { %v4636_v23 = vadd.f32 %v4635_v14, %v4547_v59 }
 0x295   : > { %v4725_v62 = vadd.f32 %v4724_v44, %v4636_v23  ;;  %v4729_v2 = vpop.f32.mrf.mxu0 }
 0x296   : > { %v4464_v36 = vpop.f32.mrf.mxu1 }
 0x297   : > { %v4843_v51 = vadd.f32 %v4842_v18, %v4725_v62  ;;  %v4881_v31 = vmul.f32 %v4725_v62, %v4725_v62  ;;  %v4465_v37 = vadd.f32 %v4464_v36, %v7381_v49 }
 0x298   : > { %v4548_v4 = vpop.f32.mrf.mxu2 }
 0x299   : > { %v4912_v54 = vadd.f32 %v4911_v32, %v4881_v31  ;;  %v4549_v61 = vadd.f32 %v4548_v4, %v4460_v10 }
 0x29a   : > { %v4637_v12 = vpop.f32.mrf.mxu3 }
 0x29b   : > { %v4638_v20 = vadd.f32 %v4637_v12, %v4549_v61 }
 0x29d   : > { %v4727_v27 = vadd.f32 %v4726_v33, %v4638_v20  ;;  %v4731_v17 = vpop.f32.mrf.mxu0 }
 0x29e   : > { %v4467_v60 = vpop.f32.mrf.mxu1 }
 0x29f   : > { %v5792_v40 = vpack.c.bf16 %v4727_v27, %v4725_v62  ;;  %v4844_v13 = vadd.f32 %v4843_v51, %v4727_v27  ;;  %v4882_v45 = vmul.f32 %v4727_v27, %v4727_v27  ;;  %v4468_v25 = vadd.f32 %v4467_v60, %v7394_v1 }
 0x2a0   : > { %v4551_v56 = vpop.f32.mrf.mxu2 }
 0x2a1   : > { %5851 = vst [vmem:[%s7591_s30 + $0x40] sm:$0xff] %v5792_v40   ;;  %v4913_v35 = vadd.f32 %v4912_v54, %v4882_v45  ;;  %v4552_v26 = vadd.f32 %v4551_v56, %v4463_v57 }
 0x2a2   : > { %v4640_v6 = vpop.f32.mrf.mxu3 }
 0x2a3   : > { %v4641_v41 = vadd.f32 %v4640_v6, %v4552_v26 }
 0x2a5   : > { %v4730_v46 = vadd.f32 %v4729_v2, %v4641_v41  ;;  %v4734_v21 = vpop.f32.mrf.mxu0 }
 0x2a6   : > { %v4469_v22 = vpop.f32.mrf.mxu1 }
 0x2a7   : > { %v4845_v16 = vadd.f32 %v4844_v13, %v4730_v46  ;;  %v4883_v48 = vmul.f32 %v4730_v46, %v4730_v46  ;;  %v4470_v59 = vadd.f32 %v4469_v22, %v7409_v30 }
 0x2a8   : > { %v4553_v47 = vpop.f32.mrf.mxu2 }
 0x2a9   : > { %v4914_v24 = vadd.f32 %v4913_v35, %v4883_v48  ;;  %v4554_v34 = vadd.f32 %v4553_v47, %v4465_v37 }
 0x2aa   : > { %v4642_v19 = vpop.f32.mrf.mxu3 }
 0x2ab   : > { %v4643_v55 = vadd.f32 %v4642_v19, %v4554_v34 }
 0x2ad   : > { %v4732_v44 = vadd.f32 %v4731_v17, %v4643_v55  ;;  %v4736_v42 = vpop.f32.mrf.mxu0 }
 0x2ae   : > { %v4472_v0 = vpop.f32.mrf.mxu1 }
 0x2af   : > { %v5797_v9 = vpack.c.bf16 %v4732_v44, %v4730_v46  ;;  %v4846_v8 = vadd.f32 %v4845_v16, %v4732_v44  ;;  %v4884_v58 = vmul.f32 %v4732_v44, %v4732_v44  ;;  %v4473_v61 = vadd.f32 %v4472_v0, %v7428_v3 }
 0x2b0   : > { %v4556_v53 = vpop.f32.mrf.mxu2 }
 0x2b1   : > { %5852 = vst [vmem:[%s7591_s30 + $0x48] sm:$0xff] %v5797_v9   ;;  %v4915_v28 = vadd.f32 %v4914_v24, %v4884_v58  ;;  %v4557_v18 = vadd.f32 %v4556_v53, %v4468_v25 }
 0x2b2   : > { %v4645_v52 = vpop.f32.mrf.mxu3 }
 0x2b3   : > { %v4646_v49 = vadd.f32 %v4645_v52, %v4557_v18 }
 0x2b5   : > { %v4735_v5 = vadd.f32 %v4734_v21, %v4646_v49  ;;  %v4739_v14 = vpop.f32.mrf.mxu0 }
 0x2b6   : > { %v4474_v33 = vpop.f32.mrf.mxu1 }
 0x2b7   : > { %v4847_v63 = vadd.f32 %v4846_v8, %v4735_v5  ;;  %v4885_v32 = vmul.f32 %v4735_v5, %v4735_v5  ;;  %v4475_v17 = vadd.f32 %v4474_v33, %v7442_v38 }
 0x2b8   : > { %v4558_v23 = vpop.f32.mrf.mxu2 }
 0x2b9   : > { %v4916_v62 = vadd.f32 %v4915_v28, %v4885_v32  ;;  %v4559_v36 = vadd.f32 %v4558_v23, %v4470_v59 }
 0x2ba   : > { %v4647_v51 = vpop.f32.mrf.mxu3 }
 0x2bb   : > { %v4648_v1 = vadd.f32 %v4647_v51, %v4559_v36 }
 0x2bd   : > { %v4737_v31 = vadd.f32 %v4736_v42, %v4648_v1  ;;  %v4741_v12 = vpop.f32.mrf.mxu0 }
 0x2be   : > { %v4477_v10 = vpop.f32.mrf.mxu1 }
 0x2bf   : > { %v5802_v2 = vpack.c.bf16 %v4737_v31, %v4735_v5  ;;  %v4848_v4 = vadd.f32 %v4847_v63, %v4737_v31  ;;  %v4886_v54 = vmul.f32 %v4737_v31, %v4737_v31  ;;  %v4478_v21 = vadd.f32 %v4477_v10, %v7455_v7 }
 0x2c0   : > { %v4561_v20 = vpop.f32.mrf.mxu2 }
 0x2c1   : > { %5853 = vst [vmem:[%s7591_s30 + $0x50] sm:$0xff] %v5802_v2   ;;  %v4917_v27 = vadd.f32 %v4916_v62, %v4886_v54  ;;  %v4562_v60 = vadd.f32 %v4561_v20, %v4473_v61 }
 0x2c2   : > { %v4650_v40 = vpop.f32.mrf.mxu3 }
 0x2c3   : > { %v4651_v30 = vadd.f32 %v4650_v40, %v4562_v60 }
 0x2c5   : > { %v4740_v13 = vadd.f32 %v4739_v14, %v4651_v30  ;;  %v4744_v56 = vpop.f32.mrf.mxu0 }
 0x2c6   : > { %v4479_v26 = vpop.f32.mrf.mxu1 }
 0x2c7   : > { %v4849_v45 = vadd.f32 %v4848_v4, %v4740_v13  ;;  %v4887_v57 = vmul.f32 %v4740_v13, %v4740_v13  ;;  %v4480_v58 = vadd.f32 %v4479_v26, %v7470_v11 }
 0x2c8   : > { %v4563_v35 = vpop.f32.mrf.mxu2 }
 0x2c9   : > { %v4918_v6 = vadd.f32 %v4917_v27, %v4887_v57  ;;  %v4564_v41 = vadd.f32 %v4563_v35, %v4475_v17 }
 0x2ca   : > { %v4652_v46 = vpop.f32.mrf.mxu3 }
 0x2cb   : > { %v4653_v3 = vadd.f32 %v4652_v46, %v4564_v41 }
 0x2cd   : > { %v4742_v22 = vadd.f32 %v4741_v12, %v4653_v3  ;;  %v4746_v24 = vpop.f32.mrf.mxu0 }
 0x2ce   : > { %v4482_v38 = vpop.f32.mrf.mxu1 }
 0x2cf   : > { %v5807_v16 = vpack.c.bf16 %v4742_v22, %v4740_v13  ;;  %v4850_v48 = vadd.f32 %v4849_v45, %v4742_v22  ;;  %v4888_v37 = vmul.f32 %v4742_v22, %v4742_v22  ;;  %v4483_v32 = vadd.f32 %v4482_v38, %v7489_v29 }
 0x2d0   : > { %v4566_v47 = vpop.f32.mrf.mxu2 }
 0x2d1   : > { %5854 = vst [vmem:[%s7591_s30 + $0x58] sm:$0xff] %v5807_v16   ;;  %v4919_v34 = vadd.f32 %v4918_v6, %v4888_v37  ;;  %v4567_v19 = vadd.f32 %v4566_v47, %v4478_v21 }
 0x2d2   : > { %v4655_v55 = vpop.f32.mrf.mxu3 }
 0x2d3   : > { %v4656_v44 = vadd.f32 %v4655_v55, %v4567_v19 }
 0x2d5   : > { %v4745_v0 = vadd.f32 %v4744_v56, %v4656_v44  ;;  %v4749_v18 = vpop.f32.mrf.mxu0 }
 0x2d6   : > { %v4484_v52 = vpop.f32.mrf.mxu1 }
 0x2d7   : > { %v4851_v9 = vadd.f32 %v4850_v48, %v4745_v0  ;;  %v4889_v8 = vmul.f32 %v4745_v0, %v4745_v0  ;;  %v4485_v2 = vadd.f32 %v4484_v52, %v7503_v15 }
 0x2d8   : > { %v4568_v25 = vpop.f32.mrf.mxu2 }
 0x2d9   : > { %v4920_v42 = vadd.f32 %v4919_v34, %v4889_v8  ;;  %v4569_v53 = vadd.f32 %v4568_v25, %v4480_v58 }
 0x2da   : > { %v4657_v28 = vpop.f32.mrf.mxu3 }
 0x2db   : > { %v4658_v7 = vadd.f32 %v4657_v28, %v4569_v53  ;;  %v7830_v28 = vld [vmem:[#allocation7_spill] sm:$0xff] }
 0x2dd   : > { %v4747_v49 = vadd.f32 %v4746_v24, %v4658_v7  ;;  %v4751_v11 = vpop.f32.mrf.mxu0 }
 0x2de   : > { %v4487_v1 = vpop.f32.mrf.mxu1 }
 0x2df   : > { %v5812_v5 = vpack.c.bf16 %v4747_v49, %v4745_v0  ;;  %v4852_v33 = vadd.f32 %v4851_v9, %v4747_v49  ;;  %v4890_v63 = vmul.f32 %v4747_v49, %v4747_v49  ;;  %v4488_v13 = vadd.f32 %v4487_v1, %v7516_v50 }
 0x2e0   : > { %v4571_v59 = vpop.f32.mrf.mxu2 }
 0x2e1   : > { %5855 = vst [vmem:[%s7591_s30 + $0x60] sm:$0xff] %v5812_v5   ;;  %v4921_v14 = vadd.f32 %v4920_v42, %v4890_v63  ;;  %v4572_v23 = vadd.f32 %v4571_v59, %v4483_v32 }
 0x2e2   : > { %v4660_v62 = vpop.f32.mrf.mxu3 }
 0x2e3   : > { %v4661_v36 = vadd.f32 %v4660_v62, %v4572_v23 }
 0x2e5   : > { %v4750_v51 = vadd.f32 %v4749_v18, %v4661_v36  ;;  %v4754_v27 = vpop.f32.mrf.mxu0 }
 0x2e6   : > { %v4489_v57 = vpop.f32.mrf.mxu1 }
 0x2e7   : > { %v4853_v31 = vadd.f32 %v4852_v33, %v4750_v51  ;;  %v4891_v10 = vmul.f32 %v4750_v51, %v4750_v51  ;;  %v4490_v46 = vadd.f32 %v4489_v57, %v7526_v39 }
 0x2e8   : > { %v4573_v4 = vpop.f32.mrf.mxu2 }
 0x2e9   : > { %v4922_v54 = vadd.f32 %v4921_v14, %v4891_v10  ;;  %v4574_v61 = vadd.f32 %v4573_v4, %v4485_v2 }
 0x2ea   : > { %v4662_v12 = vpop.f32.mrf.mxu3 }
 0x2eb   : > { %v4663_v20 = vadd.f32 %v4662_v12, %v4574_v61 }
 0x2ed   : > { %v4752_v29 = vadd.f32 %v4751_v11, %v4663_v20  ;;  %v4756_v3 = vpop.f32.mrf.mxu0 }
 0x2ee   : > { %v4492_v21 = vpop.f32.mrf.mxu1 }
 0x2ef   : > { %v5817_v60 = vpack.c.bf16 %v4752_v29, %v4750_v51  ;;  %v4854_v40 = vadd.f32 %v4853_v31, %v4752_v29  ;;  %v4892_v30 = vmul.f32 %v4752_v29, %v4752_v29  ;;  %v4493_v55 = vadd.f32 %v4492_v21, %v7540_v43 }
 0x2f0   : > { %v4576_v45 = vpop.f32.mrf.mxu2 }
 0x2f1   : > { %5856 = vst [vmem:[%s7591_s30 + $0x68] sm:$0xff] %v5817_v60   ;;  %v4923_v17 = vadd.f32 %v4922_v54, %v4892_v30  ;;  %v4577_v56 = vadd.f32 %v4576_v45, %v4488_v13 }
 0x2f2   : > { %v4665_v35 = vpop.f32.mrf.mxu3 }
 0x2f3   : > { %v4666_v26 = vadd.f32 %v4665_v35, %v4577_v56 }
 0x2f5   : > { %v4755_v15 = vadd.f32 %v4754_v27, %v4666_v26  ;;  %v4759_v9 = vpop.f32.mrf.mxu0 }
 0x2f6   : > { %v4494_v58 = vpop.f32.mrf.mxu1 }
 0x2f7   : > { %v4855_v6 = vadd.f32 %v4854_v40, %v4755_v15  ;;  %v4893_v41 = vmul.f32 %v4755_v15, %v4755_v15  ;;  %v4495_v18 = vadd.f32 %v4494_v58, %v7830_v28 }
 0x2f8   : > { %v4578_v22 = vpop.f32.mrf.mxu2 }
 0x2f9   : > { %v4924_v16 = vadd.f32 %v4923_v17, %v4893_v41  ;;  %v4579_v48 = vadd.f32 %v4578_v22, %v4490_v46 }
 0x2fa   : > { %v4667_v37 = vpop.f32.mrf.mxu3 }
 0x2fb   : > { %v4668_v50 = vadd.f32 %v4667_v37, %v4579_v48 }
 0x2fd   : > { %v4757_v47 = vadd.f32 %v4756_v3, %v4668_v50  ;;  %v4761_v43 = vpop.f32.mrf.mxu0 }
 0x2ff   : > { %v5822_v24 = vpack.c.bf16 %v4757_v47, %v4755_v15  ;;  %v4856_v34 = vadd.f32 %v4855_v6, %v4757_v47  ;;  %v4894_v19 = vmul.f32 %v4757_v47, %v4757_v47 }
 0x300   : > { %v4581_v38 = vpop.f32.mrf.mxu2 }
 0x301   : > { %5857 = vst [vmem:[%s7591_s30 + $0x70] sm:$0xff] %v5822_v24   ;;  %v4925_v44 = vadd.f32 %v4924_v16, %v4894_v19  ;;  %v4582_v0 = vadd.f32 %v4581_v38, %v4493_v55 }
 0x302   : > { %v4670_v8 = vpop.f32.mrf.mxu3 }
 0x303   : > { %v4671_v39 = vadd.f32 %v4670_v8, %v4582_v0 }
 0x305   : > { %v4760_v25 = vadd.f32 %v4759_v9, %v4671_v39 }
 0x307   : > { %v4857_v42 = vadd.f32 %v4856_v34, %v4760_v25  ;;  %v4895_v53 = vmul.f32 %v4760_v25, %v4760_v25 }
 0x308   : > { %v4583_v7 = vpop.f32.mrf.mxu2 }
 0x309   : > { %v4926_v52 = vadd.f32 %v4925_v44, %v4895_v53  ;;  %v4584_v49 = vadd.f32 %v4583_v7, %v4495_v18 }
 0x30a   : > { %v4672_v5 = vpop.f32.mrf.mxu3 }
 0x30b   : > { %v4673_v33 = vadd.f32 %v4672_v5, %v4584_v49 }
 0x30d   : > { %v4762_v63 = vadd.f32 %v4761_v43, %v4673_v33 }
 0x30f   : > { %v5827_v32 = vpack.c.bf16 %v4762_v63, %v4760_v25  ;;  %v4858_v59 = vadd.f32 %v4857_v42, %v4762_v63  ;;  %v4896_v14 = vmul.f32 %v4762_v63, %v4762_v63 }
 0x311   : > { %5858 = vst [vmem:[%s7591_s30 + $0x78] sm:$0xff] %v5827_v32   ;;  %v4859_v23 = vrot.slane %v4858_v59, 4  ;;  %v4927_v62 = vadd.f32 %v4926_v52, %v4896_v14 }
 0x313   : > { %v4860_v36 = vadd.f32 %v4859_v23, %v4858_v59  ;;  %v4928_v11 = vrot.slane %v4927_v62, 4 }
 0x315   : > { %v4861_v51 = vrot.slane %v4860_v36, 2  ;;  %v4929_v1 = vadd.f32 %v4928_v11, %v4927_v62 }
 0x317   : > { %v4862_v31 = vadd.f32 %v4861_v51, %v4860_v36  ;;  %v4930_v10 = vrot.slane %v4929_v1, 2 }
 0x319   : > { %v4863_v2 = vrot.slane %v4862_v31, 1  ;;  %v4931_v4 = vadd.f32 %v4930_v10, %v4929_v1 }
 0x31b   : > { %v4932_v54 = vrot.slane %v4931_v4, 1  ;;  %v4864_v61 = vadd.f32 %v4863_v2, %v4862_v31 }
 0x31d   : > { %v4933_v12 = vadd.f32 %v4932_v54, %v4931_v4 }
 0x31f   : > { %v4935_v20 = vsel %vm822_vm6, %v4864_v61, %v4933_v12 }
 0x320   : > { %4936 = vst [vmem:[%s235_s8] sm:$0x3] %v4935_v20 }
 0x321 PF: > { %s16_s18 = sadd.s32 1, %s5934_s18  }
 0x322   : > { %p13_p4 = scmp.ge.s32.totalorder %s16_s18, 4  }
 0x324   :  { %15 = sbr.rel (!%p13_p4) target bundleno = 1 (0x1), region = 80 }

</bundles_post_ra>
